<compile_context>
chip_gen: v6e
topology: v6e:2x2x1
jax: 0.10.0
libtpu: 0.0.40
codegen_flags: <defaults>
</compile_context>

<pallas_src>
import jax
import jax.numpy as jnp
from jax.experimental import pallas as pl
from jax.experimental.pallas import tpu as pltpu

BN_EPS = 1e-5

_VMEM_LIMIT = None


def _vmem_limit_bytes():
    """~75% of physical VMEM (96 MiB on v5e/v6e, 48 MiB on v7x), safe fallback."""
    global _VMEM_LIMIT
    if _VMEM_LIMIT is None:
        try:
            _VMEM_LIMIT = int(pltpu.get_tpu_info().vmem_capacity_bytes * 3 // 4)
        except Exception:
            _VMEM_LIMIT = 48 * 1024 * 1024
    return _VMEM_LIMIT


def _divisors(n):
    return [d for d in range(1, n + 1) if n % d == 0]


def _pick_cout_tile(Cout, Cin):
    # Keep the resident (16*Cin, tn) bf16 weight slab <= ~8 MiB so even a
    # (16*1024, 2048) = 64 MiB layer-5 weight (base_channels=128) pipelines on
    # v7x's 64 MiB VMEM.
    if Cout <= 256 or Cout % 128 != 0:
        return Cout
    tn = 512
    while tn > 128 and (Cout % tn != 0 or 16 * Cin * tn * 2 > 8 * 1024 * 1024):
        tn //= 2
    return tn if Cout % tn == 0 else Cout


def _pick_conv_b_tile(B, Ho, Wo, Cin, tn, target_m=256):
    """Images per grid step: make M = b_tile*Ho*Wo >= target_m (256-wide MXU on
    v6e/v7x; also >=128 for v5e) within a VMEM budget, keeping the raw-output
    block sublane aligned (rows % 8 == 0 or rows == full)."""
    hw = Ho * Wo

    def aligned(bt):
        return (bt * hw) % 8 == 0 or bt == B

    def footprint(bt):
        m = bt * hw
        return (8 * bt * (Ho + 1) * Wo * Cin * 2 * 2      # parity planes, 2x buffered
                + m * 16 * Cin * 2 * 2                    # patch scratch + live value
                + 16 * Cin * tn * 2 * 2                   # weight block
                + m * tn * 4 * 3)                         # raw out block + f32 result

    budget = max(8 * 1024 * 1024, _vmem_limit_bytes() // 2)
    divs = _divisors(B)
    cands = [d for d in divs if aligned(d) and footprint(d) <= budget]
    if not cands:
        return next(d for d in divs if aligned(d))        # bt == B always aligned
    want = max(1, -(-target_m // hw))
    for d in cands:
        if d >= want:
            return d
    return cands[-1]


def _pick_row_tile(rows, cols):
    cap = max(1, (16 * 1024 * 1024) // max(cols * 12, 1))  # f32 in + bf16 out, 2x buf
    cands = [d for d in _divisors(rows) if (d % 8 == 0 or d == rows) and d <= cap]
    return cands[-1] if cands else rows


# ---------------- Kernel A: conv (+bias) with batch statistics ----------------

def make_conv_stats_kernel(Ho, Wo, Cin, b_tile, total_rows):
    HW = Ho * Wo
    M = b_tile * HW
    n_blk = float(M)
    n_tot = float(total_rows)

    def kernel(*refs):
        planes = refs[0:8]                  # 8 x (b_tile, (Ho+1)*Wo, Cin) bf16
        w_ref, bias_ref = refs[8], refs[9]  # (16*Cin, tn) bf16, (1, tn) f32
        raw_ref, stat_ref = refs[10], refs[11]
        patch_ref = refs[12]                # VMEM scratch (M, 16*Cin) bf16

        b = pl.program_id(1)

        # Fused im2col: the (M, 16*Cin) patch matrix only ever exists in VMEM.
        # Every tap read is a contiguous static row-slice of a shift-cropped
        # parity plane; per-image rows are stacked via slice stores (no
        # unaligned value reshapes).
        for ib in range(b_tile):
            taps = []
            for kh in range(4):
                for kw in range(4):
                    a = ((kh % 2) * 2 + (kw % 2)) * 2 + (kw // 2)
                    r0 = (kh // 2) * Wo
                    taps.append(planes[a][ib, r0:r0 + HW, :])
                patch_row = None
            patch_ref[ib * HW:(ib + 1) * HW, :] = jnp.concatenate(taps, axis=-1)

        # One MXU matmul per grid step (image-batched M), f32 accumulation.
        y = jnp.dot(patch_ref[...], w_ref[...],
                    preferred_element_type=jnp.float32) + bias_ref[...]
        raw_ref[...] = y                                   # pre-BN activations, f32

        # Batch stats: exact two-pass (mean, M2) inside the VMEM-resident block,
        # Chan/Welford merge across image blocks -> no E[x^2]-E[x]^2 cancellation.
        m_b = jnp.sum(y, axis=0, keepdims=True) * (1.0 / n_blk)
        dev = y - m_b
        m2_b = jnp.sum(dev * dev, axis=0, keepdims=True)

        @pl.when(b == 0)
        def _init():
            stat_ref[0:1, :] = m_b
            stat_ref[1:2, :] = m2_b

        @pl.when(b > 0)
        def _merge():
            mean_a = stat_ref[0:1, :]
            m2_a = stat_ref[1:2, :]
            n_a = b.astype(jnp.float32) * n_blk
            n_ab = n_a + n_blk
            delta = m_b - mean_a
            stat_ref[0:1, :] = mean_a + delta * (n_blk / n_ab)
            stat_ref[1:2, :] = m2_a + m2_b + delta * delta * (n_a * n_blk / n_ab)

        @pl.when(b == pl.num_programs(1) - 1)
        def _finalize():
            # row 0: mean, row 1: biased variance (PyTorch BN training mode).
            stat_ref[1:2, :] = stat_ref[1:2, :] * (1.0 / n_tot)

    return kernel


def conv_bn_stats(x_nhwc, w, bias):
    """Returns raw pre-BN conv output as (B*Ho*Wo, Cout) f32 and (mean,var)."""
    B, H, W, Cin = x_nhwc.shape
    Cout = w.shape[0]
    Ho, Wo = H // 2, W // 2
    HW = Ho * Wo

    # Shift-cropped stride-2 parity planes of the zero-padded input with the
    # spatial dims pre-flattened (host-side, ~2x input bytes in bf16) so every
    # in-kernel tap is a contiguous static slice.
    xp = jnp.pad(x_nhwc, ((0, 0), (1, 1), (1, 1), (0, 0))).astype(jnp.bfloat16)
    planes = []
    for i in (0, 1):
        for j in (0, 1):
            par = xp[:, i::2, j::2, :]                       # (B, Ho+1, Wo+1, Cin)
            for dw in (0, 1):
                planes.append(par[:, :, dw:dw + Wo, :]
                              .reshape(B, (Ho + 1) * Wo, Cin))

    # Weight rows in (kh, kw, cin) order to match the in-kernel tap order.
    w_mat = jnp.transpose(w, (2, 3, 1, 0)).reshape(16 * Cin, Cout)
    w_mat = w_mat.astype(jnp.bfloat16)
    bias2 = bias.reshape(1, Cout).astype(jnp.float32)

    tn = _pick_cout_tile(Cout, Cin)
    b_tile = _pick_conv_b_tile(B, Ho, Wo, Cin, tn)
    n_b = B // b_tile
    n_j = Cout // tn
    M = b_tile * HW

    kernel = make_conv_stats_kernel(Ho, Wo, Cin, b_tile, total_rows=B * HW)
    plane_spec = pl.BlockSpec((b_tile, (Ho + 1) * Wo, Cin), lambda j, b: (b, 0, 0))

    raw, stats = pl.pallas_call(
        kernel,
        out_shape=(jax.ShapeDtypeStruct((B * HW, Cout), jnp.float32),
                   jax.ShapeDtypeStruct((2, Cout), jnp.float32)),
        grid_spec=pltpu.PrefetchScalarGridSpec(
            num_scalar_prefetch=0,
            grid=(n_j, n_b),                    # (Cout tile, image block)
            in_specs=[plane_spec] * 8 + [
                # TODO(synk): single-buffer these grid-invariant weight/bias
                # blocks (pipeline_mode=pl.Buffered(1)) once confirmed on this
                # JAX build; Cout tiling already caps the resident slab size.
                pl.BlockSpec((16 * Cin, tn), lambda j, b: (0, j)),
                pl.BlockSpec((1, tn), lambda j, b: (0, j)),
            ],
            out_specs=[
                pl.BlockSpec((M, tn), lambda j, b: (b, j)),
                pl.BlockSpec((2, tn), lambda j, b: (0, j)),   # stats accumulator
            ],
            scratch_shapes=[pltpu.VMEM((M, 16 * Cin), jnp.bfloat16)]),
        compiler_params=pltpu.CompilerParams(
            # Cout tiles are independent -> parallel (v7x megacore); the image
            # axis carries the running batch-stat merge -> arbitrary.
            dimension_semantics=("parallel", "arbitrary"),
            vmem_limit_bytes=_vmem_limit_bytes()),
    )(*planes, w_mat, bias2)
    return raw, stats


# ---------------- Kernel B: BN apply + ReLU (optionally fused with heads) ----

def bn_relu_kernel(raw_ref, scale_ref, shift_ref, o_ref):
    y = raw_ref[...] * scale_ref[...] + shift_ref[...]
    o_ref[...] = jnp.maximum(y, 0.0).astype(o_ref.dtype)


def bn_relu_apply(raw2d, scale, shift):
    R, C = raw2d.shape
    rt = _pick_row_tile(R, C)
    return pl.pallas_call(
        bn_relu_kernel,
        out_shape=jax.ShapeDtypeStruct((R, C), jnp.bfloat16),
        grid_spec=pltpu.PrefetchScalarGridSpec(
            num_scalar_prefetch=0,
            grid=(R // rt,),
            in_specs=[pl.BlockSpec((rt, C), lambda i: (i, 0)),
                      pl.BlockSpec((1, C), lambda i: (0, 0)),
                      pl.BlockSpec((1, C), lambda i: (0, 0))],
            out_specs=pl.BlockSpec((rt, C), lambda i: (i, 0))),
        compiler_params=pltpu.CompilerParams(
            dimension_semantics=("parallel",),
            vmem_limit_bytes=_vmem_limit_bytes()),
    )(raw2d, scale.astype(jnp.float32), shift.astype(jnp.float32))


def bn_relu_heads_kernel(feat_ref, scale_ref, shift_ref, w_ref, b_ref, o_ref):
    # BN apply + ReLU of the final 1x1 feature map fused with the mu/logvar
    # Linear heads as one lane-padded matmul (lane-dense, unmasked stores).
    h = jnp.maximum(feat_ref[...] * scale_ref[...] + shift_ref[...], 0.0)
    o_ref[...] = (jnp.dot(h.astype(jnp.bfloat16), w_ref[...],
                          preferred_element_type=jnp.float32) + b_ref[...])


def bn_relu_heads(feat_raw, scale, shift, wmu, bmu, wlv, blv):
    B, C = feat_raw.shape
    code = wmu.shape[0]
    n_out = 2 * code
    n_pad = max(128, ((n_out + 127) // 128) * 128)

    w_cat = jnp.concatenate([wmu.T, wlv.T], axis=1)        # (C, 2*code)
    w_cat = jnp.pad(w_cat, ((0, 0), (0, n_pad - n_out))).astype(jnp.bfloat16)
    b_cat = jnp.pad(jnp.concatenate([bmu, blv]), (0, n_pad - n_out))
    b_cat = b_cat.reshape(1, n_pad).astype(jnp.float32)

    out = pl.pallas_call(
        bn_relu_heads_kernel,
        out_shape=jax.ShapeDtypeStruct((B, n_pad), jnp.float32),
        in_specs=[pl.BlockSpec(memory_space=pltpu.MemorySpace.VMEM)] * 5,
        out_specs=pl.BlockSpec(memory_space=pltpu.MemorySpace.VMEM),
        compiler_params=pltpu.CompilerParams(
            vmem_limit_bytes=_vmem_limit_bytes()),
    )(feat_raw, scale.astype(jnp.float32), shift.astype(jnp.float32),
      w_cat, b_cat)
    return out[:, :code], out[:, code:n_out]


# ---------------- Full forward ----------------

def build_channels(in_ch, base_channels, channel_mults):
    """Mirror the (quirky) reference __init__ loop exactly."""
    chans = []
    prev = in_ch
    nxt = channel_mults[0] * base_channels
    for idx in channel_mults:
        chans.append((prev, nxt))
        prev = nxt
        nxt = channel_mults[idx + 1] * nxt
    return chans, prev


def mnist_encoder_forward(x_nchw, conv_params, wmu, bmu, wlv, blv):
    h = jnp.transpose(x_nchw, (0, 2, 3, 1))        # NCHW -> NHWC once
    B = h.shape[0]
    n_layers = len(conv_params)
    for li, (w, b, gamma, beta) in enumerate(conv_params):
        Cout = w.shape[0]
        Ho, Wo = h.shape[1] // 2, h.shape[2] // 2
        raw2d, stats = conv_bn_stats(h, w, b)      # (B*Ho*Wo, Cout) f32, (2, Cout)
        mean = stats[0:1, :]
        var = jnp.maximum(stats[1:2, :], 0.0)
        scale = gamma.reshape(1, Cout) * jax.lax.rsqrt(var + BN_EPS)
        shift = beta.reshape(1, Cout) - mean * scale
        if li + 1 < n_layers:
            act2d = bn_relu_apply(raw2d, scale, shift)
            h = act2d.reshape(B, Ho, Wo, Cout)
        else:
            # Final spatial is 1x1 -> raw rows are already the flat features
            # (== torch.flatten(NCHW, start_dim=1)).
            assert Ho == 1 and Wo == 1, "encoder expects final spatial 1x1"
            return bn_relu_heads(raw2d, scale, shift, wmu, bmu, wlv, blv)


# ---------------- Demo / deterministic init ----------------

if __name__ == "__main__":
    B, in_ch, spatial = 2, 1, 32            # 32 -> 16 -> 8 -> 4 -> 2 -> 1
    base_channels = 8                       # small demo; reference default is 128
    channel_mults = [1, 2, 2, 2, 2]
    code_size = 16

    chans, feat_dim = build_channels(in_ch, base_channels, channel_mults)

    key = jax.random.PRNGKey(0)
    keys = jax.random.split(key, len(chans) + 3)

    conv_params = []
    for li, (cin, cout) in enumerate(chans):
        k_w, k_b, k_g, k_bt = jax.random.split(keys[li], 4)
        w = 0.1 * jax.random.normal(k_w, (cout, cin, 4, 4), jnp.float32)
        b = 0.05 * jax.random.normal(k_b, (cout,), jnp.float32)
        gamma = 1.0 + 0.1 * jax.random.normal(k_g, (cout,), jnp.float32)
        beta = 0.05 * jax.random.normal(k_bt, (cout,), jnp.float32)
        conv_params.append((w, b, gamma, beta))

    kmu, klv = jax.random.split(keys[len(chans)], 2)
    wmu = 0.1 * jax.random.normal(kmu, (code_size, feat_dim), jnp.float32)
    bmu = 0.05 * jax.random.normal(keys[len(chans) + 1], (code_size,), jnp.float32)
    wlv = 0.1 * jax.random.normal(klv, (code_size, feat_dim), jnp.float32)
    blv = jnp.zeros((code_size,), jnp.float32)

    x = jax.random.normal(keys[-1], (B, in_ch, spatial, spatial), jnp.float32)

    fwd = jax.jit(mnist_encoder_forward)
    mu, logvar = fwd(x, conv_params, wmu, bmu, wlv, blv)
    jax.block_until_ready((mu, logvar))

    assert mu.shape == (B, code_size) and logvar.shape == (B, code_size)
    assert mu.dtype == jnp.float32 and logvar.dtype == jnp.float32
    print("KERNEL_OK")
</pallas_src>

<mosaic_0001>
module attributes {stable_mosaic.version = 11 : i64} {
  func.func @bn_relu_kernel(%arg0: i32, %arg1: memref<512x8xf32, #tpu.memory_space<vmem>>, %arg2: memref<1x8xf32, #tpu.memory_space<vmem>>, %arg3: memref<1x8xf32, #tpu.memory_space<vmem>>, %arg4: memref<512x8xbf16, #tpu.memory_space<vmem>>) attributes {dimension_semantics = [#tpu.dimension_semantics<parallel>], iteration_bounds = array<i64: 1>, scalar_prefetch = 0 : i64, scratch_operands = 0 : i64, tpu.core_type = #tpu.core_type<tc>, window_params = [{transform_indices = @transform_0, window_bounds = array<i64: 512, 8>}, {pipeline_mode = #tpu.pipeline_mode<synchronous>, transform_indices = @transform_1, window_bounds = array<i64: 1, 8>}, {pipeline_mode = #tpu.pipeline_mode<synchronous>, transform_indices = @transform_2, window_bounds = array<i64: 1, 8>}, {transform_indices = @transform_3, window_bounds = array<i64: 512, 8>}]} {
    %c0 = arith.constant 0 : index
    %c0_0 = arith.constant 0 : index
    %0 = vector.load %arg1[%c0, %c0_0] : memref<512x8xf32, #tpu.memory_space<vmem>>, vector<512x8xf32>
    %c0_1 = arith.constant 0 : index
    %c0_2 = arith.constant 0 : index
    %1 = vector.load %arg2[%c0_1, %c0_2] : memref<1x8xf32, #tpu.memory_space<vmem>>, vector<1x8xf32>
    %2 = vector.broadcast %1 : vector<1x8xf32> to vector<512x8xf32>
    %3 = arith.mulf %0, %2 : vector<512x8xf32>
    %c0_3 = arith.constant 0 : index
    %c0_4 = arith.constant 0 : index
    %4 = vector.load %arg3[%c0_3, %c0_4] : memref<1x8xf32, #tpu.memory_space<vmem>>, vector<1x8xf32>
    %5 = vector.broadcast %4 : vector<1x8xf32> to vector<512x8xf32>
    %6 = arith.addf %3, %5 : vector<512x8xf32>
    %cst = arith.constant 0.000000e+00 : f32
    %7 = vector.broadcast %cst : f32 to vector<512x8xf32>
    %8 = arith.maximumf %6, %7 : vector<512x8xf32>
    %9 = arith.truncf %8 : vector<512x8xf32> to vector<512x8xbf16>
    %c0_5 = arith.constant 0 : index
    %c0_6 = arith.constant 0 : index
    %10 = vector.load %arg4[%c0_5, %c0_6] : memref<512x8xbf16, #tpu.memory_space<vmem>>, vector<512x8xbf16>
    tpu.vector_store %arg4[%c0_5, %c0_6], %9 {strides = array<i32>} : memref<512x8xbf16, #tpu.memory_space<vmem>>, vector<512x8xbf16>,
    return
  }
  func.func @transform_0(%arg0: i32) -> (i32, i32) {
    %c0_i32 = arith.constant 0 : i32
    %c0_i32_0 = arith.constant 0 : i32
    return %arg0, %c0_i32 : i32, i32
  }
  func.func @transform_1(%arg0: i32) -> (i32, i32) {
    %c0_i32 = arith.constant 0 : i32
    %c0_i32_0 = arith.constant 0 : i32
    %c0_i32_1 = arith.constant 0 : i32
    return %c0_i32, %c0_i32_0 : i32, i32
  }
  func.func @transform_2(%arg0: i32) -> (i32, i32) {
    %c0_i32 = arith.constant 0 : i32
    %c0_i32_0 = arith.constant 0 : i32
    %c0_i32_1 = arith.constant 0 : i32
    return %c0_i32, %c0_i32_0 : i32, i32
  }
  func.func @transform_3(%arg0: i32) -> (i32, i32) {
    %c0_i32 = arith.constant 0 : i32
    %c0_i32_0 = arith.constant 0 : i32
    return %arg0, %c0_i32 : i32, i32
  }
}

module attributes {stable_mosaic.version = 11 : i64} {
  func.func @kernel(%arg0: i32, %arg1: i32, %arg2: memref<1x272x1xbf16, #tpu.memory_space<vmem>>, %arg3: memref<1x272x1xbf16, #tpu.memory_space<vmem>>, %arg4: memref<1x272x1xbf16, #tpu.memory_space<vmem>>, %arg5: memref<1x272x1xbf16, #tpu.memory_space<vmem>>, %arg6: memref<1x272x1xbf16, #tpu.memory_space<vmem>>, %arg7: memref<1x272x1xbf16, #tpu.memory_space<vmem>>, %arg8: memref<1x272x1xbf16, #tpu.memory_space<vmem>>, %arg9: memref<1x272x1xbf16, #tpu.memory_space<vmem>>, %arg10: memref<16x8xbf16, #tpu.memory_space<vmem>>, %arg11: memref<1x8xf32, #tpu.memory_space<vmem>>, %arg12: memref<256x8xf32, #tpu.memory_space<vmem>>, %arg13: memref<2x8xf32, #tpu.memory_space<vmem>>, %arg14: memref<256x16xbf16, #tpu.memory_space<vmem>>) attributes {dimension_semantics = [#tpu.dimension_semantics<parallel>, #tpu.dimension_semantics<arbitrary>], iteration_bounds = array<i64: 1, 2>, scalar_prefetch = 0 : i64, scratch_operands = 1 : i64, tpu.core_type = #tpu.core_type<tc>, window_params = [{transform_indices = @transform_0, window_bounds = array<i64: 1, 272, 1>}, {transform_indices = @transform_1, window_bounds = array<i64: 1, 272, 1>}, {transform_indices = @transform_2, window_bounds = array<i64: 1, 272, 1>}, {transform_indices = @transform_3, window_bounds = array<i64: 1, 272, 1>}, {transform_indices = @transform_4, window_bounds = array<i64: 1, 272, 1>}, {transform_indices = @transform_5, window_bounds = array<i64: 1, 272, 1>}, {transform_indices = @transform_6, window_bounds = array<i64: 1, 272, 1>}, {transform_indices = @transform_7, window_bounds = array<i64: 1, 272, 1>}, {transform_indices = @transform_8, window_bounds = array<i64: 16, 8>}, {transform_indices = @transform_9, window_bounds = array<i64: 1, 8>}, {transform_indices = @transform_10, window_bounds = array<i64: 256, 8>}, {transform_indices = @transform_11, window_bounds = array<i64: 2, 8>}]} {
    %c0 = arith.constant 0 : index
    %c0_0 = arith.constant 0 : index
    %c0_1 = arith.constant 0 : index
    %0 = vector.load %arg2[%c0, %c0_0, %c0_1] : memref<1x272x1xbf16, #tpu.memory_space<vmem>>, vector<1x256x1xbf16>
    %1 = vector.shape_cast %0 : vector<1x256x1xbf16> to vector<256x1xbf16>
    %c0_2 = arith.constant 0 : index
    %c0_3 = arith.constant 0 : index
    %c0_4 = arith.constant 0 : index
    %2 = vector.load %arg4[%c0_2, %c0_3, %c0_4] : memref<1x272x1xbf16, #tpu.memory_space<vmem>>, vector<1x256x1xbf16>
    %3 = vector.shape_cast %2 : vector<1x256x1xbf16> to vector<256x1xbf16>
    %c0_5 = arith.constant 0 : index
    %c0_6 = arith.constant 0 : index
    %c0_7 = arith.constant 0 : index
    %4 = vector.load %arg3[%c0_5, %c0_6, %c0_7] : memref<1x272x1xbf16, #tpu.memory_space<vmem>>, vector<1x256x1xbf16>
    %5 = vector.shape_cast %4 : vector<1x256x1xbf16> to vector<256x1xbf16>
    %c0_8 = arith.constant 0 : index
    %c0_9 = arith.constant 0 : index
    %c0_10 = arith.constant 0 : index
    %6 = vector.load %arg5[%c0_8, %c0_9, %c0_10] : memref<1x272x1xbf16, #tpu.memory_space<vmem>>, vector<1x256x1xbf16>
    %7 = vector.shape_cast %6 : vector<1x256x1xbf16> to vector<256x1xbf16>
    %c0_11 = arith.constant 0 : index
    %c0_12 = arith.constant 0 : index
    %c0_13 = arith.constant 0 : index
    %8 = vector.load %arg6[%c0_11, %c0_12, %c0_13] : memref<1x272x1xbf16, #tpu.memory_space<vmem>>, vector<1x256x1xbf16>
    %9 = vector.shape_cast %8 : vector<1x256x1xbf16> to vector<256x1xbf16>
    %c0_14 = arith.constant 0 : index
    %c0_15 = arith.constant 0 : index
    %c0_16 = arith.constant 0 : index
    %10 = vector.load %arg8[%c0_14, %c0_15, %c0_16] : memref<1x272x1xbf16, #tpu.memory_space<vmem>>, vector<1x256x1xbf16>
    %11 = vector.shape_cast %10 : vector<1x256x1xbf16> to vector<256x1xbf16>
    %c0_17 = arith.constant 0 : index
    %c0_18 = arith.constant 0 : index
    %c0_19 = arith.constant 0 : index
    %12 = vector.load %arg7[%c0_17, %c0_18, %c0_19] : memref<1x272x1xbf16, #tpu.memory_space<vmem>>, vector<1x256x1xbf16>
    %13 = vector.shape_cast %12 : vector<1x256x1xbf16> to vector<256x1xbf16>
    %c0_20 = arith.constant 0 : index
    %c0_21 = arith.constant 0 : index
    %c0_22 = arith.constant 0 : index
    %14 = vector.load %arg9[%c0_20, %c0_21, %c0_22] : memref<1x272x1xbf16, #tpu.memory_space<vmem>>, vector<1x256x1xbf16>
    %15 = vector.shape_cast %14 : vector<1x256x1xbf16> to vector<256x1xbf16>
    %c0_23 = arith.constant 0 : index
    %c16 = arith.constant 16 : index
    %c0_24 = arith.constant 0 : index
    %16 = vector.load %arg2[%c0_23, %c16, %c0_24] : memref<1x272x1xbf16, #tpu.memory_space<vmem>>, vector<1x256x1xbf16>
    %17 = vector.shape_cast %16 : vector<1x256x1xbf16> to vector<256x1xbf16>
    %c0_25 = arith.constant 0 : index
    %c16_26 = arith.constant 16 : index
    %c0_27 = arith.constant 0 : index
    %18 = vector.load %arg4[%c0_25, %c16_26, %c0_27] : memref<1x272x1xbf16, #tpu.memory_space<vmem>>, vector<1x256x1xbf16>
    %19 = vector.shape_cast %18 : vector<1x256x1xbf16> to vector<256x1xbf16>
    %c0_28 = arith.constant 0 : index
    %c16_29 = arith.constant 16 : index
    %c0_30 = arith.constant 0 : index
    %20 = vector.load %arg3[%c0_28, %c16_29, %c0_30] : memref<1x272x1xbf16, #tpu.memory_space<vmem>>, vector<1x256x1xbf16>
    %21 = vector.shape_cast %20 : vector<1x256x1xbf16> to vector<256x1xbf16>
    %c0_31 = arith.constant 0 : index
    %c16_32 = arith.constant 16 : index
    %c0_33 = arith.constant 0 : index
    %22 = vector.load %arg5[%c0_31, %c16_32, %c0_33] : memref<1x272x1xbf16, #tpu.memory_space<vmem>>, vector<1x256x1xbf16>
    %23 = vector.shape_cast %22 : vector<1x256x1xbf16> to vector<256x1xbf16>
    %c0_34 = arith.constant 0 : index
    %c16_35 = arith.constant 16 : index
    %c0_36 = arith.constant 0 : index
    %24 = vector.load %arg6[%c0_34, %c16_35, %c0_36] : memref<1x272x1xbf16, #tpu.memory_space<vmem>>, vector<1x256x1xbf16>
    %25 = vector.shape_cast %24 : vector<1x256x1xbf16> to vector<256x1xbf16>
    %c0_37 = arith.constant 0 : index
    %c16_38 = arith.constant 16 : index
    %c0_39 = arith.constant 0 : index
    %26 = vector.load %arg8[%c0_37, %c16_38, %c0_39] : memref<1x272x1xbf16, #tpu.memory_space<vmem>>, vector<1x256x1xbf16>
    %27 = vector.shape_cast %26 : vector<1x256x1xbf16> to vector<256x1xbf16>
    %c0_40 = arith.constant 0 : index
    %c16_41 = arith.constant 16 : index
    %c0_42 = arith.constant 0 : index
    %28 = vector.load %arg7[%c0_40, %c16_41, %c0_42] : memref<1x272x1xbf16, #tpu.memory_space<vmem>>, vector<1x256x1xbf16>
    %29 = vector.shape_cast %28 : vector<1x256x1xbf16> to vector<256x1xbf16>
    %c0_43 = arith.constant 0 : index
    %c16_44 = arith.constant 16 : index
    %c0_45 = arith.constant 0 : index
    %30 = vector.load %arg9[%c0_43, %c16_44, %c0_45] : memref<1x272x1xbf16, #tpu.memory_space<vmem>>, vector<1x256x1xbf16>
    %31 = vector.shape_cast %30 : vector<1x256x1xbf16> to vector<256x1xbf16>
    %32 = tpu.concatenate %1, %3, %5, %7, %9, %11, %13, %15, %17, %19, %21, %23, %25, %27, %29, %31 in 1 : vector<256x1xbf16>, vector<256x1xbf16>, vector<256x1xbf16>, vector<256x1xbf16>, vector<256x1xbf16>, vector<256x1xbf16>, vector<256x1xbf16>, vector<256x1xbf16>, vector<256x1xbf16>, vector<256x1xbf16>, vector<256x1xbf16>, vector<256x1xbf16>, vector<256x1xbf16>, vector<256x1xbf16>, vector<256x1xbf16>, vector<256x1xbf16> -> vector<256x16xbf16>
    %c0_46 = arith.constant 0 : index
    %c0_47 = arith.constant 0 : index
    %33 = vector.load %arg14[%c0_46, %c0_47] : memref<256x16xbf16, #tpu.memory_space<vmem>>, vector<256x16xbf16>
    tpu.vector_store %arg14[%c0_46, %c0_47], %32 {strides = array<i32>} : memref<256x16xbf16, #tpu.memory_space<vmem>>, vector<256x16xbf16>,
    %c0_48 = arith.constant 0 : index
    %c0_49 = arith.constant 0 : index
    %34 = vector.load %arg14[%c0_48, %c0_49] : memref<256x16xbf16, #tpu.memory_space<vmem>>, vector<256x16xbf16>
    %c0_50 = arith.constant 0 : index
    %c0_51 = arith.constant 0 : index
    %35 = vector.load %arg10[%c0_50, %c0_51] : memref<16x8xbf16, #tpu.memory_space<vmem>>, vector<16x8xbf16>
    %cst = arith.constant dense<0.000000e+00> : vector<256x8xf32>
    %36 = tpu.matmul %34, %35, %cst {dimension_numbers = #tpu.dot_dimension_numbers<[1], [0], [0], [1], [0, 0, 1, 1], [], []>} : vector<256x16xbf16>, vector<16x8xbf16>, vector<256x8xf32> -> vector<256x8xf32>
    %c0_52 = arith.constant 0 : index
    %c0_53 = arith.constant 0 : index
    %37 = vector.load %arg11[%c0_52, %c0_53] : memref<1x8xf32, #tpu.memory_space<vmem>>, vector<1x8xf32>
    %38 = vector.broadcast %37 : vector<1x8xf32> to vector<256x8xf32>
    %39 = arith.addf %36, %38 : vector<256x8xf32>
    %c0_54 = arith.constant 0 : index
    %c0_55 = arith.constant 0 : index
    %40 = vector.load %arg12[%c0_54, %c0_55] : memref<256x8xf32, #tpu.memory_space<vmem>>, vector<256x8xf32>
    tpu.vector_store %arg12[%c0_54, %c0_55], %39 {strides = array<i32>} : memref<256x8xf32, #tpu.memory_space<vmem>>, vector<256x8xf32>,
    %cst_56 = arith.constant dense<0.000000e+00> : vector<8xf32>
    %41 = vector.multi_reduction <add>, %39, %cst_56 [0] : vector<256x8xf32> to vector<8xf32>
    %42 = vector.shape_cast %41 : vector<8xf32> to vector<1x8xf32>
    %cst_57 = arith.constant 3.906250e-03 : f32
    %43 = vector.broadcast %cst_57 : f32 to vector<1x8xf32>
    %44 = arith.mulf %42, %43 : vector<1x8xf32>
    %45 = vector.broadcast %44 : vector<1x8xf32> to vector<256x8xf32>
    %46 = arith.subf %39, %45 : vector<256x8xf32>
    %47 = arith.mulf %46, %46 : vector<256x8xf32>
    %cst_58 = arith.constant dense<0.000000e+00> : vector<8xf32>
    %48 = vector.multi_reduction <add>, %47, %cst_58 [0] : vector<256x8xf32> to vector<8xf32>
    %49 = vector.shape_cast %48 : vector<8xf32> to vector<1x8xf32>
    %c0_i32 = arith.constant 0 : i32
    %50 = arith.cmpi eq, %arg1, %c0_i32 : i32
    %51 = arith.extui %50 : i1 to i32
    %c0_i32_59 = arith.constant 0 : i32
    %52 = arith.cmpi ne, %51, %c0_i32_59 : i32
    scf.if %52 {
      %c0_63 = arith.constant 0 : index
      %c0_64 = arith.constant 0 : index
      %59 = vector.load %arg13[%c0_63, %c0_64] : memref<2x8xf32, #tpu.memory_space<vmem>>, vector<1x8xf32>
      tpu.vector_store %arg13[%c0_63, %c0_64], %44 {strides = array<i32>} : memref<2x8xf32, #tpu.memory_space<vmem>>, vector<1x8xf32>,
      %c1 = arith.constant 1 : index
      %c0_65 = arith.constant 0 : index
      %60 = vector.load %arg13[%c1, %c0_65] : memref<2x8xf32, #tpu.memory_space<vmem>>, vector<1x8xf32>
      tpu.vector_store %arg13[%c1, %c0_65], %49 {strides = array<i32>} : memref<2x8xf32, #tpu.memory_space<vmem>>, vector<1x8xf32>,
    } else {
    }
    %c0_i32_60 = arith.constant 0 : i32
    %53 = arith.cmpi sgt, %arg1, %c0_i32_60 : i32
    %54 = arith.extui %53 : i1 to i32
    %c0_i32_61 = arith.constant 0 : i32
    %55 = arith.cmpi ne, %54, %c0_i32_61 : i32
    scf.if %55 {
      %c0_63 = arith.constant 0 : index
      %c0_64 = arith.constant 0 : index
      %59 = vector.load %arg13[%c0_63, %c0_64] : memref<2x8xf32, #tpu.memory_space<vmem>>, vector<1x8xf32>
      %c1 = arith.constant 1 : index
      %c0_65 = arith.constant 0 : index
      %60 = vector.load %arg13[%c1, %c0_65] : memref<2x8xf32, #tpu.memory_space<vmem>>, vector<1x8xf32>
      %61 = arith.sitofp %arg1 : i32 to f32
      %cst_66 = arith.constant 2.560000e+02 : f32
      %62 = arith.mulf %61, %cst_66 : f32
      %cst_67 = arith.constant 2.560000e+02 : f32
      %63 = arith.addf %62, %cst_67 : f32
      %64 = arith.subf %44, %59 : vector<1x8xf32>
      %cst_68 = arith.constant 2.560000e+02 : f32
      %65 = arith.divf %cst_68, %63 : f32
      %66 = vector.broadcast %65 : f32 to vector<1x8xf32>
      %67 = arith.mulf %64, %66 : vector<1x8xf32>
      %68 = arith.addf %59, %67 : vector<1x8xf32>
      %c0_69 = arith.constant 0 : index
      %c0_70 = arith.constant 0 : index
      %69 = vector.load %arg13[%c0_69, %c0_70] : memref<2x8xf32, #tpu.memory_space<vmem>>, vector<1x8xf32>
      tpu.vector_store %arg13[%c0_69, %c0_70], %68 {strides = array<i32>} : memref<2x8xf32, #tpu.memory_space<vmem>>, vector<1x8xf32>,
      %70 = arith.addf %60, %49 : vector<1x8xf32>
      %71 = arith.mulf %64, %64 : vector<1x8xf32>
      %cst_71 = arith.constant 2.560000e+02 : f32
      %72 = arith.mulf %62, %cst_71 : f32
      %73 = arith.divf %72, %63 : f32
      %74 = vector.broadcast %73 : f32 to vector<1x8xf32>
      %75 = arith.mulf %71, %74 : vector<1x8xf32>
      %76 = arith.addf %70, %75 : vector<1x8xf32>
      %c1_72 = arith.constant 1 : index
      %c0_73 = arith.constant 0 : index
      %77 = vector.load %arg13[%c1_72, %c0_73] : memref<2x8xf32, #tpu.memory_space<vmem>>, vector<1x8xf32>
      tpu.vector_store %arg13[%c1_72, %c0_73], %76 {strides = array<i32>} : memref<2x8xf32, #tpu.memory_space<vmem>>, vector<1x8xf32>,
    } else {
    }
    %c1_i32 = arith.constant 1 : i32
    %56 = arith.cmpi eq, %arg1, %c1_i32 : i32
    %57 = arith.extui %56 : i1 to i32
    %c0_i32_62 = arith.constant 0 : i32
    %58 = arith.cmpi ne, %57, %c0_i32_62 : i32
    scf.if %58 {
      %c1 = arith.constant 1 : index
      %c0_63 = arith.constant 0 : index
      %59 = vector.load %arg13[%c1, %c0_63] : memref<2x8xf32, #tpu.memory_space<vmem>>, vector<1x8xf32>
      %cst_64 = arith.constant 0.001953125 : f32
      %60 = vector.broadcast %cst_64 : f32 to vector<1x8xf32>
      %61 = arith.mulf %59, %60 : vector<1x8xf32>
      %c1_65 = arith.constant 1 : index
      %c0_66 = arith.constant 0 : index
      %62 = vector.load %arg13[%c1_65, %c0_66] : memref<2x8xf32, #tpu.memory_space<vmem>>, vector<1x8xf32>
      tpu.vector_store %arg13[%c1_65, %c0_66], %61 {strides = array<i32>} : memref<2x8xf32, #tpu.memory_space<vmem>>, vector<1x8xf32>,
    } else {
    }
    return
  }
  func.func @transform_0(%arg0: i32, %arg1: i32) -> (i32, i32, i32) {
    %c0_i32 = arith.constant 0 : i32
    %c0_i32_0 = arith.constant 0 : i32
    %c0_i32_1 = arith.constant 0 : i32
    return %arg1, %c0_i32, %c0_i32_0 : i32, i32, i32
  }
  func.func @transform_1(%arg0: i32, %arg1: i32) -> (i32, i32, i32) {
    %c0_i32 = arith.constant 0 : i32
    %c0_i32_0 = arith.constant 0 : i32
    %c0_i32_1 = arith.constant 0 : i32
    return %arg1, %c0_i32, %c0_i32_0 : i32, i32, i32
  }
  func.func @transform_2(%arg0: i32, %arg1: i32) -> (i32, i32, i32) {
    %c0_i32 = arith.constant 0 : i32
    %c0_i32_0 = arith.constant 0 : i32
    %c0_i32_1 = arith.constant 0 : i32
    return %arg1, %c0_i32, %c0_i32_0 : i32, i32, i32
  }
  func.func @transform_3(%arg0: i32, %arg1: i32) -> (i32, i32, i32) {
    %c0_i32 = arith.constant 0 : i32
    %c0_i32_0 = arith.constant 0 : i32
    %c0_i32_1 = arith.constant 0 : i32
    return %arg1, %c0_i32, %c0_i32_0 : i32, i32, i32
  }
  func.func @transform_4(%arg0: i32, %arg1: i32) -> (i32, i32, i32) {
    %c0_i32 = arith.constant 0 : i32
    %c0_i32_0 = arith.constant 0 : i32
    %c0_i32_1 = arith.constant 0 : i32
    return %arg1, %c0_i32, %c0_i32_0 : i32, i32, i32
  }
  func.func @transform_5(%arg0: i32, %arg1: i32) -> (i32, i32, i32) {
    %c0_i32 = arith.constant 0 : i32
    %c0_i32_0 = arith.constant 0 : i32
    %c0_i32_1 = arith.constant 0 : i32
    return %arg1, %c0_i32, %c0_i32_0 : i32, i32, i32
  }
  func.func @transform_6(%arg0: i32, %arg1: i32) -> (i32, i32, i32) {
    %c0_i32 = arith.constant 0 : i32
    %c0_i32_0 = arith.constant 0 : i32
    %c0_i32_1 = arith.constant 0 : i32
    return %arg1, %c0_i32, %c0_i32_0 : i32, i32, i32
  }
  func.func @transform_7(%arg0: i32, %arg1: i32) -> (i32, i32, i32) {
    %c0_i32 = arith.constant 0 : i32
    %c0_i32_0 = arith.constant 0 : i32
    %c0_i32_1 = arith.constant 0 : i32
    return %arg1, %c0_i32, %c0_i32_0 : i32, i32, i32
  }
  func.func @transform_8(%arg0: i32, %arg1: i32) -> (i32, i32) {
    %c0_i32 = arith.constant 0 : i32
    %c0_i32_0 = arith.constant 0 : i32
    return %c0_i32, %arg0 : i32, i32
  }
  func.func @transform_9(%arg0: i32, %arg1: i32) -> (i32, i32) {
    %c0_i32 = arith.constant 0 : i32
    %c0_i32_0 = arith.constant 0 : i32
    return %c0_i32, %arg0 : i32, i32
  }
  func.func @transform_10(%arg0: i32, %arg1: i32) -> (i32, i32) {
    %c0_i32 = arith.constant 0 : i32
    return %arg1, %arg0 : i32, i32
  }
  func.func @transform_11(%arg0: i32, %arg1: i32) -> (i32, i32) {
    %c0_i32 = arith.constant 0 : i32
    %c0_i32_0 = arith.constant 0 : i32
    return %c0_i32, %arg0 : i32, i32
  }
}

module attributes {stable_mosaic.version = 11 : i64} {
  func.func @bn_relu_kernel(%arg0: i32, %arg1: memref<128x16xf32, #tpu.memory_space<vmem>>, %arg2: memref<1x16xf32, #tpu.memory_space<vmem>>, %arg3: memref<1x16xf32, #tpu.memory_space<vmem>>, %arg4: memref<128x16xbf16, #tpu.memory_space<vmem>>) attributes {dimension_semantics = [#tpu.dimension_semantics<parallel>], iteration_bounds = array<i64: 1>, scalar_prefetch = 0 : i64, scratch_operands = 0 : i64, tpu.core_type = #tpu.core_type<tc>, window_params = [{transform_indices = @transform_0, window_bounds = array<i64: 128, 16>}, {pipeline_mode = #tpu.pipeline_mode<synchronous>, transform_indices = @transform_1, window_bounds = array<i64: 1, 16>}, {pipeline_mode = #tpu.pipeline_mode<synchronous>, transform_indices = @transform_2, window_bounds = array<i64: 1, 16>}, {transform_indices = @transform_3, window_bounds = array<i64: 128, 16>}]} {
    %c0 = arith.constant 0 : index
    %c0_0 = arith.constant 0 : index
    %0 = vector.load %arg1[%c0, %c0_0] : memref<128x16xf32, #tpu.memory_space<vmem>>, vector<128x16xf32>
    %c0_1 = arith.constant 0 : index
    %c0_2 = arith.constant 0 : index
    %1 = vector.load %arg2[%c0_1, %c0_2] : memref<1x16xf32, #tpu.memory_space<vmem>>, vector<1x16xf32>
    %2 = vector.broadcast %1 : vector<1x16xf32> to vector<128x16xf32>
    %3 = arith.mulf %0, %2 : vector<128x16xf32>
    %c0_3 = arith.constant 0 : index
    %c0_4 = arith.constant 0 : index
    %4 = vector.load %arg3[%c0_3, %c0_4] : memref<1x16xf32, #tpu.memory_space<vmem>>, vector<1x16xf32>
    %5 = vector.broadcast %4 : vector<1x16xf32> to vector<128x16xf32>
    %6 = arith.addf %3, %5 : vector<128x16xf32>
    %cst = arith.constant 0.000000e+00 : f32
    %7 = vector.broadcast %cst : f32 to vector<128x16xf32>
    %8 = arith.maximumf %6, %7 : vector<128x16xf32>
    %9 = arith.truncf %8 : vector<128x16xf32> to vector<128x16xbf16>
    %c0_5 = arith.constant 0 : index
    %c0_6 = arith.constant 0 : index
    %10 = vector.load %arg4[%c0_5, %c0_6] : memref<128x16xbf16, #tpu.memory_space<vmem>>, vector<128x16xbf16>
    tpu.vector_store %arg4[%c0_5, %c0_6], %9 {strides = array<i32>} : memref<128x16xbf16, #tpu.memory_space<vmem>>, vector<128x16xbf16>,
    return
  }
  func.func @transform_0(%arg0: i32) -> (i32, i32) {
    %c0_i32 = arith.constant 0 : i32
    %c0_i32_0 = arith.constant 0 : i32
    return %arg0, %c0_i32 : i32, i32
  }
  func.func @transform_1(%arg0: i32) -> (i32, i32) {
    %c0_i32 = arith.constant 0 : i32
    %c0_i32_0 = arith.constant 0 : i32
    %c0_i32_1 = arith.constant 0 : i32
    return %c0_i32, %c0_i32_0 : i32, i32
  }
  func.func @transform_2(%arg0: i32) -> (i32, i32) {
    %c0_i32 = arith.constant 0 : i32
    %c0_i32_0 = arith.constant 0 : i32
    %c0_i32_1 = arith.constant 0 : i32
    return %c0_i32, %c0_i32_0 : i32, i32
  }
  func.func @transform_3(%arg0: i32) -> (i32, i32) {
    %c0_i32 = arith.constant 0 : i32
    %c0_i32_0 = arith.constant 0 : i32
    return %arg0, %c0_i32 : i32, i32
  }
}

module attributes {stable_mosaic.version = 11 : i64} {
  func.func @kernel(%arg0: i32, %arg1: i32, %arg2: memref<2x72x8xbf16, #tpu.memory_space<vmem>>, %arg3: memref<2x72x8xbf16, #tpu.memory_space<vmem>>, %arg4: memref<2x72x8xbf16, #tpu.memory_space<vmem>>, %arg5: memref<2x72x8xbf16, #tpu.memory_space<vmem>>, %arg6: memref<2x72x8xbf16, #tpu.memory_space<vmem>>, %arg7: memref<2x72x8xbf16, #tpu.memory_space<vmem>>, %arg8: memref<2x72x8xbf16, #tpu.memory_space<vmem>>, %arg9: memref<2x72x8xbf16, #tpu.memory_space<vmem>>, %arg10: memref<128x16xbf16, #tpu.memory_space<vmem>>, %arg11: memref<1x16xf32, #tpu.memory_space<vmem>>, %arg12: memref<128x16xf32, #tpu.memory_space<vmem>>, %arg13: memref<2x16xf32, #tpu.memory_space<vmem>>, %arg14: memref<128x128xbf16, #tpu.memory_space<vmem>>) attributes {dimension_semantics = [#tpu.dimension_semantics<parallel>, #tpu.dimension_semantics<arbitrary>], iteration_bounds = array<i64: 1, 1>, scalar_prefetch = 0 : i64, scratch_operands = 1 : i64, tpu.core_type = #tpu.core_type<tc>, window_params = [{transform_indices = @transform_0, window_bounds = array<i64: 2, 72, 8>}, {transform_indices = @transform_1, window_bounds = array<i64: 2, 72, 8>}, {transform_indices = @transform_2, window_bounds = array<i64: 2, 72, 8>}, {transform_indices = @transform_3, window_bounds = array<i64: 2, 72, 8>}, {transform_indices = @transform_4, window_bounds = array<i64: 2, 72, 8>}, {transform_indices = @transform_5, window_bounds = array<i64: 2, 72, 8>}, {transform_indices = @transform_6, window_bounds = array<i64: 2, 72, 8>}, {transform_indices = @transform_7, window_bounds = array<i64: 2, 72, 8>}, {transform_indices = @transform_8, window_bounds = array<i64: 128, 16>}, {transform_indices = @transform_9, window_bounds = array<i64: 1, 16>}, {transform_indices = @transform_10, window_bounds = array<i64: 128, 16>}, {transform_indices = @transform_11, window_bounds = array<i64: 2, 16>}]} {
    %c0 = arith.constant 0 : index
    %c0_0 = arith.constant 0 : index
    %c0_1 = arith.constant 0 : index
    %0 = vector.load %arg2[%c0, %c0_0, %c0_1] : memref<2x72x8xbf16, #tpu.memory_space<vmem>>, vector<1x64x8xbf16>
    %1 = vector.shape_cast %0 : vector<1x64x8xbf16> to vector<64x8xbf16>
    %c0_2 = arith.constant 0 : index
    %c0_3 = arith.constant 0 : index
    %c0_4 = arith.constant 0 : index
    %2 = vector.load %arg4[%c0_2, %c0_3, %c0_4] : memref<2x72x8xbf16, #tpu.memory_space<vmem>>, vector<1x64x8xbf16>
    %3 = vector.shape_cast %2 : vector<1x64x8xbf16> to vector<64x8xbf16>
    %c0_5 = arith.constant 0 : index
    %c0_6 = arith.constant 0 : index
    %c0_7 = arith.constant 0 : index
    %4 = vector.load %arg3[%c0_5, %c0_6, %c0_7] : memref<2x72x8xbf16, #tpu.memory_space<vmem>>, vector<1x64x8xbf16>
    %5 = vector.shape_cast %4 : vector<1x64x8xbf16> to vector<64x8xbf16>
    %c0_8 = arith.constant 0 : index
    %c0_9 = arith.constant 0 : index
    %c0_10 = arith.constant 0 : index
    %6 = vector.load %arg5[%c0_8, %c0_9, %c0_10] : memref<2x72x8xbf16, #tpu.memory_space<vmem>>, vector<1x64x8xbf16>
    %7 = vector.shape_cast %6 : vector<1x64x8xbf16> to vector<64x8xbf16>
    %c0_11 = arith.constant 0 : index
    %c0_12 = arith.constant 0 : index
    %c0_13 = arith.constant 0 : index
    %8 = vector.load %arg6[%c0_11, %c0_12, %c0_13] : memref<2x72x8xbf16, #tpu.memory_space<vmem>>, vector<1x64x8xbf16>
    %9 = vector.shape_cast %8 : vector<1x64x8xbf16> to vector<64x8xbf16>
    %c0_14 = arith.constant 0 : index
    %c0_15 = arith.constant 0 : index
    %c0_16 = arith.constant 0 : index
    %10 = vector.load %arg8[%c0_14, %c0_15, %c0_16] : memref<2x72x8xbf16, #tpu.memory_space<vmem>>, vector<1x64x8xbf16>
    %11 = vector.shape_cast %10 : vector<1x64x8xbf16> to vector<64x8xbf16>
    %c0_17 = arith.constant 0 : index
    %c0_18 = arith.constant 0 : index
    %c0_19 = arith.constant 0 : index
    %12 = vector.load %arg7[%c0_17, %c0_18, %c0_19] : memref<2x72x8xbf16, #tpu.memory_space<vmem>>, vector<1x64x8xbf16>
    %13 = vector.shape_cast %12 : vector<1x64x8xbf16> to vector<64x8xbf16>
    %c0_20 = arith.constant 0 : index
    %c0_21 = arith.constant 0 : index
    %c0_22 = arith.constant 0 : index
    %14 = vector.load %arg9[%c0_20, %c0_21, %c0_22] : memref<2x72x8xbf16, #tpu.memory_space<vmem>>, vector<1x64x8xbf16>
    %15 = vector.shape_cast %14 : vector<1x64x8xbf16> to vector<64x8xbf16>
    %c0_23 = arith.constant 0 : index
    %c8 = arith.constant 8 : index
    %c0_24 = arith.constant 0 : index
    %16 = vector.load %arg2[%c0_23, %c8, %c0_24] : memref<2x72x8xbf16, #tpu.memory_space<vmem>>, vector<1x64x8xbf16>
    %17 = vector.shape_cast %16 : vector<1x64x8xbf16> to vector<64x8xbf16>
    %c0_25 = arith.constant 0 : index
    %c8_26 = arith.constant 8 : index
    %c0_27 = arith.constant 0 : index
    %18 = vector.load %arg4[%c0_25, %c8_26, %c0_27] : memref<2x72x8xbf16, #tpu.memory_space<vmem>>, vector<1x64x8xbf16>
    %19 = vector.shape_cast %18 : vector<1x64x8xbf16> to vector<64x8xbf16>
    %c0_28 = arith.constant 0 : index
    %c8_29 = arith.constant 8 : index
    %c0_30 = arith.constant 0 : index
    %20 = vector.load %arg3[%c0_28, %c8_29, %c0_30] : memref<2x72x8xbf16, #tpu.memory_space<vmem>>, vector<1x64x8xbf16>
    %21 = vector.shape_cast %20 : vector<1x64x8xbf16> to vector<64x8xbf16>
    %c0_31 = arith.constant 0 : index
    %c8_32 = arith.constant 8 : index
    %c0_33 = arith.constant 0 : index
    %22 = vector.load %arg5[%c0_31, %c8_32, %c0_33] : memref<2x72x8xbf16, #tpu.memory_space<vmem>>, vector<1x64x8xbf16>
    %23 = vector.shape_cast %22 : vector<1x64x8xbf16> to vector<64x8xbf16>
    %c0_34 = arith.constant 0 : index
    %c8_35 = arith.constant 8 : index
    %c0_36 = arith.constant 0 : index
    %24 = vector.load %arg6[%c0_34, %c8_35, %c0_36] : memref<2x72x8xbf16, #tpu.memory_space<vmem>>, vector<1x64x8xbf16>
    %25 = vector.shape_cast %24 : vector<1x64x8xbf16> to vector<64x8xbf16>
    %c0_37 = arith.constant 0 : index
    %c8_38 = arith.constant 8 : index
    %c0_39 = arith.constant 0 : index
    %26 = vector.load %arg8[%c0_37, %c8_38, %c0_39] : memref<2x72x8xbf16, #tpu.memory_space<vmem>>, vector<1x64x8xbf16>
    %27 = vector.shape_cast %26 : vector<1x64x8xbf16> to vector<64x8xbf16>
    %c0_40 = arith.constant 0 : index
    %c8_41 = arith.constant 8 : index
    %c0_42 = arith.constant 0 : index
    %28 = vector.load %arg7[%c0_40, %c8_41, %c0_42] : memref<2x72x8xbf16, #tpu.memory_space<vmem>>, vector<1x64x8xbf16>
    %29 = vector.shape_cast %28 : vector<1x64x8xbf16> to vector<64x8xbf16>
    %c0_43 = arith.constant 0 : index
    %c8_44 = arith.constant 8 : index
    %c0_45 = arith.constant 0 : index
    %30 = vector.load %arg9[%c0_43, %c8_44, %c0_45] : memref<2x72x8xbf16, #tpu.memory_space<vmem>>, vector<1x64x8xbf16>
    %31 = vector.shape_cast %30 : vector<1x64x8xbf16> to vector<64x8xbf16>
    %32 = tpu.concatenate %1, %3, %5, %7, %9, %11, %13, %15, %17, %19, %21, %23, %25, %27, %29, %31 in 1 : vector<64x8xbf16>, vector<64x8xbf16>, vector<64x8xbf16>, vector<64x8xbf16>, vector<64x8xbf16>, vector<64x8xbf16>, vector<64x8xbf16>, vector<64x8xbf16>, vector<64x8xbf16>, vector<64x8xbf16>, vector<64x8xbf16>, vector<64x8xbf16>, vector<64x8xbf16>, vector<64x8xbf16>, vector<64x8xbf16>, vector<64x8xbf16> -> vector<64x128xbf16>
    %c0_46 = arith.constant 0 : index
    %c0_47 = arith.constant 0 : index
    %33 = vector.load %arg14[%c0_46, %c0_47] : memref<128x128xbf16, #tpu.memory_space<vmem>>, vector<64x128xbf16>
    tpu.vector_store %arg14[%c0_46, %c0_47], %32 {strides = array<i32>} : memref<128x128xbf16, #tpu.memory_space<vmem>>, vector<64x128xbf16>,
    %c1 = arith.constant 1 : index
    %c0_48 = arith.constant 0 : index
    %c0_49 = arith.constant 0 : index
    %34 = vector.load %arg2[%c1, %c0_48, %c0_49] : memref<2x72x8xbf16, #tpu.memory_space<vmem>>, vector<1x64x8xbf16>
    %35 = vector.shape_cast %34 : vector<1x64x8xbf16> to vector<64x8xbf16>
    %c1_50 = arith.constant 1 : index
    %c0_51 = arith.constant 0 : index
    %c0_52 = arith.constant 0 : index
    %36 = vector.load %arg4[%c1_50, %c0_51, %c0_52] : memref<2x72x8xbf16, #tpu.memory_space<vmem>>, vector<1x64x8xbf16>
    %37 = vector.shape_cast %36 : vector<1x64x8xbf16> to vector<64x8xbf16>
    %c1_53 = arith.constant 1 : index
    %c0_54 = arith.constant 0 : index
    %c0_55 = arith.constant 0 : index
    %38 = vector.load %arg3[%c1_53, %c0_54, %c0_55] : memref<2x72x8xbf16, #tpu.memory_space<vmem>>, vector<1x64x8xbf16>
    %39 = vector.shape_cast %38 : vector<1x64x8xbf16> to vector<64x8xbf16>
    %c1_56 = arith.constant 1 : index
    %c0_57 = arith.constant 0 : index
    %c0_58 = arith.constant 0 : index
    %40 = vector.load %arg5[%c1_56, %c0_57, %c0_58] : memref<2x72x8xbf16, #tpu.memory_space<vmem>>, vector<1x64x8xbf16>
    %41 = vector.shape_cast %40 : vector<1x64x8xbf16> to vector<64x8xbf16>
    %c1_59 = arith.constant 1 : index
    %c0_60 = arith.constant 0 : index
    %c0_61 = arith.constant 0 : index
    %42 = vector.load %arg6[%c1_59, %c0_60, %c0_61] : memref<2x72x8xbf16, #tpu.memory_space<vmem>>, vector<1x64x8xbf16>
    %43 = vector.shape_cast %42 : vector<1x64x8xbf16> to vector<64x8xbf16>
    %c1_62 = arith.constant 1 : index
    %c0_63 = arith.constant 0 : index
    %c0_64 = arith.constant 0 : index
    %44 = vector.load %arg8[%c1_62, %c0_63, %c0_64] : memref<2x72x8xbf16, #tpu.memory_space<vmem>>, vector<1x64x8xbf16>
    %45 = vector.shape_cast %44 : vector<1x64x8xbf16> to vector<64x8xbf16>
    %c1_65 = arith.constant 1 : index
    %c0_66 = arith.constant 0 : index
    %c0_67 = arith.constant 0 : index
    %46 = vector.load %arg7[%c1_65, %c0_66, %c0_67] : memref<2x72x8xbf16, #tpu.memory_space<vmem>>, vector<1x64x8xbf16>
    %47 = vector.shape_cast %46 : vector<1x64x8xbf16> to vector<64x8xbf16>
    %c1_68 = arith.constant 1 : index
    %c0_69 = arith.constant 0 : index
    %c0_70 = arith.constant 0 : index
    %48 = vector.load %arg9[%c1_68, %c0_69, %c0_70] : memref<2x72x8xbf16, #tpu.memory_space<vmem>>, vector<1x64x8xbf16>
    %49 = vector.shape_cast %48 : vector<1x64x8xbf16> to vector<64x8xbf16>
    %c1_71 = arith.constant 1 : index
    %c8_72 = arith.constant 8 : index
    %c0_73 = arith.constant 0 : index
    %50 = vector.load %arg2[%c1_71, %c8_72, %c0_73] : memref<2x72x8xbf16, #tpu.memory_space<vmem>>, vector<1x64x8xbf16>
    %51 = vector.shape_cast %50 : vector<1x64x8xbf16> to vector<64x8xbf16>
    %c1_74 = arith.constant 1 : index
    %c8_75 = arith.constant 8 : index
    %c0_76 = arith.constant 0 : index
    %52 = vector.load %arg4[%c1_74, %c8_75, %c0_76] : memref<2x72x8xbf16, #tpu.memory_space<vmem>>, vector<1x64x8xbf16>
    %53 = vector.shape_cast %52 : vector<1x64x8xbf16> to vector<64x8xbf16>
    %c1_77 = arith.constant 1 : index
    %c8_78 = arith.constant 8 : index
    %c0_79 = arith.constant 0 : index
    %54 = vector.load %arg3[%c1_77, %c8_78, %c0_79] : memref<2x72x8xbf16, #tpu.memory_space<vmem>>, vector<1x64x8xbf16>
    %55 = vector.shape_cast %54 : vector<1x64x8xbf16> to vector<64x8xbf16>
    %c1_80 = arith.constant 1 : index
    %c8_81 = arith.constant 8 : index
    %c0_82 = arith.constant 0 : index
    %56 = vector.load %arg5[%c1_80, %c8_81, %c0_82] : memref<2x72x8xbf16, #tpu.memory_space<vmem>>, vector<1x64x8xbf16>
    %57 = vector.shape_cast %56 : vector<1x64x8xbf16> to vector<64x8xbf16>
    %c1_83 = arith.constant 1 : index
    %c8_84 = arith.constant 8 : index
    %c0_85 = arith.constant 0 : index
    %58 = vector.load %arg6[%c1_83, %c8_84, %c0_85] : memref<2x72x8xbf16, #tpu.memory_space<vmem>>, vector<1x64x8xbf16>
    %59 = vector.shape_cast %58 : vector<1x64x8xbf16> to vector<64x8xbf16>
    %c1_86 = arith.constant 1 : index
    %c8_87 = arith.constant 8 : index
    %c0_88 = arith.constant 0 : index
    %60 = vector.load %arg8[%c1_86, %c8_87, %c0_88] : memref<2x72x8xbf16, #tpu.memory_space<vmem>>, vector<1x64x8xbf16>
    %61 = vector.shape_cast %60 : vector<1x64x8xbf16> to vector<64x8xbf16>
    %c1_89 = arith.constant 1 : index
    %c8_90 = arith.constant 8 : index
    %c0_91 = arith.constant 0 : index
    %62 = vector.load %arg7[%c1_89, %c8_90, %c0_91] : memref<2x72x8xbf16, #tpu.memory_space<vmem>>, vector<1x64x8xbf16>
    %63 = vector.shape_cast %62 : vector<1x64x8xbf16> to vector<64x8xbf16>
    %c1_92 = arith.constant 1 : index
    %c8_93 = arith.constant 8 : index
    %c0_94 = arith.constant 0 : index
    %64 = vector.load %arg9[%c1_92, %c8_93, %c0_94] : memref<2x72x8xbf16, #tpu.memory_space<vmem>>, vector<1x64x8xbf16>
    %65 = vector.shape_cast %64 : vector<1x64x8xbf16> to vector<64x8xbf16>
    %66 = tpu.concatenate %35, %37, %39, %41, %43, %45, %47, %49, %51, %53, %55, %57, %59, %61, %63, %65 in 1 : vector<64x8xbf16>, vector<64x8xbf16>, vector<64x8xbf16>, vector<64x8xbf16>, vector<64x8xbf16>, vector<64x8xbf16>, vector<64x8xbf16>, vector<64x8xbf16>, vector<64x8xbf16>, vector<64x8xbf16>, vector<64x8xbf16>, vector<64x8xbf16>, vector<64x8xbf16>, vector<64x8xbf16>, vector<64x8xbf16>, vector<64x8xbf16> -> vector<64x128xbf16>
    %c64 = arith.constant 64 : index
    %c0_95 = arith.constant 0 : index
    %67 = vector.load %arg14[%c64, %c0_95] : memref<128x128xbf16, #tpu.memory_space<vmem>>, vector<64x128xbf16>
    tpu.vector_store %arg14[%c64, %c0_95], %66 {strides = array<i32>} : memref<128x128xbf16, #tpu.memory_space<vmem>>, vector<64x128xbf16>,
    %c0_96 = arith.constant 0 : index
    %c0_97 = arith.constant 0 : index
    %68 = vector.load %arg14[%c0_96, %c0_97] : memref<128x128xbf16, #tpu.memory_space<vmem>>, vector<128x128xbf16>
    %c0_98 = arith.constant 0 : index
    %c0_99 = arith.constant 0 : index
    %69 = vector.load %arg10[%c0_98, %c0_99] : memref<128x16xbf16, #tpu.memory_space<vmem>>, vector<128x16xbf16>
    %cst = arith.constant dense<0.000000e+00> : vector<128x16xf32>
    %70 = tpu.matmul %68, %69, %cst {dimension_numbers = #tpu.dot_dimension_numbers<[1], [0], [0], [1], [0, 0, 1, 1], [], []>} : vector<128x128xbf16>, vector<128x16xbf16>, vector<128x16xf32> -> vector<128x16xf32>
    %c0_100 = arith.constant 0 : index
    %c0_101 = arith.constant 0 : index
    %71 = vector.load %arg11[%c0_100, %c0_101] : memref<1x16xf32, #tpu.memory_space<vmem>>, vector<1x16xf32>
    %72 = vector.broadcast %71 : vector<1x16xf32> to vector<128x16xf32>
    %73 = arith.addf %70, %72 : vector<128x16xf32>
    %c0_102 = arith.constant 0 : index
    %c0_103 = arith.constant 0 : index
    %74 = vector.load %arg12[%c0_102, %c0_103] : memref<128x16xf32, #tpu.memory_space<vmem>>, vector<128x16xf32>
    tpu.vector_store %arg12[%c0_102, %c0_103], %73 {strides = array<i32>} : memref<128x16xf32, #tpu.memory_space<vmem>>, vector<128x16xf32>,
    %cst_104 = arith.constant dense<0.000000e+00> : vector<16xf32>
    %75 = vector.multi_reduction <add>, %73, %cst_104 [0] : vector<128x16xf32> to vector<16xf32>
    %76 = vector.shape_cast %75 : vector<16xf32> to vector<1x16xf32>
    %cst_105 = arith.constant 7.812500e-03 : f32
    %77 = vector.broadcast %cst_105 : f32 to vector<1x16xf32>
    %78 = arith.mulf %76, %77 : vector<1x16xf32>
    %79 = vector.broadcast %78 : vector<1x16xf32> to vector<128x16xf32>
    %80 = arith.subf %73, %79 : vector<128x16xf32>
    %81 = arith.mulf %80, %80 : vector<128x16xf32>
    %cst_106 = arith.constant dense<0.000000e+00> : vector<16xf32>
    %82 = vector.multi_reduction <add>, %81, %cst_106 [0] : vector<128x16xf32> to vector<16xf32>
    %83 = vector.shape_cast %82 : vector<16xf32> to vector<1x16xf32>
    %c0_i32 = arith.constant 0 : i32
    %84 = arith.cmpi eq, %arg1, %c0_i32 : i32
    %85 = arith.extui %84 : i1 to i32
    %c0_i32_107 = arith.constant 0 : i32
    %86 = arith.cmpi ne, %85, %c0_i32_107 : i32
    scf.if %86 {
      %c0_112 = arith.constant 0 : index
      %c0_113 = arith.constant 0 : index
      %93 = vector.load %arg13[%c0_112, %c0_113] : memref<2x16xf32, #tpu.memory_space<vmem>>, vector<1x16xf32>
      tpu.vector_store %arg13[%c0_112, %c0_113], %78 {strides = array<i32>} : memref<2x16xf32, #tpu.memory_space<vmem>>, vector<1x16xf32>,
      %c1_114 = arith.constant 1 : index
      %c0_115 = arith.constant 0 : index
      %94 = vector.load %arg13[%c1_114, %c0_115] : memref<2x16xf32, #tpu.memory_space<vmem>>, vector<1x16xf32>
      tpu.vector_store %arg13[%c1_114, %c0_115], %83 {strides = array<i32>} : memref<2x16xf32, #tpu.memory_space<vmem>>, vector<1x16xf32>,
    } else {
    }
    %c0_i32_108 = arith.constant 0 : i32
    %87 = arith.cmpi sgt, %arg1, %c0_i32_108 : i32
    %88 = arith.extui %87 : i1 to i32
    %c0_i32_109 = arith.constant 0 : i32
    %89 = arith.cmpi ne, %88, %c0_i32_109 : i32
    scf.if %89 {
      %c0_112 = arith.constant 0 : index
      %c0_113 = arith.constant 0 : index
      %93 = vector.load %arg13[%c0_112, %c0_113] : memref<2x16xf32, #tpu.memory_space<vmem>>, vector<1x16xf32>
      %c1_114 = arith.constant 1 : index
      %c0_115 = arith.constant 0 : index
      %94 = vector.load %arg13[%c1_114, %c0_115] : memref<2x16xf32, #tpu.memory_space<vmem>>, vector<1x16xf32>
      %95 = arith.sitofp %arg1 : i32 to f32
      %cst_116 = arith.constant 1.280000e+02 : f32
      %96 = arith.mulf %95, %cst_116 : f32
      %cst_117 = arith.constant 1.280000e+02 : f32
      %97 = arith.addf %96, %cst_117 : f32
      %98 = arith.subf %78, %93 : vector<1x16xf32>
      %cst_118 = arith.constant 1.280000e+02 : f32
      %99 = arith.divf %cst_118, %97 : f32
      %100 = vector.broadcast %99 : f32 to vector<1x16xf32>
      %101 = arith.mulf %98, %100 : vector<1x16xf32>
      %102 = arith.addf %93, %101 : vector<1x16xf32>
      %c0_119 = arith.constant 0 : index
      %c0_120 = arith.constant 0 : index
      %103 = vector.load %arg13[%c0_119, %c0_120] : memref<2x16xf32, #tpu.memory_space<vmem>>, vector<1x16xf32>
      tpu.vector_store %arg13[%c0_119, %c0_120], %102 {strides = array<i32>} : memref<2x16xf32, #tpu.memory_space<vmem>>, vector<1x16xf32>,
      %104 = arith.addf %94, %83 : vector<1x16xf32>
      %105 = arith.mulf %98, %98 : vector<1x16xf32>
      %cst_121 = arith.constant 1.280000e+02 : f32
      %106 = arith.mulf %96, %cst_121 : f32
      %107 = arith.divf %106, %97 : f32
      %108 = vector.broadcast %107 : f32 to vector<1x16xf32>
      %109 = arith.mulf %105, %108 : vector<1x16xf32>
      %110 = arith.addf %104, %109 : vector<1x16xf32>
      %c1_122 = arith.constant 1 : index
      %c0_123 = arith.constant 0 : index
      %111 = vector.load %arg13[%c1_122, %c0_123] : memref<2x16xf32, #tpu.memory_space<vmem>>, vector<1x16xf32>
      tpu.vector_store %arg13[%c1_122, %c0_123], %110 {strides = array<i32>} : memref<2x16xf32, #tpu.memory_space<vmem>>, vector<1x16xf32>,
    } else {
    }
    %c0_i32_110 = arith.constant 0 : i32
    %90 = arith.cmpi eq, %arg1, %c0_i32_110 : i32
    %91 = arith.extui %90 : i1 to i32
    %c0_i32_111 = arith.constant 0 : i32
    %92 = arith.cmpi ne, %91, %c0_i32_111 : i32
    scf.if %92 {
      %c1_112 = arith.constant 1 : index
      %c0_113 = arith.constant 0 : index
      %93 = vector.load %arg13[%c1_112, %c0_113] : memref<2x16xf32, #tpu.memory_space<vmem>>, vector<1x16xf32>
      %cst_114 = arith.constant 7.812500e-03 : f32
      %94 = vector.broadcast %cst_114 : f32 to vector<1x16xf32>
      %95 = arith.mulf %93, %94 : vector<1x16xf32>
      %c1_115 = arith.constant 1 : index
      %c0_116 = arith.constant 0 : index
      %96 = vector.load %arg13[%c1_115, %c0_116] : memref<2x16xf32, #tpu.memory_space<vmem>>, vector<1x16xf32>
      tpu.vector_store %arg13[%c1_115, %c0_116], %95 {strides = array<i32>} : memref<2x16xf32, #tpu.memory_space<vmem>>, vector<1x16xf32>,
    } else {
    }
    return
  }
  func.func @transform_0(%arg0: i32, %arg1: i32) -> (i32, i32, i32) {
    %c0_i32 = arith.constant 0 : i32
    %c0_i32_0 = arith.constant 0 : i32
    %c0_i32_1 = arith.constant 0 : i32
    return %arg1, %c0_i32, %c0_i32_0 : i32, i32, i32
  }
  func.func @transform_1(%arg0: i32, %arg1: i32) -> (i32, i32, i32) {
    %c0_i32 = arith.constant 0 : i32
    %c0_i32_0 = arith.constant 0 : i32
    %c0_i32_1 = arith.constant 0 : i32
    return %arg1, %c0_i32, %c0_i32_0 : i32, i32, i32
  }
  func.func @transform_2(%arg0: i32, %arg1: i32) -> (i32, i32, i32) {
    %c0_i32 = arith.constant 0 : i32
    %c0_i32_0 = arith.constant 0 : i32
    %c0_i32_1 = arith.constant 0 : i32
    return %arg1, %c0_i32, %c0_i32_0 : i32, i32, i32
  }
  func.func @transform_3(%arg0: i32, %arg1: i32) -> (i32, i32, i32) {
    %c0_i32 = arith.constant 0 : i32
    %c0_i32_0 = arith.constant 0 : i32
    %c0_i32_1 = arith.constant 0 : i32
    return %arg1, %c0_i32, %c0_i32_0 : i32, i32, i32
  }
  func.func @transform_4(%arg0: i32, %arg1: i32) -> (i32, i32, i32) {
    %c0_i32 = arith.constant 0 : i32
    %c0_i32_0 = arith.constant 0 : i32
    %c0_i32_1 = arith.constant 0 : i32
    return %arg1, %c0_i32, %c0_i32_0 : i32, i32, i32
  }
  func.func @transform_5(%arg0: i32, %arg1: i32) -> (i32, i32, i32) {
    %c0_i32 = arith.constant 0 : i32
    %c0_i32_0 = arith.constant 0 : i32
    %c0_i32_1 = arith.constant 0 : i32
    return %arg1, %c0_i32, %c0_i32_0 : i32, i32, i32
  }
  func.func @transform_6(%arg0: i32, %arg1: i32) -> (i32, i32, i32) {
    %c0_i32 = arith.constant 0 : i32
    %c0_i32_0 = arith.constant 0 : i32
    %c0_i32_1 = arith.constant 0 : i32
    return %arg1, %c0_i32, %c0_i32_0 : i32, i32, i32
  }
  func.func @transform_7(%arg0: i32, %arg1: i32) -> (i32, i32, i32) {
    %c0_i32 = arith.constant 0 : i32
    %c0_i32_0 = arith.constant 0 : i32
    %c0_i32_1 = arith.constant 0 : i32
    return %arg1, %c0_i32, %c0_i32_0 : i32, i32, i32
  }
  func.func @transform_8(%arg0: i32, %arg1: i32) -> (i32, i32) {
    %c0_i32 = arith.constant 0 : i32
    %c0_i32_0 = arith.constant 0 : i32
    return %c0_i32, %arg0 : i32, i32
  }
  func.func @transform_9(%arg0: i32, %arg1: i32) -> (i32, i32) {
    %c0_i32 = arith.constant 0 : i32
    %c0_i32_0 = arith.constant 0 : i32
    return %c0_i32, %arg0 : i32, i32
  }
  func.func @transform_10(%arg0: i32, %arg1: i32) -> (i32, i32) {
    %c0_i32 = arith.constant 0 : i32
    return %arg1, %arg0 : i32, i32
  }
  func.func @transform_11(%arg0: i32, %arg1: i32) -> (i32, i32) {
    %c0_i32 = arith.constant 0 : i32
    %c0_i32_0 = arith.constant 0 : i32
    return %c0_i32, %arg0 : i32, i32
  }
}

module attributes {stable_mosaic.version = 11 : i64} {
  func.func @kernel(%arg0: i32, %arg1: i32, %arg2: memref<2x20x16xbf16, #tpu.memory_space<vmem>>, %arg3: memref<2x20x16xbf16, #tpu.memory_space<vmem>>, %arg4: memref<2x20x16xbf16, #tpu.memory_space<vmem>>, %arg5: memref<2x20x16xbf16, #tpu.memory_space<vmem>>, %arg6: memref<2x20x16xbf16, #tpu.memory_space<vmem>>, %arg7: memref<2x20x16xbf16, #tpu.memory_space<vmem>>, %arg8: memref<2x20x16xbf16, #tpu.memory_space<vmem>>, %arg9: memref<2x20x16xbf16, #tpu.memory_space<vmem>>, %arg10: memref<256x32xbf16, #tpu.memory_space<vmem>>, %arg11: memref<1x32xf32, #tpu.memory_space<vmem>>, %arg12: memref<32x32xf32, #tpu.memory_space<vmem>>, %arg13: memref<2x32xf32, #tpu.memory_space<vmem>>, %arg14: memref<32x256xbf16, #tpu.memory_space<vmem>>) attributes {dimension_semantics = [#tpu.dimension_semantics<parallel>, #tpu.dimension_semantics<arbitrary>], iteration_bounds = array<i64: 1, 1>, scalar_prefetch = 0 : i64, scratch_operands = 1 : i64, tpu.core_type = #tpu.core_type<tc>, window_params = [{transform_indices = @transform_0, window_bounds = array<i64: 2, 20, 16>}, {transform_indices = @transform_1, window_bounds = array<i64: 2, 20, 16>}, {transform_indices = @transform_2, window_bounds = array<i64: 2, 20, 16>}, {transform_indices = @transform_3, window_bounds = array<i64: 2, 20, 16>}, {transform_indices = @transform_4, window_bounds = array<i64: 2, 20, 16>}, {transform_indices = @transform_5, window_bounds = array<i64: 2, 20, 16>}, {transform_indices = @transform_6, window_bounds = array<i64: 2, 20, 16>}, {transform_indices = @transform_7, window_bounds = array<i64: 2, 20, 16>}, {transform_indices = @transform_8, window_bounds = array<i64: 256, 32>}, {transform_indices = @transform_9, window_bounds = array<i64: 1, 32>}, {transform_indices = @transform_10, window_bounds = array<i64: 32, 32>}, {transform_indices = @transform_11, window_bounds = array<i64: 2, 32>}]} {
    %c0 = arith.constant 0 : index
    %c0_0 = arith.constant 0 : index
    %c0_1 = arith.constant 0 : index
    %0 = vector.load %arg2[%c0, %c0_0, %c0_1] : memref<2x20x16xbf16, #tpu.memory_space<vmem>>, vector<1x16x16xbf16>
    %1 = vector.shape_cast %0 : vector<1x16x16xbf16> to vector<16x16xbf16>
    %c0_2 = arith.constant 0 : index
    %c0_3 = arith.constant 0 : index
    %c0_4 = arith.constant 0 : index
    %2 = vector.load %arg4[%c0_2, %c0_3, %c0_4] : memref<2x20x16xbf16, #tpu.memory_space<vmem>>, vector<1x16x16xbf16>
    %3 = vector.shape_cast %2 : vector<1x16x16xbf16> to vector<16x16xbf16>
    %c0_5 = arith.constant 0 : index
    %c0_6 = arith.constant 0 : index
    %c0_7 = arith.constant 0 : index
    %4 = vector.load %arg3[%c0_5, %c0_6, %c0_7] : memref<2x20x16xbf16, #tpu.memory_space<vmem>>, vector<1x16x16xbf16>
    %5 = vector.shape_cast %4 : vector<1x16x16xbf16> to vector<16x16xbf16>
    %c0_8 = arith.constant 0 : index
    %c0_9 = arith.constant 0 : index
    %c0_10 = arith.constant 0 : index
    %6 = vector.load %arg5[%c0_8, %c0_9, %c0_10] : memref<2x20x16xbf16, #tpu.memory_space<vmem>>, vector<1x16x16xbf16>
    %7 = vector.shape_cast %6 : vector<1x16x16xbf16> to vector<16x16xbf16>
    %c0_11 = arith.constant 0 : index
    %c0_12 = arith.constant 0 : index
    %c0_13 = arith.constant 0 : index
    %8 = vector.load %arg6[%c0_11, %c0_12, %c0_13] : memref<2x20x16xbf16, #tpu.memory_space<vmem>>, vector<1x16x16xbf16>
    %9 = vector.shape_cast %8 : vector<1x16x16xbf16> to vector<16x16xbf16>
    %c0_14 = arith.constant 0 : index
    %c0_15 = arith.constant 0 : index
    %c0_16 = arith.constant 0 : index
    %10 = vector.load %arg8[%c0_14, %c0_15, %c0_16] : memref<2x20x16xbf16, #tpu.memory_space<vmem>>, vector<1x16x16xbf16>
    %11 = vector.shape_cast %10 : vector<1x16x16xbf16> to vector<16x16xbf16>
    %c0_17 = arith.constant 0 : index
    %c0_18 = arith.constant 0 : index
    %c0_19 = arith.constant 0 : index
    %12 = vector.load %arg7[%c0_17, %c0_18, %c0_19] : memref<2x20x16xbf16, #tpu.memory_space<vmem>>, vector<1x16x16xbf16>
    %13 = vector.shape_cast %12 : vector<1x16x16xbf16> to vector<16x16xbf16>
    %c0_20 = arith.constant 0 : index
    %c0_21 = arith.constant 0 : index
    %c0_22 = arith.constant 0 : index
    %14 = vector.load %arg9[%c0_20, %c0_21, %c0_22] : memref<2x20x16xbf16, #tpu.memory_space<vmem>>, vector<1x16x16xbf16>
    %15 = vector.shape_cast %14 : vector<1x16x16xbf16> to vector<16x16xbf16>
    %c0_23 = arith.constant 0 : index
    %c4 = arith.constant 4 : index
    %c0_24 = arith.constant 0 : index
    %16 = vector.load %arg2[%c0_23, %c4, %c0_24] : memref<2x20x16xbf16, #tpu.memory_space<vmem>>, vector<1x16x16xbf16>
    %17 = vector.shape_cast %16 : vector<1x16x16xbf16> to vector<16x16xbf16>
    %c0_25 = arith.constant 0 : index
    %c4_26 = arith.constant 4 : index
    %c0_27 = arith.constant 0 : index
    %18 = vector.load %arg4[%c0_25, %c4_26, %c0_27] : memref<2x20x16xbf16, #tpu.memory_space<vmem>>, vector<1x16x16xbf16>
    %19 = vector.shape_cast %18 : vector<1x16x16xbf16> to vector<16x16xbf16>
    %c0_28 = arith.constant 0 : index
    %c4_29 = arith.constant 4 : index
    %c0_30 = arith.constant 0 : index
    %20 = vector.load %arg3[%c0_28, %c4_29, %c0_30] : memref<2x20x16xbf16, #tpu.memory_space<vmem>>, vector<1x16x16xbf16>
    %21 = vector.shape_cast %20 : vector<1x16x16xbf16> to vector<16x16xbf16>
    %c0_31 = arith.constant 0 : index
    %c4_32 = arith.constant 4 : index
    %c0_33 = arith.constant 0 : index
    %22 = vector.load %arg5[%c0_31, %c4_32, %c0_33] : memref<2x20x16xbf16, #tpu.memory_space<vmem>>, vector<1x16x16xbf16>
    %23 = vector.shape_cast %22 : vector<1x16x16xbf16> to vector<16x16xbf16>
    %c0_34 = arith.constant 0 : index
    %c4_35 = arith.constant 4 : index
    %c0_36 = arith.constant 0 : index
    %24 = vector.load %arg6[%c0_34, %c4_35, %c0_36] : memref<2x20x16xbf16, #tpu.memory_space<vmem>>, vector<1x16x16xbf16>
    %25 = vector.shape_cast %24 : vector<1x16x16xbf16> to vector<16x16xbf16>
    %c0_37 = arith.constant 0 : index
    %c4_38 = arith.constant 4 : index
    %c0_39 = arith.constant 0 : index
    %26 = vector.load %arg8[%c0_37, %c4_38, %c0_39] : memref<2x20x16xbf16, #tpu.memory_space<vmem>>, vector<1x16x16xbf16>
    %27 = vector.shape_cast %26 : vector<1x16x16xbf16> to vector<16x16xbf16>
    %c0_40 = arith.constant 0 : index
    %c4_41 = arith.constant 4 : index
    %c0_42 = arith.constant 0 : index
    %28 = vector.load %arg7[%c0_40, %c4_41, %c0_42] : memref<2x20x16xbf16, #tpu.memory_space<vmem>>, vector<1x16x16xbf16>
    %29 = vector.shape_cast %28 : vector<1x16x16xbf16> to vector<16x16xbf16>
    %c0_43 = arith.constant 0 : index
    %c4_44 = arith.constant 4 : index
    %c0_45 = arith.constant 0 : index
    %30 = vector.load %arg9[%c0_43, %c4_44, %c0_45] : memref<2x20x16xbf16, #tpu.memory_space<vmem>>, vector<1x16x16xbf16>
    %31 = vector.shape_cast %30 : vector<1x16x16xbf16> to vector<16x16xbf16>
    %32 = tpu.concatenate %1, %3, %5, %7, %9, %11, %13, %15, %17, %19, %21, %23, %25, %27, %29, %31 in 1 : vector<16x16xbf16>, vector<16x16xbf16>, vector<16x16xbf16>, vector<16x16xbf16>, vector<16x16xbf16>, vector<16x16xbf16>, vector<16x16xbf16>, vector<16x16xbf16>, vector<16x16xbf16>, vector<16x16xbf16>, vector<16x16xbf16>, vector<16x16xbf16>, vector<16x16xbf16>, vector<16x16xbf16>, vector<16x16xbf16>, vector<16x16xbf16> -> vector<16x256xbf16>
    %c0_46 = arith.constant 0 : index
    %c0_47 = arith.constant 0 : index
    %33 = vector.load %arg14[%c0_46, %c0_47] : memref<32x256xbf16, #tpu.memory_space<vmem>>, vector<16x256xbf16>
    tpu.vector_store %arg14[%c0_46, %c0_47], %32 {strides = array<i32>} : memref<32x256xbf16, #tpu.memory_space<vmem>>, vector<16x256xbf16>,
    %c1 = arith.constant 1 : index
    %c0_48 = arith.constant 0 : index
    %c0_49 = arith.constant 0 : index
    %34 = vector.load %arg2[%c1, %c0_48, %c0_49] : memref<2x20x16xbf16, #tpu.memory_space<vmem>>, vector<1x16x16xbf16>
    %35 = vector.shape_cast %34 : vector<1x16x16xbf16> to vector<16x16xbf16>
    %c1_50 = arith.constant 1 : index
    %c0_51 = arith.constant 0 : index
    %c0_52 = arith.constant 0 : index
    %36 = vector.load %arg4[%c1_50, %c0_51, %c0_52] : memref<2x20x16xbf16, #tpu.memory_space<vmem>>, vector<1x16x16xbf16>
    %37 = vector.shape_cast %36 : vector<1x16x16xbf16> to vector<16x16xbf16>
    %c1_53 = arith.constant 1 : index
    %c0_54 = arith.constant 0 : index
    %c0_55 = arith.constant 0 : index
    %38 = vector.load %arg3[%c1_53, %c0_54, %c0_55] : memref<2x20x16xbf16, #tpu.memory_space<vmem>>, vector<1x16x16xbf16>
    %39 = vector.shape_cast %38 : vector<1x16x16xbf16> to vector<16x16xbf16>
    %c1_56 = arith.constant 1 : index
    %c0_57 = arith.constant 0 : index
    %c0_58 = arith.constant 0 : index
    %40 = vector.load %arg5[%c1_56, %c0_57, %c0_58] : memref<2x20x16xbf16, #tpu.memory_space<vmem>>, vector<1x16x16xbf16>
    %41 = vector.shape_cast %40 : vector<1x16x16xbf16> to vector<16x16xbf16>
    %c1_59 = arith.constant 1 : index
    %c0_60 = arith.constant 0 : index
    %c0_61 = arith.constant 0 : index
    %42 = vector.load %arg6[%c1_59, %c0_60, %c0_61] : memref<2x20x16xbf16, #tpu.memory_space<vmem>>, vector<1x16x16xbf16>
    %43 = vector.shape_cast %42 : vector<1x16x16xbf16> to vector<16x16xbf16>
    %c1_62 = arith.constant 1 : index
    %c0_63 = arith.constant 0 : index
    %c0_64 = arith.constant 0 : index
    %44 = vector.load %arg8[%c1_62, %c0_63, %c0_64] : memref<2x20x16xbf16, #tpu.memory_space<vmem>>, vector<1x16x16xbf16>
    %45 = vector.shape_cast %44 : vector<1x16x16xbf16> to vector<16x16xbf16>
    %c1_65 = arith.constant 1 : index
    %c0_66 = arith.constant 0 : index
    %c0_67 = arith.constant 0 : index
    %46 = vector.load %arg7[%c1_65, %c0_66, %c0_67] : memref<2x20x16xbf16, #tpu.memory_space<vmem>>, vector<1x16x16xbf16>
    %47 = vector.shape_cast %46 : vector<1x16x16xbf16> to vector<16x16xbf16>
    %c1_68 = arith.constant 1 : index
    %c0_69 = arith.constant 0 : index
    %c0_70 = arith.constant 0 : index
    %48 = vector.load %arg9[%c1_68, %c0_69, %c0_70] : memref<2x20x16xbf16, #tpu.memory_space<vmem>>, vector<1x16x16xbf16>
    %49 = vector.shape_cast %48 : vector<1x16x16xbf16> to vector<16x16xbf16>
    %c1_71 = arith.constant 1 : index
    %c4_72 = arith.constant 4 : index
    %c0_73 = arith.constant 0 : index
    %50 = vector.load %arg2[%c1_71, %c4_72, %c0_73] : memref<2x20x16xbf16, #tpu.memory_space<vmem>>, vector<1x16x16xbf16>
    %51 = vector.shape_cast %50 : vector<1x16x16xbf16> to vector<16x16xbf16>
    %c1_74 = arith.constant 1 : index
    %c4_75 = arith.constant 4 : index
    %c0_76 = arith.constant 0 : index
    %52 = vector.load %arg4[%c1_74, %c4_75, %c0_76] : memref<2x20x16xbf16, #tpu.memory_space<vmem>>, vector<1x16x16xbf16>
    %53 = vector.shape_cast %52 : vector<1x16x16xbf16> to vector<16x16xbf16>
    %c1_77 = arith.constant 1 : index
    %c4_78 = arith.constant 4 : index
    %c0_79 = arith.constant 0 : index
    %54 = vector.load %arg3[%c1_77, %c4_78, %c0_79] : memref<2x20x16xbf16, #tpu.memory_space<vmem>>, vector<1x16x16xbf16>
    %55 = vector.shape_cast %54 : vector<1x16x16xbf16> to vector<16x16xbf16>
    %c1_80 = arith.constant 1 : index
    %c4_81 = arith.constant 4 : index
    %c0_82 = arith.constant 0 : index
    %56 = vector.load %arg5[%c1_80, %c4_81, %c0_82] : memref<2x20x16xbf16, #tpu.memory_space<vmem>>, vector<1x16x16xbf16>
    %57 = vector.shape_cast %56 : vector<1x16x16xbf16> to vector<16x16xbf16>
    %c1_83 = arith.constant 1 : index
    %c4_84 = arith.constant 4 : index
    %c0_85 = arith.constant 0 : index
    %58 = vector.load %arg6[%c1_83, %c4_84, %c0_85] : memref<2x20x16xbf16, #tpu.memory_space<vmem>>, vector<1x16x16xbf16>
    %59 = vector.shape_cast %58 : vector<1x16x16xbf16> to vector<16x16xbf16>
    %c1_86 = arith.constant 1 : index
    %c4_87 = arith.constant 4 : index
    %c0_88 = arith.constant 0 : index
    %60 = vector.load %arg8[%c1_86, %c4_87, %c0_88] : memref<2x20x16xbf16, #tpu.memory_space<vmem>>, vector<1x16x16xbf16>
    %61 = vector.shape_cast %60 : vector<1x16x16xbf16> to vector<16x16xbf16>
    %c1_89 = arith.constant 1 : index
    %c4_90 = arith.constant 4 : index
    %c0_91 = arith.constant 0 : index
    %62 = vector.load %arg7[%c1_89, %c4_90, %c0_91] : memref<2x20x16xbf16, #tpu.memory_space<vmem>>, vector<1x16x16xbf16>
    %63 = vector.shape_cast %62 : vector<1x16x16xbf16> to vector<16x16xbf16>
    %c1_92 = arith.constant 1 : index
    %c4_93 = arith.constant 4 : index
    %c0_94 = arith.constant 0 : index
    %64 = vector.load %arg9[%c1_92, %c4_93, %c0_94] : memref<2x20x16xbf16, #tpu.memory_space<vmem>>, vector<1x16x16xbf16>
    %65 = vector.shape_cast %64 : vector<1x16x16xbf16> to vector<16x16xbf16>
    %66 = tpu.concatenate %35, %37, %39, %41, %43, %45, %47, %49, %51, %53, %55, %57, %59, %61, %63, %65 in 1 : vector<16x16xbf16>, vector<16x16xbf16>, vector<16x16xbf16>, vector<16x16xbf16>, vector<16x16xbf16>, vector<16x16xbf16>, vector<16x16xbf16>, vector<16x16xbf16>, vector<16x16xbf16>, vector<16x16xbf16>, vector<16x16xbf16>, vector<16x16xbf16>, vector<16x16xbf16>, vector<16x16xbf16>, vector<16x16xbf16>, vector<16x16xbf16> -> vector<16x256xbf16>
    %c16 = arith.constant 16 : index
    %c0_95 = arith.constant 0 : index
    %67 = vector.load %arg14[%c16, %c0_95] : memref<32x256xbf16, #tpu.memory_space<vmem>>, vector<16x256xbf16>
    tpu.vector_store %arg14[%c16, %c0_95], %66 {strides = array<i32>} : memref<32x256xbf16, #tpu.memory_space<vmem>>, vector<16x256xbf16>,
    %c0_96 = arith.constant 0 : index
    %c0_97 = arith.constant 0 : index
    %68 = vector.load %arg14[%c0_96, %c0_97] : memref<32x256xbf16, #tpu.memory_space<vmem>>, vector<32x256xbf16>
    %c0_98 = arith.constant 0 : index
    %c0_99 = arith.constant 0 : index
    %69 = vector.load %arg10[%c0_98, %c0_99] : memref<256x32xbf16, #tpu.memory_space<vmem>>, vector<256x32xbf16>
    %cst = arith.constant dense<0.000000e+00> : vector<32x32xf32>
    %70 = tpu.matmul %68, %69, %cst {dimension_numbers = #tpu.dot_dimension_numbers<[1], [0], [0], [1], [0, 0, 1, 1], [], []>} : vector<32x256xbf16>, vector<256x32xbf16>, vector<32x32xf32> -> vector<32x32xf32>
    %c0_100 = arith.constant 0 : index
    %c0_101 = arith.constant 0 : index
    %71 = vector.load %arg11[%c0_100, %c0_101] : memref<1x32xf32, #tpu.memory_space<vmem>>, vector<1x32xf32>
    %72 = vector.broadcast %71 : vector<1x32xf32> to vector<32x32xf32>
    %73 = arith.addf %70, %72 : vector<32x32xf32>
    %c0_102 = arith.constant 0 : index
    %c0_103 = arith.constant 0 : index
    %74 = vector.load %arg12[%c0_102, %c0_103] : memref<32x32xf32, #tpu.memory_space<vmem>>, vector<32x32xf32>
    tpu.vector_store %arg12[%c0_102, %c0_103], %73 {strides = array<i32>} : memref<32x32xf32, #tpu.memory_space<vmem>>, vector<32x32xf32>,
    %cst_104 = arith.constant dense<0.000000e+00> : vector<32xf32>
    %75 = vector.multi_reduction <add>, %73, %cst_104 [0] : vector<32x32xf32> to vector<32xf32>
    %76 = vector.shape_cast %75 : vector<32xf32> to vector<1x32xf32>
    %cst_105 = arith.constant 3.125000e-02 : f32
    %77 = vector.broadcast %cst_105 : f32 to vector<1x32xf32>
    %78 = arith.mulf %76, %77 : vector<1x32xf32>
    %79 = vector.broadcast %78 : vector<1x32xf32> to vector<32x32xf32>
    %80 = arith.subf %73, %79 : vector<32x32xf32>
    %81 = arith.mulf %80, %80 : vector<32x32xf32>
    %cst_106 = arith.constant dense<0.000000e+00> : vector<32xf32>
    %82 = vector.multi_reduction <add>, %81, %cst_106 [0] : vector<32x32xf32> to vector<32xf32>
    %83 = vector.shape_cast %82 : vector<32xf32> to vector<1x32xf32>
    %c0_i32 = arith.constant 0 : i32
    %84 = arith.cmpi eq, %arg1, %c0_i32 : i32
    %85 = arith.extui %84 : i1 to i32
    %c0_i32_107 = arith.constant 0 : i32
    %86 = arith.cmpi ne, %85, %c0_i32_107 : i32
    scf.if %86 {
      %c0_112 = arith.constant 0 : index
      %c0_113 = arith.constant 0 : index
      %93 = vector.load %arg13[%c0_112, %c0_113] : memref<2x32xf32, #tpu.memory_space<vmem>>, vector<1x32xf32>
      tpu.vector_store %arg13[%c0_112, %c0_113], %78 {strides = array<i32>} : memref<2x32xf32, #tpu.memory_space<vmem>>, vector<1x32xf32>,
      %c1_114 = arith.constant 1 : index
      %c0_115 = arith.constant 0 : index
      %94 = vector.load %arg13[%c1_114, %c0_115] : memref<2x32xf32, #tpu.memory_space<vmem>>, vector<1x32xf32>
      tpu.vector_store %arg13[%c1_114, %c0_115], %83 {strides = array<i32>} : memref<2x32xf32, #tpu.memory_space<vmem>>, vector<1x32xf32>,
    } else {
    }
    %c0_i32_108 = arith.constant 0 : i32
    %87 = arith.cmpi sgt, %arg1, %c0_i32_108 : i32
    %88 = arith.extui %87 : i1 to i32
    %c0_i32_109 = arith.constant 0 : i32
    %89 = arith.cmpi ne, %88, %c0_i32_109 : i32
    scf.if %89 {
      %c0_112 = arith.constant 0 : index
      %c0_113 = arith.constant 0 : index
      %93 = vector.load %arg13[%c0_112, %c0_113] : memref<2x32xf32, #tpu.memory_space<vmem>>, vector<1x32xf32>
      %c1_114 = arith.constant 1 : index
      %c0_115 = arith.constant 0 : index
      %94 = vector.load %arg13[%c1_114, %c0_115] : memref<2x32xf32, #tpu.memory_space<vmem>>, vector<1x32xf32>
      %95 = arith.sitofp %arg1 : i32 to f32
      %cst_116 = arith.constant 3.200000e+01 : f32
      %96 = arith.mulf %95, %cst_116 : f32
      %cst_117 = arith.constant 3.200000e+01 : f32
      %97 = arith.addf %96, %cst_117 : f32
      %98 = arith.subf %78, %93 : vector<1x32xf32>
      %cst_118 = arith.constant 3.200000e+01 : f32
      %99 = arith.divf %cst_118, %97 : f32
      %100 = vector.broadcast %99 : f32 to vector<1x32xf32>
      %101 = arith.mulf %98, %100 : vector<1x32xf32>
      %102 = arith.addf %93, %101 : vector<1x32xf32>
      %c0_119 = arith.constant 0 : index
      %c0_120 = arith.constant 0 : index
      %103 = vector.load %arg13[%c0_119, %c0_120] : memref<2x32xf32, #tpu.memory_space<vmem>>, vector<1x32xf32>
      tpu.vector_store %arg13[%c0_119, %c0_120], %102 {strides = array<i32>} : memref<2x32xf32, #tpu.memory_space<vmem>>, vector<1x32xf32>,
      %104 = arith.addf %94, %83 : vector<1x32xf32>
      %105 = arith.mulf %98, %98 : vector<1x32xf32>
      %cst_121 = arith.constant 3.200000e+01 : f32
      %106 = arith.mulf %96, %cst_121 : f32
      %107 = arith.divf %106, %97 : f32
      %108 = vector.broadcast %107 : f32 to vector<1x32xf32>
      %109 = arith.mulf %105, %108 : vector<1x32xf32>
      %110 = arith.addf %104, %109 : vector<1x32xf32>
      %c1_122 = arith.constant 1 : index
      %c0_123 = arith.constant 0 : index
      %111 = vector.load %arg13[%c1_122, %c0_123] : memref<2x32xf32, #tpu.memory_space<vmem>>, vector<1x32xf32>
      tpu.vector_store %arg13[%c1_122, %c0_123], %110 {strides = array<i32>} : memref<2x32xf32, #tpu.memory_space<vmem>>, vector<1x32xf32>,
    } else {
    }
    %c0_i32_110 = arith.constant 0 : i32
    %90 = arith.cmpi eq, %arg1, %c0_i32_110 : i32
    %91 = arith.extui %90 : i1 to i32
    %c0_i32_111 = arith.constant 0 : i32
    %92 = arith.cmpi ne, %91, %c0_i32_111 : i32
    scf.if %92 {
      %c1_112 = arith.constant 1 : index
      %c0_113 = arith.constant 0 : index
      %93 = vector.load %arg13[%c1_112, %c0_113] : memref<2x32xf32, #tpu.memory_space<vmem>>, vector<1x32xf32>
      %cst_114 = arith.constant 3.125000e-02 : f32
      %94 = vector.broadcast %cst_114 : f32 to vector<1x32xf32>
      %95 = arith.mulf %93, %94 : vector<1x32xf32>
      %c1_115 = arith.constant 1 : index
      %c0_116 = arith.constant 0 : index
      %96 = vector.load %arg13[%c1_115, %c0_116] : memref<2x32xf32, #tpu.memory_space<vmem>>, vector<1x32xf32>
      tpu.vector_store %arg13[%c1_115, %c0_116], %95 {strides = array<i32>} : memref<2x32xf32, #tpu.memory_space<vmem>>, vector<1x32xf32>,
    } else {
    }
    return
  }
  func.func @transform_0(%arg0: i32, %arg1: i32) -> (i32, i32, i32) {
    %c0_i32 = arith.constant 0 : i32
    %c0_i32_0 = arith.constant 0 : i32
    %c0_i32_1 = arith.constant 0 : i32
    return %arg1, %c0_i32, %c0_i32_0 : i32, i32, i32
  }
  func.func @transform_1(%arg0: i32, %arg1: i32) -> (i32, i32, i32) {
    %c0_i32 = arith.constant 0 : i32
    %c0_i32_0 = arith.constant 0 : i32
    %c0_i32_1 = arith.constant 0 : i32
    return %arg1, %c0_i32, %c0_i32_0 : i32, i32, i32
  }
  func.func @transform_2(%arg0: i32, %arg1: i32) -> (i32, i32, i32) {
    %c0_i32 = arith.constant 0 : i32
    %c0_i32_0 = arith.constant 0 : i32
    %c0_i32_1 = arith.constant 0 : i32
    return %arg1, %c0_i32, %c0_i32_0 : i32, i32, i32
  }
  func.func @transform_3(%arg0: i32, %arg1: i32) -> (i32, i32, i32) {
    %c0_i32 = arith.constant 0 : i32
    %c0_i32_0 = arith.constant 0 : i32
    %c0_i32_1 = arith.constant 0 : i32
    return %arg1, %c0_i32, %c0_i32_0 : i32, i32, i32
  }
  func.func @transform_4(%arg0: i32, %arg1: i32) -> (i32, i32, i32) {
    %c0_i32 = arith.constant 0 : i32
    %c0_i32_0 = arith.constant 0 : i32
    %c0_i32_1 = arith.constant 0 : i32
    return %arg1, %c0_i32, %c0_i32_0 : i32, i32, i32
  }
  func.func @transform_5(%arg0: i32, %arg1: i32) -> (i32, i32, i32) {
    %c0_i32 = arith.constant 0 : i32
    %c0_i32_0 = arith.constant 0 : i32
    %c0_i32_1 = arith.constant 0 : i32
    return %arg1, %c0_i32, %c0_i32_0 : i32, i32, i32
  }
  func.func @transform_6(%arg0: i32, %arg1: i32) -> (i32, i32, i32) {
    %c0_i32 = arith.constant 0 : i32
    %c0_i32_0 = arith.constant 0 : i32
    %c0_i32_1 = arith.constant 0 : i32
    return %arg1, %c0_i32, %c0_i32_0 : i32, i32, i32
  }
  func.func @transform_7(%arg0: i32, %arg1: i32) -> (i32, i32, i32) {
    %c0_i32 = arith.constant 0 : i32
    %c0_i32_0 = arith.constant 0 : i32
    %c0_i32_1 = arith.constant 0 : i32
    return %arg1, %c0_i32, %c0_i32_0 : i32, i32, i32
  }
  func.func @transform_8(%arg0: i32, %arg1: i32) -> (i32, i32) {
    %c0_i32 = arith.constant 0 : i32
    %c0_i32_0 = arith.constant 0 : i32
    return %c0_i32, %arg0 : i32, i32
  }
  func.func @transform_9(%arg0: i32, %arg1: i32) -> (i32, i32) {
    %c0_i32 = arith.constant 0 : i32
    %c0_i32_0 = arith.constant 0 : i32
    return %c0_i32, %arg0 : i32, i32
  }
  func.func @transform_10(%arg0: i32, %arg1: i32) -> (i32, i32) {
    %c0_i32 = arith.constant 0 : i32
    return %arg1, %arg0 : i32, i32
  }
  func.func @transform_11(%arg0: i32, %arg1: i32) -> (i32, i32) {
    %c0_i32 = arith.constant 0 : i32
    %c0_i32_0 = arith.constant 0 : i32
    return %c0_i32, %arg0 : i32, i32
  }
}

module attributes {stable_mosaic.version = 11 : i64} {
  func.func @bn_relu_kernel(%arg0: i32, %arg1: memref<32x32xf32, #tpu.memory_space<vmem>>, %arg2: memref<1x32xf32, #tpu.memory_space<vmem>>, %arg3: memref<1x32xf32, #tpu.memory_space<vmem>>, %arg4: memref<32x32xbf16, #tpu.memory_space<vmem>>) attributes {dimension_semantics = [#tpu.dimension_semantics<parallel>], iteration_bounds = array<i64: 1>, scalar_prefetch = 0 : i64, scratch_operands = 0 : i64, tpu.core_type = #tpu.core_type<tc>, window_params = [{transform_indices = @transform_0, window_bounds = array<i64: 32, 32>}, {pipeline_mode = #tpu.pipeline_mode<synchronous>, transform_indices = @transform_1, window_bounds = array<i64: 1, 32>}, {pipeline_mode = #tpu.pipeline_mode<synchronous>, transform_indices = @transform_2, window_bounds = array<i64: 1, 32>}, {transform_indices = @transform_3, window_bounds = array<i64: 32, 32>}]} {
    %c0 = arith.constant 0 : index
    %c0_0 = arith.constant 0 : index
    %0 = vector.load %arg1[%c0, %c0_0] : memref<32x32xf32, #tpu.memory_space<vmem>>, vector<32x32xf32>
    %c0_1 = arith.constant 0 : index
    %c0_2 = arith.constant 0 : index
    %1 = vector.load %arg2[%c0_1, %c0_2] : memref<1x32xf32, #tpu.memory_space<vmem>>, vector<1x32xf32>
    %2 = vector.broadcast %1 : vector<1x32xf32> to vector<32x32xf32>
    %3 = arith.mulf %0, %2 : vector<32x32xf32>
    %c0_3 = arith.constant 0 : index
    %c0_4 = arith.constant 0 : index
    %4 = vector.load %arg3[%c0_3, %c0_4] : memref<1x32xf32, #tpu.memory_space<vmem>>, vector<1x32xf32>
    %5 = vector.broadcast %4 : vector<1x32xf32> to vector<32x32xf32>
    %6 = arith.addf %3, %5 : vector<32x32xf32>
    %cst = arith.constant 0.000000e+00 : f32
    %7 = vector.broadcast %cst : f32 to vector<32x32xf32>
    %8 = arith.maximumf %6, %7 : vector<32x32xf32>
    %9 = arith.truncf %8 : vector<32x32xf32> to vector<32x32xbf16>
    %c0_5 = arith.constant 0 : index
    %c0_6 = arith.constant 0 : index
    %10 = vector.load %arg4[%c0_5, %c0_6] : memref<32x32xbf16, #tpu.memory_space<vmem>>, vector<32x32xbf16>
    tpu.vector_store %arg4[%c0_5, %c0_6], %9 {strides = array<i32>} : memref<32x32xbf16, #tpu.memory_space<vmem>>, vector<32x32xbf16>,
    return
  }
  func.func @transform_0(%arg0: i32) -> (i32, i32) {
    %c0_i32 = arith.constant 0 : i32
    %c0_i32_0 = arith.constant 0 : i32
    return %arg0, %c0_i32 : i32, i32
  }
  func.func @transform_1(%arg0: i32) -> (i32, i32) {
    %c0_i32 = arith.constant 0 : i32
    %c0_i32_0 = arith.constant 0 : i32
    %c0_i32_1 = arith.constant 0 : i32
    return %c0_i32, %c0_i32_0 : i32, i32
  }
  func.func @transform_2(%arg0: i32) -> (i32, i32) {
    %c0_i32 = arith.constant 0 : i32
    %c0_i32_0 = arith.constant 0 : i32
    %c0_i32_1 = arith.constant 0 : i32
    return %c0_i32, %c0_i32_0 : i32, i32
  }
  func.func @transform_3(%arg0: i32) -> (i32, i32) {
    %c0_i32 = arith.constant 0 : i32
    %c0_i32_0 = arith.constant 0 : i32
    return %arg0, %c0_i32 : i32, i32
  }
}

module attributes {stable_mosaic.version = 11 : i64} {
  func.func @kernel(%arg0: i32, %arg1: i32, %arg2: memref<2x6x32xbf16, #tpu.memory_space<vmem>>, %arg3: memref<2x6x32xbf16, #tpu.memory_space<vmem>>, %arg4: memref<2x6x32xbf16, #tpu.memory_space<vmem>>, %arg5: memref<2x6x32xbf16, #tpu.memory_space<vmem>>, %arg6: memref<2x6x32xbf16, #tpu.memory_space<vmem>>, %arg7: memref<2x6x32xbf16, #tpu.memory_space<vmem>>, %arg8: memref<2x6x32xbf16, #tpu.memory_space<vmem>>, %arg9: memref<2x6x32xbf16, #tpu.memory_space<vmem>>, %arg10: memref<512x64xbf16, #tpu.memory_space<vmem>>, %arg11: memref<1x64xf32, #tpu.memory_space<vmem>>, %arg12: memref<8x64xf32, #tpu.memory_space<vmem>>, %arg13: memref<2x64xf32, #tpu.memory_space<vmem>>, %arg14: memref<8x512xbf16, #tpu.memory_space<vmem>>) attributes {dimension_semantics = [#tpu.dimension_semantics<parallel>, #tpu.dimension_semantics<arbitrary>], iteration_bounds = array<i64: 1, 1>, scalar_prefetch = 0 : i64, scratch_operands = 1 : i64, tpu.core_type = #tpu.core_type<tc>, window_params = [{transform_indices = @transform_0, window_bounds = array<i64: 2, 6, 32>}, {transform_indices = @transform_1, window_bounds = array<i64: 2, 6, 32>}, {transform_indices = @transform_2, window_bounds = array<i64: 2, 6, 32>}, {transform_indices = @transform_3, window_bounds = array<i64: 2, 6, 32>}, {transform_indices = @transform_4, window_bounds = array<i64: 2, 6, 32>}, {transform_indices = @transform_5, window_bounds = array<i64: 2, 6, 32>}, {transform_indices = @transform_6, window_bounds = array<i64: 2, 6, 32>}, {transform_indices = @transform_7, window_bounds = array<i64: 2, 6, 32>}, {transform_indices = @transform_8, window_bounds = array<i64: 512, 64>}, {transform_indices = @transform_9, window_bounds = array<i64: 1, 64>}, {transform_indices = @transform_10, window_bounds = array<i64: 8, 64>}, {transform_indices = @transform_11, window_bounds = array<i64: 2, 64>}]} {
    %c0 = arith.constant 0 : index
    %c0_0 = arith.constant 0 : index
    %c0_1 = arith.constant 0 : index
    %0 = vector.load %arg2[%c0, %c0_0, %c0_1] : memref<2x6x32xbf16, #tpu.memory_space<vmem>>, vector<1x4x32xbf16>
    %1 = vector.shape_cast %0 : vector<1x4x32xbf16> to vector<4x32xbf16>
    %c0_2 = arith.constant 0 : index
    %c0_3 = arith.constant 0 : index
    %c0_4 = arith.constant 0 : index
    %2 = vector.load %arg4[%c0_2, %c0_3, %c0_4] : memref<2x6x32xbf16, #tpu.memory_space<vmem>>, vector<1x4x32xbf16>
    %3 = vector.shape_cast %2 : vector<1x4x32xbf16> to vector<4x32xbf16>
    %c0_5 = arith.constant 0 : index
    %c0_6 = arith.constant 0 : index
    %c0_7 = arith.constant 0 : index
    %4 = vector.load %arg3[%c0_5, %c0_6, %c0_7] : memref<2x6x32xbf16, #tpu.memory_space<vmem>>, vector<1x4x32xbf16>
    %5 = vector.shape_cast %4 : vector<1x4x32xbf16> to vector<4x32xbf16>
    %c0_8 = arith.constant 0 : index
    %c0_9 = arith.constant 0 : index
    %c0_10 = arith.constant 0 : index
    %6 = vector.load %arg5[%c0_8, %c0_9, %c0_10] : memref<2x6x32xbf16, #tpu.memory_space<vmem>>, vector<1x4x32xbf16>
    %7 = vector.shape_cast %6 : vector<1x4x32xbf16> to vector<4x32xbf16>
    %c0_11 = arith.constant 0 : index
    %c0_12 = arith.constant 0 : index
    %c0_13 = arith.constant 0 : index
    %8 = vector.load %arg6[%c0_11, %c0_12, %c0_13] : memref<2x6x32xbf16, #tpu.memory_space<vmem>>, vector<1x4x32xbf16>
    %9 = vector.shape_cast %8 : vector<1x4x32xbf16> to vector<4x32xbf16>
    %c0_14 = arith.constant 0 : index
    %c0_15 = arith.constant 0 : index
    %c0_16 = arith.constant 0 : index
    %10 = vector.load %arg8[%c0_14, %c0_15, %c0_16] : memref<2x6x32xbf16, #tpu.memory_space<vmem>>, vector<1x4x32xbf16>
    %11 = vector.shape_cast %10 : vector<1x4x32xbf16> to vector<4x32xbf16>
    %c0_17 = arith.constant 0 : index
    %c0_18 = arith.constant 0 : index
    %c0_19 = arith.constant 0 : index
    %12 = vector.load %arg7[%c0_17, %c0_18, %c0_19] : memref<2x6x32xbf16, #tpu.memory_space<vmem>>, vector<1x4x32xbf16>
    %13 = vector.shape_cast %12 : vector<1x4x32xbf16> to vector<4x32xbf16>
    %c0_20 = arith.constant 0 : index
    %c0_21 = arith.constant 0 : index
    %c0_22 = arith.constant 0 : index
    %14 = vector.load %arg9[%c0_20, %c0_21, %c0_22] : memref<2x6x32xbf16, #tpu.memory_space<vmem>>, vector<1x4x32xbf16>
    %15 = vector.shape_cast %14 : vector<1x4x32xbf16> to vector<4x32xbf16>
    %c0_23 = arith.constant 0 : index
    %c2 = arith.constant 2 : index
    %c0_24 = arith.constant 0 : index
    %16 = vector.load %arg2[%c0_23, %c2, %c0_24] : memref<2x6x32xbf16, #tpu.memory_space<vmem>>, vector<1x4x32xbf16>
    %17 = vector.shape_cast %16 : vector<1x4x32xbf16> to vector<4x32xbf16>
    %c0_25 = arith.constant 0 : index
    %c2_26 = arith.constant 2 : index
    %c0_27 = arith.constant 0 : index
    %18 = vector.load %arg4[%c0_25, %c2_26, %c0_27] : memref<2x6x32xbf16, #tpu.memory_space<vmem>>, vector<1x4x32xbf16>
    %19 = vector.shape_cast %18 : vector<1x4x32xbf16> to vector<4x32xbf16>
    %c0_28 = arith.constant 0 : index
    %c2_29 = arith.constant 2 : index
    %c0_30 = arith.constant 0 : index
    %20 = vector.load %arg3[%c0_28, %c2_29, %c0_30] : memref<2x6x32xbf16, #tpu.memory_space<vmem>>, vector<1x4x32xbf16>
    %21 = vector.shape_cast %20 : vector<1x4x32xbf16> to vector<4x32xbf16>
    %c0_31 = arith.constant 0 : index
    %c2_32 = arith.constant 2 : index
    %c0_33 = arith.constant 0 : index
    %22 = vector.load %arg5[%c0_31, %c2_32, %c0_33] : memref<2x6x32xbf16, #tpu.memory_space<vmem>>, vector<1x4x32xbf16>
    %23 = vector.shape_cast %22 : vector<1x4x32xbf16> to vector<4x32xbf16>
    %c0_34 = arith.constant 0 : index
    %c2_35 = arith.constant 2 : index
    %c0_36 = arith.constant 0 : index
    %24 = vector.load %arg6[%c0_34, %c2_35, %c0_36] : memref<2x6x32xbf16, #tpu.memory_space<vmem>>, vector<1x4x32xbf16>
    %25 = vector.shape_cast %24 : vector<1x4x32xbf16> to vector<4x32xbf16>
    %c0_37 = arith.constant 0 : index
    %c2_38 = arith.constant 2 : index
    %c0_39 = arith.constant 0 : index
    %26 = vector.load %arg8[%c0_37, %c2_38, %c0_39] : memref<2x6x32xbf16, #tpu.memory_space<vmem>>, vector<1x4x32xbf16>
    %27 = vector.shape_cast %26 : vector<1x4x32xbf16> to vector<4x32xbf16>
    %c0_40 = arith.constant 0 : index
    %c2_41 = arith.constant 2 : index
    %c0_42 = arith.constant 0 : index
    %28 = vector.load %arg7[%c0_40, %c2_41, %c0_42] : memref<2x6x32xbf16, #tpu.memory_space<vmem>>, vector<1x4x32xbf16>
    %29 = vector.shape_cast %28 : vector<1x4x32xbf16> to vector<4x32xbf16>
    %c0_43 = arith.constant 0 : index
    %c2_44 = arith.constant 2 : index
    %c0_45 = arith.constant 0 : index
    %30 = vector.load %arg9[%c0_43, %c2_44, %c0_45] : memref<2x6x32xbf16, #tpu.memory_space<vmem>>, vector<1x4x32xbf16>
    %31 = vector.shape_cast %30 : vector<1x4x32xbf16> to vector<4x32xbf16>
    %32 = tpu.concatenate %1, %3, %5, %7, %9, %11, %13, %15, %17, %19, %21, %23, %25, %27, %29, %31 in 1 : vector<4x32xbf16>, vector<4x32xbf16>, vector<4x32xbf16>, vector<4x32xbf16>, vector<4x32xbf16>, vector<4x32xbf16>, vector<4x32xbf16>, vector<4x32xbf16>, vector<4x32xbf16>, vector<4x32xbf16>, vector<4x32xbf16>, vector<4x32xbf16>, vector<4x32xbf16>, vector<4x32xbf16>, vector<4x32xbf16>, vector<4x32xbf16> -> vector<4x512xbf16>
    %c0_46 = arith.constant 0 : index
    %c0_47 = arith.constant 0 : index
    %33 = vector.load %arg14[%c0_46, %c0_47] : memref<8x512xbf16, #tpu.memory_space<vmem>>, vector<4x512xbf16>
    tpu.vector_store %arg14[%c0_46, %c0_47], %32 {strides = array<i32>} : memref<8x512xbf16, #tpu.memory_space<vmem>>, vector<4x512xbf16>,
    %c1 = arith.constant 1 : index
    %c0_48 = arith.constant 0 : index
    %c0_49 = arith.constant 0 : index
    %34 = vector.load %arg2[%c1, %c0_48, %c0_49] : memref<2x6x32xbf16, #tpu.memory_space<vmem>>, vector<1x4x32xbf16>
    %35 = vector.shape_cast %34 : vector<1x4x32xbf16> to vector<4x32xbf16>
    %c1_50 = arith.constant 1 : index
    %c0_51 = arith.constant 0 : index
    %c0_52 = arith.constant 0 : index
    %36 = vector.load %arg4[%c1_50, %c0_51, %c0_52] : memref<2x6x32xbf16, #tpu.memory_space<vmem>>, vector<1x4x32xbf16>
    %37 = vector.shape_cast %36 : vector<1x4x32xbf16> to vector<4x32xbf16>
    %c1_53 = arith.constant 1 : index
    %c0_54 = arith.constant 0 : index
    %c0_55 = arith.constant 0 : index
    %38 = vector.load %arg3[%c1_53, %c0_54, %c0_55] : memref<2x6x32xbf16, #tpu.memory_space<vmem>>, vector<1x4x32xbf16>
    %39 = vector.shape_cast %38 : vector<1x4x32xbf16> to vector<4x32xbf16>
    %c1_56 = arith.constant 1 : index
    %c0_57 = arith.constant 0 : index
    %c0_58 = arith.constant 0 : index
    %40 = vector.load %arg5[%c1_56, %c0_57, %c0_58] : memref<2x6x32xbf16, #tpu.memory_space<vmem>>, vector<1x4x32xbf16>
    %41 = vector.shape_cast %40 : vector<1x4x32xbf16> to vector<4x32xbf16>
    %c1_59 = arith.constant 1 : index
    %c0_60 = arith.constant 0 : index
    %c0_61 = arith.constant 0 : index
    %42 = vector.load %arg6[%c1_59, %c0_60, %c0_61] : memref<2x6x32xbf16, #tpu.memory_space<vmem>>, vector<1x4x32xbf16>
    %43 = vector.shape_cast %42 : vector<1x4x32xbf16> to vector<4x32xbf16>
    %c1_62 = arith.constant 1 : index
    %c0_63 = arith.constant 0 : index
    %c0_64 = arith.constant 0 : index
    %44 = vector.load %arg8[%c1_62, %c0_63, %c0_64] : memref<2x6x32xbf16, #tpu.memory_space<vmem>>, vector<1x4x32xbf16>
    %45 = vector.shape_cast %44 : vector<1x4x32xbf16> to vector<4x32xbf16>
    %c1_65 = arith.constant 1 : index
    %c0_66 = arith.constant 0 : index
    %c0_67 = arith.constant 0 : index
    %46 = vector.load %arg7[%c1_65, %c0_66, %c0_67] : memref<2x6x32xbf16, #tpu.memory_space<vmem>>, vector<1x4x32xbf16>
    %47 = vector.shape_cast %46 : vector<1x4x32xbf16> to vector<4x32xbf16>
    %c1_68 = arith.constant 1 : index
    %c0_69 = arith.constant 0 : index
    %c0_70 = arith.constant 0 : index
    %48 = vector.load %arg9[%c1_68, %c0_69, %c0_70] : memref<2x6x32xbf16, #tpu.memory_space<vmem>>, vector<1x4x32xbf16>
    %49 = vector.shape_cast %48 : vector<1x4x32xbf16> to vector<4x32xbf16>
    %c1_71 = arith.constant 1 : index
    %c2_72 = arith.constant 2 : index
    %c0_73 = arith.constant 0 : index
    %50 = vector.load %arg2[%c1_71, %c2_72, %c0_73] : memref<2x6x32xbf16, #tpu.memory_space<vmem>>, vector<1x4x32xbf16>
    %51 = vector.shape_cast %50 : vector<1x4x32xbf16> to vector<4x32xbf16>
    %c1_74 = arith.constant 1 : index
    %c2_75 = arith.constant 2 : index
    %c0_76 = arith.constant 0 : index
    %52 = vector.load %arg4[%c1_74, %c2_75, %c0_76] : memref<2x6x32xbf16, #tpu.memory_space<vmem>>, vector<1x4x32xbf16>
    %53 = vector.shape_cast %52 : vector<1x4x32xbf16> to vector<4x32xbf16>
    %c1_77 = arith.constant 1 : index
    %c2_78 = arith.constant 2 : index
    %c0_79 = arith.constant 0 : index
    %54 = vector.load %arg3[%c1_77, %c2_78, %c0_79] : memref<2x6x32xbf16, #tpu.memory_space<vmem>>, vector<1x4x32xbf16>
    %55 = vector.shape_cast %54 : vector<1x4x32xbf16> to vector<4x32xbf16>
    %c1_80 = arith.constant 1 : index
    %c2_81 = arith.constant 2 : index
    %c0_82 = arith.constant 0 : index
    %56 = vector.load %arg5[%c1_80, %c2_81, %c0_82] : memref<2x6x32xbf16, #tpu.memory_space<vmem>>, vector<1x4x32xbf16>
    %57 = vector.shape_cast %56 : vector<1x4x32xbf16> to vector<4x32xbf16>
    %c1_83 = arith.constant 1 : index
    %c2_84 = arith.constant 2 : index
    %c0_85 = arith.constant 0 : index
    %58 = vector.load %arg6[%c1_83, %c2_84, %c0_85] : memref<2x6x32xbf16, #tpu.memory_space<vmem>>, vector<1x4x32xbf16>
    %59 = vector.shape_cast %58 : vector<1x4x32xbf16> to vector<4x32xbf16>
    %c1_86 = arith.constant 1 : index
    %c2_87 = arith.constant 2 : index
    %c0_88 = arith.constant 0 : index
    %60 = vector.load %arg8[%c1_86, %c2_87, %c0_88] : memref<2x6x32xbf16, #tpu.memory_space<vmem>>, vector<1x4x32xbf16>
    %61 = vector.shape_cast %60 : vector<1x4x32xbf16> to vector<4x32xbf16>
    %c1_89 = arith.constant 1 : index
    %c2_90 = arith.constant 2 : index
    %c0_91 = arith.constant 0 : index
    %62 = vector.load %arg7[%c1_89, %c2_90, %c0_91] : memref<2x6x32xbf16, #tpu.memory_space<vmem>>, vector<1x4x32xbf16>
    %63 = vector.shape_cast %62 : vector<1x4x32xbf16> to vector<4x32xbf16>
    %c1_92 = arith.constant 1 : index
    %c2_93 = arith.constant 2 : index
    %c0_94 = arith.constant 0 : index
    %64 = vector.load %arg9[%c1_92, %c2_93, %c0_94] : memref<2x6x32xbf16, #tpu.memory_space<vmem>>, vector<1x4x32xbf16>
    %65 = vector.shape_cast %64 : vector<1x4x32xbf16> to vector<4x32xbf16>
    %66 = tpu.concatenate %35, %37, %39, %41, %43, %45, %47, %49, %51, %53, %55, %57, %59, %61, %63, %65 in 1 : vector<4x32xbf16>, vector<4x32xbf16>, vector<4x32xbf16>, vector<4x32xbf16>, vector<4x32xbf16>, vector<4x32xbf16>, vector<4x32xbf16>, vector<4x32xbf16>, vector<4x32xbf16>, vector<4x32xbf16>, vector<4x32xbf16>, vector<4x32xbf16>, vector<4x32xbf16>, vector<4x32xbf16>, vector<4x32xbf16>, vector<4x32xbf16> -> vector<4x512xbf16>
    %c4 = arith.constant 4 : index
    %c0_95 = arith.constant 0 : index
    %67 = vector.load %arg14[%c4, %c0_95] : memref<8x512xbf16, #tpu.memory_space<vmem>>, vector<4x512xbf16>
    tpu.vector_store %arg14[%c4, %c0_95], %66 {strides = array<i32>} : memref<8x512xbf16, #tpu.memory_space<vmem>>, vector<4x512xbf16>,
    %c0_96 = arith.constant 0 : index
    %c0_97 = arith.constant 0 : index
    %68 = vector.load %arg14[%c0_96, %c0_97] : memref<8x512xbf16, #tpu.memory_space<vmem>>, vector<8x512xbf16>
    %c0_98 = arith.constant 0 : index
    %c0_99 = arith.constant 0 : index
    %69 = vector.load %arg10[%c0_98, %c0_99] : memref<512x64xbf16, #tpu.memory_space<vmem>>, vector<512x64xbf16>
    %cst = arith.constant dense<0.000000e+00> : vector<8x64xf32>
    %70 = tpu.matmul %68, %69, %cst {dimension_numbers = #tpu.dot_dimension_numbers<[1], [0], [0], [1], [0, 0, 1, 1], [], []>} : vector<8x512xbf16>, vector<512x64xbf16>, vector<8x64xf32> -> vector<8x64xf32>
    %c0_100 = arith.constant 0 : index
    %c0_101 = arith.constant 0 : index
    %71 = vector.load %arg11[%c0_100, %c0_101] : memref<1x64xf32, #tpu.memory_space<vmem>>, vector<1x64xf32>
    %72 = vector.broadcast %71 : vector<1x64xf32> to vector<8x64xf32>
    %73 = arith.addf %70, %72 : vector<8x64xf32>
    %c0_102 = arith.constant 0 : index
    %c0_103 = arith.constant 0 : index
    %74 = vector.load %arg12[%c0_102, %c0_103] : memref<8x64xf32, #tpu.memory_space<vmem>>, vector<8x64xf32>
    tpu.vector_store %arg12[%c0_102, %c0_103], %73 {strides = array<i32>} : memref<8x64xf32, #tpu.memory_space<vmem>>, vector<8x64xf32>,
    %cst_104 = arith.constant dense<0.000000e+00> : vector<64xf32>
    %75 = vector.multi_reduction <add>, %73, %cst_104 [0] : vector<8x64xf32> to vector<64xf32>
    %76 = vector.shape_cast %75 : vector<64xf32> to vector<1x64xf32>
    %cst_105 = arith.constant 1.250000e-01 : f32
    %77 = vector.broadcast %cst_105 : f32 to vector<1x64xf32>
    %78 = arith.mulf %76, %77 : vector<1x64xf32>
    %79 = vector.broadcast %78 : vector<1x64xf32> to vector<8x64xf32>
    %80 = arith.subf %73, %79 : vector<8x64xf32>
    %81 = arith.mulf %80, %80 : vector<8x64xf32>
    %cst_106 = arith.constant dense<0.000000e+00> : vector<64xf32>
    %82 = vector.multi_reduction <add>, %81, %cst_106 [0] : vector<8x64xf32> to vector<64xf32>
    %83 = vector.shape_cast %82 : vector<64xf32> to vector<1x64xf32>
    %c0_i32 = arith.constant 0 : i32
    %84 = arith.cmpi eq, %arg1, %c0_i32 : i32
    %85 = arith.extui %84 : i1 to i32
    %c0_i32_107 = arith.constant 0 : i32
    %86 = arith.cmpi ne, %85, %c0_i32_107 : i32
    scf.if %86 {
      %c0_112 = arith.constant 0 : index
      %c0_113 = arith.constant 0 : index
      %93 = vector.load %arg13[%c0_112, %c0_113] : memref<2x64xf32, #tpu.memory_space<vmem>>, vector<1x64xf32>
      tpu.vector_store %arg13[%c0_112, %c0_113], %78 {strides = array<i32>} : memref<2x64xf32, #tpu.memory_space<vmem>>, vector<1x64xf32>,
      %c1_114 = arith.constant 1 : index
      %c0_115 = arith.constant 0 : index
      %94 = vector.load %arg13[%c1_114, %c0_115] : memref<2x64xf32, #tpu.memory_space<vmem>>, vector<1x64xf32>
      tpu.vector_store %arg13[%c1_114, %c0_115], %83 {strides = array<i32>} : memref<2x64xf32, #tpu.memory_space<vmem>>, vector<1x64xf32>,
    } else {
    }
    %c0_i32_108 = arith.constant 0 : i32
    %87 = arith.cmpi sgt, %arg1, %c0_i32_108 : i32
    %88 = arith.extui %87 : i1 to i32
    %c0_i32_109 = arith.constant 0 : i32
    %89 = arith.cmpi ne, %88, %c0_i32_109 : i32
    scf.if %89 {
      %c0_112 = arith.constant 0 : index
      %c0_113 = arith.constant 0 : index
      %93 = vector.load %arg13[%c0_112, %c0_113] : memref<2x64xf32, #tpu.memory_space<vmem>>, vector<1x64xf32>
      %c1_114 = arith.constant 1 : index
      %c0_115 = arith.constant 0 : index
      %94 = vector.load %arg13[%c1_114, %c0_115] : memref<2x64xf32, #tpu.memory_space<vmem>>, vector<1x64xf32>
      %95 = arith.sitofp %arg1 : i32 to f32
      %cst_116 = arith.constant 8.000000e+00 : f32
      %96 = arith.mulf %95, %cst_116 : f32
      %cst_117 = arith.constant 8.000000e+00 : f32
      %97 = arith.addf %96, %cst_117 : f32
      %98 = arith.subf %78, %93 : vector<1x64xf32>
      %cst_118 = arith.constant 8.000000e+00 : f32
      %99 = arith.divf %cst_118, %97 : f32
      %100 = vector.broadcast %99 : f32 to vector<1x64xf32>
      %101 = arith.mulf %98, %100 : vector<1x64xf32>
      %102 = arith.addf %93, %101 : vector<1x64xf32>
      %c0_119 = arith.constant 0 : index
      %c0_120 = arith.constant 0 : index
      %103 = vector.load %arg13[%c0_119, %c0_120] : memref<2x64xf32, #tpu.memory_space<vmem>>, vector<1x64xf32>
      tpu.vector_store %arg13[%c0_119, %c0_120], %102 {strides = array<i32>} : memref<2x64xf32, #tpu.memory_space<vmem>>, vector<1x64xf32>,
      %104 = arith.addf %94, %83 : vector<1x64xf32>
      %105 = arith.mulf %98, %98 : vector<1x64xf32>
      %cst_121 = arith.constant 8.000000e+00 : f32
      %106 = arith.mulf %96, %cst_121 : f32
      %107 = arith.divf %106, %97 : f32
      %108 = vector.broadcast %107 : f32 to vector<1x64xf32>
      %109 = arith.mulf %105, %108 : vector<1x64xf32>
      %110 = arith.addf %104, %109 : vector<1x64xf32>
      %c1_122 = arith.constant 1 : index
      %c0_123 = arith.constant 0 : index
      %111 = vector.load %arg13[%c1_122, %c0_123] : memref<2x64xf32, #tpu.memory_space<vmem>>, vector<1x64xf32>
      tpu.vector_store %arg13[%c1_122, %c0_123], %110 {strides = array<i32>} : memref<2x64xf32, #tpu.memory_space<vmem>>, vector<1x64xf32>,
    } else {
    }
    %c0_i32_110 = arith.constant 0 : i32
    %90 = arith.cmpi eq, %arg1, %c0_i32_110 : i32
    %91 = arith.extui %90 : i1 to i32
    %c0_i32_111 = arith.constant 0 : i32
    %92 = arith.cmpi ne, %91, %c0_i32_111 : i32
    scf.if %92 {
      %c1_112 = arith.constant 1 : index
      %c0_113 = arith.constant 0 : index
      %93 = vector.load %arg13[%c1_112, %c0_113] : memref<2x64xf32, #tpu.memory_space<vmem>>, vector<1x64xf32>
      %cst_114 = arith.constant 1.250000e-01 : f32
      %94 = vector.broadcast %cst_114 : f32 to vector<1x64xf32>
      %95 = arith.mulf %93, %94 : vector<1x64xf32>
      %c1_115 = arith.constant 1 : index
      %c0_116 = arith.constant 0 : index
      %96 = vector.load %arg13[%c1_115, %c0_116] : memref<2x64xf32, #tpu.memory_space<vmem>>, vector<1x64xf32>
      tpu.vector_store %arg13[%c1_115, %c0_116], %95 {strides = array<i32>} : memref<2x64xf32, #tpu.memory_space<vmem>>, vector<1x64xf32>,
    } else {
    }
    return
  }
  func.func @transform_0(%arg0: i32, %arg1: i32) -> (i32, i32, i32) {
    %c0_i32 = arith.constant 0 : i32
    %c0_i32_0 = arith.constant 0 : i32
    %c0_i32_1 = arith.constant 0 : i32
    return %arg1, %c0_i32, %c0_i32_0 : i32, i32, i32
  }
  func.func @transform_1(%arg0: i32, %arg1: i32) -> (i32, i32, i32) {
    %c0_i32 = arith.constant 0 : i32
    %c0_i32_0 = arith.constant 0 : i32
    %c0_i32_1 = arith.constant 0 : i32
    return %arg1, %c0_i32, %c0_i32_0 : i32, i32, i32
  }
  func.func @transform_2(%arg0: i32, %arg1: i32) -> (i32, i32, i32) {
    %c0_i32 = arith.constant 0 : i32
    %c0_i32_0 = arith.constant 0 : i32
    %c0_i32_1 = arith.constant 0 : i32
    return %arg1, %c0_i32, %c0_i32_0 : i32, i32, i32
  }
  func.func @transform_3(%arg0: i32, %arg1: i32) -> (i32, i32, i32) {
    %c0_i32 = arith.constant 0 : i32
    %c0_i32_0 = arith.constant 0 : i32
    %c0_i32_1 = arith.constant 0 : i32
    return %arg1, %c0_i32, %c0_i32_0 : i32, i32, i32
  }
  func.func @transform_4(%arg0: i32, %arg1: i32) -> (i32, i32, i32) {
    %c0_i32 = arith.constant 0 : i32
    %c0_i32_0 = arith.constant 0 : i32
    %c0_i32_1 = arith.constant 0 : i32
    return %arg1, %c0_i32, %c0_i32_0 : i32, i32, i32
  }
  func.func @transform_5(%arg0: i32, %arg1: i32) -> (i32, i32, i32) {
    %c0_i32 = arith.constant 0 : i32
    %c0_i32_0 = arith.constant 0 : i32
    %c0_i32_1 = arith.constant 0 : i32
    return %arg1, %c0_i32, %c0_i32_0 : i32, i32, i32
  }
  func.func @transform_6(%arg0: i32, %arg1: i32) -> (i32, i32, i32) {
    %c0_i32 = arith.constant 0 : i32
    %c0_i32_0 = arith.constant 0 : i32
    %c0_i32_1 = arith.constant 0 : i32
    return %arg1, %c0_i32, %c0_i32_0 : i32, i32, i32
  }
  func.func @transform_7(%arg0: i32, %arg1: i32) -> (i32, i32, i32) {
    %c0_i32 = arith.constant 0 : i32
    %c0_i32_0 = arith.constant 0 : i32
    %c0_i32_1 = arith.constant 0 : i32
    return %arg1, %c0_i32, %c0_i32_0 : i32, i32, i32
  }
  func.func @transform_8(%arg0: i32, %arg1: i32) -> (i32, i32) {
    %c0_i32 = arith.constant 0 : i32
    %c0_i32_0 = arith.constant 0 : i32
    return %c0_i32, %arg0 : i32, i32
  }
  func.func @transform_9(%arg0: i32, %arg1: i32) -> (i32, i32) {
    %c0_i32 = arith.constant 0 : i32
    %c0_i32_0 = arith.constant 0 : i32
    return %c0_i32, %arg0 : i32, i32
  }
  func.func @transform_10(%arg0: i32, %arg1: i32) -> (i32, i32) {
    %c0_i32 = arith.constant 0 : i32
    return %arg1, %arg0 : i32, i32
  }
  func.func @transform_11(%arg0: i32, %arg1: i32) -> (i32, i32) {
    %c0_i32 = arith.constant 0 : i32
    %c0_i32_0 = arith.constant 0 : i32
    return %c0_i32, %arg0 : i32, i32
  }
}

module attributes {stable_mosaic.version = 11 : i64} {
  func.func @bn_relu_kernel(%arg0: i32, %arg1: memref<8x64xf32, #tpu.memory_space<vmem>>, %arg2: memref<1x64xf32, #tpu.memory_space<vmem>>, %arg3: memref<1x64xf32, #tpu.memory_space<vmem>>, %arg4: memref<8x64xbf16, #tpu.memory_space<vmem>>) attributes {dimension_semantics = [#tpu.dimension_semantics<parallel>], iteration_bounds = array<i64: 1>, scalar_prefetch = 0 : i64, scratch_operands = 0 : i64, tpu.core_type = #tpu.core_type<tc>, window_params = [{transform_indices = @transform_0, window_bounds = array<i64: 8, 64>}, {pipeline_mode = #tpu.pipeline_mode<synchronous>, transform_indices = @transform_1, window_bounds = array<i64: 1, 64>}, {pipeline_mode = #tpu.pipeline_mode<synchronous>, transform_indices = @transform_2, window_bounds = array<i64: 1, 64>}, {transform_indices = @transform_3, window_bounds = array<i64: 8, 64>}]} {
    %c0 = arith.constant 0 : index
    %c0_0 = arith.constant 0 : index
    %0 = vector.load %arg1[%c0, %c0_0] : memref<8x64xf32, #tpu.memory_space<vmem>>, vector<8x64xf32>
    %c0_1 = arith.constant 0 : index
    %c0_2 = arith.constant 0 : index
    %1 = vector.load %arg2[%c0_1, %c0_2] : memref<1x64xf32, #tpu.memory_space<vmem>>, vector<1x64xf32>
    %2 = vector.broadcast %1 : vector<1x64xf32> to vector<8x64xf32>
    %3 = arith.mulf %0, %2 : vector<8x64xf32>
    %c0_3 = arith.constant 0 : index
    %c0_4 = arith.constant 0 : index
    %4 = vector.load %arg3[%c0_3, %c0_4] : memref<1x64xf32, #tpu.memory_space<vmem>>, vector<1x64xf32>
    %5 = vector.broadcast %4 : vector<1x64xf32> to vector<8x64xf32>
    %6 = arith.addf %3, %5 : vector<8x64xf32>
    %cst = arith.constant 0.000000e+00 : f32
    %7 = vector.broadcast %cst : f32 to vector<8x64xf32>
    %8 = arith.maximumf %6, %7 : vector<8x64xf32>
    %9 = arith.truncf %8 : vector<8x64xf32> to vector<8x64xbf16>
    %c0_5 = arith.constant 0 : index
    %c0_6 = arith.constant 0 : index
    %10 = vector.load %arg4[%c0_5, %c0_6] : memref<8x64xbf16, #tpu.memory_space<vmem>>, vector<8x64xbf16>
    tpu.vector_store %arg4[%c0_5, %c0_6], %9 {strides = array<i32>} : memref<8x64xbf16, #tpu.memory_space<vmem>>, vector<8x64xbf16>,
    return
  }
  func.func @transform_0(%arg0: i32) -> (i32, i32) {
    %c0_i32 = arith.constant 0 : i32
    %c0_i32_0 = arith.constant 0 : i32
    return %arg0, %c0_i32 : i32, i32
  }
  func.func @transform_1(%arg0: i32) -> (i32, i32) {
    %c0_i32 = arith.constant 0 : i32
    %c0_i32_0 = arith.constant 0 : i32
    %c0_i32_1 = arith.constant 0 : i32
    return %c0_i32, %c0_i32_0 : i32, i32
  }
  func.func @transform_2(%arg0: i32) -> (i32, i32) {
    %c0_i32 = arith.constant 0 : i32
    %c0_i32_0 = arith.constant 0 : i32
    %c0_i32_1 = arith.constant 0 : i32
    return %c0_i32, %c0_i32_0 : i32, i32
  }
  func.func @transform_3(%arg0: i32) -> (i32, i32) {
    %c0_i32 = arith.constant 0 : i32
    %c0_i32_0 = arith.constant 0 : i32
    return %arg0, %c0_i32 : i32, i32
  }
}

module attributes {stable_mosaic.version = 11 : i64} {
  func.func @kernel(%arg0: i32, %arg1: i32, %arg2: memref<2x2x64xbf16, #tpu.memory_space<vmem>>, %arg3: memref<2x2x64xbf16, #tpu.memory_space<vmem>>, %arg4: memref<2x2x64xbf16, #tpu.memory_space<vmem>>, %arg5: memref<2x2x64xbf16, #tpu.memory_space<vmem>>, %arg6: memref<2x2x64xbf16, #tpu.memory_space<vmem>>, %arg7: memref<2x2x64xbf16, #tpu.memory_space<vmem>>, %arg8: memref<2x2x64xbf16, #tpu.memory_space<vmem>>, %arg9: memref<2x2x64xbf16, #tpu.memory_space<vmem>>, %arg10: memref<1024x128xbf16, #tpu.memory_space<vmem>>, %arg11: memref<1x128xf32, #tpu.memory_space<vmem>>, %arg12: memref<2x128xf32, #tpu.memory_space<vmem>>, %arg13: memref<2x128xf32, #tpu.memory_space<vmem>>, %arg14: memref<2x1024xbf16, #tpu.memory_space<vmem>>) attributes {dimension_semantics = [#tpu.dimension_semantics<parallel>, #tpu.dimension_semantics<arbitrary>], iteration_bounds = array<i64: 1, 1>, scalar_prefetch = 0 : i64, scratch_operands = 1 : i64, tpu.core_type = #tpu.core_type<tc>, window_params = [{transform_indices = @transform_0, window_bounds = array<i64: 2, 2, 64>}, {transform_indices = @transform_1, window_bounds = array<i64: 2, 2, 64>}, {transform_indices = @transform_2, window_bounds = array<i64: 2, 2, 64>}, {transform_indices = @transform_3, window_bounds = array<i64: 2, 2, 64>}, {transform_indices = @transform_4, window_bounds = array<i64: 2, 2, 64>}, {transform_indices = @transform_5, window_bounds = array<i64: 2, 2, 64>}, {transform_indices = @transform_6, window_bounds = array<i64: 2, 2, 64>}, {transform_indices = @transform_7, window_bounds = array<i64: 2, 2, 64>}, {transform_indices = @transform_8, window_bounds = array<i64: 1024, 128>}, {transform_indices = @transform_9, window_bounds = array<i64: 1, 128>}, {transform_indices = @transform_10, window_bounds = array<i64: 2, 128>}, {transform_indices = @transform_11, window_bounds = array<i64: 2, 128>}]} {
    %c0 = arith.constant 0 : index
    %c0_0 = arith.constant 0 : index
    %c0_1 = arith.constant 0 : index
    %0 = vector.load %arg2[%c0, %c0_0, %c0_1] : memref<2x2x64xbf16, #tpu.memory_space<vmem>>, vector<1x1x64xbf16>
    %1 = vector.shape_cast %0 : vector<1x1x64xbf16> to vector<1x64xbf16>
    %c0_2 = arith.constant 0 : index
    %c0_3 = arith.constant 0 : index
    %c0_4 = arith.constant 0 : index
    %2 = vector.load %arg4[%c0_2, %c0_3, %c0_4] : memref<2x2x64xbf16, #tpu.memory_space<vmem>>, vector<1x1x64xbf16>
    %3 = vector.shape_cast %2 : vector<1x1x64xbf16> to vector<1x64xbf16>
    %c0_5 = arith.constant 0 : index
    %c0_6 = arith.constant 0 : index
    %c0_7 = arith.constant 0 : index
    %4 = vector.load %arg3[%c0_5, %c0_6, %c0_7] : memref<2x2x64xbf16, #tpu.memory_space<vmem>>, vector<1x1x64xbf16>
    %5 = vector.shape_cast %4 : vector<1x1x64xbf16> to vector<1x64xbf16>
    %c0_8 = arith.constant 0 : index
    %c0_9 = arith.constant 0 : index
    %c0_10 = arith.constant 0 : index
    %6 = vector.load %arg5[%c0_8, %c0_9, %c0_10] : memref<2x2x64xbf16, #tpu.memory_space<vmem>>, vector<1x1x64xbf16>
    %7 = vector.shape_cast %6 : vector<1x1x64xbf16> to vector<1x64xbf16>
    %c0_11 = arith.constant 0 : index
    %c0_12 = arith.constant 0 : index
    %c0_13 = arith.constant 0 : index
    %8 = vector.load %arg6[%c0_11, %c0_12, %c0_13] : memref<2x2x64xbf16, #tpu.memory_space<vmem>>, vector<1x1x64xbf16>
    %9 = vector.shape_cast %8 : vector<1x1x64xbf16> to vector<1x64xbf16>
    %c0_14 = arith.constant 0 : index
    %c0_15 = arith.constant 0 : index
    %c0_16 = arith.constant 0 : index
    %10 = vector.load %arg8[%c0_14, %c0_15, %c0_16] : memref<2x2x64xbf16, #tpu.memory_space<vmem>>, vector<1x1x64xbf16>
    %11 = vector.shape_cast %10 : vector<1x1x64xbf16> to vector<1x64xbf16>
    %c0_17 = arith.constant 0 : index
    %c0_18 = arith.constant 0 : index
    %c0_19 = arith.constant 0 : index
    %12 = vector.load %arg7[%c0_17, %c0_18, %c0_19] : memref<2x2x64xbf16, #tpu.memory_space<vmem>>, vector<1x1x64xbf16>
    %13 = vector.shape_cast %12 : vector<1x1x64xbf16> to vector<1x64xbf16>
    %c0_20 = arith.constant 0 : index
    %c0_21 = arith.constant 0 : index
    %c0_22 = arith.constant 0 : index
    %14 = vector.load %arg9[%c0_20, %c0_21, %c0_22] : memref<2x2x64xbf16, #tpu.memory_space<vmem>>, vector<1x1x64xbf16>
    %15 = vector.shape_cast %14 : vector<1x1x64xbf16> to vector<1x64xbf16>
    %c0_23 = arith.constant 0 : index
    %c1 = arith.constant 1 : index
    %c0_24 = arith.constant 0 : index
    %16 = vector.load %arg2[%c0_23, %c1, %c0_24] : memref<2x2x64xbf16, #tpu.memory_space<vmem>>, vector<1x1x64xbf16>
    %17 = vector.shape_cast %16 : vector<1x1x64xbf16> to vector<1x64xbf16>
    %c0_25 = arith.constant 0 : index
    %c1_26 = arith.constant 1 : index
    %c0_27 = arith.constant 0 : index
    %18 = vector.load %arg4[%c0_25, %c1_26, %c0_27] : memref<2x2x64xbf16, #tpu.memory_space<vmem>>, vector<1x1x64xbf16>
    %19 = vector.shape_cast %18 : vector<1x1x64xbf16> to vector<1x64xbf16>
    %c0_28 = arith.constant 0 : index
    %c1_29 = arith.constant 1 : index
    %c0_30 = arith.constant 0 : index
    %20 = vector.load %arg3[%c0_28, %c1_29, %c0_30] : memref<2x2x64xbf16, #tpu.memory_space<vmem>>, vector<1x1x64xbf16>
    %21 = vector.shape_cast %20 : vector<1x1x64xbf16> to vector<1x64xbf16>
    %c0_31 = arith.constant 0 : index
    %c1_32 = arith.constant 1 : index
    %c0_33 = arith.constant 0 : index
    %22 = vector.load %arg5[%c0_31, %c1_32, %c0_33] : memref<2x2x64xbf16, #tpu.memory_space<vmem>>, vector<1x1x64xbf16>
    %23 = vector.shape_cast %22 : vector<1x1x64xbf16> to vector<1x64xbf16>
    %c0_34 = arith.constant 0 : index
    %c1_35 = arith.constant 1 : index
    %c0_36 = arith.constant 0 : index
    %24 = vector.load %arg6[%c0_34, %c1_35, %c0_36] : memref<2x2x64xbf16, #tpu.memory_space<vmem>>, vector<1x1x64xbf16>
    %25 = vector.shape_cast %24 : vector<1x1x64xbf16> to vector<1x64xbf16>
    %c0_37 = arith.constant 0 : index
    %c1_38 = arith.constant 1 : index
    %c0_39 = arith.constant 0 : index
    %26 = vector.load %arg8[%c0_37, %c1_38, %c0_39] : memref<2x2x64xbf16, #tpu.memory_space<vmem>>, vector<1x1x64xbf16>
    %27 = vector.shape_cast %26 : vector<1x1x64xbf16> to vector<1x64xbf16>
    %c0_40 = arith.constant 0 : index
    %c1_41 = arith.constant 1 : index
    %c0_42 = arith.constant 0 : index
    %28 = vector.load %arg7[%c0_40, %c1_41, %c0_42] : memref<2x2x64xbf16, #tpu.memory_space<vmem>>, vector<1x1x64xbf16>
    %29 = vector.shape_cast %28 : vector<1x1x64xbf16> to vector<1x64xbf16>
    %c0_43 = arith.constant 0 : index
    %c1_44 = arith.constant 1 : index
    %c0_45 = arith.constant 0 : index
    %30 = vector.load %arg9[%c0_43, %c1_44, %c0_45] : memref<2x2x64xbf16, #tpu.memory_space<vmem>>, vector<1x1x64xbf16>
    %31 = vector.shape_cast %30 : vector<1x1x64xbf16> to vector<1x64xbf16>
    %32 = tpu.concatenate %1, %3, %5, %7, %9, %11, %13, %15, %17, %19, %21, %23, %25, %27, %29, %31 in 1 : vector<1x64xbf16>, vector<1x64xbf16>, vector<1x64xbf16>, vector<1x64xbf16>, vector<1x64xbf16>, vector<1x64xbf16>, vector<1x64xbf16>, vector<1x64xbf16>, vector<1x64xbf16>, vector<1x64xbf16>, vector<1x64xbf16>, vector<1x64xbf16>, vector<1x64xbf16>, vector<1x64xbf16>, vector<1x64xbf16>, vector<1x64xbf16> -> vector<1x1024xbf16>
    %c0_46 = arith.constant 0 : index
    %c0_47 = arith.constant 0 : index
    %33 = vector.load %arg14[%c0_46, %c0_47] : memref<2x1024xbf16, #tpu.memory_space<vmem>>, vector<1x1024xbf16>
    tpu.vector_store %arg14[%c0_46, %c0_47], %32 {strides = array<i32>} : memref<2x1024xbf16, #tpu.memory_space<vmem>>, vector<1x1024xbf16>,
    %c1_48 = arith.constant 1 : index
    %c0_49 = arith.constant 0 : index
    %c0_50 = arith.constant 0 : index
    %34 = vector.load %arg2[%c1_48, %c0_49, %c0_50] : memref<2x2x64xbf16, #tpu.memory_space<vmem>>, vector<1x1x64xbf16>
    %35 = vector.shape_cast %34 : vector<1x1x64xbf16> to vector<1x64xbf16>
    %c1_51 = arith.constant 1 : index
    %c0_52 = arith.constant 0 : index
    %c0_53 = arith.constant 0 : index
    %36 = vector.load %arg4[%c1_51, %c0_52, %c0_53] : memref<2x2x64xbf16, #tpu.memory_space<vmem>>, vector<1x1x64xbf16>
    %37 = vector.shape_cast %36 : vector<1x1x64xbf16> to vector<1x64xbf16>
    %c1_54 = arith.constant 1 : index
    %c0_55 = arith.constant 0 : index
    %c0_56 = arith.constant 0 : index
    %38 = vector.load %arg3[%c1_54, %c0_55, %c0_56] : memref<2x2x64xbf16, #tpu.memory_space<vmem>>, vector<1x1x64xbf16>
    %39 = vector.shape_cast %38 : vector<1x1x64xbf16> to vector<1x64xbf16>
    %c1_57 = arith.constant 1 : index
    %c0_58 = arith.constant 0 : index
    %c0_59 = arith.constant 0 : index
    %40 = vector.load %arg5[%c1_57, %c0_58, %c0_59] : memref<2x2x64xbf16, #tpu.memory_space<vmem>>, vector<1x1x64xbf16>
    %41 = vector.shape_cast %40 : vector<1x1x64xbf16> to vector<1x64xbf16>
    %c1_60 = arith.constant 1 : index
    %c0_61 = arith.constant 0 : index
    %c0_62 = arith.constant 0 : index
    %42 = vector.load %arg6[%c1_60, %c0_61, %c0_62] : memref<2x2x64xbf16, #tpu.memory_space<vmem>>, vector<1x1x64xbf16>
    %43 = vector.shape_cast %42 : vector<1x1x64xbf16> to vector<1x64xbf16>
    %c1_63 = arith.constant 1 : index
    %c0_64 = arith.constant 0 : index
    %c0_65 = arith.constant 0 : index
    %44 = vector.load %arg8[%c1_63, %c0_64, %c0_65] : memref<2x2x64xbf16, #tpu.memory_space<vmem>>, vector<1x1x64xbf16>
    %45 = vector.shape_cast %44 : vector<1x1x64xbf16> to vector<1x64xbf16>
    %c1_66 = arith.constant 1 : index
    %c0_67 = arith.constant 0 : index
    %c0_68 = arith.constant 0 : index
    %46 = vector.load %arg7[%c1_66, %c0_67, %c0_68] : memref<2x2x64xbf16, #tpu.memory_space<vmem>>, vector<1x1x64xbf16>
    %47 = vector.shape_cast %46 : vector<1x1x64xbf16> to vector<1x64xbf16>
    %c1_69 = arith.constant 1 : index
    %c0_70 = arith.constant 0 : index
    %c0_71 = arith.constant 0 : index
    %48 = vector.load %arg9[%c1_69, %c0_70, %c0_71] : memref<2x2x64xbf16, #tpu.memory_space<vmem>>, vector<1x1x64xbf16>
    %49 = vector.shape_cast %48 : vector<1x1x64xbf16> to vector<1x64xbf16>
    %c1_72 = arith.constant 1 : index
    %c1_73 = arith.constant 1 : index
    %c0_74 = arith.constant 0 : index
    %50 = vector.load %arg2[%c1_72, %c1_73, %c0_74] : memref<2x2x64xbf16, #tpu.memory_space<vmem>>, vector<1x1x64xbf16>
    %51 = vector.shape_cast %50 : vector<1x1x64xbf16> to vector<1x64xbf16>
    %c1_75 = arith.constant 1 : index
    %c1_76 = arith.constant 1 : index
    %c0_77 = arith.constant 0 : index
    %52 = vector.load %arg4[%c1_75, %c1_76, %c0_77] : memref<2x2x64xbf16, #tpu.memory_space<vmem>>, vector<1x1x64xbf16>
    %53 = vector.shape_cast %52 : vector<1x1x64xbf16> to vector<1x64xbf16>
    %c1_78 = arith.constant 1 : index
    %c1_79 = arith.constant 1 : index
    %c0_80 = arith.constant 0 : index
    %54 = vector.load %arg3[%c1_78, %c1_79, %c0_80] : memref<2x2x64xbf16, #tpu.memory_space<vmem>>, vector<1x1x64xbf16>
    %55 = vector.shape_cast %54 : vector<1x1x64xbf16> to vector<1x64xbf16>
    %c1_81 = arith.constant 1 : index
    %c1_82 = arith.constant 1 : index
    %c0_83 = arith.constant 0 : index
    %56 = vector.load %arg5[%c1_81, %c1_82, %c0_83] : memref<2x2x64xbf16, #tpu.memory_space<vmem>>, vector<1x1x64xbf16>
    %57 = vector.shape_cast %56 : vector<1x1x64xbf16> to vector<1x64xbf16>
    %c1_84 = arith.constant 1 : index
    %c1_85 = arith.constant 1 : index
    %c0_86 = arith.constant 0 : index
    %58 = vector.load %arg6[%c1_84, %c1_85, %c0_86] : memref<2x2x64xbf16, #tpu.memory_space<vmem>>, vector<1x1x64xbf16>
    %59 = vector.shape_cast %58 : vector<1x1x64xbf16> to vector<1x64xbf16>
    %c1_87 = arith.constant 1 : index
    %c1_88 = arith.constant 1 : index
    %c0_89 = arith.constant 0 : index
    %60 = vector.load %arg8[%c1_87, %c1_88, %c0_89] : memref<2x2x64xbf16, #tpu.memory_space<vmem>>, vector<1x1x64xbf16>
    %61 = vector.shape_cast %60 : vector<1x1x64xbf16> to vector<1x64xbf16>
    %c1_90 = arith.constant 1 : index
    %c1_91 = arith.constant 1 : index
    %c0_92 = arith.constant 0 : index
    %62 = vector.load %arg7[%c1_90, %c1_91, %c0_92] : memref<2x2x64xbf16, #tpu.memory_space<vmem>>, vector<1x1x64xbf16>
    %63 = vector.shape_cast %62 : vector<1x1x64xbf16> to vector<1x64xbf16>
    %c1_93 = arith.constant 1 : index
    %c1_94 = arith.constant 1 : index
    %c0_95 = arith.constant 0 : index
    %64 = vector.load %arg9[%c1_93, %c1_94, %c0_95] : memref<2x2x64xbf16, #tpu.memory_space<vmem>>, vector<1x1x64xbf16>
    %65 = vector.shape_cast %64 : vector<1x1x64xbf16> to vector<1x64xbf16>
    %66 = tpu.concatenate %35, %37, %39, %41, %43, %45, %47, %49, %51, %53, %55, %57, %59, %61, %63, %65 in 1 : vector<1x64xbf16>, vector<1x64xbf16>, vector<1x64xbf16>, vector<1x64xbf16>, vector<1x64xbf16>, vector<1x64xbf16>, vector<1x64xbf16>, vector<1x64xbf16>, vector<1x64xbf16>, vector<1x64xbf16>, vector<1x64xbf16>, vector<1x64xbf16>, vector<1x64xbf16>, vector<1x64xbf16>, vector<1x64xbf16>, vector<1x64xbf16> -> vector<1x1024xbf16>
    %c1_96 = arith.constant 1 : index
    %c0_97 = arith.constant 0 : index
    %67 = vector.load %arg14[%c1_96, %c0_97] : memref<2x1024xbf16, #tpu.memory_space<vmem>>, vector<1x1024xbf16>
    tpu.vector_store %arg14[%c1_96, %c0_97], %66 {strides = array<i32>} : memref<2x1024xbf16, #tpu.memory_space<vmem>>, vector<1x1024xbf16>,
    %c0_98 = arith.constant 0 : index
    %c0_99 = arith.constant 0 : index
    %68 = vector.load %arg14[%c0_98, %c0_99] : memref<2x1024xbf16, #tpu.memory_space<vmem>>, vector<2x1024xbf16>
    %c0_100 = arith.constant 0 : index
    %c0_101 = arith.constant 0 : index
    %69 = vector.load %arg10[%c0_100, %c0_101] : memref<1024x128xbf16, #tpu.memory_space<vmem>>, vector<1024x128xbf16>
    %cst = arith.constant dense<0.000000e+00> : vector<2x128xf32>
    %70 = tpu.matmul %68, %69, %cst {dimension_numbers = #tpu.dot_dimension_numbers<[1], [0], [0], [1], [0, 0, 1, 1], [], []>} : vector<2x1024xbf16>, vector<1024x128xbf16>, vector<2x128xf32> -> vector<2x128xf32>
    %c0_102 = arith.constant 0 : index
    %c0_103 = arith.constant 0 : index
    %71 = vector.load %arg11[%c0_102, %c0_103] : memref<1x128xf32, #tpu.memory_space<vmem>>, vector<1x128xf32>
    %72 = vector.broadcast %71 : vector<1x128xf32> to vector<2x128xf32>
    %73 = arith.addf %70, %72 : vector<2x128xf32>
    %c0_104 = arith.constant 0 : index
    %c0_105 = arith.constant 0 : index
    %74 = vector.load %arg12[%c0_104, %c0_105] : memref<2x128xf32, #tpu.memory_space<vmem>>, vector<2x128xf32>
    tpu.vector_store %arg12[%c0_104, %c0_105], %73 {strides = array<i32>} : memref<2x128xf32, #tpu.memory_space<vmem>>, vector<2x128xf32>,
    %cst_106 = arith.constant dense<0.000000e+00> : vector<128xf32>
    %75 = vector.multi_reduction <add>, %73, %cst_106 [0] : vector<2x128xf32> to vector<128xf32>
    %76 = vector.shape_cast %75 : vector<128xf32> to vector<1x128xf32>
    %cst_107 = arith.constant 5.000000e-01 : f32
    %77 = vector.broadcast %cst_107 : f32 to vector<1x128xf32>
    %78 = arith.mulf %76, %77 : vector<1x128xf32>
    %79 = vector.broadcast %78 : vector<1x128xf32> to vector<2x128xf32>
    %80 = arith.subf %73, %79 : vector<2x128xf32>
    %81 = arith.mulf %80, %80 : vector<2x128xf32>
    %cst_108 = arith.constant dense<0.000000e+00> : vector<128xf32>
    %82 = vector.multi_reduction <add>, %81, %cst_108 [0] : vector<2x128xf32> to vector<128xf32>
    %83 = vector.shape_cast %82 : vector<128xf32> to vector<1x128xf32>
    %c0_i32 = arith.constant 0 : i32
    %84 = arith.cmpi eq, %arg1, %c0_i32 : i32
    %85 = arith.extui %84 : i1 to i32
    %c0_i32_109 = arith.constant 0 : i32
    %86 = arith.cmpi ne, %85, %c0_i32_109 : i32
    scf.if %86 {
      %c0_114 = arith.constant 0 : index
      %c0_115 = arith.constant 0 : index
      %93 = vector.load %arg13[%c0_114, %c0_115] : memref<2x128xf32, #tpu.memory_space<vmem>>, vector<1x128xf32>
      tpu.vector_store %arg13[%c0_114, %c0_115], %78 {strides = array<i32>} : memref<2x128xf32, #tpu.memory_space<vmem>>, vector<1x128xf32>,
      %c1_116 = arith.constant 1 : index
      %c0_117 = arith.constant 0 : index
      %94 = vector.load %arg13[%c1_116, %c0_117] : memref<2x128xf32, #tpu.memory_space<vmem>>, vector<1x128xf32>
      tpu.vector_store %arg13[%c1_116, %c0_117], %83 {strides = array<i32>} : memref<2x128xf32, #tpu.memory_space<vmem>>, vector<1x128xf32>,
    } else {
    }
    %c0_i32_110 = arith.constant 0 : i32
    %87 = arith.cmpi sgt, %arg1, %c0_i32_110 : i32
    %88 = arith.extui %87 : i1 to i32
    %c0_i32_111 = arith.constant 0 : i32
    %89 = arith.cmpi ne, %88, %c0_i32_111 : i32
    scf.if %89 {
      %c0_114 = arith.constant 0 : index
      %c0_115 = arith.constant 0 : index
      %93 = vector.load %arg13[%c0_114, %c0_115] : memref<2x128xf32, #tpu.memory_space<vmem>>, vector<1x128xf32>
      %c1_116 = arith.constant 1 : index
      %c0_117 = arith.constant 0 : index
      %94 = vector.load %arg13[%c1_116, %c0_117] : memref<2x128xf32, #tpu.memory_space<vmem>>, vector<1x128xf32>
      %95 = arith.sitofp %arg1 : i32 to f32
      %cst_118 = arith.constant 2.000000e+00 : f32
      %96 = arith.mulf %95, %cst_118 : f32
      %cst_119 = arith.constant 2.000000e+00 : f32
      %97 = arith.addf %96, %cst_119 : f32
      %98 = arith.subf %78, %93 : vector<1x128xf32>
      %cst_120 = arith.constant 2.000000e+00 : f32
      %99 = arith.divf %cst_120, %97 : f32
      %100 = vector.broadcast %99 : f32 to vector<1x128xf32>
      %101 = arith.mulf %98, %100 : vector<1x128xf32>
      %102 = arith.addf %93, %101 : vector<1x128xf32>
      %c0_121 = arith.constant 0 : index
      %c0_122 = arith.constant 0 : index
      %103 = vector.load %arg13[%c0_121, %c0_122] : memref<2x128xf32, #tpu.memory_space<vmem>>, vector<1x128xf32>
      tpu.vector_store %arg13[%c0_121, %c0_122], %102 {strides = array<i32>} : memref<2x128xf32, #tpu.memory_space<vmem>>, vector<1x128xf32>,
      %104 = arith.addf %94, %83 : vector<1x128xf32>
      %105 = arith.mulf %98, %98 : vector<1x128xf32>
      %cst_123 = arith.constant 2.000000e+00 : f32
      %106 = arith.mulf %96, %cst_123 : f32
      %107 = arith.divf %106, %97 : f32
      %108 = vector.broadcast %107 : f32 to vector<1x128xf32>
      %109 = arith.mulf %105, %108 : vector<1x128xf32>
      %110 = arith.addf %104, %109 : vector<1x128xf32>
      %c1_124 = arith.constant 1 : index
      %c0_125 = arith.constant 0 : index
      %111 = vector.load %arg13[%c1_124, %c0_125] : memref<2x128xf32, #tpu.memory_space<vmem>>, vector<1x128xf32>
      tpu.vector_store %arg13[%c1_124, %c0_125], %110 {strides = array<i32>} : memref<2x128xf32, #tpu.memory_space<vmem>>, vector<1x128xf32>,
    } else {
    }
    %c0_i32_112 = arith.constant 0 : i32
    %90 = arith.cmpi eq, %arg1, %c0_i32_112 : i32
    %91 = arith.extui %90 : i1 to i32
    %c0_i32_113 = arith.constant 0 : i32
    %92 = arith.cmpi ne, %91, %c0_i32_113 : i32
    scf.if %92 {
      %c1_114 = arith.constant 1 : index
      %c0_115 = arith.constant 0 : index
      %93 = vector.load %arg13[%c1_114, %c0_115] : memref<2x128xf32, #tpu.memory_space<vmem>>, vector<1x128xf32>
      %cst_116 = arith.constant 5.000000e-01 : f32
      %94 = vector.broadcast %cst_116 : f32 to vector<1x128xf32>
      %95 = arith.mulf %93, %94 : vector<1x128xf32>
      %c1_117 = arith.constant 1 : index
      %c0_118 = arith.constant 0 : index
      %96 = vector.load %arg13[%c1_117, %c0_118] : memref<2x128xf32, #tpu.memory_space<vmem>>, vector<1x128xf32>
      tpu.vector_store %arg13[%c1_117, %c0_118], %95 {strides = array<i32>} : memref<2x128xf32, #tpu.memory_space<vmem>>, vector<1x128xf32>,
    } else {
    }
    return
  }
  func.func @transform_0(%arg0: i32, %arg1: i32) -> (i32, i32, i32) {
    %c0_i32 = arith.constant 0 : i32
    %c0_i32_0 = arith.constant 0 : i32
    %c0_i32_1 = arith.constant 0 : i32
    return %arg1, %c0_i32, %c0_i32_0 : i32, i32, i32
  }
  func.func @transform_1(%arg0: i32, %arg1: i32) -> (i32, i32, i32) {
    %c0_i32 = arith.constant 0 : i32
    %c0_i32_0 = arith.constant 0 : i32
    %c0_i32_1 = arith.constant 0 : i32
    return %arg1, %c0_i32, %c0_i32_0 : i32, i32, i32
  }
  func.func @transform_2(%arg0: i32, %arg1: i32) -> (i32, i32, i32) {
    %c0_i32 = arith.constant 0 : i32
    %c0_i32_0 = arith.constant 0 : i32
    %c0_i32_1 = arith.constant 0 : i32
    return %arg1, %c0_i32, %c0_i32_0 : i32, i32, i32
  }
  func.func @transform_3(%arg0: i32, %arg1: i32) -> (i32, i32, i32) {
    %c0_i32 = arith.constant 0 : i32
    %c0_i32_0 = arith.constant 0 : i32
    %c0_i32_1 = arith.constant 0 : i32
    return %arg1, %c0_i32, %c0_i32_0 : i32, i32, i32
  }
  func.func @transform_4(%arg0: i32, %arg1: i32) -> (i32, i32, i32) {
    %c0_i32 = arith.constant 0 : i32
    %c0_i32_0 = arith.constant 0 : i32
    %c0_i32_1 = arith.constant 0 : i32
    return %arg1, %c0_i32, %c0_i32_0 : i32, i32, i32
  }
  func.func @transform_5(%arg0: i32, %arg1: i32) -> (i32, i32, i32) {
    %c0_i32 = arith.constant 0 : i32
    %c0_i32_0 = arith.constant 0 : i32
    %c0_i32_1 = arith.constant 0 : i32
    return %arg1, %c0_i32, %c0_i32_0 : i32, i32, i32
  }
  func.func @transform_6(%arg0: i32, %arg1: i32) -> (i32, i32, i32) {
    %c0_i32 = arith.constant 0 : i32
    %c0_i32_0 = arith.constant 0 : i32
    %c0_i32_1 = arith.constant 0 : i32
    return %arg1, %c0_i32, %c0_i32_0 : i32, i32, i32
  }
  func.func @transform_7(%arg0: i32, %arg1: i32) -> (i32, i32, i32) {
    %c0_i32 = arith.constant 0 : i32
    %c0_i32_0 = arith.constant 0 : i32
    %c0_i32_1 = arith.constant 0 : i32
    return %arg1, %c0_i32, %c0_i32_0 : i32, i32, i32
  }
  func.func @transform_8(%arg0: i32, %arg1: i32) -> (i32, i32) {
    %c0_i32 = arith.constant 0 : i32
    %c0_i32_0 = arith.constant 0 : i32
    return %c0_i32, %arg0 : i32, i32
  }
  func.func @transform_9(%arg0: i32, %arg1: i32) -> (i32, i32) {
    %c0_i32 = arith.constant 0 : i32
    %c0_i32_0 = arith.constant 0 : i32
    return %c0_i32, %arg0 : i32, i32
  }
  func.func @transform_10(%arg0: i32, %arg1: i32) -> (i32, i32) {
    %c0_i32 = arith.constant 0 : i32
    return %arg1, %arg0 : i32, i32
  }
  func.func @transform_11(%arg0: i32, %arg1: i32) -> (i32, i32) {
    %c0_i32 = arith.constant 0 : i32
    %c0_i32_0 = arith.constant 0 : i32
    return %c0_i32, %arg0 : i32, i32
  }
}

module attributes {stable_mosaic.version = 11 : i64} {
  func.func @bn_relu_heads_kernel(%arg0: memref<2x128xf32, #tpu.memory_space<vmem>>, %arg1: memref<1x128xf32, #tpu.memory_space<vmem>>, %arg2: memref<1x128xf32, #tpu.memory_space<vmem>>, %arg3: memref<128x128xbf16, #tpu.memory_space<vmem>>, %arg4: memref<1x128xf32, #tpu.memory_space<vmem>>, %arg5: memref<2x128xf32, #tpu.memory_space<vmem>>) attributes {dimension_semantics = [], scalar_prefetch = 0 : i64, scratch_operands = 0 : i64, tpu.core_type = #tpu.core_type<tc>} {
    %c0 = arith.constant 0 : index
    %c0_0 = arith.constant 0 : index
    %0 = vector.load %arg0[%c0, %c0_0] : memref<2x128xf32, #tpu.memory_space<vmem>>, vector<2x128xf32>
    %c0_1 = arith.constant 0 : index
    %c0_2 = arith.constant 0 : index
    %1 = vector.load %arg1[%c0_1, %c0_2] : memref<1x128xf32, #tpu.memory_space<vmem>>, vector<1x128xf32>
    %2 = vector.broadcast %1 : vector<1x128xf32> to vector<2x128xf32>
    %3 = arith.mulf %0, %2 : vector<2x128xf32>
    %c0_3 = arith.constant 0 : index
    %c0_4 = arith.constant 0 : index
    %4 = vector.load %arg2[%c0_3, %c0_4] : memref<1x128xf32, #tpu.memory_space<vmem>>, vector<1x128xf32>
    %5 = vector.broadcast %4 : vector<1x128xf32> to vector<2x128xf32>
    %6 = arith.addf %3, %5 : vector<2x128xf32>
    %cst = arith.constant 0.000000e+00 : f32
    %7 = vector.broadcast %cst : f32 to vector<2x128xf32>
    %8 = arith.maximumf %6, %7 : vector<2x128xf32>
    %9 = arith.truncf %8 : vector<2x128xf32> to vector<2x128xbf16>
    %c0_5 = arith.constant 0 : index
    %c0_6 = arith.constant 0 : index
    %10 = vector.load %arg3[%c0_5, %c0_6] : memref<128x128xbf16, #tpu.memory_space<vmem>>, vector<128x128xbf16>
    %cst_7 = arith.constant dense<0.000000e+00> : vector<2x128xf32>
    %11 = tpu.matmul %9, %10, %cst_7 {dimension_numbers = #tpu.dot_dimension_numbers<[1], [0], [0], [1], [0, 0, 1, 1], [], []>} : vector<2x128xbf16>, vector<128x128xbf16>, vector<2x128xf32> -> vector<2x128xf32>
    %c0_8 = arith.constant 0 : index
    %c0_9 = arith.constant 0 : index
    %12 = vector.load %arg4[%c0_8, %c0_9] : memref<1x128xf32, #tpu.memory_space<vmem>>, vector<1x128xf32>
    %13 = vector.broadcast %12 : vector<1x128xf32> to vector<2x128xf32>
    %14 = arith.addf %11, %13 : vector<2x128xf32>
    %c0_10 = arith.constant 0 : index
    %c0_11 = arith.constant 0 : index
    %15 = vector.load %arg5[%c0_10, %c0_11] : memref<2x128xf32, #tpu.memory_space<vmem>>, vector<2x128xf32>
    tpu.vector_store %arg5[%c0_10, %c0_11], %14 {strides = array<i32>} : memref<2x128xf32, #tpu.memory_space<vmem>>, vector<2x128xf32>,
    return
  }
}

</mosaic_0001>

<bundles_post_ra>
// kernel: mnist_encoder_forward.11
= control target key start
LH: loop header
LB: loop body
LE: loop exit
PB: predicated region body
PF: predicated region fallthrough
CT: control target
= control target key end

     0   :  { %vm540_vm0 = vcmask 60416   ;;  %s1345_s0 = inlined_call_operand.vmem [shape: f32[512,8], index: 0, kind: input, shape index: {}]   ;;  %s1346_s1 = inlined_call_operand.vmem [shape: f32[1,8], index: 1, kind: input, shape index: {}]   ;;  %s1347_s2 = inlined_call_operand.vmem [shape: f32[1,8], index: 2, kind: input, shape index: {}]   ;;  %s1348_s3 = inlined_call_operand.vmem [shape: bf16[512,8], index: 3, kind: output, shape index: {}]  }
   0x1   :  { %v14_v0 = vld [vmem:[%s1345_s0] sm:$0xff]  ;;  %v15_v4 = vld [vmem:[%s1345_s0 + $0x8] sm:$0xff]  ;;  %v16_v5 = vld [vmem:[%s1345_s0 + $0x10] sm:$0xff] }
   0x2   :  { %v765_v1 = vld [vmem:[%s1346_s1] ss:$0 sm:$0xff]  ;;  %v17_v6 = vld [vmem:[%s1345_s0 + $0x18] sm:$0xff]  ;;  %v19_v11 = vld [vmem:[%s1345_s0 + $0x28] sm:$0xff] }
   0x3   :  { %v770_v2 = vld [vmem:[%s1347_s2] ss:$0 sm:$0xff]  ;;  %v85_v3 = vmul.f32 %v765_v1, %v14_v0  ;;  %v86_v7 = vmul.f32 %v765_v1, %v15_v4  ;;  %v87_v8 = vmul.f32 %v765_v1, %v16_v5  ;;  %v88_v9 = vmul.f32 %v765_v1, %v17_v6  ;;  %v20_v12 = vld [vmem:[%s1345_s0 + $0x30] sm:$0xff]  ;;  %v21_v17 = vld [vmem:[%s1345_s0 + $0x38] sm:$0xff] }
   0x4   :  { %v18_v10 = vld [vmem:[%s1345_s0 + $0x20] sm:$0xff]  ;;  %v90_v15 = vmul.f32 %v765_v1, %v19_v11  ;;  %v91_v16 = vmul.f32 %v765_v1, %v20_v12  ;;  %v92_v21 = vmul.f32 %v765_v1, %v21_v17  ;;  %v23_v35 = vld [vmem:[%s1345_s0 + $0x48] sm:$0xff]  ;;  %v24_v36 = vld [vmem:[%s1345_s0 + $0x50] sm:$0xff] }
   0x5   :  { %v156_v13 = vadd.f32 %v770_v2, %v85_v3  ;;  %v89_v14 = vmul.f32 %v765_v1, %v18_v10  ;;  %v157_v18 = vadd.f32 %v770_v2, %v86_v7  ;;  %v158_v19 = vadd.f32 %v770_v2, %v87_v8  ;;  %v22_v30 = vld [vmem:[%s1345_s0 + $0x40] sm:$0xff]  ;;  %v25_v37 = vld [vmem:[%s1345_s0 + $0x58] sm:$0xff]  ;;  %v27_v43 = vld [vmem:[%s1345_s0 + $0x68] sm:$0xff] }
   0x6   :  { %v159_v20 = vadd.f32 %v770_v2, %v88_v9  ;;  %v161_v24 = vadd.f32 %v770_v2, %v90_v15  ;;  %v162_v25 = vadd.f32 %v770_v2, %v91_v16  ;;  %v163_v29 = vadd.f32 %v770_v2, %v92_v21  ;;  %v26_v42 = vld [vmem:[%s1345_s0 + $0x60] sm:$0xff]  ;;  %v28_v44 = vld [vmem:[%s1345_s0 + $0x70] sm:$0xff]  ;;  %v29_v49 = vld [vmem:[%s1345_s0 + $0x78] sm:$0xff] }
   0x7   :  { %v220_v22 = vmax.f32 %v156_v13, 0.0  ;;  %v160_v23 = vadd.f32 %v770_v2, %v89_v14  ;;  %v221_v26 = vmax.f32 %v157_v18, 0.0  ;;  %v222_v27 = vmax.f32 %v158_v19, 0.0  ;;  %v30_v8 = vld [vmem:[%s1345_s0 + $0x80] sm:$0xff]  ;;  %v31_v13 = vld [vmem:[%s1345_s0 + $0x88] sm:$0xff]  ;;  %v32_v14 = vld [vmem:[%s1345_s0 + $0x90] sm:$0xff] }
   0x8   :  { %v223_v28 = vmax.f32 %v159_v20, 0.0  ;;  %v225_v33 = vmax.f32 %v161_v24, 0.0  ;;  %v226_v34 = vmax.f32 %v162_v25, 0.0  ;;  %v227_v41 = vmax.f32 %v163_v29, 0.0  ;;  %v33_v15 = vld [vmem:[%s1345_s0 + $0x98] sm:$0xff]  ;;  %v34_v20 = vld [vmem:[%s1345_s0 + $0xa0] sm:$0xff] }
   0x9   :  { %v675_v31 = vpack.c.bf16 %v220_v22, %v220_v22  ;;  %v224_v32 = vmax.f32 %v160_v23, 0.0  ;;  %v676_v38 = vpack.c.bf16 %v221_v26, %v221_v26  ;;  %v677_v39 = vpack.c.bf16 %v222_v27, %v222_v27  ;;  %v35_v21 = vld [vmem:[%s1345_s0 + $0xa8] sm:$0xff]  ;;  %v36_v22 = vld [vmem:[%s1345_s0 + $0xb0] sm:$0xff]  ;;  %v37_v27 = vld [vmem:[%s1345_s0 + $0xb8] sm:$0xff] }
   0xa   :  { %v678_v40 = vpack.c.bf16 %v223_v28, %v223_v28  ;;  %v680_v46 = vpack.c.bf16 %v225_v33, %v225_v33  ;;  %v681_v47 = vpack.c.bf16 %v226_v34, %v226_v34  ;;  %v93_v48 = vmul.f32 %v765_v1, %v22_v30 }
   0xb   :  { %541 = vst.msk [vmem:[%s1348_s3] sm:$0xf] %vm540_vm0, %v675_v31  ;;  %v679_v45 = vpack.c.bf16 %v224_v32, %v224_v32  ;;  %542 = vst.msk [vmem:[%s1348_s3 + $0x4] sm:$0xf] %vm540_vm0, %v676_v38  ;;  %v682_v50 = vpack.c.bf16 %v227_v41, %v227_v41  ;;  %v94_v51 = vmul.f32 %v765_v1, %v23_v35 }
   0xc   :  { %543 = vst.msk [vmem:[%s1348_s3 + $0x8] sm:$0xf] %vm540_vm0, %v677_v39  ;;  %544 = vst.msk [vmem:[%s1348_s3 + $0xc] sm:$0xf] %vm540_vm0, %v678_v40  ;;  %v95_v52 = vmul.f32 %v765_v1, %v24_v36  ;;  %v96_v53 = vmul.f32 %v765_v1, %v25_v37  ;;  %v164_v54 = vadd.f32 %v770_v2, %v93_v48  ;;  %v38_v48 = vld [vmem:[%s1345_s0 + $0xc0] sm:$0xff] }
   0xd   :  { %545 = vst.msk [vmem:[%s1348_s3 + $0x10] sm:$0xf] %vm540_vm0, %v679_v45  ;;  %546 = vst.msk [vmem:[%s1348_s3 + $0x14] sm:$0xf] %vm540_vm0, %v680_v46  ;;  %v97_v55 = vmul.f32 %v765_v1, %v26_v42  ;;  %v98_v56 = vmul.f32 %v765_v1, %v27_v43  ;;  %v99_v57 = vmul.f32 %v765_v1, %v28_v44 }
   0xe   :  { %547 = vst.msk [vmem:[%s1348_s3 + $0x18] sm:$0xf] %vm540_vm0, %v681_v47  ;;  %548 = vst.msk [vmem:[%s1348_s3 + $0x1c] sm:$0xf] %vm540_vm0, %v682_v50  ;;  %v165_v58 = vadd.f32 %v770_v2, %v94_v51  ;;  %v166_v59 = vadd.f32 %v770_v2, %v95_v52  ;;  %v167_v60 = vadd.f32 %v770_v2, %v96_v53  ;;  %v228_v62 = vmax.f32 %v164_v54, 0.0  ;;  %v39_v53 = vld [vmem:[%s1345_s0 + $0xc8] sm:$0xff] }
   0xf   :  { %v100_v61 = vmul.f32 %v765_v1, %v29_v49  ;;  %v168_v63 = vadd.f32 %v770_v2, %v97_v55  ;;  %v169_v0 = vadd.f32 %v770_v2, %v98_v56  ;;  %v170_v3 = vadd.f32 %v770_v2, %v99_v57  ;;  %v40_v54 = vld [vmem:[%s1345_s0 + $0xd0] sm:$0xff]  ;;  %v41_v55 = vld [vmem:[%s1345_s0 + $0xd8] sm:$0xff] }
  0x10   :  { %v229_v4 = vmax.f32 %v165_v58, 0.0  ;;  %v230_v5 = vmax.f32 %v166_v59, 0.0  ;;  %v231_v6 = vmax.f32 %v167_v60, 0.0  ;;  %v683_v9 = vpack.c.bf16 %v228_v62, %v228_v62  ;;  %v42_v60 = vld [vmem:[%s1345_s0 + $0xe0] sm:$0xff]  ;;  %v44_v62 = vld [vmem:[%s1345_s0 + $0xf0] sm:$0xff] }
  0x11   :  { %v171_v7 = vadd.f32 %v770_v2, %v100_v61  ;;  %v232_v10 = vmax.f32 %v168_v63, 0.0  ;;  %v233_v11 = vmax.f32 %v169_v0, 0.0  ;;  %v234_v12 = vmax.f32 %v170_v3, 0.0  ;;  %v43_v61 = vld [vmem:[%s1345_s0 + $0xe8] sm:$0xff] }
  0x12   :  { %v684_v16 = vpack.c.bf16 %v229_v4, %v229_v4  ;;  %v685_v17 = vpack.c.bf16 %v230_v5, %v230_v5  ;;  %v686_v18 = vpack.c.bf16 %v231_v6, %v231_v6  ;;  %549 = vst.msk [vmem:[%s1348_s3 + $0x20] sm:$0xf] %vm540_vm0, %v683_v9  ;;  %v101_v26 = vmul.f32 %v765_v1, %v30_v8  ;;  %v45_v5 = vld [vmem:[%s1345_s0 + $0xf8] sm:$0xff] }
  0x13   :  { %v235_v19 = vmax.f32 %v171_v7, 0.0  ;;  %v687_v23 = vpack.c.bf16 %v232_v10, %v232_v10  ;;  %v688_v24 = vpack.c.bf16 %v233_v11, %v233_v11  ;;  %v689_v25 = vpack.c.bf16 %v234_v12, %v234_v12 }
  0x14   :  { %550 = vst.msk [vmem:[%s1348_s3 + $0x24] sm:$0xf] %vm540_vm0, %v684_v16  ;;  %551 = vst.msk [vmem:[%s1348_s3 + $0x28] sm:$0xf] %vm540_vm0, %v685_v17  ;;  %v102_v29 = vmul.f32 %v765_v1, %v31_v13  ;;  %v103_v30 = vmul.f32 %v765_v1, %v32_v14  ;;  %v104_v31 = vmul.f32 %v765_v1, %v33_v15 }
  0x15   :  { %552 = vst.msk [vmem:[%s1348_s3 + $0x2c] sm:$0xf] %vm540_vm0, %v686_v18  ;;  %v690_v28 = vpack.c.bf16 %v235_v19, %v235_v19  ;;  %553 = vst.msk [vmem:[%s1348_s3 + $0x30] sm:$0xf] %vm540_vm0, %v687_v23  ;;  %v172_v32 = vadd.f32 %v770_v2, %v101_v26  ;;  %v105_v33 = vmul.f32 %v765_v1, %v34_v20  ;;  %v46_v26 = vld [vmem:[%s1345_s0 + $0x100] sm:$0xff] }
  0x16   :  { %554 = vst.msk [vmem:[%s1348_s3 + $0x34] sm:$0xf] %vm540_vm0, %v688_v24  ;;  %555 = vst.msk [vmem:[%s1348_s3 + $0x38] sm:$0xf] %vm540_vm0, %v689_v25  ;;  %v106_v34 = vmul.f32 %v765_v1, %v35_v21  ;;  %v107_v35 = vmul.f32 %v765_v1, %v36_v22  ;;  %v173_v36 = vadd.f32 %v770_v2, %v102_v29 }
  0x17   :  { %556 = vst.msk [vmem:[%s1348_s3 + $0x3c] sm:$0xf] %vm540_vm0, %v690_v28  ;;  %v174_v37 = vadd.f32 %v770_v2, %v103_v30  ;;  %v175_v38 = vadd.f32 %v770_v2, %v104_v31  ;;  %v108_v39 = vmul.f32 %v765_v1, %v37_v27  ;;  %v236_v40 = vmax.f32 %v172_v32, 0.0  ;;  %v47_v31 = vld [vmem:[%s1345_s0 + $0x108] sm:$0xff]  ;;  %v48_v32 = vld [vmem:[%s1345_s0 + $0x110] sm:$0xff] }
  0x18   :  { %v176_v41 = vadd.f32 %v770_v2, %v105_v33  ;;  %v177_v42 = vadd.f32 %v770_v2, %v106_v34  ;;  %v178_v43 = vadd.f32 %v770_v2, %v107_v35  ;;  %v237_v44 = vmax.f32 %v173_v36, 0.0  ;;  %v49_v33 = vld [vmem:[%s1345_s0 + $0x118] sm:$0xff] }
  0x19   :  { %v238_v45 = vmax.f32 %v174_v37, 0.0  ;;  %v239_v46 = vmax.f32 %v175_v38, 0.0  ;;  %v179_v47 = vadd.f32 %v770_v2, %v108_v39  ;;  %v691_v49 = vpack.c.bf16 %v236_v40, %v236_v40  ;;  %v50_v38 = vld [vmem:[%s1345_s0 + $0x120] sm:$0xff]  ;;  %v51_v39 = vld [vmem:[%s1345_s0 + $0x128] sm:$0xff]  ;;  %v52_v40 = vld [vmem:[%s1345_s0 + $0x130] sm:$0xff] }
  0x1a   :  { %v240_v50 = vmax.f32 %v176_v41, 0.0  ;;  %v241_v51 = vmax.f32 %v177_v42, 0.0  ;;  %v242_v52 = vmax.f32 %v178_v43, 0.0  ;;  %v692_v56 = vpack.c.bf16 %v237_v44, %v237_v44 }
  0x1b   :  { %v693_v57 = vpack.c.bf16 %v238_v45, %v238_v45  ;;  %v694_v58 = vpack.c.bf16 %v239_v46, %v239_v46  ;;  %v243_v59 = vmax.f32 %v179_v47, 0.0  ;;  %557 = vst.msk [vmem:[%s1348_s3 + $0x40] sm:$0xf] %vm540_vm0, %v691_v49  ;;  %v109_v4 = vmul.f32 %v765_v1, %v38_v48  ;;  %v53_v45 = vld [vmem:[%s1345_s0 + $0x138] sm:$0xff] }
  0x1c   :  { %v695_v63 = vpack.c.bf16 %v240_v50, %v240_v50  ;;  %v696_v0 = vpack.c.bf16 %v241_v51, %v241_v51  ;;  %v697_v3 = vpack.c.bf16 %v242_v52, %v242_v52  ;;  %558 = vst.msk [vmem:[%s1348_s3 + $0x44] sm:$0xf] %vm540_vm0, %v692_v56  ;;  %v110_v7 = vmul.f32 %v765_v1, %v39_v53 }
  0x1d   :  { %559 = vst.msk [vmem:[%s1348_s3 + $0x48] sm:$0xf] %vm540_vm0, %v693_v57  ;;  %560 = vst.msk [vmem:[%s1348_s3 + $0x4c] sm:$0xf] %vm540_vm0, %v694_v58  ;;  %v698_v6 = vpack.c.bf16 %v243_v59, %v243_v59  ;;  %v111_v8 = vmul.f32 %v765_v1, %v40_v54  ;;  %v112_v9 = vmul.f32 %v765_v1, %v41_v55 }
  0x1e   :  { %561 = vst.msk [vmem:[%s1348_s3 + $0x50] sm:$0xf] %vm540_vm0, %v695_v63  ;;  %562 = vst.msk [vmem:[%s1348_s3 + $0x54] sm:$0xf] %vm540_vm0, %v696_v0  ;;  %v180_v10 = vadd.f32 %v770_v2, %v109_v4  ;;  %v113_v11 = vmul.f32 %v765_v1, %v42_v60  ;;  %v114_v12 = vmul.f32 %v765_v1, %v43_v61  ;;  %v54_v4 = vld [vmem:[%s1345_s0 + $0x140] sm:$0xff] }
  0x1f   :  { %563 = vst.msk [vmem:[%s1348_s3 + $0x58] sm:$0xf] %vm540_vm0, %v697_v3  ;;  %v115_v13 = vmul.f32 %v765_v1, %v44_v62  ;;  %564 = vst.msk [vmem:[%s1348_s3 + $0x5c] sm:$0xf] %vm540_vm0, %v698_v6  ;;  %v181_v14 = vadd.f32 %v770_v2, %v110_v7  ;;  %v182_v15 = vadd.f32 %v770_v2, %v111_v8 }
  0x20   :  { %v183_v16 = vadd.f32 %v770_v2, %v112_v9  ;;  %v116_v17 = vmul.f32 %v765_v1, %v45_v5  ;;  %v244_v18 = vmax.f32 %v180_v10, 0.0  ;;  %v184_v19 = vadd.f32 %v770_v2, %v113_v11  ;;  %v55_v9 = vld [vmem:[%s1345_s0 + $0x148] sm:$0xff]  ;;  %v56_v10 = vld [vmem:[%s1345_s0 + $0x150] sm:$0xff]  ;;  %v57_v11 = vld [vmem:[%s1345_s0 + $0x158] sm:$0xff] }
  0x21   :  { %v185_v20 = vadd.f32 %v770_v2, %v114_v12  ;;  %v186_v21 = vadd.f32 %v770_v2, %v115_v13  ;;  %v245_v22 = vmax.f32 %v181_v14, 0.0  ;;  %v246_v23 = vmax.f32 %v182_v15, 0.0 }
  0x22   :  { %v247_v24 = vmax.f32 %v183_v16, 0.0  ;;  %v187_v25 = vadd.f32 %v770_v2, %v116_v17  ;;  %v699_v27 = vpack.c.bf16 %v244_v18, %v244_v18  ;;  %v248_v28 = vmax.f32 %v184_v19, 0.0  ;;  %v58_v16 = vld [vmem:[%s1345_s0 + $0x160] sm:$0xff]  ;;  %v59_v17 = vld [vmem:[%s1345_s0 + $0x168] sm:$0xff]  ;;  %v60_v18 = vld [vmem:[%s1345_s0 + $0x170] sm:$0xff] }
  0x23   :  { %v249_v29 = vmax.f32 %v185_v20, 0.0  ;;  %v250_v30 = vmax.f32 %v186_v21, 0.0  ;;  %v700_v34 = vpack.c.bf16 %v245_v22, %v245_v22  ;;  %v701_v35 = vpack.c.bf16 %v246_v23, %v246_v23  ;;  %v61_v23 = vld [vmem:[%s1345_s0 + $0x178] sm:$0xff] }
  0x24   :  { %v702_v36 = vpack.c.bf16 %v247_v24, %v247_v24  ;;  %v251_v37 = vmax.f32 %v187_v25, 0.0  ;;  %565 = vst.msk [vmem:[%s1348_s3 + $0x60] sm:$0xf] %vm540_vm0, %v699_v27  ;;  %v703_v41 = vpack.c.bf16 %v248_v28, %v248_v28  ;;  %v117_v44 = vmul.f32 %v765_v1, %v46_v26 }
  0x25   :  { %v704_v42 = vpack.c.bf16 %v249_v29, %v249_v29  ;;  %v705_v43 = vpack.c.bf16 %v250_v30, %v250_v30  ;;  %566 = vst.msk [vmem:[%s1348_s3 + $0x64] sm:$0xf] %vm540_vm0, %v700_v34  ;;  %567 = vst.msk [vmem:[%s1348_s3 + $0x68] sm:$0xf] %vm540_vm0, %v701_v35  ;;  %v118_v47 = vmul.f32 %v765_v1, %v47_v31 }
  0x26   :  { %568 = vst.msk [vmem:[%s1348_s3 + $0x6c] sm:$0xf] %vm540_vm0, %v702_v36  ;;  %v706_v46 = vpack.c.bf16 %v251_v37, %v251_v37  ;;  %v119_v48 = vmul.f32 %v765_v1, %v48_v32  ;;  %v120_v49 = vmul.f32 %v765_v1, %v49_v33  ;;  %569 = vst.msk [vmem:[%s1348_s3 + $0x70] sm:$0xf] %vm540_vm0, %v703_v41 }
  0x27   :  { %570 = vst.msk [vmem:[%s1348_s3 + $0x74] sm:$0xf] %vm540_vm0, %v704_v42  ;;  %571 = vst.msk [vmem:[%s1348_s3 + $0x78] sm:$0xf] %vm540_vm0, %v705_v43  ;;  %v188_v50 = vadd.f32 %v770_v2, %v117_v44  ;;  %v121_v51 = vmul.f32 %v765_v1, %v50_v38  ;;  %v122_v52 = vmul.f32 %v765_v1, %v51_v39  ;;  %v62_v44 = vld [vmem:[%s1345_s0 + $0x180] sm:$0xff] }
  0x28   :  { %v123_v53 = vmul.f32 %v765_v1, %v52_v40  ;;  %572 = vst.msk [vmem:[%s1348_s3 + $0x7c] sm:$0xf] %vm540_vm0, %v706_v46  ;;  %v189_v54 = vadd.f32 %v770_v2, %v118_v47  ;;  %v190_v55 = vadd.f32 %v770_v2, %v119_v48  ;;  %v191_v56 = vadd.f32 %v770_v2, %v120_v49  ;;  %v63_v49 = vld [vmem:[%s1345_s0 + $0x188] sm:$0xff] }
  0x29   :  { %v124_v57 = vmul.f32 %v765_v1, %v53_v45  ;;  %v252_v58 = vmax.f32 %v188_v50, 0.0  ;;  %v192_v59 = vadd.f32 %v770_v2, %v121_v51  ;;  %v193_v60 = vadd.f32 %v770_v2, %v122_v52  ;;  %v64_v50 = vld [vmem:[%s1345_s0 + $0x190] sm:$0xff]  ;;  %v65_v51 = vld [vmem:[%s1345_s0 + $0x198] sm:$0xff] }
  0x2a   :  { %v194_v61 = vadd.f32 %v770_v2, %v123_v53  ;;  %v253_v62 = vmax.f32 %v189_v54, 0.0  ;;  %v254_v63 = vmax.f32 %v190_v55, 0.0  ;;  %v255_v0 = vmax.f32 %v191_v56, 0.0  ;;  %v66_v56 = vld [vmem:[%s1345_s0 + $0x1a0] sm:$0xff] }
  0x2b   :  { %v195_v3 = vadd.f32 %v770_v2, %v124_v57  ;;  %v707_v5 = vpack.c.bf16 %v252_v58, %v252_v58  ;;  %v256_v6 = vmax.f32 %v192_v59, 0.0  ;;  %v257_v7 = vmax.f32 %v193_v60, 0.0  ;;  %v67_v57 = vld [vmem:[%s1345_s0 + $0x1a8] sm:$0xff]  ;;  %v68_v58 = vld [vmem:[%s1345_s0 + $0x1b0] sm:$0xff] }
  0x2c   :  { %v258_v8 = vmax.f32 %v194_v61, 0.0  ;;  %v708_v12 = vpack.c.bf16 %v253_v62, %v253_v62  ;;  %v709_v13 = vpack.c.bf16 %v254_v63, %v254_v63  ;;  %v710_v14 = vpack.c.bf16 %v255_v0, %v255_v0  ;;  %v69_v63 = vld [vmem:[%s1345_s0 + $0x1b8] sm:$0xff] }
  0x2d   :  { %v259_v15 = vmax.f32 %v195_v3, 0.0  ;;  %573 = vst.msk [vmem:[%s1348_s3 + $0x80] sm:$0xf] %vm540_vm0, %v707_v5  ;;  %v711_v19 = vpack.c.bf16 %v256_v6, %v256_v6  ;;  %v712_v20 = vpack.c.bf16 %v257_v7, %v257_v7  ;;  %v125_v22 = vmul.f32 %v765_v1, %v54_v4 }
  0x2e   :  { %v713_v21 = vpack.c.bf16 %v258_v8, %v258_v8  ;;  %574 = vst.msk [vmem:[%s1348_s3 + $0x84] sm:$0xf] %vm540_vm0, %v708_v12  ;;  %575 = vst.msk [vmem:[%s1348_s3 + $0x88] sm:$0xf] %vm540_vm0, %v709_v13  ;;  %v126_v25 = vmul.f32 %v765_v1, %v55_v9  ;;  %v127_v26 = vmul.f32 %v765_v1, %v56_v10 }
  0x2f   :  { %576 = vst.msk [vmem:[%s1348_s3 + $0x8c] sm:$0xf] %vm540_vm0, %v710_v14  ;;  %v714_v24 = vpack.c.bf16 %v259_v15, %v259_v15  ;;  %v128_v27 = vmul.f32 %v765_v1, %v57_v11  ;;  %577 = vst.msk [vmem:[%s1348_s3 + $0x90] sm:$0xf] %vm540_vm0, %v711_v19  ;;  %v196_v28 = vadd.f32 %v770_v2, %v125_v22  ;;  %v70_v22 = vld [vmem:[%s1345_s0 + $0x1c0] sm:$0xff] }
  0x30   :  { %578 = vst.msk [vmem:[%s1348_s3 + $0x94] sm:$0xf] %vm540_vm0, %v712_v20  ;;  %579 = vst.msk [vmem:[%s1348_s3 + $0x98] sm:$0xf] %vm540_vm0, %v713_v21  ;;  %v129_v29 = vmul.f32 %v765_v1, %v58_v16  ;;  %v130_v30 = vmul.f32 %v765_v1, %v59_v17  ;;  %v131_v31 = vmul.f32 %v765_v1, %v60_v18 }
  0x31   :  { %580 = vst.msk [vmem:[%s1348_s3 + $0x9c] sm:$0xf] %vm540_vm0, %v714_v24  ;;  %v197_v32 = vadd.f32 %v770_v2, %v126_v25  ;;  %v198_v33 = vadd.f32 %v770_v2, %v127_v26  ;;  %v199_v34 = vadd.f32 %v770_v2, %v128_v27  ;;  %v132_v35 = vmul.f32 %v765_v1, %v61_v23  ;;  %v71_v27 = vld [vmem:[%s1345_s0 + $0x1c8] sm:$0xff] }
  0x32   :  { %v260_v36 = vmax.f32 %v196_v28, 0.0  ;;  %v200_v37 = vadd.f32 %v770_v2, %v129_v29  ;;  %v201_v38 = vadd.f32 %v770_v2, %v130_v30  ;;  %v202_v39 = vadd.f32 %v770_v2, %v131_v31  ;;  %v72_v28 = vld [vmem:[%s1345_s0 + $0x1d0] sm:$0xff]  ;;  %v73_v29 = vld [vmem:[%s1345_s0 + $0x1d8] sm:$0xff] }
  0x33   :  { %v261_v40 = vmax.f32 %v197_v32, 0.0  ;;  %v262_v41 = vmax.f32 %v198_v33, 0.0  ;;  %v263_v42 = vmax.f32 %v199_v34, 0.0  ;;  %v203_v43 = vadd.f32 %v770_v2, %v132_v35  ;;  %v74_v34 = vld [vmem:[%s1345_s0 + $0x1e0] sm:$0xff]  ;;  %v75_v35 = vld [vmem:[%s1345_s0 + $0x1e8] sm:$0xff] }
  0x34   :  { %v715_v45 = vpack.c.bf16 %v260_v36, %v260_v36  ;;  %v264_v46 = vmax.f32 %v200_v37, 0.0  ;;  %v265_v47 = vmax.f32 %v201_v38, 0.0  ;;  %v266_v48 = vmax.f32 %v202_v39, 0.0  ;;  %v76_v36 = vld [vmem:[%s1345_s0 + $0x1f0] sm:$0xff] }
  0x35   :  { %v716_v52 = vpack.c.bf16 %v261_v40, %v261_v40  ;;  %v717_v53 = vpack.c.bf16 %v262_v41, %v262_v41  ;;  %v718_v54 = vpack.c.bf16 %v263_v42, %v263_v42  ;;  %v267_v55 = vmax.f32 %v203_v43, 0.0  ;;  %v77_v41 = vld [vmem:[%s1345_s0 + $0x1f8] sm:$0xff] }
  0x36   :  { %581 = vst.msk [vmem:[%s1348_s3 + $0xa0] sm:$0xf] %vm540_vm0, %v715_v45  ;;  %v719_v59 = vpack.c.bf16 %v264_v46, %v264_v46  ;;  %v720_v60 = vpack.c.bf16 %v265_v47, %v265_v47  ;;  %v721_v61 = vpack.c.bf16 %v266_v48, %v266_v48  ;;  %v133_v62 = vmul.f32 %v765_v1, %v62_v44 }
  0x37   :  { %582 = vst.msk [vmem:[%s1348_s3 + $0xa4] sm:$0xf] %vm540_vm0, %v716_v52  ;;  %583 = vst.msk [vmem:[%s1348_s3 + $0xa8] sm:$0xf] %vm540_vm0, %v717_v53  ;;  %v722_v0 = vpack.c.bf16 %v267_v55, %v267_v55  ;;  %v134_v3 = vmul.f32 %v765_v1, %v63_v49  ;;  %v135_v4 = vmul.f32 %v765_v1, %v64_v50 }
  0x38   :  { %584 = vst.msk [vmem:[%s1348_s3 + $0xac] sm:$0xf] %vm540_vm0, %v718_v54  ;;  %v136_v5 = vmul.f32 %v765_v1, %v65_v51  ;;  %585 = vst.msk [vmem:[%s1348_s3 + $0xb0] sm:$0xf] %vm540_vm0, %v719_v59  ;;  %v204_v6 = vadd.f32 %v770_v2, %v133_v62  ;;  %v137_v7 = vmul.f32 %v765_v1, %v66_v56 }
  0x39   :  { %586 = vst.msk [vmem:[%s1348_s3 + $0xb4] sm:$0xf] %vm540_vm0, %v720_v60  ;;  %587 = vst.msk [vmem:[%s1348_s3 + $0xb8] sm:$0xf] %vm540_vm0, %v721_v61  ;;  %v138_v8 = vmul.f32 %v765_v1, %v67_v57  ;;  %v139_v9 = vmul.f32 %v765_v1, %v68_v58  ;;  %v205_v10 = vadd.f32 %v770_v2, %v134_v3 }
  0x3a   :  { %588 = vst.msk [vmem:[%s1348_s3 + $0xbc] sm:$0xf] %vm540_vm0, %v722_v0  ;;  %v206_v11 = vadd.f32 %v770_v2, %v135_v4  ;;  %v207_v12 = vadd.f32 %v770_v2, %v136_v5  ;;  %v140_v13 = vmul.f32 %v765_v1, %v69_v63  ;;  %v268_v14 = vmax.f32 %v204_v6, 0.0 }
  0x3b   :  { %v208_v15 = vadd.f32 %v770_v2, %v137_v7  ;;  %v209_v16 = vadd.f32 %v770_v2, %v138_v8  ;;  %v210_v17 = vadd.f32 %v770_v2, %v139_v9  ;;  %v269_v18 = vmax.f32 %v205_v10, 0.0 }
  0x3c   :  { %v270_v19 = vmax.f32 %v206_v11, 0.0  ;;  %v271_v20 = vmax.f32 %v207_v12, 0.0  ;;  %v211_v21 = vadd.f32 %v770_v2, %v140_v13  ;;  %v723_v23 = vpack.c.bf16 %v268_v14, %v268_v14 }
  0x3d   :  { %v272_v24 = vmax.f32 %v208_v15, 0.0  ;;  %v273_v25 = vmax.f32 %v209_v16, 0.0  ;;  %v274_v26 = vmax.f32 %v210_v17, 0.0  ;;  %v724_v30 = vpack.c.bf16 %v269_v18, %v269_v18 }
  0x3e   :  { %v725_v31 = vpack.c.bf16 %v270_v19, %v270_v19  ;;  %v726_v32 = vpack.c.bf16 %v271_v20, %v271_v20  ;;  %v275_v33 = vmax.f32 %v211_v21, 0.0  ;;  %589 = vst.msk [vmem:[%s1348_s3 + $0xc0] sm:$0xf] %vm540_vm0, %v723_v23  ;;  %v141_v40 = vmul.f32 %v765_v1, %v70_v22 }
  0x3f   :  { %v727_v37 = vpack.c.bf16 %v272_v24, %v272_v24  ;;  %v728_v38 = vpack.c.bf16 %v273_v25, %v273_v25  ;;  %v729_v39 = vpack.c.bf16 %v274_v26, %v274_v26  ;;  %590 = vst.msk [vmem:[%s1348_s3 + $0xc4] sm:$0xf] %vm540_vm0, %v724_v30  ;;  %v142_v43 = vmul.f32 %v765_v1, %v71_v27 }
  0x40   :  { %591 = vst.msk [vmem:[%s1348_s3 + $0xc8] sm:$0xf] %vm540_vm0, %v725_v31  ;;  %592 = vst.msk [vmem:[%s1348_s3 + $0xcc] sm:$0xf] %vm540_vm0, %v726_v32  ;;  %v730_v42 = vpack.c.bf16 %v275_v33, %v275_v33  ;;  %v143_v44 = vmul.f32 %v765_v1, %v72_v28  ;;  %v144_v45 = vmul.f32 %v765_v1, %v73_v29 }
  0x41   :  { %593 = vst.msk [vmem:[%s1348_s3 + $0xd0] sm:$0xf] %vm540_vm0, %v727_v37  ;;  %594 = vst.msk [vmem:[%s1348_s3 + $0xd4] sm:$0xf] %vm540_vm0, %v728_v38  ;;  %v212_v46 = vadd.f32 %v770_v2, %v141_v40  ;;  %v145_v47 = vmul.f32 %v765_v1, %v74_v34  ;;  %v146_v48 = vmul.f32 %v765_v1, %v75_v35 }
  0x42   :  { %595 = vst.msk [vmem:[%s1348_s3 + $0xd8] sm:$0xf] %vm540_vm0, %v729_v39  ;;  %v147_v49 = vmul.f32 %v765_v1, %v76_v36  ;;  %596 = vst.msk [vmem:[%s1348_s3 + $0xdc] sm:$0xf] %vm540_vm0, %v730_v42  ;;  %v213_v50 = vadd.f32 %v770_v2, %v142_v43  ;;  %v214_v51 = vadd.f32 %v770_v2, %v143_v44 }
  0x43   :  { %v215_v52 = vadd.f32 %v770_v2, %v144_v45  ;;  %v148_v53 = vmul.f32 %v765_v1, %v77_v41  ;;  %v276_v54 = vmax.f32 %v212_v46, 0.0  ;;  %v216_v55 = vadd.f32 %v770_v2, %v145_v47 }
  0x44   :  { %v217_v56 = vadd.f32 %v770_v2, %v146_v48  ;;  %v218_v57 = vadd.f32 %v770_v2, %v147_v49  ;;  %v277_v58 = vmax.f32 %v213_v50, 0.0  ;;  %v278_v59 = vmax.f32 %v214_v51, 0.0 }
  0x45   :  { %v279_v60 = vmax.f32 %v215_v52, 0.0  ;;  %v219_v61 = vadd.f32 %v770_v2, %v148_v53  ;;  %v731_v62 = vpack.c.bf16 %v276_v54, %v276_v54  ;;  %v280_v63 = vmax.f32 %v216_v55, 0.0 }
  0x46   :  { %v281_v0 = vmax.f32 %v217_v56, 0.0  ;;  %v282_v3 = vmax.f32 %v218_v57, 0.0  ;;  %v732_v4 = vpack.c.bf16 %v277_v58, %v277_v58  ;;  %v733_v5 = vpack.c.bf16 %v278_v59, %v278_v59 }
  0x47   :  { %v734_v6 = vpack.c.bf16 %v279_v60, %v279_v60  ;;  %v283_v1 = vmax.f32 %v219_v61, 0.0  ;;  %597 = vst.msk [vmem:[%s1348_s3 + $0xe0] sm:$0xf] %vm540_vm0, %v731_v62  ;;  %v735_v7 = vpack.c.bf16 %v280_v63, %v280_v63 }
  0x48   :  { %v736_v8 = vpack.c.bf16 %v281_v0, %v281_v0  ;;  %v737_v9 = vpack.c.bf16 %v282_v3, %v282_v3  ;;  %598 = vst.msk [vmem:[%s1348_s3 + $0xe4] sm:$0xf] %vm540_vm0, %v732_v4  ;;  %599 = vst.msk [vmem:[%s1348_s3 + $0xe8] sm:$0xf] %vm540_vm0, %v733_v5 }
  0x49   :  { %600 = vst.msk [vmem:[%s1348_s3 + $0xec] sm:$0xf] %vm540_vm0, %v734_v6  ;;  %v738_v2 = vpack.c.bf16 %v283_v1, %v283_v1  ;;  %601 = vst.msk [vmem:[%s1348_s3 + $0xf0] sm:$0xf] %vm540_vm0, %v735_v7 }
  0x4a   :  { %602 = vst.msk [vmem:[%s1348_s3 + $0xf4] sm:$0xf] %vm540_vm0, %v736_v8  ;;  %603 = vst.msk [vmem:[%s1348_s3 + $0xf8] sm:$0xf] %vm540_vm0, %v737_v9 }
  0x4b   :  { %604 = vst.msk [vmem:[%s1348_s3 + $0xfc] sm:$0xf] %vm540_vm0, %v738_v2 }

// kernel: mnist_encoder_forward.13
= control target key start
LH: loop header
LB: loop body
LE: loop exit
PB: predicated region body
PF: predicated region fallthrough
CT: control target
= control target key end

     0   :  { %vm156_vm0 = vcmask 125952   ;;  %s385_s0 = inlined_call_operand.vmem [shape: f32[128,16], index: 0, kind: input, shape index: {}]   ;;  %s386_s1 = inlined_call_operand.vmem [shape: f32[1,16], index: 1, kind: input, shape index: {}]   ;;  %s387_s2 = inlined_call_operand.vmem [shape: f32[1,16], index: 2, kind: input, shape index: {}]   ;;  %s388_s3 = inlined_call_operand.vmem [shape: bf16[128,16], index: 3, kind: output, shape index: {}]  }
   0x1   :  { %v14_v0 = vld [vmem:[%s385_s0] sm:$0xff]  ;;  %v15_v4 = vld [vmem:[%s385_s0 + $0x8] sm:$0xff]  ;;  %v16_v5 = vld [vmem:[%s385_s0 + $0x10] sm:$0xff] }
   0x2   :  { %v237_v1 = vld [vmem:[%s386_s1] ss:$0 sm:$0xff]  ;;  %v17_v6 = vld [vmem:[%s385_s0 + $0x18] sm:$0xff]  ;;  %v19_v11 = vld [vmem:[%s385_s0 + $0x28] sm:$0xff] }
   0x3   :  { %v242_v2 = vld [vmem:[%s387_s2] ss:$0 sm:$0xff]  ;;  %v37_v3 = vmul.f32 %v237_v1, %v14_v0  ;;  %v38_v7 = vmul.f32 %v237_v1, %v15_v4  ;;  %v39_v8 = vmul.f32 %v237_v1, %v16_v5  ;;  %v40_v9 = vmul.f32 %v237_v1, %v17_v6  ;;  %v20_v12 = vld [vmem:[%s385_s0 + $0x30] sm:$0xff]  ;;  %v21_v17 = vld [vmem:[%s385_s0 + $0x38] sm:$0xff] }
   0x4   :  { %v18_v10 = vld [vmem:[%s385_s0 + $0x20] sm:$0xff]  ;;  %v42_v15 = vmul.f32 %v237_v1, %v19_v11  ;;  %v43_v16 = vmul.f32 %v237_v1, %v20_v12  ;;  %v44_v21 = vmul.f32 %v237_v1, %v21_v17  ;;  %v23_v35 = vld [vmem:[%s385_s0 + $0x48] sm:$0xff]  ;;  %v24_v36 = vld [vmem:[%s385_s0 + $0x50] sm:$0xff] }
   0x5   :  { %v60_v13 = vadd.f32 %v242_v2, %v37_v3  ;;  %v41_v14 = vmul.f32 %v237_v1, %v18_v10  ;;  %v61_v18 = vadd.f32 %v242_v2, %v38_v7  ;;  %v62_v19 = vadd.f32 %v242_v2, %v39_v8  ;;  %v22_v30 = vld [vmem:[%s385_s0 + $0x40] sm:$0xff]  ;;  %v25_v37 = vld [vmem:[%s385_s0 + $0x58] sm:$0xff]  ;;  %v27_v43 = vld [vmem:[%s385_s0 + $0x68] sm:$0xff] }
   0x6   :  { %v63_v20 = vadd.f32 %v242_v2, %v40_v9  ;;  %v65_v24 = vadd.f32 %v242_v2, %v42_v15  ;;  %v66_v25 = vadd.f32 %v242_v2, %v43_v16  ;;  %v67_v29 = vadd.f32 %v242_v2, %v44_v21  ;;  %v26_v42 = vld [vmem:[%s385_s0 + $0x60] sm:$0xff]  ;;  %v28_v44 = vld [vmem:[%s385_s0 + $0x70] sm:$0xff]  ;;  %v29_v49 = vld [vmem:[%s385_s0 + $0x78] sm:$0xff] }
   0x7   :  { %v76_v22 = vmax.f32 %v60_v13, 0.0  ;;  %v64_v23 = vadd.f32 %v242_v2, %v41_v14  ;;  %v77_v26 = vmax.f32 %v61_v18, 0.0  ;;  %v78_v27 = vmax.f32 %v62_v19, 0.0 }
   0x8   :  { %v79_v28 = vmax.f32 %v63_v20, 0.0  ;;  %v81_v33 = vmax.f32 %v65_v24, 0.0  ;;  %v82_v34 = vmax.f32 %v66_v25, 0.0  ;;  %v83_v41 = vmax.f32 %v67_v29, 0.0 }
   0x9   :  { %v195_v31 = vpack.c.bf16 %v76_v22, %v76_v22  ;;  %v80_v32 = vmax.f32 %v64_v23, 0.0  ;;  %v196_v38 = vpack.c.bf16 %v77_v26, %v77_v26  ;;  %v197_v39 = vpack.c.bf16 %v78_v27, %v78_v27 }
   0xa   :  { %v198_v40 = vpack.c.bf16 %v79_v28, %v79_v28  ;;  %v200_v46 = vpack.c.bf16 %v81_v33, %v81_v33  ;;  %v201_v47 = vpack.c.bf16 %v82_v34, %v82_v34  ;;  %v45_v48 = vmul.f32 %v237_v1, %v22_v30 }
   0xb   :  { %157 = vst.msk [vmem:[%s388_s3] sm:$0xf] %vm156_vm0, %v195_v31  ;;  %v199_v45 = vpack.c.bf16 %v80_v32, %v80_v32  ;;  %158 = vst.msk [vmem:[%s388_s3 + $0x4] sm:$0xf] %vm156_vm0, %v196_v38  ;;  %v202_v50 = vpack.c.bf16 %v83_v41, %v83_v41  ;;  %v46_v51 = vmul.f32 %v237_v1, %v23_v35 }
   0xc   :  { %159 = vst.msk [vmem:[%s388_s3 + $0x8] sm:$0xf] %vm156_vm0, %v197_v39  ;;  %160 = vst.msk [vmem:[%s388_s3 + $0xc] sm:$0xf] %vm156_vm0, %v198_v40  ;;  %v47_v52 = vmul.f32 %v237_v1, %v24_v36  ;;  %v48_v53 = vmul.f32 %v237_v1, %v25_v37  ;;  %v68_v54 = vadd.f32 %v242_v2, %v45_v48 }
   0xd   :  { %161 = vst.msk [vmem:[%s388_s3 + $0x10] sm:$0xf] %vm156_vm0, %v199_v45  ;;  %162 = vst.msk [vmem:[%s388_s3 + $0x14] sm:$0xf] %vm156_vm0, %v200_v46  ;;  %v49_v55 = vmul.f32 %v237_v1, %v26_v42  ;;  %v50_v56 = vmul.f32 %v237_v1, %v27_v43  ;;  %v51_v57 = vmul.f32 %v237_v1, %v28_v44 }
   0xe   :  { %163 = vst.msk [vmem:[%s388_s3 + $0x18] sm:$0xf] %vm156_vm0, %v201_v47  ;;  %164 = vst.msk [vmem:[%s388_s3 + $0x1c] sm:$0xf] %vm156_vm0, %v202_v50  ;;  %v69_v58 = vadd.f32 %v242_v2, %v46_v51  ;;  %v70_v59 = vadd.f32 %v242_v2, %v47_v52  ;;  %v71_v60 = vadd.f32 %v242_v2, %v48_v53  ;;  %v84_v62 = vmax.f32 %v68_v54, 0.0 }
   0xf   :  { %v52_v61 = vmul.f32 %v237_v1, %v29_v49  ;;  %v72_v63 = vadd.f32 %v242_v2, %v49_v55  ;;  %v73_v0 = vadd.f32 %v242_v2, %v50_v56  ;;  %v74_v3 = vadd.f32 %v242_v2, %v51_v57 }
  0x10   :  { %v85_v4 = vmax.f32 %v69_v58, 0.0  ;;  %v86_v5 = vmax.f32 %v70_v59, 0.0  ;;  %v87_v6 = vmax.f32 %v71_v60, 0.0  ;;  %v203_v8 = vpack.c.bf16 %v84_v62, %v84_v62 }
  0x11   :  { %v75_v7 = vadd.f32 %v242_v2, %v52_v61  ;;  %v88_v9 = vmax.f32 %v72_v63, 0.0  ;;  %v89_v10 = vmax.f32 %v73_v0, 0.0  ;;  %v90_v11 = vmax.f32 %v74_v3, 0.0 }
  0x12   :  { %v204_v12 = vpack.c.bf16 %v85_v4, %v85_v4  ;;  %v205_v13 = vpack.c.bf16 %v86_v5, %v86_v5  ;;  %v206_v14 = vpack.c.bf16 %v87_v6, %v87_v6  ;;  %165 = vst.msk [vmem:[%s388_s3 + $0x20] sm:$0xf] %vm156_vm0, %v203_v8 }
  0x13   :  { %v91_v1 = vmax.f32 %v75_v7, 0.0  ;;  %v207_v15 = vpack.c.bf16 %v88_v9, %v88_v9  ;;  %v208_v16 = vpack.c.bf16 %v89_v10, %v89_v10  ;;  %v209_v17 = vpack.c.bf16 %v90_v11, %v90_v11 }
  0x14   :  { %166 = vst.msk [vmem:[%s388_s3 + $0x24] sm:$0xf] %vm156_vm0, %v204_v12  ;;  %167 = vst.msk [vmem:[%s388_s3 + $0x28] sm:$0xf] %vm156_vm0, %v205_v13 }
  0x15   :  { %168 = vst.msk [vmem:[%s388_s3 + $0x2c] sm:$0xf] %vm156_vm0, %v206_v14  ;;  %v210_v2 = vpack.c.bf16 %v91_v1, %v91_v1  ;;  %169 = vst.msk [vmem:[%s388_s3 + $0x30] sm:$0xf] %vm156_vm0, %v207_v15 }
  0x16   :  { %170 = vst.msk [vmem:[%s388_s3 + $0x34] sm:$0xf] %vm156_vm0, %v208_v16  ;;  %171 = vst.msk [vmem:[%s388_s3 + $0x38] sm:$0xf] %vm156_vm0, %v209_v17 }
  0x17   :  { %172 = vst.msk [vmem:[%s388_s3 + $0x3c] sm:$0xf] %vm156_vm0, %v210_v2 }

// kernel: mnist_encoder_forward.12
= control target key start
LH: loop header
LB: loop body
LE: loop exit
PB: predicated region body
PF: predicated region fallthrough
CT: control target
= control target key end

     0   :  { %s2044_s14 = smov 8   ;;  %s3600_s15 = smov 16   ;;  %vm438_vm0 = vcmask 64512   ;;  %vm451_vm1 = vcmask 130048   ;;  %vm460_vm2 = vcmask 195584   ;;  %vm469_vm3 = vcmask 261120   ;;  %s3576_s2 = inlined_call_operand.vmem [shape: bf16[2,72,8], index: 2, kind: input, shape index: {}]   ;;  %s3577_s1 = inlined_call_operand.vmem [shape: bf16[2,72,8], index: 1, kind: input, shape index: {}]   ;;  %s3578_s3 = inlined_call_operand.vmem [shape: bf16[2,72,8], index: 3, kind: input, shape index: {}]   ;;  %s3579_s4 = inlined_call_operand.vmem [shape: bf16[2,72,8], index: 4, kind: input, shape index: {}]   ;;  %s3580_s6 = inlined_call_operand.vmem [shape: bf16[2,72,8], index: 6, kind: input, shape index: {}]   ;;  %s3581_s0 = inlined_call_operand.vmem [shape: bf16[2,72,8], index: 0, kind: input, shape index: {}]   ;;  %s3582_s5 = inlined_call_operand.vmem [shape: bf16[2,72,8], index: 5, kind: input, shape index: {}]   ;;  %s3583_s7 = inlined_call_operand.vmem [shape: bf16[2,72,8], index: 7, kind: input, shape index: {}]   ;;  %s3584_s8 = inlined_call_operand.vmem [shape: bf16[128,16], index: 8, kind: input, shape index: {}]   ;;  %s3585_s9 = inlined_call_operand.vmem [shape: f32[1,16], index: 9, kind: input, shape index: {}]   ;;  %s3586_s10 = inlined_call_operand.vmem [shape: f32[128,16], index: 10, kind: output, shape index: {0}]   ;;  %s3587_s11 = inlined_call_operand.vmem [shape: f32[2,16], index: 11, kind: output, shape index: {1}]  }
   0x1   :  { %v46_v0 = vld [vmem:[%s3576_s2] sm:$0xf]  ;;  %v2125_v1 = vld [vmem:[%s3576_s2 + $0x4] sm:$0xf]  ;;  %v2130_v2 = vld [vmem:[%s3576_s2 + $0x8] sm:$0xf] }
   0x2   :  { %v1592_v3 = vcombine.low %v46_v0, %v2125_v1  ;;  %v54_v4 = vld [vmem:[%s3577_s1] sm:$0xf]  ;;  %v2139_v5 = vld [vmem:[%s3577_s1 + $0x4] sm:$0xf]  ;;  %v2144_v6 = vld [vmem:[%s3577_s1 + $0x8] sm:$0xf]  ;;  %v1624_v57 = vcombine.low %v2125_v1, %v2130_v2 }
   0x3   :  { %v1596_v7 = vcombine.low %v54_v4, %v2139_v5  ;;  %v2150_v8 = vld [vmem:[%s3576_s2 + $0xc] sm:$0xf]  ;;  %v62_v12 = vld [vmem:[%s3578_s3] sm:$0xf]  ;;  %v2169_v13 = vld [vmem:[%s3578_s3 + $0x4] sm:$0xf] }
   0x4   :  { %v2155_v9 = vld [vmem:[%s3577_s1 + $0xc] sm:$0xf]  ;;  %150 = vrot.lane.b32.xlu0 %v1592_v3, %s2044_s14  ;;  %v1593_v10 = vcombine.low %v2130_v2, %v2150_v8  ;;  %v2174_v14 = vld [vmem:[%s3578_s3 + $0x8] sm:$0xf]  ;;  %v1600_v16 = vcombine.low %v62_v12, %v2169_v13  ;;  %v70_v18 = vld [vmem:[%s3579_s4] sm:$0xf] }
   0x5   :  { %178 = vrot.lane.b32.xlu1 %v1596_v7, %s3600_s15  ;;  %v1597_v11 = vcombine.low %v2144_v6, %v2155_v9  ;;  %v2179_v15 = vld [vmem:[%s3578_s3 + $0xc] sm:$0xf]  ;;  %v2192_v19 = vld [vmem:[%s3579_s4 + $0x4] sm:$0xf]  ;;  %v2197_v20 = vld [vmem:[%s3579_s4 + $0x8] sm:$0xf] }
   0x6   :  { %v1601_v17 = vcombine.low %v2174_v14, %v2179_v15  ;;  %v2202_v21 = vld [vmem:[%s3579_s4 + $0xc] sm:$0xf]  ;;  %s3594_s13 = smov 24   ;;  %v1604_v22 = vcombine.low %v70_v18, %v2192_v19  ;;  %v78_v23 = vld [vmem:[%s3580_s6] sm:$0xf]  ;;  %s3590_s28 = smov 32  }
   0x7   :  { %v1605_v24 = vcombine.low %v2197_v20, %v2202_v21  ;;  %v2215_v25 = vld [vmem:[%s3580_s6 + $0x4] sm:$0xf]  ;;  %v2220_v26 = vld [vmem:[%s3581_s0 + $0x8] sm:$0xf]  ;;  %v2225_v27 = vld [vmem:[%s3581_s0 + $0xc] sm:$0xf] }
   0x8   :  { %152 = vrot.lane.b32.xlu0 %v1593_v10, %s2044_s14  ;;  %v2230_v28 = vld [vmem:[%s3580_s6 + $0x8] sm:$0xf]  ;;  %v2235_v29 = vld [vmem:[%s3580_s6 + $0xc] sm:$0xf]  ;;  %v1608_v31 = vcombine.low %v78_v23, %v2215_v25  ;;  %v86_v33 = vld [vmem:[%s3582_s5] sm:$0xf]  ;;  %v1628_v10 = vcombine.low %v2139_v5, %v2144_v6 }
   0x9   :  { %180 = vrot.lane.b32.xlu1 %v1597_v11, %s3600_s15  ;;  %v1609_v32 = vcombine.low %v2230_v28, %v2235_v29  ;;  %v2250_v34 = vld [vmem:[%s3582_s5 + $0x4] sm:$0xf]  ;;  %v2255_v35 = vld [vmem:[%s3582_s5 + $0x8] sm:$0xf]  ;;  %v2260_v36 = vld [vmem:[%s3582_s5 + $0xc] sm:$0xf] }
   0xa   :  { %s3588_s21 = smov 40   ;;  %v1612_v37 = vcombine.low %v86_v33, %v2250_v34  ;;  %v1613_v38 = vcombine.low %v2255_v35, %v2260_v36  ;;  %v94_v39 = vld [vmem:[%s3583_s7] sm:$0xf]  ;;  %v2273_v40 = vld [vmem:[%s3583_s7 + $0x4] sm:$0xf]  ;;  %s2049_s19 = smov 48  }
   0xb   :  { %v2278_v41 = vld [vmem:[%s3583_s7 + $0x8] sm:$0xf]  ;;  %v2283_v42 = vld [vmem:[%s3583_s7 + $0xc] sm:$0xf]  ;;  %v2288_v43 = vld [vmem:[%s3581_s0 + $0x10] sm:$0xf]  ;;  %v1616_v45 = vcombine.low %v94_v39, %v2273_v40 }
   0xc   :  { %206 = vrot.lane.b32.xlu0 %v1600_v16, %s3594_s13  ;;  %v2293_v44 = vld [vmem:[%s3581_s0 + $0x14] sm:$0xf]  ;;  %v2300_v46 = vld [vmem:[%s3581_s0 + $0x18] sm:$0xf]  ;;  %v2307_v48 = vld [vmem:[%s3581_s0 + $0x1c] sm:$0xf]  ;;  %v1617_v49 = vcombine.low %v2278_v41, %v2283_v42  ;;  %v1621_v56 = vcombine.low %v2225_v27, %v2288_v43 }
   0xd   :  { %208 = vrot.lane.b32.xlu1 %v1601_v17, %s3594_s13  ;;  %v2315_v50 = vld [vmem:[%s3581_s0 + $0x4] sm:$0xf]  ;;  %v50_v52 = vld [vmem:[%s3576_s2 + $0x10] sm:$0xf]  ;;  %v2325_v53 = vld [vmem:[%s3576_s2 + $0x14] sm:$0xf] }
   0xe   :  { %s2050_s16 = smov 56   ;;  %v1620_v54 = vcombine.low %v2315_v50, %v2220_v26  ;;  %v1594_v55 = vcombine.low %v50_v52, %v2325_v53  ;;  %s2051_s17 = smov 64   ;;  %v2341_v58 = vld [vmem:[%s3576_s2 + $0x18] sm:$0xf]  ;;  %v2346_v59 = vld [vmem:[%s3576_s2 + $0x1c] sm:$0xf]  ;;  %v1625_v2 = vcombine.low %v2150_v8, %v50_v52 }
   0xf   :  { %v58_v60 = vld [vmem:[%s3577_s1 + $0x10] sm:$0xf]  ;;  %v2354_v61 = vld [vmem:[%s3577_s1 + $0x14] sm:$0xf]  ;;  %v1595_v62 = vcombine.low %v2341_v58, %v2346_v59  ;;  %s2052_s29 = smov 72   ;;  %s3598_s24 = smov 80  }
  0x10   :  { %234 = vrot.lane.b32.xlu0 %v1604_v22, %s3590_s28  ;;  %v1598_v63 = vcombine.low %v58_v60, %v2354_v61  ;;  %v2364_v0 = vld [vmem:[%s3581_s0 + $0x2c] sm:$0xf]  ;;  %v2369_v1 = vld [vmem:[%s3581_s0 + $0x30] sm:$0xf]  ;;  %v2376_v3 = vld [vmem:[%s3581_s0 + $0x34] sm:$0xf]  ;;  %v1629_v18 = vcombine.low %v2155_v9, %v58_v60  ;;  %v1632_v22 = vcombine.low %v2169_v13, %v2174_v14 }
  0x11   :  { %236 = vrot.lane.b32.xlu1 %v1605_v24, %s3590_s28  ;;  %3608 = vst [vmem:[#allocation3_spill] sm:$0xff] %v2369_v1  ;;  %3609 = vst [vmem:[#allocation4_spill] sm:$0xff] %v2376_v3  ;;  %v2381_v4 = vld [vmem:[%s3581_s0 + $0x38] sm:$0xf]  ;;  %v2396_v11 = vld [vmem:[%s3577_s1 + $0x1c] sm:$0xf] }
  0x12   :  { %v2391_v8 = vld [vmem:[%s3577_s1 + $0x18] sm:$0xf]  ;;  %v66_v16 = vld [vmem:[%s3578_s3 + $0x10] sm:$0xf]  ;;  %v2406_v5 = vld [vmem:[%s3578_s3 + $0x14] sm:$0xf] }
  0x13   :  { %v1599_v6 = vcombine.low %v2391_v8, %v2396_v11  ;;  %v1602_v17 = vcombine.low %v66_v16, %v2406_v5  ;;  %v2421_v23 = vld [vmem:[%s3578_s3 + $0x18] sm:$0xf]  ;;  %v2426_v24 = vld [vmem:[%s3578_s3 + $0x1c] sm:$0xf]  ;;  %v2434_v9 = vld [vmem:[%s3579_s4 + $0x14] sm:$0xf] }
  0x14   :  { %262 = vrot.lane.b32.xlu0 %v1608_v31, %s3588_s21  ;;  %v74_v31 = vld [vmem:[%s3579_s4 + $0x10] sm:$0xf]  ;;  %v1603_v13 = vcombine.low %v2421_v23, %v2426_v24  ;;  %s3596_s23 = smov 88   ;;  %v2457_v39 = vld [vmem:[%s3579_s4 + $0x18] sm:$0xf]  ;;  %s3592_s27 = smov 96  }
  0x15   :  { %264 = vrot.lane.b32.xlu1 %v1609_v32, %s3588_s21  ;;  %v1606_v14 = vcombine.low %v74_v31, %v2434_v9  ;;  %v1633_v32 = vcombine.low %v2179_v15, %v66_v16  ;;  %v82_v33 = vld [vmem:[%s3580_s6 + $0x10] sm:$0xf]  ;;  %v2462_v15 = vld [vmem:[%s3579_s4 + $0x1c] sm:$0xf]  ;;  %v1637_v52 = vcombine.low %v2202_v21, %v74_v31  ;;  %v2496_v21 = vld [vmem:[%s3582_s5 + $0x14] sm:$0xf]  ;;  %v1648_v31 = vcombine.low %v2273_v40, %v2278_v41 }
  0x16   :  { %v2019_v60 = vld [vmem:[%s3584_s8 + $0x28] sm:$0xff]   ;;  %s2056_s25 = smov 104   ;;  %v2522_v16 = vld [vmem:[%s3582_s5 + $0x1c] sm:$0xf]  ;;  %s2057_s12 = smov 112   ;;  %v1622_v41 = vcombine.low %v2293_v44, %v2300_v46  ;;  %vm478_vm4 = vcmask 326656  }
  0x17   :  { %s2058_s30 = smov 120   ;;  %s3611_s18 = smov 96   ;;  %vm487_vm5 = vcmask 392192   ;;  %vm496_vm6 = vcmask 457728   ;;  %vm505_vm7 = vcmask 523264   ;;  %vm514_vm8 = vcmask 588800  }
  0x18   :  { %290 = vrot.lane.b32.xlu0 %v1612_v37, %s2049_s19  ;;  %v1636_v37 = vcombine.low %v2192_v19, %v2197_v20  ;;  %v1607_v19 = vcombine.low %v2457_v39, %v2462_v15  ;;  %s3612_s26 = smov 32   ;;  %vm523_vm9 = vcmask 654336   ;;  %vm532_vm10 = vcmask 719872  }
  0x19   :  { %292 = vrot.lane.b32.xlu1 %v1613_v38, %s2049_s19  ;;  %v2452_v38 = vld [vmem:[%s3580_s6 + $0x14] sm:$0xf]  ;;  %vm541_vm11 = vcmask 785408   ;;  %vm550_vm12 = vcmask 850944   ;;  %vm559_vm13 = vcmask 916480   ;;  %vm568_vm14 = vcmask 982016  }
  0x1a   :  { %v1610_v20 = vcombine.low %v82_v33, %v2452_v38  ;;  %vm1540_vm15 = vcmask 122880  }
  0x1c   :  { %318 = vrot.lane.b32.xlu0 %v1616_v45, %s2050_s16  ;;  %v2009_v45 = vld [vmem:[%s3584_s8 + $0x38] sm:$0xff]  }
  0x1d   :  { %320 = vrot.lane.b32.xlu1 %v1617_v49, %s2050_s16  ;;  %1837 = vmatprep.subr.bf16.mxu0 %v2009_v45  ;;  %v2012_v49 = vld [vmem:[%s3584_s8 + $0x30] sm:$0xff]  }
  0x1e   :  { %1838 = vmatpush3.bf16.msra.mxu0 %v2009_v45  ;;  %1869 = vmatprep.subr.bf16.mxu1 %v2009_v45 }
  0x1f   :  { %1877 = vmatpush3.bf16.msra.mxu1 %v2009_v45  ;;  %1839 = vmatprep.subr.bf16.mxu0 %v2012_v49 }
  0x20   :  { %332 = vrot.lane.b32.xlu0 %v1620_v54, %s2051_s17  ;;  %v90_v54 = vld [vmem:[%s3582_s5 + $0x10] sm:$0xf]  ;;  %1870 = vmatprep.subr.bf16.mxu1 %v2012_v49 }
  0x21   :  { %154 = vrot.lane.b32.xlu1 %v1594_v55, %s2044_s14  ;;  %v2483_v55 = vld [vmem:[%s3580_s6 + $0x18] sm:$0xf] }
  0x22   :  { %1840 = vmatpush3.bf16.msra.mxu0 %v2012_v49 }
  0x23   :  { %1878 = vmatpush3.bf16.msra.mxu1 %v2012_v49  ;;  %1841 = vmatprep.subr.bf16.mxu0 %v2019_v60 }
  0x24   :  { %334 = vrot.lane.b32.xlu0 %v1621_v56, %s2051_s17  ;;  %v1640_v56 = vcombine.low %v2215_v25, %v2230_v28  ;;  %v1614_v28 = vcombine.low %v90_v54, %v2496_v21  ;;  %1871 = vmatprep.subr.bf16.mxu1 %v2019_v60 }
  0x25   :  { %346 = vrot.lane.b32.xlu1 %v1624_v57, %s2052_s29  ;;  %v2491_v57 = vld [vmem:[%s3580_s6 + $0x1c] sm:$0xf] }
  0x26   :  { %v1611_v25 = vcombine.low %v2483_v55, %v2491_v57  ;;  %1842 = vmatpush3.bf16.msra.mxu0 %v2019_v60 }
  0x27   :  { %1879 = vmatpush3.bf16.msra.mxu1 %v2019_v60  ;;  %v1676_v60 = vld [vmem:[%s3577_s1 + $0x24] sm:$0xf] }
  0x28   :  { %156 = vrot.lane.b32.xlu0 %v1595_v62, %s2044_s14  ;;  %v2022_v62 = vld [vmem:[%s3584_s8 + $0x20] sm:$0xff]  }
  0x29   :  { %182 = vrot.lane.b32.xlu1 %v1598_v63, %s3600_s15  ;;  %v1641_v63 = vcombine.low %v2235_v29, %v82_v33  ;;  %1843 = vmatprep.subr.bf16.mxu0 %v2022_v62  ;;  %v98_v29 = vld [vmem:[%s3583_s7 + $0x10] sm:$0xf]  ;;  %v2032_v33 = vld [vmem:[%s3584_s8] sm:$0xff]  }
  0x2a   :  { %1844 = vmatpush3.bf16.msra.mxu0 %v2022_v62  ;;  %1872 = vmatprep.subr.bf16.mxu1 %v2022_v62 }
  0x2b   :  { %1880 = vmatpush3.bf16.msra.mxu1 %v2022_v62  ;;  %v1634_v62 = vcombine.low %v2406_v5, %v2421_v23 }
  0x2c   :  { %348 = vrot.lane.b32.xlu0 %v1625_v2, %s2052_s29  ;;  %v1644_v2 = vcombine.low %v2250_v34, %v2255_v35  ;;  %v2025_v34 = vld [vmem:[%s3584_s8 + $0x18] sm:$0xff]  }
  0x2d   :  { %360 = vrot.lane.b32.xlu1 %v1628_v10, %s3598_s24  ;;  %v2517_v10 = vld [vmem:[%s3582_s5 + $0x18] sm:$0xf]  ;;  %1845 = vmatprep.subr.bf16.mxu0 %v2025_v34 }
  0x2e   :  { %v1615_v35 = vcombine.low %v2517_v10, %v2522_v16  ;;  %1846 = vmatpush3.bf16.msra.mxu0 %v2025_v34  ;;  %1873 = vmatprep.subr.bf16.mxu1 %v2025_v34 }
  0x2f   :  { %1881 = vmatpush3.bf16.msra.mxu1 %v2025_v34  ;;  %v105_v34 = vld [vmem:[%s3578_s3 + $0x20] sm:$0xf] }
  0x30   :  { %184 = vrot.lane.b32.xlu0 %v1599_v6, %s3600_s15  ;;  %v2530_v6 = vld [vmem:[%s3583_s7 + $0x14] sm:$0xf] }
  0x31   :  { %210 = vrot.lane.b32.xlu1 %v1602_v17, %s3594_s13  ;;  %v1618_v17 = vcombine.low %v98_v29, %v2530_v6 }
  0x34   :  { %362 = vrot.lane.b32.xlu0 %v1629_v18, %s3598_s24  ;;  %v2026_v18 = vld [vmem:[%s3584_s8 + $0x10] sm:$0xff]  }
  0x35   :  { %374 = vrot.lane.b32.xlu1 %v1632_v22, %s3596_s23  ;;  %v1645_v22 = vcombine.low %v2260_v36, %v90_v54  ;;  %1847 = vmatprep.subr.bf16.mxu0 %v2026_v18  ;;  %v2029_v36 = vld [vmem:[%s3584_s8 + $0x8] sm:$0xff]   ;;  %s3614_s8 = smov 16  }
  0x36   :  { %1848 = vmatpush3.bf16.msra.mxu0 %v2026_v18  ;;  %1874 = vmatprep.subr.bf16.mxu1 %v2026_v18 }
  0x37   :  { %1882 = vmatpush3.bf16.msra.mxu1 %v2026_v18  ;;  %1849 = vmatprep.subr.bf16.mxu0 %v2029_v36  ;;  %v2663_v18 = vld [vmem:[%s3578_s3 + $0x2c] sm:$0xf] }
  0x38   :  { %212 = vrot.lane.b32.xlu0 %v1603_v13, %s3594_s13  ;;  %v2551_v13 = vld [vmem:[%s3583_s7 + $0x18] sm:$0xf]  ;;  %1875 = vmatprep.subr.bf16.mxu1 %v2029_v36 }
  0x39   :  { %238 = vrot.lane.b32.xlu1 %v1606_v14, %s3590_s28  ;;  %v2556_v14 = vld [vmem:[%s3583_s7 + $0x1c] sm:$0xf] }
  0x3a   :  { %v1619_v40 = vcombine.low %v2551_v13, %v2556_v14  ;;  %1850 = vmatpush3.bf16.msra.mxu0 %v2029_v36 }
  0x3b   :  { %1883 = vmatpush3.bf16.msra.mxu1 %v2029_v36  ;;  %1851 = vmatprep.subr.bf16.mxu0 %v2032_v33  ;;  %v106_v36 = vld [vmem:[%s3579_s4 + $0x20] sm:$0xf] }
  0x3c   :  { %376 = vrot.lane.b32.xlu0 %v1633_v32, %s3596_s23  ;;  %v102_v32 = vld [vmem:[%s3581_s0 + $0x20] sm:$0xf]  ;;  %1876 = vmatprep.subr.bf16.mxu1 %v2032_v33 }
  0x3d   :  { %388 = vrot.lane.b32.xlu1 %v1636_v37, %s3592_s27  ;;  %v1649_v37 = vcombine.low %v2283_v42, %v98_v29  ;;  %v1623_v45 = vcombine.low %v2307_v48, %v102_v32  ;;  %v1626_v42 = vcombine.low %v2325_v53, %v2341_v58  ;;  %v2601_v53 = vld [vmem:[%s3576_s2 + $0x2c] sm:$0xf]  ;;  %v2606_v58 = vld [vmem:[%s3576_s2 + $0x30] sm:$0xf]  ;;  %v1684_v29 = vld [vmem:[%s3578_s3 + $0x24] sm:$0xf]  ;;  %v1639_v32 = vcombine.low %v2462_v15, %v106_v36 }
  0x3e   :  { %1852 = vmatpush3.bf16.msra.mxu0 %v2032_v33  ;;  %v1700_v15 = vld [vmem:[%s3580_s6 + $0x24] sm:$0xf] }
  0x3f   :  { %1884 = vmatpush3.bf16.msra.mxu1 %v2032_v33  ;;  %v1642_v33 = vcombine.low %v2452_v38, %v2483_v55  ;;  %v2713_v38 = vld [vmem:[%s3580_s6 + $0x28] sm:$0xf] }
  0x40   :  { %240 = vrot.lane.b32.xlu0 %v1607_v19, %s3590_s28  ;;  %v1668_v19 = vld [vmem:[%s3576_s2 + $0x24] sm:$0xf]  ;;  %s3618_s28 = smov 80  }
  0x41   :  { %266 = vrot.lane.b32.xlu1 %v1610_v20, %s3588_s21  ;;  %v2583_v20 = vld [vmem:[%s3576_s2 + $0x28] sm:$0xf] }
  0x42   :  { %v1736_v49 = vcombine.low %v1668_v19, %v2583_v20 }
  0x44   :  { %390 = vrot.lane.b32.xlu0 %v1637_v52, %s3592_s27  ;;  %v103_v52 = vld [vmem:[%s3576_s2 + $0x20] sm:$0xf]  ;;  %s3610_s27 = smov 24  }
  0x45   :  { %402 = vrot.lane.b32.xlu1 %v1640_v56, %s2056_s25  ;;  %v1627_v54 = vcombine.low %v2346_v59, %v103_v52  ;;  %v1630_v56 = vcombine.low %v2354_v61, %v2391_v8  ;;  %v2614_v59 = vld [vmem:[%s3577_s1 + $0x28] sm:$0xf]  ;;  %v1737_v61 = vcombine.low %v2601_v53, %v2606_v58  ;;  %v107_v52 = vld [vmem:[%s3580_s6 + $0x20] sm:$0xf] }
  0x46   :  { %v1740_v8 = vcombine.low %v1676_v60, %v2614_v59  ;;  %v1643_v60 = vcombine.low %v2491_v57, %v107_v52  ;;  %v1708_v57 = vld [vmem:[%s3582_s5 + $0x24] sm:$0xf] }
  0x48   :  { %268 = vrot.lane.b32.xlu0 %v1611_v25, %s3588_s21  ;;  %v104_v25 = vld [vmem:[%s3577_s1 + $0x20] sm:$0xf] }
  0x49   :  { %294 = vrot.lane.b32.xlu1 %v1614_v28, %s2049_s19  ;;  %v1631_v28 = vcombine.low %v2396_v11, %v104_v25  ;;  %v2645_v11 = vld [vmem:[%s3578_s3 + $0x28] sm:$0xf]  ;;  %v2742_v25 = vld [vmem:[%s3580_s6 + $0x30] sm:$0xf] }
  0x4a   :  { %v1744_v23 = vcombine.low %v1684_v29, %v2645_v11 }
  0x4c   :  { %404 = vrot.lane.b32.xlu0 %v1641_v63, %s2056_s25  ;;  %v2632_v63 = vld [vmem:[%s3577_s1 + $0x2c] sm:$0xf] }
  0x4d   :  { %416 = vrot.lane.b32.xlu1 %v1644_v2, %s2057_s12  ;;  %v2637_v2 = vld [vmem:[%s3577_s1 + $0x30] sm:$0xf] }
  0x4e   :  { %v1741_v5 = vcombine.low %v2632_v63, %v2637_v2 }
  0x50   :  { %296 = vrot.lane.b32.xlu0 %v1615_v35, %s2049_s19  ;;  %v1635_v35 = vcombine.low %v2426_v24, %v105_v34  ;;  %v2676_v24 = vld [vmem:[%s3579_s4 + $0x28] sm:$0xf] }
  0x51   :  { %322 = vrot.lane.b32.xlu1 %v1618_v17, %s2050_s16  ;;  %v1638_v17 = vcombine.low %v2434_v9, %v2457_v39 }
  0x54   :  { %418 = vrot.lane.b32.xlu0 %v1645_v22, %s2057_s12  ;;  %v2668_v22 = vld [vmem:[%s3578_s3 + $0x30] sm:$0xf] }
  0x55   :  { %430 = vrot.lane.b32.xlu1 %v1648_v31, %s2058_s30  ;;  %v1692_v31 = vld [vmem:[%s3579_s4 + $0x24] sm:$0xf]  ;;  %v1745_v9 = vcombine.low %v2663_v18, %v2668_v22 }
  0x56   :  { %v1748_v39 = vcombine.low %v1692_v31, %v2676_v24  ;;  %v2776_v31 = vld [vmem:[%s3582_s5 + $0x2c] sm:$0xf] }
  0x58   :  { %324 = vrot.lane.b32.xlu0 %v1619_v40, %s2050_s16 }
  0x59   :  { %336 = vrot.lane.b32.xlu1 %v1622_v41, %s2051_s17 }
  0x5c   :  { %432 = vrot.lane.b32.xlu0 %v1649_v37, %s2058_s30  ;;  %v2698_v37 = vld [vmem:[%s3579_s4 + $0x2c] sm:$0xf] }
  0x5d   :  { %338 = vrot.lane.b32.xlu1 %v1623_v45, %s2051_s17  ;;  %v2703_v45 = vld [vmem:[%s3579_s4 + $0x30] sm:$0xf] }
  0x60   :  { %350 = vrot.lane.b32.xlu0 %v1626_v42, %s2052_s29  ;;  %v1749_v42 = vcombine.low %v2698_v37, %v2703_v45 }
  0x61   :  { %733 = vrot.lane.b32.xlu1 %v1736_v49, %s2044_s14  ;;  %v1752_v49 = vcombine.low %v1700_v15, %v2713_v38 }
  0x64   :  { %352 = vrot.lane.b32.xlu0 %v1627_v54, %s2052_s29 }
  0x65   :  { %364 = vrot.lane.b32.xlu1 %v1630_v56, %s3598_s24 }
  0x68   :  { %735 = vrot.lane.b32.xlu0 %v1737_v61, %s2044_s14  ;;  %v1646_v61 = vcombine.low %v2496_v21, %v2517_v10  ;;  %v2752_v21 = vld [vmem:[%s3582_s5 + $0x28] sm:$0xf] }
  0x69   :  { %761 = vrot.lane.b32.xlu1 %v1740_v8, %s3600_s15  ;;  %v2737_v8 = vld [vmem:[%s3580_s6 + $0x2c] sm:$0xf]  ;;  %v1756_v29 = vcombine.low %v1708_v57, %v2752_v21  ;;  %v2825_v57 = vld [vmem:[%s3581_s0 + $0x28] sm:$0xf] }
  0x6c   :  { %366 = vrot.lane.b32.xlu0 %v1631_v28, %s3598_s24  ;;  %s3613_s24 = smov 40  }
  0x6d   :  { %378 = vrot.lane.b32.xlu1 %v1634_v62, %s3596_s23  ;;  %v1753_v62 = vcombine.low %v2737_v8, %v2742_v25 }
  0x70   :  { %763 = vrot.lane.b32.xlu0 %v1741_v5, %s3600_s15  ;;  %v108_v5 = vld [vmem:[%s3582_s5 + $0x20] sm:$0xf] }
  0x71   :  { %789 = vrot.lane.b32.xlu1 %v1744_v23, %s3610_s27 }
  0x74   :  { %380 = vrot.lane.b32.xlu0 %v1635_v35, %s3596_s23  ;;  %v1647_v35 = vcombine.low %v2522_v16, %v108_v5  ;;  %v1716_v16 = vld [vmem:[%s3583_s7 + $0x24] sm:$0xf]  ;;  %s3622_s23 = smov 88  }
  0x75   :  { %392 = vrot.lane.b32.xlu1 %v1638_v17, %s3611_s18  ;;  %v1650_v17 = vcombine.low %v2530_v6, %v2551_v13  ;;  %v2791_v6 = vld [vmem:[%s3583_s7 + $0x28] sm:$0xf] }
  0x76   :  { %v2686_v40 = vpop.permute.xlu0 %150 }
  0x77   :  { %v2688_v41 = vpop.permute.xlu1 %178 }
  0x78   :  { %791 = vrot.lane.b32.xlu0 %v1745_v9, %s3610_s27  ;;  %v2781_v9 = vld [vmem:[%s3582_s5 + $0x30] sm:$0xf] }
  0x79   :  { %817 = vrot.lane.b32.xlu1 %v1748_v39, %s3612_s26  ;;  %v1757_v36 = vcombine.low %v2776_v31, %v2781_v9 }
  0x7a   :  { %v2705_v19 = vpop.permute.xlu0 %152 }
  0x7b   :  { %v2715_v55 = vpop.permute.xlu1 %180 }
  0x7c   :  { %394 = vrot.lane.b32.xlu0 %v1639_v32, %s3611_s18  ;;  %v1760_v32 = vcombine.low %v1716_v16, %v2791_v6 }
  0x7d   :  { %406 = vrot.lane.b32.xlu1 %v1642_v33, %s2056_s25  ;;  %v109_v33 = vld [vmem:[%s3583_s7 + $0x20] sm:$0xf] }
  0x7e   :  { %v2725_v54 = vpop.permute.xlu0 %206 }
  0x7f   :  { %v2727_v56 = vpop.permute.xlu1 %208 }
  0x80   :  { %819 = vrot.lane.b32.xlu0 %v1749_v42, %s3612_s26  ;;  %v2808_v42 = vld [vmem:[%s3583_s7 + $0x2c] sm:$0xf] }
  0x81   :  { %845 = vrot.lane.b32.xlu1 %v1752_v49, %s3613_s24  ;;  %v2813_v49 = vld [vmem:[%s3583_s7 + $0x30] sm:$0xf] }
  0x82   :  { %v2744_v28 = vpop.permute.xlu0 %234 }
  0x83   :  { %v2754_v10 = vpop.permute.xlu1 %236 }
  0x84   :  { %408 = vrot.lane.b32.xlu0 %v1643_v60, %s2056_s25  ;;  %v1651_v60 = vcombine.low %v2556_v14, %v109_v33  ;;  %v2835_v14 = vld [vmem:[%s3576_s2 + $0x38] sm:$0xf]  ;;  %v1768_v33 = vcombine.low %v2583_v20, %v2601_v53 }
  0x85   :  { %420 = vrot.lane.b32.xlu1 %v1646_v61, %s2057_s12  ;;  %v1761_v61 = vcombine.low %v2808_v42, %v2813_v49 }
  0x86   :  { %v2764_v23 = vpop.permute.xlu0 %262 }
  0x87   :  { %v2766_v34 = vpop.permute.xlu1 %264 }
  0x88   :  { %847 = vrot.lane.b32.xlu0 %v1753_v62, %s3613_s24 }
  0x89   :  { %873 = vrot.lane.b32.xlu1 %v1756_v29, %s2049_s19  ;;  %v1672_v29 = vld [vmem:[%s3576_s2 + $0x34] sm:$0xf] }
  0x8a   :  { %v2783_v39 = vpop.permute.xlu0 %290  ;;  %v1769_v47 = vcombine.low %v2606_v58, %v1672_v29  ;;  %v3615_v58 = vcombine.low %v2288_v43, %v2293_v44 }
  0x8b   :  { %v2793_v13 = vpop.permute.xlu1 %292 }
  0x8c   :  { %422 = vrot.lane.b32.xlu0 %v1647_v35, %s2057_s12  ;;  %v1764_v35 = vcombine.low %v2825_v57, %v2364_v0 }
  0x8d   :  { %434 = vrot.lane.b32.xlu1 %v1650_v17, %s2058_s30  ;;  %v1738_v17 = vcombine.low %v1672_v29, %v2835_v14 }
  0x8e   :  { %v2803_v15 = vpop.permute.xlu0 %318 }
  0x8f   :  { %v2815_v52 = vpop.permute.xlu1 %320 }
  0x90   :  { %875 = vrot.lane.b32.xlu0 %v1757_v36, %s2049_s19 }
  0x91   :  { %901 = vrot.lane.b32.xlu1 %v1760_v32, %s2050_s16  ;;  %v1765_v32 = vcombine.low %v2369_v1, %v2376_v3  ;;  %v2892_v3 = vld [vmem:[%s3577_s1 + $0x40] sm:$0xf]  ;;  %v2908_v1 = vld [vmem:[%s3578_s3 + $0x38] sm:$0xf] }
  0x92   :  { %v2827_v62 = vpop.permute.xlu0 %332  ;;  %3617 = vst [vmem:[#allocation5_spill] sm:$0xff] %v2908_v1 }
  0x93   :  { %v155_v5 = vpop.permute.xlu1 %154 }
  0x94   :  { %436 = vrot.lane.b32.xlu0 %v1651_v60, %s2058_s30  ;;  %v2855_v60 = vld [vmem:[%s3576_s2 + $0x3c] sm:$0xf]  ;;  %v447_v29 = vsel %vm438_vm0, %v3615_v58, %v155_v5 }
  0x95   :  { %903 = vrot.lane.b32.xlu1 %v1761_v61, %s2050_s16  ;;  %v2860_v61 = vld [vmem:[%s3576_s2 + $0x40] sm:$0xf] }
  0x96   :  { %v2842_v16 = vpop.permute.xlu0 %334  ;;  %v1739_v53 = vcombine.low %v2855_v60, %v2860_v61 }
  0x97   :  { %v2844_v36 = vpop.permute.xlu1 %346 }
  0x98   :  { %915 = vrot.lane.b32.xlu0 %v1764_v35, %s2051_s17  ;;  %v1680_v35 = vld [vmem:[%s3577_s1 + $0x34] sm:$0xf] }
  0x99   :  { %737 = vrot.lane.b32.xlu1 %v1738_v17, %s2044_s14  ;;  %v2868_v17 = vld [vmem:[%s3577_s1 + $0x38] sm:$0xf] }
  0x9a   :  { %v157_v12 = vpop.permute.xlu0 %156  ;;  %v1742_v7 = vcombine.low %v1680_v35, %v2868_v17 }
  0x9b   :  { %v183_v20 = vpop.permute.xlu1 %182 }
  0x9c   :  { %917 = vrot.lane.b32.xlu0 %v1765_v32, %s2051_s17  ;;  %v1772_v32 = vcombine.low %v2614_v59, %v2632_v63  ;;  %v457_v43 = vsel %vm451_vm1, %v447_v29, %v183_v20  ;;  %v1773_v20 = vcombine.low %v2637_v2, %v1680_v35  ;;  %v2930_v29 = vld [vmem:[%s3578_s3 + $0x3c] sm:$0xf]  ;;  %v1696_v2 = vld [vmem:[%s3579_s4 + $0x34] sm:$0xf]  ;;  %v2943_v35 = vld [vmem:[%s3579_s4 + $0x38] sm:$0xf] }
  0x9d   :  { %929 = vrot.lane.b32.xlu1 %v1768_v33, %s2052_s29  ;;  %v2887_v33 = vld [vmem:[%s3577_s1 + $0x3c] sm:$0xf]  ;;  %3619 = vst [vmem:[#allocation6_spill] sm:$0xff] %v2930_v29  ;;  %3621 = vst [vmem:[#allocation8_spill] sm:$0xff] %v2943_v35 }
  0x9e   :  { %v2875_v30 = vpop.permute.xlu0 %348 }
  0x9f   :  { %v2877_v51 = vpop.permute.xlu1 %360 }
  0xa0   :  { %739 = vrot.lane.b32.xlu0 %v1739_v53, %s2044_s14  ;;  %v1688_v53 = vld [vmem:[%s3578_s3 + $0x34] sm:$0xf] }
  0xa1   :  { %765 = vrot.lane.b32.xlu1 %v1742_v7, %s3614_s8  ;;  %v3616_v7 = vcombine.low %v2300_v46, %v2307_v48  ;;  %v1743_v48 = vcombine.low %v2887_v33, %v2892_v3 }
  0xa2   :  { %v185_v63 = vpop.permute.xlu0 %184 }
  0xa3   :  { %v450_v59 = vsel %vm438_vm0, %v3616_v7, %v157_v12  ;;  %v211_v44 = vpop.permute.xlu1 %210  ;;  %v1746_v12 = vcombine.low %v1688_v53, %v2908_v1  ;;  %v1777_v1 = vcombine.low %v2668_v22, %v1688_v53  ;;  %v2977_v53 = vld [vmem:[%s3580_s6 + $0x34] sm:$0xf] }
  0xa4   :  { %v459_v5 = vsel %vm451_vm1, %v450_v59, %v185_v63  ;;  %v466_v46 = vsel %vm460_vm2, %v457_v43, %v211_v44  ;;  %931 = vrot.lane.b32.xlu0 %v1769_v47, %s2052_s29  ;;  %v1776_v47 = vcombine.low %v2645_v11, %v2663_v18  ;;  %v1750_v44 = vcombine.low %v1696_v2, %v2943_v35 }
  0xa5   :  { %943 = vrot.lane.b32.xlu1 %v1772_v32, %s3618_s28  ;;  %v2935_v32 = vld [vmem:[%s3578_s3 + $0x40] sm:$0xf] }
  0xa6   :  { %v2918_v58 = vpop.permute.xlu0 %362  ;;  %3620 = vst [vmem:[#allocation7_spill] sm:$0xff] %v2935_v32  ;;  %v1747_v43 = vcombine.low %v2930_v29, %v2935_v32 }
  0xa7   :  { %v2920_v7 = vpop.permute.xlu1 %374 }
  0xa8   :  { %767 = vrot.lane.b32.xlu0 %v1743_v48, %s3614_s8 }
  0xa9   :  { %793 = vrot.lane.b32.xlu1 %v1746_v12, %s3610_s27 }
  0xaa   :  { %v213_v59 = vpop.permute.xlu0 %212 }
  0xab   :  { %v239_v11 = vpop.permute.xlu1 %238  ;;  %v468_v18 = vsel %vm460_vm2, %v459_v5, %v213_v59  ;;  %v38_v5 = vld [vmem:[%s3581_s0] sm:$0xf] }
  0xac   :  { %v475_v63 = vsel %vm469_vm3, %v466_v46, %v239_v11  ;;  %945 = vrot.lane.b32.xlu0 %v1773_v20, %s3618_s28  ;;  %v1780_v46 = vcombine.low %v2676_v24, %v2698_v37  ;;  %v2967_v20 = vld [vmem:[%s3579_s4 + $0x3c] sm:$0xf]  ;;  %v2982_v24 = vld [vmem:[%s3580_s6 + $0x38] sm:$0xf]  ;;  %v1588_v11 = vcombine.low %v38_v5, %v2315_v50  ;;  %v1781_v50 = vcombine.low %v2703_v45, %v1696_v2  ;;  %v3012_v5 = vld [vmem:[%s3580_s6 + $0x40] sm:$0xf] }
  0xad   :  { %957 = vrot.lane.b32.xlu1 %v1776_v47, %s3622_s23  ;;  %v2972_v47 = vld [vmem:[%s3579_s4 + $0x40] sm:$0xf]  ;;  %v1754_v35 = vcombine.low %v2977_v53, %v2982_v24  ;;  %v3017_v45 = vld [vmem:[%s3582_s5 + $0x34] sm:$0xf] }
  0xae   :  { %v2952_v48 = vpop.permute.xlu0 %376 }
  0xaf   :  { %v2954_v12 = vpop.permute.xlu1 %388 }
  0xb0   :  { %795 = vrot.lane.b32.xlu0 %v1747_v43, %s3610_s27 }
  0xb1   :  { %821 = vrot.lane.b32.xlu1 %v1750_v44, %s3612_s26  ;;  %v1751_v44 = vcombine.low %v2967_v20, %v2972_v47 }
  0xb2   :  { %v241_v22 = vpop.permute.xlu0 %240 }
  0xb3   :  { %v267_v37 = vpop.permute.xlu1 %266  ;;  %v477_v59 = vsel %vm469_vm3, %v468_v18, %v241_v22  ;;  %v441_v18 = vsel %vm438_vm0, %v1588_v11, %v2686_v40  ;;  %v3623_v11 = vcombine.low %v2220_v26, %v2225_v27  ;;  %v3062_v26 = vld [vmem:[%s3582_s5 + $0x3c] sm:$0xf]  ;;  %v1788_v27 = vcombine.low %v2752_v21, %v2776_v31  ;;  %v3086_v21 = vld [vmem:[%s3583_s7 + $0x38] sm:$0xf] }
  0xb4   :  { %v2987_v43 = vsel %vm478_vm4, %v475_v63, %v267_v37  ;;  %959 = vrot.lane.b32.xlu0 %v1777_v1, %s3622_s23  ;;  %v1784_v1 = vcombine.low %v2713_v38, %v2737_v8  ;;  %v3007_v63 = vld [vmem:[%s3580_s6 + $0x3c] sm:$0xf]  ;;  %v3022_v38 = vld [vmem:[%s3582_s5 + $0x38] sm:$0xf]  ;;  %v453_v8 = vsel %vm451_vm1, %v441_v18, %v2688_v41 }
  0xb5   :  { %971 = vrot.lane.b32.xlu1 %v1780_v46, %s3611_s18  ;;  %v462_v46 = vsel %vm460_vm2, %v453_v8, %v2725_v54  ;;  %v1755_v22 = vcombine.low %v3007_v63, %v3012_v5  ;;  %v1758_v41 = vcombine.low %v3017_v45, %v3022_v38 }
  0xb6   :  { %v2995_v32 = vpop.permute.xlu0 %390  ;;  %v471_v37 = vsel %vm469_vm3, %v462_v46, %v2744_v28 }
  0xb7   :  { %v403_v29 = vpop.permute.xlu1 %402 }
  0xb8   :  { %823 = vrot.lane.b32.xlu0 %v1751_v44, %s3612_s26  ;;  %v444_v44 = vsel %vm438_vm0, %v3623_v11, %v2705_v19  ;;  %v3070_v19 = vld [vmem:[%s3582_s5 + $0x40] sm:$0xf] }
  0xb9   :  { %849 = vrot.lane.b32.xlu1 %v1754_v35, %s3613_s24  ;;  %v1759_v8 = vcombine.low %v3062_v26, %v3070_v19 }
  0xba   :  { %v269_v40 = vpop.permute.xlu0 %268 }
  0xbb   :  { %v3026_v2 = vpop.permute.xlu1 %294  ;;  %v3029_v35 = vsel %vm478_vm4, %v477_v59, %v269_v40  ;;  %v480_v59 = vsel %vm478_vm4, %v471_v37, %v2764_v23  ;;  %v1785_v23 = vcombine.low %v2742_v25, %v2977_v53  ;;  %v455_v25 = vsel %vm451_vm1, %v444_v44, %v2715_v55 }
  0xbc   :  { %973 = vrot.lane.b32.xlu0 %v1781_v50, %s3611_s18  ;;  %v489_v28 = vsel %vm487_vm5, %v480_v59, %v2783_v39  ;;  %v3077_v39 = vld [vmem:[%s3583_s7 + $0x34] sm:$0xf]  ;;  %v464_v31 = vsel %vm460_vm2, %v455_v25, %v2727_v56  ;;  %v1789_v59 = vcombine.low %v2781_v9, %v3017_v45  ;;  %v3133_v9 = vld [vmem:[%s3583_s7 + $0x40] sm:$0xf]  ;;  %v1724_v25 = vld [vmem:[%s3581_s0 + $0x44] sm:$0xf] }
  0xbd   :  { %985 = vrot.lane.b32.xlu1 %v1784_v1, %s2056_s25  ;;  %v498_v50 = vsel %vm496_vm6, %v489_v28, %v2803_v15 }
  0xbe   :  { %v3043_v54 = vpop.permute.xlu0 %404  ;;  %v507_v1 = vsel %vm505_vm7, %v498_v50, %v2827_v62  ;;  %v1660_v50 = vld [vmem:[%s3581_s0 + $0x24] sm:$0xf] }
  0xbf   :  { %v417_v18 = vpop.permute.xlu1 %416  ;;  %v516_v15 = vsel %vm514_vm8, %v507_v1, %v2844_v36  ;;  %v473_v36 = vsel %vm469_vm3, %v464_v31, %v2754_v10  ;;  %v1762_v10 = vcombine.low %v3077_v39, %v3086_v21  ;;  %v1793_v31 = vcombine.low %v2813_v49, %v3077_v39 }
  0xc0   :  { %851 = vrot.lane.b32.xlu0 %v1755_v22, %s3613_s24  ;;  %v525_v55 = vsel %vm523_vm9, %v516_v15, %v2877_v51  ;;  %v482_v56 = vsel %vm478_vm4, %v473_v36, %v2766_v34 }
  0xc1   :  { %877 = vrot.lane.b32.xlu1 %v1758_v41, %s2049_s19  ;;  %v534_v40 = vsel %vm532_vm10, %v525_v55, %v2920_v7  ;;  %v491_v7 = vsel %vm487_vm5, %v482_v56, %v2793_v13  ;;  %v1792_v13 = vcombine.low %v2791_v6, %v2808_v42  ;;  %v1732_v55 = vcombine.low %v1660_v50, %v2825_v57 }
  0xc2   :  { %v3081_v62 = vpop.permute.xlu0 %296  ;;  %v543_v51 = vsel %vm541_vm11, %v534_v40, %v2954_v12  ;;  %v500_v37 = vsel %vm496_vm6, %v491_v7, %v2815_v52  ;;  %v1770_v57 = vcombine.low %v2835_v14, %v2855_v60  ;;  %v1774_v14 = vcombine.low %v2868_v17, %v2887_v33  ;;  %v3626_v17 = vld [vmem:[#allocation6_spill] sm:$0xff]  ;;  %v3627_v33 = vld [vmem:[#allocation5_spill] sm:$0xff] }
  0xc3   :  { %v3092_v53 = vpop.permute.xlu1 %322  ;;  %v552_v46 = vsel %vm550_vm12, %v543_v51, %v403_v29  ;;  %v509_v12 = vsel %vm505_vm7, %v500_v37, %v2842_v16  ;;  %v3128_v16 = vld [vmem:[%s3583_s7 + $0x3c] sm:$0xf] }
  0xc4   :  { %987 = vrot.lane.b32.xlu0 %v1785_v23, %s2056_s25  ;;  %v561_v34 = vsel %vm559_vm13, %v552_v46, %v417_v18  ;;  %v518_v29 = vsel %vm514_vm8, %v509_v12, %v2875_v30  ;;  %v3142_v30 = vld [vmem:[%s3581_s0 + $0x3c] sm:$0xf]  ;;  %v1726_v46 = vld [vmem:[%s3577_s1 + $0x44] sm:$0xf] }
  0xc5   :  { %999 = vrot.lane.b32.xlu1 %v1788_v27, %s2057_s12  ;;  %v527_v6 = vsel %vm523_vm9, %v518_v29, %v2918_v58  ;;  %v1763_v58 = vcombine.low %v3128_v16, %v3133_v9  ;;  %v3165_v27 = vld [vmem:[%s3581_s0 + $0x40] sm:$0xf]  ;;  %v1775_v60 = vcombine.low %v2892_v3, %v1726_v46  ;;  %v1778_v29 = vcombine.low %v3627_v33, %v3626_v17 }
  0xc6   :  { %v419_v22 = vpop.permute.xlu0 %418  ;;  %v536_v45 = vsel %vm532_vm10, %v527_v6, %v2952_v48  ;;  %v1766_v48 = vcombine.low %v2381_v4, %v3142_v30  ;;  %v1767_v56 = vcombine.low %v3165_v27, %v1724_v25  ;;  %v1728_v6 = vld [vmem:[%s3579_s4 + $0x44] sm:$0xf]  ;;  %v1786_v25 = vcombine.low %v2982_v24, %v3007_v63 }
  0xc7   :  { %v431_v41 = vpop.permute.xlu1 %430  ;;  %v545_v18 = vsel %vm541_vm11, %v536_v45, %v2995_v32  ;;  %v1783_v50 = vcombine.low %v2972_v47, %v1728_v6 }
  0xc8   :  { %v570_v11 = vsel %vm568_vm14, %v561_v34, %v431_v41  ;;  %879 = vrot.lane.b32.xlu0 %v1759_v8, %s2049_s19  ;;  %v554_v23 = vsel %vm550_vm12, %v545_v18, %v3043_v54  ;;  %v1725_v8 = vld [vmem:[%s3576_s2 + $0x44] sm:$0xf]  ;;  %v3629_v18 = vld [vmem:[#allocation8_spill] sm:$0xff] }
  0xc9   :  { %v1652_v52 = vcombine.low %v570_v11, %v570_v11  ;;  %v1653_v44 = vcombine.high %v570_v11, %v570_v11  ;;  %905 = vrot.lane.b32.xlu1 %v1762_v10, %s2050_s16  ;;  %v563_v1 = vsel %vm559_vm13, %v554_v23, %v419_v22  ;;  %v1771_v7 = vcombine.low %v2860_v61, %v1725_v8  ;;  %v1727_v34 = vld [vmem:[%s3578_s3 + $0x44] sm:$0xf] }
  0xca   :  { %v3137_v42 = vpop.permute.xlu0 %324  ;;  %v1729_v23 = vld [vmem:[%s3580_s6 + $0x44] sm:$0xf] }
  0xcb   :  { %605 = vst [vmem:[#allocation2] sm:$0xf] %v1652_v52  ;;  %606 = vst [vmem:[#allocation2 + $0x4] sm:$0xf] %v1653_v44  ;;  %v3146_v28 = vpop.permute.xlu1 %336  ;;  %v3628_v52 = vld [vmem:[#allocation7_spill] sm:$0xff] }
  0xcc   :  { %1001 = vrot.lane.b32.xlu0 %v1789_v59, %s2057_s12  ;;  %v3624_v59 = vld [vmem:[#allocation3_spill] sm:$0xff]  ;;  %v1779_v44 = vcombine.low %v3628_v52, %v1727_v34 }
  0xcd   :  { %1013 = vrot.lane.b32.xlu1 %v1792_v13, %s2058_s30  ;;  %v3625_v11 = vcombine.low %v2364_v0, %v3624_v59 }
  0xce   :  { %v433_v32 = vpop.permute.xlu0 %432 }
  0xcf   :  { %v3170_v15 = vpop.permute.xlu1 %338  ;;  %v572_v54 = vsel %vm568_vm14, %v563_v1, %v433_v32 }
  0xd0   :  { %v1654_v36 = vcombine.low %v572_v54, %v572_v54  ;;  %v1655_v40 = vcombine.high %v572_v54, %v572_v54  ;;  %907 = vrot.lane.b32.xlu0 %v1763_v58, %s2050_s16  ;;  %v1782_v58 = vcombine.low %v3629_v18, %v2967_v20  ;;  %v1787_v20 = vcombine.low %v3012_v5, %v1729_v23  ;;  %v1731_v5 = vld [vmem:[%s3583_s7 + $0x44] sm:$0xf] }
  0xd1   :  { %919 = vrot.lane.b32.xlu1 %v1766_v48, %s2051_s17 }
  0xd2   :  { %607 = vst [vmem:[#allocation2 + $0x8] sm:$0xf] %v1654_v36  ;;  %608 = vst [vmem:[#allocation2 + $0xc] sm:$0xf] %v1655_v40  ;;  %v3182_v51 = vpop.permute.xlu0 %350  ;;  %v2031_v10 = vld [vmem:[#allocation2] sm:$0xff]   ;;  %v1790_v36 = vcombine.low %v3022_v38, %v3062_v26  ;;  %v1794_v38 = vcombine.low %v3086_v21, %v3128_v16  ;;  %v1795_v26 = vcombine.low %v3133_v9, %v1731_v5 }
  0xd3   :  { %v734_v49 = vpop.permute.xlu1 %733  ;;  %1853 = vmatprep.mubr.bf16.mxu0 %v2031_v10  ;;  %v493_v21 = vsel %vm487_vm5, %v2987_v43, %v3026_v2 }
  0xd4   :  { %v1023_v39 = vsel %vm438_vm0, %v1732_v55, %v734_v49  ;;  %1015 = vrot.lane.b32.xlu0 %v1793_v31, %s2058_s30  ;;  %v1730_v31 = vld [vmem:[%s3582_s5 + $0x44] sm:$0xf]  ;;  %v502_v9 = vsel %vm496_vm6, %v493_v21, %v3092_v53  ;;  %v495_v53 = vsel %vm487_vm5, %v3029_v35, %v3081_v62 }
  0xd5   :  { %921 = vrot.lane.b32.xlu1 %v1767_v56, %s2051_s17  ;;  %v1791_v24 = vcombine.low %v3070_v19, %v1730_v31  ;;  %v504_v59 = vsel %vm496_vm6, %v495_v53, %v3137_v42 }
  0xd6   :  { %v3193_v22 = vpop.permute.xlu0 %352 }
  0xd7   :  { %v3195_v37 = vpop.permute.xlu1 %364 }
  0xd8   :  { %933 = vrot.lane.b32.xlu0 %v1770_v57, %s2052_s29 }
  0xd9   :  { %935 = vrot.lane.b32.xlu1 %v1771_v7, %s2052_s29  ;;  %v2033_v61 = vld [vmem:[#allocation2 + $0x8] sm:$0xff]  }
  0xda   :  { %v736_v41 = vpop.permute.xlu0 %735  ;;  %1854 = vmatmul.mubr.bf16.vlgmr.msra.gmra.mxu0 %v2033_v61 }
  0xdb   :  { %v762_v12 = vpop.permute.xlu1 %761  ;;  %v1026_v13 = vsel %vm438_vm0, %v3625_v11, %v736_v41 }
  0xdc   :  { %v1034_v3 = vsel %vm451_vm1, %v1023_v39, %v762_v12  ;;  %947 = vrot.lane.b32.xlu0 %v1774_v14, %s3618_s28  ;;  %v511_v14 = vsel %vm505_vm7, %v502_v9, %v3146_v28 }
  0xdd   :  { %949 = vrot.lane.b32.xlu1 %v1775_v60, %s3618_s28  ;;  %v520_v60 = vsel %vm514_vm8, %v511_v14, %v3182_v51 }
  0xde   :  { %v3218_v45 = vpop.permute.xlu0 %366  ;;  %v529_v34 = vsel %vm523_vm9, %v520_v60, %v3195_v37 }
  0xdf   :  { %v379_v0 = vpop.permute.xlu1 %378 }
  0xe0   :  { %961 = vrot.lane.b32.xlu0 %v1778_v29, %s3622_s23  ;;  %v538_v43 = vsel %vm532_vm10, %v529_v34, %v379_v0 }
  0xe1   :  { %963 = vrot.lane.b32.xlu1 %v1779_v44, %s3622_s23 }
  0xe2   :  { %v764_v48 = vpop.permute.xlu0 %763 }
  0xe3   :  { %v790_v1 = vpop.permute.xlu1 %789  ;;  %v1036_v32 = vsel %vm451_vm1, %v1026_v13, %v764_v48  ;;  %v513_v13 = vsel %vm505_vm7, %v504_v59, %v3170_v15 }
  0xe4   :  { %v1042_v54 = vsel %vm460_vm2, %v1034_v3, %v790_v1  ;;  %975 = vrot.lane.b32.xlu0 %v1782_v58, %s3611_s18  ;;  %v522_v33 = vsel %vm514_vm8, %v513_v13, %v3193_v22  ;;  %v3630_v1 = vld [vmem:[#allocation4_spill] sm:$0xff] }
  0xe5   :  { %977 = vrot.lane.b32.xlu1 %v1783_v50, %s3611_s18  ;;  %v531_v35 = vsel %vm523_vm9, %v522_v33, %v3218_v45 }
  0xe6   :  { %v381_v47 = vpop.permute.xlu0 %380 }
  0xe7   :  { %v393_v55 = vpop.permute.xlu1 %392  ;;  %v540_v52 = vsel %vm532_vm10, %v531_v35, %v381_v47  ;;  %v1735_v47 = vcombine.low %v3142_v30, %v3165_v27 }
  0xe8   :  { %989 = vrot.lane.b32.xlu0 %v1786_v25, %s2056_s25  ;;  %v547_v2 = vsel %vm541_vm11, %v538_v43, %v393_v55 }
  0xe9   :  { %991 = vrot.lane.b32.xlu1 %v1787_v20, %s2056_s25 }
  0xea   :  { %v792_v63 = vpop.permute.xlu0 %791 }
  0xeb   :  { %v818_v40 = vpop.permute.xlu1 %817  ;;  %v1044_v8 = vsel %vm460_vm2, %v1036_v32, %v792_v63  ;;  %v3631_v32 = vcombine.low %v3630_v1, %v2381_v4 }
  0xec   :  { %v1050_v56 = vsel %vm469_vm3, %v1042_v54, %v818_v40  ;;  %1003 = vrot.lane.b32.xlu0 %v1790_v36, %s2057_s12 }
  0xed   :  { %1005 = vrot.lane.b32.xlu1 %v1791_v24, %s2057_s12 }
  0xee   :  { %v395_v19 = vpop.permute.xlu0 %394 }
  0xef   :  { %v407_v10 = vpop.permute.xlu1 %406  ;;  %v549_v44 = vsel %vm541_vm11, %v540_v52, %v395_v19 }
  0xf0   :  { %1017 = vrot.lane.b32.xlu0 %v1794_v38, %s2058_s30  ;;  %v556_v28 = vsel %vm550_vm12, %v547_v2, %v407_v10 }
  0xf1   :  { %1019 = vrot.lane.b32.xlu1 %v1795_v26, %s2058_s30 }
  0xf2   :  { %v820_v49 = vpop.permute.xlu0 %819 }
  0xf3   :  { %v846_v57 = vpop.permute.xlu1 %845  ;;  %v1052_v39 = vsel %vm469_vm3, %v1044_v8, %v820_v49 }
  0xf4   :  { %v3257_v7 = vsel %vm478_vm4, %v1050_v56, %v846_v57 }
  0xf6   :  { %v409_v46 = vpop.permute.xlu0 %408 }
  0xf7   :  { %v421_v16 = vpop.permute.xlu1 %420  ;;  %v558_v15 = vsel %vm550_vm12, %v549_v44, %v409_v46 }
  0xf8   :  { %v565_v37 = vsel %vm559_vm13, %v556_v28, %v421_v16 }
  0xfa   :  { %v848_v61 = vpop.permute.xlu0 %847 }
  0xfb   :  { %v3270_v41 = vpop.permute.xlu1 %873  ;;  %v3273_v12 = vsel %vm478_vm4, %v1052_v39, %v848_v61 }
  0xfc   :  { %v1066_v9 = vsel %vm487_vm5, %v3257_v7, %v3270_v41 }
  0xfe   :  { %v423_v51 = vpop.permute.xlu0 %422 }
  0xff   :  { %v435_v11 = vpop.permute.xlu1 %434  ;;  %v567_v6 = vsel %vm559_vm13, %v558_v15, %v423_v51 }
 0x100   :  { %v574_v17 = vsel %vm568_vm14, %v565_v37, %v435_v11 }
 0x101   :  { %v1656_v29 = vcombine.low %v574_v17, %v574_v17  ;;  %v1657_v3 = vcombine.high %v574_v17, %v574_v17 }
 0x102   :  { %v876_v62 = vpop.permute.xlu0 %875 }
 0x103   :  { %609 = vst [vmem:[#allocation2 + $0x10] sm:$0xf] %v1656_v29  ;;  %610 = vst [vmem:[#allocation2 + $0x14] sm:$0xf] %v1657_v3  ;;  %v902_v42 = vpop.permute.xlu1 %901  ;;  %v1068_v59 = vsel %vm487_vm5, %v3273_v12, %v876_v62 }
 0x104   :  { %v1074_v60 = vsel %vm496_vm6, %v1066_v9, %v902_v42 }
 0x106   :  { %v437_v0 = vpop.permute.xlu0 %436 }
 0x107   :  { %v904_v18 = vpop.permute.xlu1 %903  ;;  %v576_v22 = vsel %vm568_vm14, %v567_v6, %v437_v0 }
 0x108   :  { %v1658_v58 = vcombine.low %v576_v22, %v576_v22  ;;  %v1659_v50 = vcombine.high %v576_v22, %v576_v22  ;;  %v1076_v37 = vsel %vm496_vm6, %v1068_v59, %v904_v18 }
 0x10a   :  { %611 = vst [vmem:[#allocation2 + $0x18] sm:$0xf] %v1658_v58  ;;  %612 = vst [vmem:[#allocation2 + $0x1c] sm:$0xf] %v1659_v50  ;;  %v916_v45 = vpop.permute.xlu0 %915  ;;  %v2037_v23 = vld [vmem:[#allocation2 + $0x10] sm:$0xff]  }
 0x10b   :  { %v738_v48 = vpop.permute.xlu1 %737  ;;  %1857 = vmatprep.mubr.bf16.mxu0 %v2037_v23  ;;  %v1082_v61 = vsel %vm505_vm7, %v1074_v60, %v916_v45 }
 0x10c   :  { %v1029_v25 = vsel %vm438_vm0, %v3631_v32, %v738_v48 }
 0x10e   :  { %v918_v54 = vpop.permute.xlu0 %917 }
 0x10f   :  { %v930_v20 = vpop.permute.xlu1 %929  ;;  %v1084_v17 = vsel %vm505_vm7, %v1076_v37, %v918_v54 }
 0x110   :  { %v1090_v34 = vsel %vm514_vm8, %v1082_v61, %v930_v20 }
 0x111   :  { %v2039_v31 = vld [vmem:[#allocation2 + $0x18] sm:$0xff]  }
 0x112   :  { %v740_v55 = vpop.permute.xlu0 %739  ;;  %1858 = vmatmul.mubr.bf16.gmra.mxu0 %v2039_v31 }
 0x113   :  { %v766_v36 = vpop.permute.xlu1 %765  ;;  %v3303_v24 = vsel %vm438_vm0, %v1735_v47, %v740_v55 }
 0x114   :  { %v3306_v63 = vsel %vm451_vm1, %v1029_v25, %v766_v36 }
 0x116   :  { %v932_v5 = vpop.permute.xlu0 %931 }
 0x117   :  { %v944_v4 = vpop.permute.xlu1 %943  ;;  %v1092_v29 = vsel %vm514_vm8, %v1084_v17, %v932_v5 }
 0x118   :  { %v1098_v2 = vsel %vm523_vm9, %v1090_v34, %v944_v4 }
 0x11a   :  { %v3308_v40 = vpop.permute.xlu0 %767 }
 0x11b   :  { %v3310_v8 = vpop.permute.xlu1 %793  ;;  %v1040_v55 = vsel %vm451_vm1, %v3303_v24, %v3308_v40 }
 0x11c   :  { %v1046_v31 = vsel %vm460_vm2, %v3306_v63, %v3310_v8 }
 0x11e   :  { %v946_v56 = vpop.permute.xlu0 %945 }
 0x11f   :  { %v958_v38 = vpop.permute.xlu1 %957  ;;  %v1100_v52 = vsel %vm523_vm9, %v1092_v29, %v946_v56  ;;  %v3372_v29 = vld [vmem:[%s3585_s9] ss:$0 sm:$0xff] }
 0x120   :  { %v1106_v28 = vsel %vm532_vm10, %v1098_v2, %v958_v38 }
 0x122   :  { %v3312_v26 = vpop.permute.xlu0 %795 }
 0x123   :  { %v822_v30 = vpop.permute.xlu1 %821  ;;  %v1048_v4 = vsel %vm460_vm2, %v1040_v55, %v3312_v26 }
 0x124   :  { %v1054_v5 = vsel %vm469_vm3, %v1046_v31, %v822_v30 }
 0x126   :  { %v960_v27 = vpop.permute.xlu0 %959 }
 0x127   :  { %v972_v19 = vpop.permute.xlu1 %971  ;;  %v1108_v12 = vsel %vm532_vm10, %v1100_v52, %v960_v27 }
 0x128   :  { %v1114_v51 = vsel %vm541_vm11, %v1106_v28, %v972_v19 }
 0x12a   :  { %v824_v10 = vpop.permute.xlu0 %823 }
 0x12b   :  { %v850_v49 = vpop.permute.xlu1 %849  ;;  %v1056_v38 = vsel %vm469_vm3, %v1048_v4, %v824_v10 }
 0x12c   :  { %v1062_v56 = vsel %vm478_vm4, %v1054_v5, %v850_v49 }
 0x12e   :  { %v974_v57 = vpop.permute.xlu0 %973 }
 0x12f   :  { %v986_v39 = vpop.permute.xlu1 %985  ;;  %v1116_v44 = vsel %vm541_vm11, %v1108_v12, %v974_v57 }
 0x130   :  { %v1122_v7 = vsel %vm550_vm12, %v1114_v51, %v986_v39 }
 0x132   :  { %v852_v46 = vpop.permute.xlu0 %851 }
 0x133   :  { %v878_v21 = vpop.permute.xlu1 %877  ;;  %v1064_v19 = vsel %vm478_vm4, %v1056_v38, %v852_v46 }
 0x134   :  { %v1070_v27 = vsel %vm487_vm5, %v1062_v56, %v878_v21 }
 0x136   :  { %v988_v16 = vpop.permute.xlu0 %987 }
 0x137   :  { %v1000_v14 = vpop.permute.xlu1 %999  ;;  %v1124_v15 = vsel %vm550_vm12, %v1116_v44, %v988_v16 }
 0x138   :  { %v1130_v11 = vsel %vm559_vm13, %v1122_v7, %v1000_v14 }
 0x13a   :  { %v880_v43 = vpop.permute.xlu0 %879 }
 0x13b   :  { %v906_v53 = vpop.permute.xlu1 %905  ;;  %v1072_v8 = vsel %vm487_vm5, %v1064_v19, %v880_v43 }
 0x13c   :  { %v1078_v63 = vsel %vm496_vm6, %v1070_v27, %v906_v53 }
 0x13e   :  { %v1002_v41 = vpop.permute.xlu0 %1001 }
 0x13f   :  { %v1014_v13 = vpop.permute.xlu1 %1013  ;;  %v1132_v6 = vsel %vm559_vm13, %v1124_v15, %v1002_v41 }
 0x140   :  { %v1138_v33 = vsel %vm568_vm14, %v1130_v11, %v1014_v13 }
 0x141   :  { %v1796_v3 = vcombine.low %v1138_v33, %v1138_v33  ;;  %v1797_v35 = vcombine.high %v1138_v33, %v1138_v33 }
 0x142   :  { %v908_v42 = vpop.permute.xlu0 %907 }
 0x143   :  { %1173 = vst [vmem:[#allocation2 + $0x20] sm:$0xf] %v1796_v3  ;;  %1174 = vst [vmem:[#allocation2 + $0x24] sm:$0xf] %v1797_v35  ;;  %v920_v62 = vpop.permute.xlu1 %919  ;;  %v1080_v30 = vsel %vm496_vm6, %v1072_v8, %v908_v42 }
 0x144   :  { %v1086_v40 = vsel %vm505_vm7, %v1078_v63, %v920_v62 }
 0x146   :  { %v1016_v0 = vpop.permute.xlu0 %1015 }
 0x147   :  { %v922_v18 = vpop.permute.xlu1 %921  ;;  %v1140_v22 = vsel %vm568_vm14, %v1132_v6, %v1016_v0 }
 0x148   :  { %v1798_v58 = vcombine.low %v1140_v22, %v1140_v22  ;;  %v1799_v50 = vcombine.high %v1140_v22, %v1140_v22  ;;  %v1088_v26 = vsel %vm505_vm7, %v1080_v30, %v922_v18 }
 0x14a   :  { %1175 = vst [vmem:[#allocation2 + $0x28] sm:$0xf] %v1798_v58  ;;  %1176 = vst [vmem:[#allocation2 + $0x2c] sm:$0xf] %v1799_v50  ;;  %v934_v45 = vpop.permute.xlu0 %933  ;;  %v2040_v23 = vld [vmem:[#allocation2 + $0x20] sm:$0xff]  }
 0x14b   :  { %v936_v48 = vpop.permute.xlu1 %935  ;;  %1861 = vmatprep.mubr.bf16.mxu1 %v2040_v23  ;;  %v1094_v49 = vsel %vm514_vm8, %v1086_v40, %v934_v45 }
 0x14c   :  { %v1096_v10 = vsel %vm514_vm8, %v1088_v26, %v936_v48 }
 0x14e   :  { %v948_v1 = vpop.permute.xlu0 %947 }
 0x14f   :  { %v950_v32 = vpop.permute.xlu1 %949  ;;  %v1102_v39 = vsel %vm523_vm9, %v1094_v49, %v948_v1 }
 0x150   :  { %v1104_v46 = vsel %vm523_vm9, %v1096_v10, %v950_v32 }
 0x151   :  { %v2041_v25 = vld [vmem:[#allocation2 + $0x28] sm:$0xff]  }
 0x152   :  { %v962_v54 = vpop.permute.xlu0 %961  ;;  %1862 = vmatmul.mubr.bf16.vlgmr.msra.gmra.mxu1 %v2041_v25 }
 0x153   :  { %v964_v20 = vpop.permute.xlu1 %963  ;;  %v1110_v16 = vsel %vm532_vm10, %v1102_v39, %v962_v54 }
 0x154   :  { %v1112_v14 = vsel %vm532_vm10, %v1104_v46, %v964_v20 }
 0x156   :  { %v976_v47 = vpop.permute.xlu0 %975 }
 0x157   :  { %v978_v36 = vpop.permute.xlu1 %977  ;;  %v1118_v60 = vsel %vm541_vm11, %v1110_v16, %v976_v47 }
 0x158   :  { %v1120_v61 = vsel %vm541_vm11, %v1112_v14, %v978_v36 }
 0x15a   :  { %v990_v57 = vpop.permute.xlu0 %989 }
 0x15b   :  { %v992_v24 = vpop.permute.xlu1 %991  ;;  %v1126_v34 = vsel %vm550_vm12, %v1118_v60, %v990_v57 }
 0x15c   :  { %v1128_v43 = vsel %vm550_vm12, %v1120_v61, %v992_v24 }
 0x15e   :  { %v1004_v21 = vpop.permute.xlu0 %1003 }
 0x15f   :  { %v1006_v9 = vpop.permute.xlu1 %1005  ;;  %v1134_v2 = vsel %vm559_vm13, %v1126_v34, %v1004_v21 }
 0x160   :  { %v1136_v28 = vsel %vm559_vm13, %v1128_v43, %v1006_v9 }
 0x162   :  { %v1018_v53 = vpop.permute.xlu0 %1017 }
 0x163   :  { %v1020_v51 = vpop.permute.xlu1 %1019  ;;  %v1142_v59 = vsel %vm568_vm14, %v1134_v2, %v1018_v53 }
 0x164   :  { %v1144_v7 = vsel %vm568_vm14, %v1136_v28, %v1020_v51  ;;  %v1800_v41 = vcombine.low %v1142_v59, %v1142_v59  ;;  %v1801_v37 = vcombine.high %v1142_v59, %v1142_v59 }
 0x165   :  { %v1802_v11 = vcombine.low %v1144_v7, %v1144_v7  ;;  %v1803_v13 = vcombine.high %v1144_v7, %v1144_v7 }
 0x166   :  { %1177 = vst [vmem:[#allocation2 + $0x30] sm:$0xf] %v1800_v41  ;;  %1178 = vst [vmem:[#allocation2 + $0x34] sm:$0xf] %v1801_v37 }
 0x167   :  { %1179 = vst [vmem:[#allocation2 + $0x38] sm:$0xf] %v1802_v11  ;;  %1180 = vst [vmem:[#allocation2 + $0x3c] sm:$0xf] %v1803_v13 }
 0x16d   :  { %v2042_v17 = vld [vmem:[#allocation2 + $0x30] sm:$0xff]  }
 0x16e   :  { %v2043_v33 = vld [vmem:[#allocation2 + $0x38] sm:$0xff]   ;;  %1865 = vmatprep.mubr.bf16.mxu1 %v2042_v17 }
 0x16f   :  { %1866 = vmatmul.mubr.bf16.gmra.mxu1 %v2043_v33 }
 0x19a   :  { %v1855_v3 = vpop.f32.mrf.mxu0 }
 0x19b   :  { %v3375_v35 = vadd.f32 %v1855_v3, %v3372_v29 }
 0x19c   :  { %v1350_v52 = vpop.f32.mrf.mxu0 }
 0x19d   :  { %1415 = vst.msk [vmem:[%s3586_s10 + $0x10] sm:$0xff] %vm451_vm1, %v3375_v35  ;;  %v3383_v42 = vadd.f32 %v3372_v29, %v1350_v52  ;;  %v1432_v36 = vsel %vm451_vm1, %v3375_v35, 0.0 }
 0x19e   :  { %v1856_v12 = vpop.f32.mrf.mxu0 }
 0x19f   :  { %1413 = vst.msk [vmem:[%s3586_s10] sm:$0xff] %vm451_vm1, %v3383_v42  ;;  %v3391_v62 = vadd.f32 %v1856_v12, %v3372_v29  ;;  %v1429_v25 = vsel %vm451_vm1, %v3383_v42, 0.0 }
 0x1a0   :  { %v1353_v44 = vpop.f32.mrf.mxu0 }
 0x1a1   :  { %1416 = vst.msk [vmem:[%s3586_s10 + $0x18] sm:$0xff] %vm451_vm1, %v3391_v62  ;;  %v3399_v15 = vadd.f32 %v3372_v29, %v1353_v44  ;;  %v1434_v38 = vsel %vm451_vm1, %v3391_v62, 0.0 }
 0x1a3   :  { %1414 = vst.msk [vmem:[%s3586_s10 + $0x8] sm:$0xff] %vm451_vm1, %v3399_v15  ;;  %v1430_v48 = vsel %vm451_vm1, %v3399_v15, 0.0 }
 0x1a4   :  { %v1431_v20 = vadd.f32 %v1430_v48, %v1429_v25 }
 0x1a6   :  { %v1433_v4 = vadd.f32 %v1432_v36, %v1431_v20 }
 0x1a8   :  { %v1435_v19 = vadd.f32 %v1434_v38, %v1433_v4 }
 0x1d2   :  { %v1859_v6 = vpop.f32.mrf.mxu0 }
 0x1d3   :  { %v3407_v0 = vadd.f32 %v1859_v6, %v3372_v29 }
 0x1d4   :  { %v1366_v18 = vpop.f32.mrf.mxu0 }
 0x1d5   :  { %1419 = vst.msk [vmem:[%s3586_s10 + $0x30] sm:$0xff] %vm451_vm1, %v3407_v0  ;;  %v3415_v22 = vadd.f32 %v3372_v29, %v1366_v18  ;;  %v1440_v24 = vsel %vm451_vm1, %v3407_v0, 0.0 }
 0x1d6   :  { %v1860_v58 = vpop.f32.mrf.mxu0 }
 0x1d7   :  { %1417 = vst.msk [vmem:[%s3586_s10 + $0x20] sm:$0xff] %vm451_vm1, %v3415_v22  ;;  %v3423_v50 = vadd.f32 %v1860_v58, %v3372_v29  ;;  %v1436_v27 = vsel %vm451_vm1, %v3415_v22, 0.0 }
 0x1d8   :  { %v1369_v45 = vpop.f32.mrf.mxu0  ;;  %v1437_v63 = vadd.f32 %v1436_v27, %v1435_v19 }
 0x1d9   :  { %1420 = vst.msk [vmem:[%s3586_s10 + $0x38] sm:$0xff] %vm451_vm1, %v3423_v50  ;;  %v3431_v23 = vadd.f32 %v3372_v29, %v1369_v45  ;;  %v1442_v30 = vsel %vm451_vm1, %v3423_v50, 0.0 }
 0x1db   :  { %1418 = vst.msk [vmem:[%s3586_s10 + $0x28] sm:$0xff] %vm451_vm1, %v3431_v23  ;;  %v1438_v57 = vsel %vm451_vm1, %v3431_v23, 0.0 }
 0x1dc   :  { %v1439_v8 = vadd.f32 %v1438_v57, %v1437_v63 }
 0x1de   :  { %v1441_v40 = vadd.f32 %v1440_v24, %v1439_v8 }
 0x1e0   :  { %v1443_v49 = vadd.f32 %v1442_v30, %v1441_v40 }
 0x212   :  { %v1863_v1 = vpop.f32.mrf.mxu1 }
 0x213   :  { %v3441_v32 = vadd.f32 %v1863_v1, %v3372_v29 }
 0x214   :  { %v1382_v54 = vpop.f32.mrf.mxu1 }
 0x215   :  { %1423 = vst.msk [vmem:[%s3586_s10 + $0x50] sm:$0xff] %vm451_vm1, %v3441_v32  ;;  %v3451_v47 = vadd.f32 %v3372_v29, %v1382_v54  ;;  %v1448_v16 = vsel %vm451_vm1, %v3441_v32, 0.0 }
 0x216   :  { %v1864_v31 = vpop.f32.mrf.mxu1 }
 0x217   :  { %1421 = vst.msk [vmem:[%s3586_s10 + $0x40] sm:$0xff] %vm451_vm1, %v3451_v47  ;;  %v3459_v55 = vadd.f32 %v1864_v31, %v3372_v29  ;;  %v1444_v26 = vsel %vm451_vm1, %v3451_v47, 0.0 }
 0x218   :  { %v1385_v5 = vpop.f32.mrf.mxu1  ;;  %v1445_v39 = vadd.f32 %v1444_v26, %v1443_v49 }
 0x219   :  { %1424 = vst.msk [vmem:[%s3586_s10 + $0x58] sm:$0xff] %vm451_vm1, %v3459_v55  ;;  %v3469_v56 = vadd.f32 %v3372_v29, %v1385_v5  ;;  %v1450_v43 = vsel %vm451_vm1, %v3459_v55, 0.0 }
 0x21b   :  { %1422 = vst.msk [vmem:[%s3586_s10 + $0x48] sm:$0xff] %vm451_vm1, %v3469_v56  ;;  %v1446_v10 = vsel %vm451_vm1, %v3469_v56, 0.0 }
 0x21c   :  { %v1447_v21 = vadd.f32 %v1446_v10, %v1445_v39 }
 0x21e   :  { %v1449_v14 = vadd.f32 %v1448_v16, %v1447_v21 }
 0x220   :  { %v1451_v28 = vadd.f32 %v1450_v43, %v1449_v14 }
 0x22f   :  { %v1867_v46 = vpop.f32.mrf.mxu1 }
 0x230   :  { %v3493_v9 = vadd.f32 %v1867_v46, %v3372_v29 }
 0x231   :  { %v1398_v60 = vpop.f32.mrf.mxu1 }
 0x232   :  { %1427 = vst.msk [vmem:[%s3586_s10 + $0x70] sm:$0xff] %vm451_vm1, %v3493_v9  ;;  %v3501_v61 = vadd.f32 %v3372_v29, %v1398_v60  ;;  %v1456_v11 = vsel %vm451_vm1, %v3493_v9, 0.0 }
 0x233   :  { %v1868_v34 = vpop.f32.mrf.mxu1 }
 0x234   :  { %1425 = vst.msk [vmem:[%s3586_s10 + $0x60] sm:$0xff] %vm451_vm1, %v3501_v61  ;;  %v1452_v2 = vsel %vm451_vm1, %v3501_v61, 0.0  ;;  %v3513_v53 = vadd.f32 %v1868_v34, %v3372_v29 }
 0x235   :  { %v1401_v51 = vpop.f32.mrf.mxu1  ;;  %v1453_v7 = vadd.f32 %v1452_v2, %v1451_v28 }
 0x236   :  { %1428 = vst.msk [vmem:[%s3586_s10 + $0x78] sm:$0xff] %vm451_vm1, %v3513_v53  ;;  %v1402_v59 = vadd.f32 %v3372_v29, %v1401_v51  ;;  %v1458_v17 = vsel %vm451_vm1, %v3513_v53, 0.0 }
 0x238   :  { %1426 = vst.msk [vmem:[%s3586_s10 + $0x68] sm:$0xff] %vm451_vm1, %v1402_v59  ;;  %v1454_v41 = vsel %vm451_vm1, %v1402_v59, 0.0 }
 0x239   :  { %v1455_v37 = vadd.f32 %v1454_v41, %v1453_v7 }
 0x23b   :  { %v1457_v13 = vadd.f32 %v1456_v11, %v1455_v37 }
 0x23d   :  { %v1459_v33 = vadd.f32 %v1458_v17, %v1457_v13 }
 0x23f   :  { %v1460_v3 = vrot.slane %v1459_v33, 4 }
 0x241   :  { %v1461_v52 = vadd.f32 %v1460_v3, %v1459_v33 }
 0x243   :  { %v1462_v29 = vrot.slane %v1461_v52, 2 }
 0x245   :  { %v1463_v12 = vadd.f32 %v1462_v29, %v1461_v52 }
 0x247   :  { %v1464_v44 = vrot.slane %v1463_v12, 1 }
 0x249   :  { %v1465_v6 = vadd.f32 %v1464_v44, %v1463_v12 }
 0x24b   :  { %v1466_v18 = vmul.f32 0.0078125, %v1465_v6 }
 0x24d   :  { %v1467_v58 = vsub.f32 %v3383_v42, %v1466_v18  ;;  %v1468_v45 = vsub.f32 %v3399_v15, %v1466_v18  ;;  %1541 = vst.msk [vmem:[%s3587_s11] sm:$0x1] %vm1540_vm15, %v1466_v18  ;;  %v1469_v48 = vsub.f32 %v3375_v35, %v1466_v18  ;;  %v1470_v1 = vsub.f32 %v3391_v62, %v1466_v18 }
 0x24e   :  { %v1471_v20 = vsub.f32 %v3415_v22, %v1466_v18  ;;  %v1472_v36 = vsub.f32 %v3431_v23, %v1466_v18  ;;  %v1473_v38 = vsub.f32 %v3407_v0, %v1466_v18  ;;  %v1474_v62 = vsub.f32 %v3423_v50, %v1466_v18 }
 0x24f   :  { %v1483_v25 = vmul.f32 %v1467_v58, %v1467_v58  ;;  %v1484_v54 = vmul.f32 %v1468_v45, %v1468_v45  ;;  %v1485_v31 = vmul.f32 %v1469_v48, %v1469_v48  ;;  %v1486_v5 = vmul.f32 %v1470_v1, %v1470_v1 }
 0x250   :  { %v1487_v27 = vmul.f32 %v1471_v20, %v1471_v20  ;;  %v1488_v57 = vmul.f32 %v1472_v36, %v1472_v36  ;;  %v1475_v23 = vsub.f32 %v3451_v47, %v1466_v18  ;;  %v1489_v8 = vmul.f32 %v1473_v38, %v1473_v38 }
 0x251   :  { %v1499_v42 = vsel %vm451_vm1, %v1483_v25, 0.0  ;;  %v1500_v15 = vsel %vm451_vm1, %v1484_v54, 0.0  ;;  %v1502_v35 = vsel %vm451_vm1, %v1485_v31, 0.0  ;;  %v1504_v22 = vsel %vm451_vm1, %v1486_v5, 0.0 }
 0x252   :  { %v1501_v4 = vadd.f32 %v1500_v15, %v1499_v42  ;;  %v1506_v24 = vsel %vm451_vm1, %v1487_v27, 0.0  ;;  %v1476_v30 = vsub.f32 %v3469_v56, %v1466_v18  ;;  %v1490_v26 = vmul.f32 %v1474_v62, %v1474_v62 }
 0x253   :  { %v1508_v0 = vsel %vm451_vm1, %v1488_v57, 0.0  ;;  %v1477_v10 = vsub.f32 %v3441_v32, %v1466_v18  ;;  %v1491_v39 = vmul.f32 %v1475_v23, %v1475_v23  ;;  %v1510_v50 = vsel %vm451_vm1, %v1489_v8, 0.0 }
 0x254   :  { %v1503_v19 = vadd.f32 %v1502_v35, %v1501_v4  ;;  %v1478_v46 = vsub.f32 %v3459_v55, %v1466_v18  ;;  %v1492_v16 = vmul.f32 %v1476_v30, %v1476_v30  ;;  %v1512_v47 = vsel %vm451_vm1, %v1490_v26, 0.0 }
 0x255   :  { %v1479_v60 = vsub.f32 %v3501_v61, %v1466_v18  ;;  %v1493_v34 = vmul.f32 %v1477_v10, %v1477_v10  ;;  %v1514_v56 = vsel %vm451_vm1, %v1491_v39, 0.0  ;;  %v1480_v2 = vsub.f32 %v1402_v59, %v1466_v18 }
 0x256   :  { %v1505_v63 = vadd.f32 %v1504_v22, %v1503_v19  ;;  %v1494_v28 = vmul.f32 %v1478_v46, %v1478_v46  ;;  %v1516_v32 = vsel %vm451_vm1, %v1492_v16, 0.0  ;;  %v1481_v7 = vsub.f32 %v3493_v9, %v1466_v18 }
 0x257   :  { %v1495_v41 = vmul.f32 %v1479_v60, %v1479_v60  ;;  %v1518_v55 = vsel %vm451_vm1, %v1493_v34, 0.0  ;;  %v1482_v11 = vsub.f32 %v3513_v53, %v1466_v18  ;;  %v1496_v13 = vmul.f32 %v1480_v2, %v1480_v2 }
 0x258   :  { %v1507_v40 = vadd.f32 %v1506_v24, %v1505_v63  ;;  %v1520_v61 = vsel %vm451_vm1, %v1494_v28, 0.0  ;;  %v1497_v33 = vmul.f32 %v1481_v7, %v1481_v7 }
 0x259   :  { %v1522_v3 = vsel %vm451_vm1, %v1495_v41, 0.0  ;;  %v1498_v52 = vmul.f32 %v1482_v11, %v1482_v11  ;;  %v1524_v29 = vsel %vm451_vm1, %v1496_v13, 0.0 }
 0x25a   :  { %v1509_v49 = vadd.f32 %v1508_v0, %v1507_v40  ;;  %v1526_v9 = vsel %vm451_vm1, %v1497_v33, 0.0 }
 0x25b   :  { %v1528_v6 = vsel %vm451_vm1, %v1498_v52, 0.0 }
 0x25c   :  { %v1511_v21 = vadd.f32 %v1510_v50, %v1509_v49 }
 0x25e   :  { %v1513_v14 = vadd.f32 %v1512_v47, %v1511_v21 }
 0x260   :  { %v1515_v43 = vadd.f32 %v1514_v56, %v1513_v14 }
 0x262   :  { %v1517_v51 = vadd.f32 %v1516_v32, %v1515_v43 }
 0x264   :  { %v1519_v37 = vadd.f32 %v1518_v55, %v1517_v51 }
 0x266   :  { %v1521_v17 = vadd.f32 %v1520_v61, %v1519_v37 }
 0x268   :  { %v1523_v59 = vadd.f32 %v1522_v3, %v1521_v17 }
 0x26a   :  { %v1525_v12 = vadd.f32 %v1524_v29, %v1523_v59 }
 0x26c   :  { %v1527_v44 = vadd.f32 %v1526_v9, %v1525_v12 }
 0x26e   :  { %v1529_v58 = vadd.f32 %v1528_v6, %v1527_v44 }
 0x270   :  { %v1530_v45 = vrot.slane %v1529_v58, 4 }
 0x272   :  { %v1531_v53 = vadd.f32 %v1530_v45, %v1529_v58 }
 0x274   :  { %v1532_v18 = vrot.slane %v1531_v53, 2 }
 0x276   :  { %v1533_v48 = vadd.f32 %v1532_v18, %v1531_v53 }
 0x278   :  { %v1534_v1 = vrot.slane %v1533_v48, 1 }
 0x27a   :  { %v1535_v25 = vadd.f32 %v1534_v1, %v1533_v48 }
 0x27c   :  { %1542 = vst.msk [vmem:[%s3587_s11 + $0x1] sm:$0x1] %vm1540_vm15, %v1535_v25 }
 0x283   :  { %v1576_v54 = vld [vmem:[%s3587_s11 + $0x1] sm:$0x1] }
 0x284   :  { %v1577_v20 = vmul.f32 0.0078125, %v1576_v54 }
 0x286   :  { %1579 = vst.msk [vmem:[%s3587_s11 + $0x1] sm:$0x1] %vm1540_vm15, %v1577_v20 }

// kernel: mnist_encoder_forward.10
= control target key start
LH: loop header
LB: loop body
LE: loop exit
PB: predicated region body
PF: predicated region fallthrough
CT: control target
= control target key end

     0   :  { %s4093_s17 = smov 0   ;;  %s4095_s18 = smov 0   ;;  %s5901_s0 = inlined_call_operand.vmem [shape: bf16[2,272,1], index: 0, kind: input, shape index: {}]   ;;  %s5902_s1 = inlined_call_operand.vmem [shape: bf16[2,272,1], index: 1, kind: input, shape index: {}]   ;;  %s5903_s2 = inlined_call_operand.vmem [shape: bf16[2,272,1], index: 2, kind: input, shape index: {}]   ;;  %s5904_s3 = inlined_call_operand.vmem [shape: bf16[2,272,1], index: 3, kind: input, shape index: {}]   ;;  %s5905_s4 = inlined_call_operand.vmem [shape: bf16[2,272,1], index: 4, kind: input, shape index: {}]   ;;  %s5906_s5 = inlined_call_operand.vmem [shape: bf16[2,272,1], index: 5, kind: input, shape index: {}]   ;;  %s5907_s6 = inlined_call_operand.vmem [shape: bf16[2,272,1], index: 6, kind: input, shape index: {}]   ;;  %s5908_s7 = inlined_call_operand.vmem [shape: bf16[2,272,1], index: 7, kind: input, shape index: {}]   ;;  %s5909_s8 = inlined_call_operand.vmem [shape: bf16[16,8], index: 8, kind: input, shape index: {}]   ;;  %s5910_s9 = inlined_call_operand.vmem [shape: f32[1,8], index: 9, kind: input, shape index: {}]   ;;  %s5911_s10 = inlined_call_operand.vmem [shape: f32[512,8], index: 10, kind: output, shape index: {0}]   ;;  %s5912_s11 = inlined_call_operand.vmem [shape: f32[2,8], index: 11, kind: output, shape index: {1}]  }
   0x1   :  { %5945 = sst [smem:[#allocation6_spill]] %s5901_s0  ;;  %s4097_s19 = smov 0  }
   0x2   :  { %5946 = sst [smem:[#allocation7_spill]] %s5902_s1 }
   0x3   :  { %5947 = sst [smem:[#allocation8_spill]] %s5903_s2 }
   0x4   :  { %5948 = sst [smem:[#allocation9_spill]] %s5904_s3 }
   0x5   :  { %5949 = sst [smem:[#allocation10_spill]] %s5905_s4 }
   0x6   :  { %5950 = sst [smem:[#allocation11_spill]] %s5906_s5 }
   0x7   :  { %5951 = sst [smem:[#allocation12_spill]] %s5907_s6 }
   0x8   :  { %5952 = sst [smem:[#allocation13_spill]] %s5908_s7 }
   0x9   :  { %5953 = sst [smem:[#allocation14_spill]] %s5909_s8 }
   0xa LB: > { %s31_s20 = sadd.s32 1, %s4012_s18  ;;  %p3516_p0 = scmp.ge.s32.totalorder %s4016_s19, 1  ;;  %s4016_s19 = sphi %s4097_s19, %s22_s19   ;;  %s4012_s18 = sphi %s4095_s18, %s6008_s18   ;;  %s4008_s17 = sphi %s4093_s17, %s6007_s17  }
   0xb   : > { %p32_p1 = scmp.ge.s32.totalorder %s31_s20, 2  ;;  %p441_p2 = scmp.lt.s32.totalorder %s4016_s19, 3 }
   0xd   : > { %s6010_s20 = smov (%p32_p1, %s31_s20), 0  ;;  %p442_p3 = pnand %p3516_p0, %p441_p2 }
   0xe   : > { %5954 = sst [smem:[#allocation3_spill]] %s6010_s20 }
   0xf   : > { %445 = sbr.rel (%p442_p3) target bundleno = 1026 (0x402), region = 60 }
  0x14   : > { %p530_p4 = scmp.lt.s32.totalorder %s4008_s17, 1  ;;  %s5955_s2 = sld [smem:[#allocation8_spill]]  ;;  %vm5942_vm0 = vcmask 7168   ;;  %vm2072_vm1 = vcmask 15360   ;;  %vm2105_vm2 = vcmask 23552   ;;  %vm2138_vm3 = vcmask 31744  }
  0x15   : > { %s4018_s26 = smov 1   ;;  %s5956_s1 = sld [smem:[#allocation7_spill]]  ;;  %vm5944_vm4 = vcmask 39936   ;;  %vm2204_vm5 = vcmask 48128   ;;  %vm2237_vm6 = vcmask 56320   ;;  %vm2270_vm7 = vcmask 64512  }
  0x16   : > { %s531_s21 = scalar_select %p530_p4, %s4008_s17, 1  ;;  %vm2303_vm8 = vcmask 72704   ;;  %vm2336_vm9 = vcmask 80896   ;;  %vm2369_vm10 = vcmask 89088   ;;  %vm2402_vm11 = vcmask 97280  }
  0x17   : > { %s5957_s3 = sld [smem:[#allocation9_spill]]  ;;  %s5913_s28 = smov 2   ;;  %vm5943_vm12 = vcmask 105472   ;;  %vm2468_vm13 = vcmask 113664   ;;  %vm5941_vm14 = vcmask 121856   ;;  %vm2646_vm15 = vcmask 125952  }
  0x18   : > { %s4115_s22 = smul.u32 136, %s531_s21  ;;  %s5958_s4 = sld [smem:[#allocation10_spill]] }
  0x19   : > { %s5959_s6 = sld [smem:[#allocation12_spill]]  ;;  %s5915_s12 = smov 5  }
  0x1a   : > { %s4121_s25 = scalar_lea.vmem %s5955_s2, %s4115_s22  ;;  %s5960_s5 = sld [smem:[#allocation11_spill]] }
  0x1b   : > { %v4124_v0 = vld [vmem:[%s4121_s25 + $0x10] sm:$0xff]   ;;  %v3831_v1 = vld [vmem:[%s4121_s25] sm:$0xff]   ;;  %v4130_v2 = vld [vmem:[%s4121_s25 + $0x18] sm:$0xff]   ;;  %s4163_s29 = scalar_lea.vmem %s5956_s1, %s4115_s22  ;;  %s5961_s7 = sld [smem:[#allocation13_spill]] }
  0x1c   : > { %1027 = vrot.lane.b32.xlu1 %v4124_v0, %s4018_s26  ;;  %1023 = vrot.lane.b32.xlu0 %v3831_v1, %s4018_s26  ;;  %v4134_v3 = vld [vmem:[%s4121_s25 + $0x8] sm:$0xff]   ;;  %v4144_v5 = vld [vmem:[%s4121_s25 + $0x20] sm:$0xff]   ;;  %s5962_s0 = sld [smem:[#allocation6_spill]]  ;;  %s5933_s14 = smov 6  }
  0x1d   : > { %v4139_v4 = vld [vmem:[%s4121_s25 + $0x28] sm:$0xff]   ;;  %v3836_v6 = vld [vmem:[%s4121_s25 + $0x38] sm:$0xff]   ;;  %v4152_v7 = vld [vmem:[%s4121_s25 + $0x30] sm:$0xff]   ;;  %s4173_s13 = scalar_lea.vmem %s5957_s3, %s4115_s22  ;;  %s5917_s21 = smov 7  }
  0x1e   : > { %v3838_v8 = vld [vmem:[%s4121_s25 + $0x48] sm:$0xff]   ;;  %v3839_v9 = vld [vmem:[%s4121_s25 + $0x40] sm:$0xff]   ;;  %v3840_v10 = vld [vmem:[%s4121_s25 + $0x58] sm:$0xff]   ;;  %s4179_s16 = scalar_lea.vmem %s5958_s4, %s4115_s22  ;;  %s5931_s23 = smov 8  }
  0x1f   : > { %v3841_v11 = vld [vmem:[%s4121_s25 + $0x50] sm:$0xff]   ;;  %v3842_v12 = vld [vmem:[%s4121_s25 + $0x68] sm:$0xff]   ;;  %v3843_v13 = vld [vmem:[%s4121_s25 + $0x60] sm:$0xff]   ;;  %s4189_s24 = scalar_lea.vmem %s5959_s6, %s4115_s22  ;;  %s5965_s8 = sld [smem:[#allocation14_spill]] }
  0x20   : > { %1029 = vrot.lane.b32.xlu1 %v4130_v2, %s4018_s26  ;;  %1025 = vrot.lane.b32.xlu0 %v4134_v3, %s4018_s26  ;;  %s4195_s30 = scalar_lea.vmem %s5960_s5, %s4115_s22  ;;  %v3844_v14 = vld [vmem:[%s4121_s25 + $0x78] sm:$0xff]   ;;  %v3845_v15 = vld [vmem:[%s4121_s25 + $0x70] sm:$0xff]   ;;  %s5972_s1 = smov 4  }
  0x21   : > { %s4205_s15 = scalar_lea.vmem %s5961_s7, %s4115_s22  ;;  %v3846_v16 = vld [vmem:[%s4163_s29 + $0x8] sm:$0xff]   ;;  %v3847_v17 = vld [vmem:[%s4163_s29] sm:$0xff]   ;;  %v4219_v18 = vld [vmem:[%s4163_s29 + $0x18] sm:$0xff]   ;;  %s5973_s2 = smov 12  }
  0x22   : > { %s4213_s27 = scalar_lea.vmem %s5962_s0, %s4115_s22  ;;  %v3849_v19 = vld [vmem:[%s4163_s29 + $0x10] sm:$0xff]   ;;  %v3850_v20 = vld [vmem:[%s4173_s13] sm:$0xff]   ;;  %s5921_s22 = smov 3   ;;  %v3853_v23 = vld [vmem:[%s4173_s13 + $0x8] sm:$0xff]  }
  0x23   : > { %v4228_v21 = vld [vmem:[%s4163_s29 + $0x20] sm:$0xff]   ;;  %v3855_v25 = vld [vmem:[%s4179_s16 + $0x8] sm:$0xff]   ;;  %v4257_v32 = vld [vmem:[%s4213_s27 + $0x10] sm:$0xff]   ;;  %s5971_s0 = smov 11   ;;  %s5976_s3 = smov 13  }
  0x24   : > { %1033 = vrot.lane.b32.xlu1 %v4139_v4, %s4018_s26  ;;  %1031 = vrot.lane.b32.xlu0 %v4144_v5, %s4018_s26  ;;  %v3852_v22 = vld [vmem:[%s4179_s16] sm:$0xff]   ;;  %v3857_v27 = vld [vmem:[%s4189_s24 + $0x8] sm:$0xff]   ;;  %s5977_s4 = smov 6   ;;  %s5978_s5 = smov 14  }
  0x25   : > { %v3854_v24 = vld [vmem:[%s4189_s24] sm:$0xff]   ;;  %v3859_v29 = vld [vmem:[%s4195_s30 + $0x8] sm:$0xff]   ;;  %v3863_v33 = vld [vmem:[%s4173_s13 + $0x10] sm:$0xff]   ;;  %s5979_s6 = smov 15   ;;  %p3729_p6 = scmp.ne.s32.totalorder %s4008_s17, 0 }
  0x26   : > { %v3856_v26 = vld [vmem:[%s4195_s30] sm:$0xff]   ;;  %v4249_v30 = vld [vmem:[%s4213_s27 + $0x8] sm:$0xff]   ;;  %v4269_v34 = vld [vmem:[%s4173_s13 + $0x18] sm:$0xff]  }
  0x27   : > { %v3858_v28 = vld [vmem:[%s4205_s15] sm:$0xff]   ;;  %v3860_v31 = vld [vmem:[%s4205_s15 + $0x8] sm:$0xff]   ;;  %v3865_v35 = vld [vmem:[%s4179_s16 + $0x10] sm:$0xff]  }
  0x28   : > { %1037 = vrot.lane.b32.xlu1 %v3836_v6, %s4018_s26  ;;  %1035 = vrot.lane.b32.xlu0 %v4152_v7, %s4018_s26  ;;  %v4277_v36 = vld [vmem:[%s4179_s16 + $0x18] sm:$0xff]   ;;  %v3867_v37 = vld [vmem:[%s4189_s24 + $0x10] sm:$0xff]  }
  0x29   : > { %v4286_v38 = vld [vmem:[%s4189_s24 + $0x18] sm:$0xff]   ;;  %v3869_v39 = vld [vmem:[%s4195_s30 + $0x10] sm:$0xff]   ;;  %v3911_v43 = vld [vmem:[%s5965_s8] sm:$0xff]  }
  0x2a   : > { %v4295_v40 = vld [vmem:[%s4195_s30 + $0x18] sm:$0xff]   ;;  %v3871_v41 = vld [vmem:[%s4205_s15 + $0x10] sm:$0xff]   ;;  %3752 = vmatprep.subr.bf16.mxu0 %v3911_v43  ;;  %3786 = vmatprep.subr.bf16.mxu1 %v3911_v43  ;;  %v3875_v45 = vld [vmem:[%s4213_s27 + $0x20] sm:$0xff]  }
  0x2b   : > { %v4304_v42 = vld [vmem:[%s4205_s15 + $0x18] sm:$0xff]   ;;  %3753 = vmatpush3.bf16.msra.mxu0 %v3911_v43  ;;  %3787 = vmatpush3.bf16.msra.mxu1 %v3911_v43  ;;  %v3876_v50 = vld [vmem:[%s4213_s27 + $0x28] sm:$0xff]   ;;  %v3878_v51 = vld [vmem:[%s4173_s13 + $0x20] sm:$0xff]  }
  0x2c   : > { %1041 = vrot.lane.b32.xlu1 %v3838_v8, %s4018_s26  ;;  %1039 = vrot.lane.b32.xlu0 %v3839_v9, %s4018_s26  ;;  %v4312_v44 = vld [vmem:[%s4213_s27 + $0x18] sm:$0xff]   ;;  %v4339_v52 = vld [vmem:[%s4163_s29 + $0x28] sm:$0xff]  }
  0x2d   : > { %v3880_v57 = vld [vmem:[%s4213_s27 + $0x30] sm:$0xff]   ;;  %v3884_v61 = vld [vmem:[%s4179_s16 + $0x20] sm:$0xff]   ;;  %v4362_v62 = vld [vmem:[%s4173_s13 + $0x28] sm:$0xff]  }
  0x30   : > { %1045 = vrot.lane.b32.xlu1 %v3840_v10, %s4018_s26  ;;  %1043 = vrot.lane.b32.xlu0 %v3841_v11, %s4018_s26  ;;  %v3894_v11 = vld [vmem:[%s4195_s30 + $0x20] sm:$0xff]  }
  0x34   : > { %1049 = vrot.lane.b32.xlu1 %v3842_v12, %s4018_s26  ;;  %1047 = vrot.lane.b32.xlu0 %v3843_v13, %s4018_s26  ;;  %v4398_v12 = vld [vmem:[%s4189_s24 + $0x28] sm:$0xff]  }
  0x38   : > { %1053 = vrot.lane.b32.xlu1 %v3844_v14, %s4018_s26  ;;  %1051 = vrot.lane.b32.xlu0 %v3845_v15, %s4018_s26  ;;  %s5927_s26 = smov 4  }
  0x3c   : > { %1137 = vrot.lane.b32.xlu1 %v3846_v16, %s5913_s28  ;;  %1135 = vrot.lane.b32.xlu0 %v3847_v17, %s5913_s28  ;;  %v3896_v17 = vld [vmem:[%s4205_s15 + $0x20] sm:$0xff]  }
  0x40   : > { %1141 = vrot.lane.b32.xlu1 %v4219_v18, %s5913_s28  ;;  %1139 = vrot.lane.b32.xlu0 %v3849_v19, %s5913_s28 }
  0x44   : > { %1247 = vrot.lane.b32.xlu1 %v3850_v20, %s5921_s22  ;;  %1143 = vrot.lane.b32.xlu0 %v4228_v21, %s5913_s28  ;;  %s5929_s28 = smov 9  }
  0x48   : > { %1359 = vrot.lane.b32.xlu1 %v3852_v22, %s5927_s26  ;;  %1249 = vrot.lane.b32.xlu0 %v3853_v23, %s5921_s22 }
  0x4c   : > { %1471 = vrot.lane.b32.xlu1 %v3854_v24, %s5915_s12  ;;  %1361 = vrot.lane.b32.xlu0 %v3855_v25, %s5927_s26 }
  0x50   : > { %1583 = vrot.lane.b32.xlu1 %v3856_v26, %s5933_s14  ;;  %1473 = vrot.lane.b32.xlu0 %v3857_v27, %s5915_s12  ;;  %s5919_s12 = smov 10  }
  0x54   : > { %1695 = vrot.lane.b32.xlu1 %v3858_v28, %s5917_s21  ;;  %1585 = vrot.lane.b32.xlu0 %v3859_v29, %s5933_s14  ;;  %v3898_v28 = vld [vmem:[%s4163_s29 + $0x30] sm:$0xff]  }
  0x58   : > { %1732 = vrot.lane.b32.xlu1 %v4249_v30, %s5931_s23  ;;  %1697 = vrot.lane.b32.xlu0 %v3860_v31, %s5917_s21  ;;  %s5923_s21 = smov 11  }
  0x5c   : > { %1769 = vrot.lane.b32.xlu1 %v4134_v3, %s5929_s28  ;;  %1734 = vrot.lane.b32.xlu0 %v4257_v32, %s5931_s23  ;;  %s5967_s23 = smov 9   ;;  %v3890_v3 = vld [vmem:[%s4189_s24 + $0x20] sm:$0xff]  }
  0x60   : > { %1806 = vrot.lane.b32.xlu1 %v3846_v16, %s5919_s12  ;;  %1771 = vrot.lane.b32.xlu0 %v4124_v0, %s5929_s28  ;;  %s5966_s28 = smov 8  }
  0x64   : > { %1808 = vrot.lane.b32.xlu1 %v3849_v19, %s5919_s12  ;;  %1251 = vrot.lane.b32.xlu0 %v3863_v33, %s5921_s22  ;;  %s5925_s12 = smov 12  }
  0x68   : > { %1253 = vrot.lane.b32.xlu1 %v4269_v34, %s5921_s22  ;;  %1843 = vrot.lane.b32.xlu0 %v3853_v23, %s5923_s21  ;;  %s5963_s22 = smov 5   ;;  %v4433_v23 = vld [vmem:[%s4205_s15 + $0x28] sm:$0xff]  }
  0x6c   : > { %1845 = vrot.lane.b32.xlu1 %v3863_v33, %s5923_s21  ;;  %1363 = vrot.lane.b32.xlu0 %v3865_v35, %s5927_s26  ;;  %s5939_s21 = smov 13  }
  0x70   : > { %1365 = vrot.lane.b32.xlu1 %v4277_v36, %s5927_s26  ;;  %1880 = vrot.lane.b32.xlu0 %v3855_v25, %s5925_s12  ;;  %s5964_s26 = smov 7  }
  0x74   : > { %1882 = vrot.lane.b32.xlu1 %v3865_v35, %s5925_s12  ;;  %1475 = vrot.lane.b32.xlu0 %v3867_v37, %s5963_s22  ;;  %s5935_s12 = smov 14   ;;  %v3900_v35 = vld [vmem:[%s4173_s13 + $0x30] sm:$0xff]  }
  0x78   : > { %1477 = vrot.lane.b32.xlu1 %v4286_v38, %s5963_s22  ;;  %1917 = vrot.lane.b32.xlu0 %v3857_v27, %s5939_s21 }
  0x7c   : > { %1919 = vrot.lane.b32.xlu1 %v3867_v37, %s5939_s21  ;;  %1587 = vrot.lane.b32.xlu0 %v3869_v39, %s5933_s14  ;;  %s5970_s21 = smov 2  }
  0x80   : > { %1589 = vrot.lane.b32.xlu1 %v4295_v40, %s5933_s14  ;;  %1954 = vrot.lane.b32.xlu0 %v3859_v29, %s5935_s12  ;;  %s5937_s14 = smov 15  }
  0x84   : > { %1956 = vrot.lane.b32.xlu1 %v3869_v39, %s5935_s12  ;;  %1699 = vrot.lane.b32.xlu0 %v3871_v41, %s5964_s26  ;;  %s5968_s12 = smov 10  }
  0x88   : > { %1701 = vrot.lane.b32.xlu1 %v4304_v42, %s5964_s26  ;;  %1991 = vrot.lane.b32.xlu0 %v3860_v31, %s5937_s14 }
  0x8c   : > { %1993 = vrot.lane.b32.xlu1 %v3871_v41, %s5937_s14  ;;  %1736 = vrot.lane.b32.xlu0 %v4312_v44, %s5966_s28  ;;  %s5969_s14 = smov 3  }
  0x8e   : > { %v4321_v46 = vpop.permute.xlu1 %1027  ;;  %v4323_v47 = vpop.permute.xlu0 %1023 }
  0x90   : > { %1773 = vrot.lane.b32.xlu1 %v4130_v2, %s5967_s23  ;;  %1738 = vrot.lane.b32.xlu0 %v3875_v45, %s5966_s28 }
  0x92   : > { %v4328_v48 = vpop.permute.xlu1 %1029  ;;  %v4330_v49 = vpop.permute.xlu0 %1025 }
  0x94   : > { %1810 = vrot.lane.b32.xlu1 %v4219_v18, %s5968_s12  ;;  %1775 = vrot.lane.b32.xlu0 %v4144_v5, %s5967_s23  ;;  %v4380_v5 = vld [vmem:[%s4179_s16 + $0x28] sm:$0xff]  }
  0x95   : > { %v4416_v18 = vld [vmem:[%s4195_s30 + $0x28] sm:$0xff]  }
  0x96   : > { %v1034_v53 = vpop.permute.xlu1 %1033  ;;  %v1032_v55 = vpop.permute.xlu0 %1031 }
  0x97   : > { %v4342_v54 = vsel %vm5942_vm0, %v3876_v50, %v1034_v53  ;;  %v4345_v56 = vsel %vm5942_vm0, %v3875_v45, %v1032_v55 }
  0x98   : > { %1255 = vrot.lane.b32.xlu1 %v3878_v51, %s5969_s14  ;;  %1145 = vrot.lane.b32.xlu0 %v4339_v52, %s5970_s21 }
  0x9a   : > { %v4351_v58 = vpop.permute.xlu1 %1037  ;;  %v1036_v59 = vpop.permute.xlu0 %1035 }
  0x9b   : > { %v4354_v60 = vsel %vm5942_vm0, %v3880_v57, %v1036_v59  ;;  %v3906_v59 = vld [vmem:[%s4195_s30 + $0x30] sm:$0xff]  }
  0x9c   : > { %1847 = vrot.lane.b32.xlu1 %v4269_v34, %s5971_s0  ;;  %1812 = vrot.lane.b32.xlu0 %v4228_v21, %s5968_s12 }
  0x9e   : > { %v4364_v63 = vpop.permute.xlu1 %1041  ;;  %v4366_v0 = vpop.permute.xlu0 %1039 }
  0xa0   : > { %1367 = vrot.lane.b32.xlu1 %v3884_v61, %s5972_s1  ;;  %1257 = vrot.lane.b32.xlu0 %v4362_v62, %s5969_s14 }
  0xa2   : > { %v4371_v1 = vpop.permute.xlu1 %1045  ;;  %v4373_v2 = vpop.permute.xlu0 %1043 }
  0xa4   : > { %1884 = vrot.lane.b32.xlu1 %v4277_v36, %s5973_s2  ;;  %1849 = vrot.lane.b32.xlu0 %v3878_v51, %s5971_s0  ;;  %v4466_v36 = vld [vmem:[%s4163_s29 + $0x38] sm:$0xff]  }
  0xa5   : > { %v4502_v51 = vld [vmem:[%s4179_s16 + $0x38] sm:$0xff]  }
  0xa6   : > { %v4382_v6 = vpop.permute.xlu1 %1049  ;;  %v4384_v8 = vpop.permute.xlu0 %1047 }
  0xa8   : > { %1479 = vrot.lane.b32.xlu1 %v3890_v3, %s5963_s22  ;;  %1369 = vrot.lane.b32.xlu0 %v4380_v5, %s5972_s1 }
  0xaa   : > { %v4389_v9 = vpop.permute.xlu1 %1053  ;;  %v4391_v10 = vpop.permute.xlu0 %1051 }
  0xab   : > { %5974 = vst [vmem:[#allocation4_spill] sm:$0xff] %v4389_v9  ;;  %5975 = vst [vmem:[#allocation5_spill] sm:$0xff] %v4391_v10 }
  0xac   : > { %1921 = vrot.lane.b32.xlu1 %v4286_v38, %s5976_s3  ;;  %1886 = vrot.lane.b32.xlu0 %v3884_v61, %s5973_s2  ;;  %v4520_v61 = vld [vmem:[%s4189_s24 + $0x38] sm:$0xff]  }
  0xae   : > { %v4400_v13 = vpop.permute.xlu1 %1137  ;;  %v4402_v14 = vpop.permute.xlu0 %1135 }
  0xb0   : > { %1591 = vrot.lane.b32.xlu1 %v3894_v11, %s5977_s4  ;;  %1481 = vrot.lane.b32.xlu0 %v4398_v12, %s5963_s22 }
  0xb2   : > { %v4407_v15 = vpop.permute.xlu1 %1141  ;;  %v4409_v16 = vpop.permute.xlu0 %1139 }
  0xb4   : > { %1958 = vrot.lane.b32.xlu1 %v4295_v40, %s5978_s5  ;;  %1923 = vrot.lane.b32.xlu0 %v3890_v3, %s5976_s3  ;;  %v4484_v40 = vld [vmem:[%s4173_s13 + $0x38] sm:$0xff]  }
  0xb6   : > { %v4418_v19 = vpop.permute.xlu1 %1247  ;;  %v4420_v20 = vpop.permute.xlu0 %1143 }
  0xb8   : > { %1703 = vrot.lane.b32.xlu1 %v3896_v17, %s5964_s26  ;;  %1593 = vrot.lane.b32.xlu0 %v4416_v18, %s5977_s4 }
  0xba   : > { %v4425_v21 = vpop.permute.xlu1 %1359  ;;  %v4427_v22 = vpop.permute.xlu0 %1249 }
  0xbc   : > { %1995 = vrot.lane.b32.xlu1 %v4304_v42, %s5979_s6  ;;  %1960 = vrot.lane.b32.xlu0 %v3894_v11, %s5978_s5 }
  0xbe   : > { %v4435_v24 = vpop.permute.xlu1 %1471  ;;  %v4437_v25 = vpop.permute.xlu0 %1361 }
  0xc0   : > { %1740 = vrot.lane.b32.xlu1 %v3876_v50, %s5966_s28  ;;  %1705 = vrot.lane.b32.xlu0 %v4433_v23, %s5964_s26  ;;  %v3904_v50 = vld [vmem:[%s4189_s24 + $0x30] sm:$0xff]  }
  0xc2   : > { %v4442_v26 = vpop.permute.xlu1 %1583  ;;  %v4444_v27 = vpop.permute.xlu0 %1473 }
  0xc4   : > { %1742 = vrot.lane.b32.xlu1 %v3880_v57, %s5966_s28  ;;  %1997 = vrot.lane.b32.xlu0 %v3896_v17, %s5979_s6 }
  0xc6   : > { %v4449_v29 = vpop.permute.xlu1 %1695  ;;  %v4451_v31 = vpop.permute.xlu0 %1585 }
  0xc8   : > { %1147 = vrot.lane.b32.xlu1 %v3898_v28, %s5970_s21  ;;  %1777 = vrot.lane.b32.xlu0 %v4139_v4, %s5967_s23 }
  0xca   : > { %v4456_v33 = vpop.permute.xlu1 %1732  ;;  %v4458_v34 = vpop.permute.xlu0 %1697 }
  0xcc   : > { %1814 = vrot.lane.b32.xlu1 %v4339_v52, %s5968_s12  ;;  %1779 = vrot.lane.b32.xlu0 %v4152_v7, %s5967_s23  ;;  %v3902_v7 = vld [vmem:[%s4179_s16 + $0x30] sm:$0xff]  }
  0xce   : > { %v4468_v37 = vpop.permute.xlu1 %1769  ;;  %v4470_v38 = vpop.permute.xlu0 %1734 }
  0xd0   : > { %1259 = vrot.lane.b32.xlu1 %v3900_v35, %s5969_s14  ;;  %1149 = vrot.lane.b32.xlu0 %v4466_v36, %s5970_s21 }
  0xd2   : > { %v4475_v4 = vpop.permute.xlu1 %1806  ;;  %v4477_v39 = vpop.permute.xlu0 %1771 }
  0xd4   : > { %1851 = vrot.lane.b32.xlu1 %v4362_v62, %s5971_s0  ;;  %1816 = vrot.lane.b32.xlu0 %v3898_v28, %s5968_s12  ;;  %v4539_v28 = vld [vmem:[%s4195_s30 + $0x38] sm:$0xff]  }
  0xd6   : > { %v4486_v41 = vpop.permute.xlu1 %1808  ;;  %v4488_v42 = vpop.permute.xlu0 %1251 }
  0xd8   : > { %1371 = vrot.lane.b32.xlu1 %v3902_v7, %s5972_s1  ;;  %1261 = vrot.lane.b32.xlu0 %v4484_v40, %s5969_s14 }
  0xda   : > { %v4493_v43 = vpop.permute.xlu1 %1253  ;;  %v4495_v45 = vpop.permute.xlu0 %1843 }
  0xdc   : > { %1888 = vrot.lane.b32.xlu1 %v4380_v5, %s5973_s2  ;;  %1853 = vrot.lane.b32.xlu0 %v3900_v35, %s5971_s0  ;;  %v3874_v5 = vld [vmem:[%s4213_s27] sm:$0xff]  }
  0xdd   : > { %v2026_v35 = vsel %vm5942_vm0, %v3874_v5, %v4323_v47 }
  0xde   : > { %v4504_v52 = vpop.permute.xlu1 %1845  ;;  %v4506_v53 = vpop.permute.xlu0 %1363  ;;  %v2074_v9 = vsel %vm2072_vm1, %v2026_v35, %v4402_v14  ;;  %v4583_v35 = vld [vmem:[%s4213_s27 + $0x38] sm:$0xff]  }
  0xe0   : > { %1483 = vrot.lane.b32.xlu1 %v3904_v50, %s5963_s22  ;;  %1373 = vrot.lane.b32.xlu0 %v4502_v51, %s5972_s1 }
  0xe2   : > { %v4511_v55 = vpop.permute.xlu1 %1365  ;;  %v4513_v57 = vpop.permute.xlu0 %1880 }
  0xe4   : > { %1925 = vrot.lane.b32.xlu1 %v4398_v12, %s5976_s3  ;;  %1890 = vrot.lane.b32.xlu0 %v3902_v7, %s5973_s2  ;;  %v4535_v12 = vld [vmem:[%s4205_s15 + $0x30] sm:$0xff]  }
  0xe6   : > { %v4522_v62 = vpop.permute.xlu1 %1882  ;;  %v4524_v3 = vpop.permute.xlu0 %1475 }
  0xe8   : > { %1595 = vrot.lane.b32.xlu1 %v3906_v59, %s5977_s4  ;;  %1485 = vrot.lane.b32.xlu0 %v4520_v61, %s5963_s22 }
  0xea   : > { %v4530_v11 = vpop.permute.xlu1 %1477  ;;  %v1918_v17 = vpop.permute.xlu0 %1917 }
  0xec   : > { %1962 = vrot.lane.b32.xlu1 %v4416_v18, %s5978_s5  ;;  %1927 = vrot.lane.b32.xlu0 %v3904_v50, %s5976_s3  ;;  %v2107_v18 = vsel %vm2105_vm2, %v2074_v9, %v4418_v19  ;;  %v2029_v50 = vsel %vm5942_vm0, %v4249_v30, %v4330_v49 }
  0xed   : > { %v2140_v47 = vsel %vm2138_vm3, %v2107_v18, %v4425_v21  ;;  %v2076_v14 = vsel %vm2072_vm1, %v2029_v50, %v4400_v13 }
  0xee   : > { %v1920_v7 = vpop.permute.xlu1 %1919  ;;  %v4545_v10 = vpop.permute.xlu0 %1587  ;;  %v2173_v9 = vsel %vm5944_vm4, %v2140_v47, %v4435_v24  ;;  %v2109_v30 = vsel %vm2105_vm2, %v2076_v14, %v4427_v22 }
  0xef   : > { %v2206_v49 = vsel %vm2204_vm5, %v2173_v9, %v4442_v26  ;;  %v2142_v5 = vsel %vm2138_vm3, %v2109_v30, %v4437_v25  ;;  %v4580_v26 = vld [vmem:[%s4205_s15 + $0x38] sm:$0xff]  }
  0xf0   : > { %1707 = vrot.lane.b32.xlu1 %v4535_v12, %s5964_s26  ;;  %1597 = vrot.lane.b32.xlu0 %v4539_v28, %s5977_s4  ;;  %v2239_v13 = vsel %vm2237_vm6, %v2206_v49, %v4449_v29  ;;  %v2175_v24 = vsel %vm5944_vm4, %v2142_v5, %v4444_v27 }
  0xf1   : > { %v2272_v22 = vsel %vm2270_vm7, %v2239_v13, %v4456_v33  ;;  %v2208_v25 = vsel %vm2204_vm5, %v2175_v24, %v4451_v31  ;;  %v3983_v24 = vld [vmem:[%s4121_s25 + $0x38] sm:$0xff]  }
  0xf2   : > { %v4562_v19 = vpop.permute.xlu1 %1589  ;;  %v1955_v21 = vpop.permute.xlu0 %1954  ;;  %v2241_v27 = vsel %vm2237_vm6, %v2208_v25, %v4458_v34  ;;  %v3913_v25 = vld [vmem:[%s4173_s13 + $0x40] sm:$0xff]  }
  0xf3   : > { %v2274_v18 = vsel %vm2270_vm7, %v2241_v27, %v4470_v38 }
  0xf4   : > { %1999 = vrot.lane.b32.xlu1 %v4433_v23, %s5979_s6  ;;  %1964 = vrot.lane.b32.xlu0 %v3906_v59, %s5978_s5  ;;  %v2305_v23 = vsel %vm2303_vm8, %v2272_v22, %v4468_v37  ;;  %v2307_v34 = vsel %vm2303_vm8, %v2274_v18, %v4477_v39 }
  0xf5   : > { %v2338_v33 = vsel %vm2336_vm9, %v2305_v23, %v4475_v4  ;;  %v4608_v4 = vld [vmem:[%s4213_s27 + $0x40] sm:$0xff]   ;;  %v2340_v38 = vsel %vm2336_vm9, %v2307_v34, %v4486_v41 }
  0xf6   : > { %v1957_v29 = vpop.permute.xlu1 %1956  ;;  %v4593_v59 = vpop.permute.xlu0 %1699  ;;  %v2371_v31 = vsel %vm2369_vm10, %v2338_v33, %v4495_v45  ;;  %v2373_v47 = vsel %vm2369_vm10, %v2340_v38, %v4504_v52  ;;  %v3910_v41 = vld [vmem:[%s4163_s29 + $0x40] sm:$0xff]   ;;  %v4666_v38 = vld [vmem:[%s4173_s13 + $0x48] sm:$0xff]  }
  0xf7   : > { %v2404_v37 = vsel %vm2402_vm11, %v2371_v31, %v4513_v57  ;;  %v2406_v57 = vsel %vm2402_vm11, %v2373_v47, %v4522_v62  ;;  %v3984_v23 = vld [vmem:[%s4121_s25 + $0x40] sm:$0xff]  }
  0xf8   : > { %1744 = vrot.lane.b32.xlu1 %v4583_v35, %s5966_s28  ;;  %1709 = vrot.lane.b32.xlu0 %v4580_v26, %s5964_s26  ;;  %v2437_v45 = vsel %vm5943_vm12, %v2404_v37, %v1918_v17  ;;  %v2439_v17 = vsel %vm5943_vm12, %v2406_v57, %v1920_v7  ;;  %v3917_v37 = vld [vmem:[%s4179_s16 + $0x40] sm:$0xff]   ;;  %v4682_v57 = vld [vmem:[%s4179_s16 + $0x48] sm:$0xff]  }
  0xf9   : > { %v2470_v39 = vsel %vm2468_vm13, %v2437_v45, %v1955_v21  ;;  %v2472_v52 = vsel %vm2468_vm13, %v2439_v17, %v1957_v29  ;;  %v4648_v29 = vld [vmem:[%s4163_s29 + $0x48] sm:$0xff]  }
  0xfa   : > { %v4613_v50 = vpop.permute.xlu1 %1701  ;;  %v1992_v14 = vpop.permute.xlu0 %1991 }
  0xfb   : > { %v2503_v9 = vsel %vm5941_vm14, %v2470_v39, %v1992_v14 }
  0xfc   : > { %1746 = vrot.lane.b32.xlu1 %v4608_v4, %s5966_s28  ;;  %v3663_v30 = vcombine.low %v2503_v9, %v2503_v9  ;;  %v3664_v49 = vcombine.high %v2503_v9, %v2503_v9  ;;  %2001 = vrot.lane.b32.xlu0 %v4535_v12, %s5979_s6 }
  0xfe   : > { %v1994_v21 = vpop.permute.xlu1 %1993  ;;  %2647 = vst.msk [vmem:[#allocation2] sm:$0xf] %vm2646_vm15, %v3663_v30  ;;  %2648 = vst.msk [vmem:[#allocation2 + $0x4] sm:$0xf] %vm2646_vm15, %v3664_v49  ;;  %v4630_v62 = vpop.permute.xlu0 %1736  ;;  %v4698_v49 = vld [vmem:[%s4189_s24 + $0x48] sm:$0xff]  }
  0xff   : > { %v2505_v5 = vsel %vm5941_vm14, %v2472_v52, %v1994_v21  ;;  %vm2806_vm14 = vcmask 130048  }
 0x100   : > { %v3665_v7 = vcombine.low %v2505_v5, %v2505_v5  ;;  %v3666_v13 = vcombine.high %v2505_v5, %v2505_v5  ;;  %1151 = vrot.lane.b32.xlu1 %v3910_v41, %s5970_s21  ;;  %1781 = vrot.lane.b32.xlu0 %v3983_v24, %s5967_s23  ;;  %v2032_v5 = vsel %vm5942_vm0, %v4257_v32, %v4321_v46  ;;  %v3923_v32 = vld [vmem:[%s4205_s15 + $0x40] sm:$0xff]  }
 0x102   : > { %2649 = vst.msk [vmem:[#allocation2 + $0x8] sm:$0xf] %vm2646_vm15, %v3665_v7  ;;  %2650 = vst.msk [vmem:[#allocation2 + $0xc] sm:$0xf] %vm2646_vm15, %v3666_v13  ;;  %v4638_v12 = vpop.permute.xlu1 %1773  ;;  %v4640_v22 = vpop.permute.xlu0 %1738 }
 0x104   : > { %1818 = vrot.lane.b32.xlu1 %v4466_v36, %s5968_s12  ;;  %1783 = vrot.lane.b32.xlu0 %v3984_v23, %s5967_s23 }
 0x105   : > { %v3914_v33 = vld [vmem:[#allocation2] sm:$0xff]  }
 0x106   : > { %v1811_v27 = vpop.permute.xlu1 %1810  ;;  %v4650_v18 = vpop.permute.xlu0 %1775  ;;  %3754 = vmatprep.mubr.msk.bf16.mxu0 %vm2806_vm14, %v3914_v33 }
 0x108   : > { %1263 = vrot.lane.b32.xlu1 %v3913_v25, %s5969_s14  ;;  %1153 = vrot.lane.b32.xlu0 %v4648_v29, %s5970_s21 }
 0x109   : > { %v3915_v36 = vld [vmem:[#allocation2 + $0x8] sm:$0xff]  }
 0x10a   : > { %v4656_v31 = vpop.permute.xlu1 %1255  ;;  %v4658_v34 = vpop.permute.xlu0 %1145  ;;  %3755 = vmatmul.mubr.msk.bf16.vlgmr.msra.gmra.mxu0 %vm2806_vm14, %v3915_v36 }
 0x10c   : > { %1855 = vrot.lane.b32.xlu1 %v4484_v40, %s5971_s0  ;;  %1820 = vrot.lane.b32.xlu0 %v3910_v41, %s5968_s12  ;;  %v3919_v40 = vld [vmem:[%s4189_s24 + $0x40] sm:$0xff]  }
 0x10e   : > { %v1848_v45 = vpop.permute.xlu1 %1847  ;;  %v4668_v47 = vpop.permute.xlu0 %1812 }
 0x110   : > { %1375 = vrot.lane.b32.xlu1 %v3917_v37, %s5972_s1  ;;  %1265 = vrot.lane.b32.xlu0 %v4666_v38, %s5969_s14 }
 0x112   : > { %v4673_v39 = vpop.permute.xlu1 %1367  ;;  %v4675_v14 = vpop.permute.xlu0 %1257 }
 0x114   : > { %1892 = vrot.lane.b32.xlu1 %v4502_v51, %s5973_s2  ;;  %1857 = vrot.lane.b32.xlu0 %v3913_v25, %s5971_s0  ;;  %v3921_v51 = vld [vmem:[%s4195_s30 + $0x40] sm:$0xff]  }
 0x116   : > { %v1885_v9 = vpop.permute.xlu1 %1884  ;;  %v4684_v41 = vpop.permute.xlu0 %1849 }
 0x118   : > { %1487 = vrot.lane.b32.xlu1 %v3919_v40, %s5963_s22  ;;  %1377 = vrot.lane.b32.xlu0 %v4682_v57, %s5972_s1 }
 0x11a   : > { %v4689_v17 = vpop.permute.xlu1 %1479  ;;  %v4691_v30 = vpop.permute.xlu0 %1369 }
 0x11c   : > { %1929 = vrot.lane.b32.xlu1 %v4520_v61, %s5976_s3  ;;  %1894 = vrot.lane.b32.xlu0 %v3917_v37, %s5973_s2  ;;  %v2078_v61 = vsel %vm2072_vm1, %v2032_v5, %v4409_v16  ;;  %v4723_v16 = vld [vmem:[%s4195_s30 + $0x48] sm:$0xff]  }
 0x11d   : > { %v2111_v13 = vsel %vm2105_vm2, %v2078_v61, %v4488_v42 }
 0x11e   : > { %v1922_v52 = vpop.permute.xlu1 %1921  ;;  %v1887_v21 = vpop.permute.xlu0 %1886  ;;  %v2144_v25 = vsel %vm2138_vm3, %v2111_v13, %v4506_v53 }
 0x11f   : > { %v2177_v46 = vsel %vm5944_vm4, %v2144_v25, %v4524_v3  ;;  %v4777_v25 = vld [vmem:[%s4213_s27 + $0x50] sm:$0xff]  }
 0x120   : > { %1599 = vrot.lane.b32.xlu1 %v3921_v51, %s5977_s4  ;;  %1489 = vrot.lane.b32.xlu0 %v4698_v49, %s5963_s22  ;;  %v2210_v23 = vsel %vm2204_vm5, %v2177_v46, %v4545_v10  ;;  %v2035_v10 = vsel %vm5942_vm0, %v4312_v44, %v4328_v48  ;;  %vm5980_vm0 = vcmask 121856  }
 0x121   : > { %v2243_v33 = vsel %vm2237_vm6, %v2210_v23, %v4593_v59 }
 0x122   : > { %v4708_v7 = vpop.permute.xlu1 %1591  ;;  %v4712_v24 = vpop.permute.xlu0 %1481  ;;  %v2276_v53 = vsel %vm2270_vm7, %v2243_v33, %v4630_v62  ;;  %v2080_v62 = vsel %vm2072_vm1, %v2035_v10, %v4407_v15  ;;  %v4757_v15 = vld [vmem:[%s4205_s15 + $0x48] sm:$0xff]  }
 0x123   : > { %v2309_v3 = vsel %vm2303_vm8, %v2276_v53, %v4638_v12  ;;  %v2113_v12 = vsel %vm2105_vm2, %v2080_v62, %v4493_v43  ;;  %v3985_v62 = vld [vmem:[%s4121_s25 + $0x48] sm:$0xff]  }
 0x124   : > { %1966 = vrot.lane.b32.xlu1 %v4539_v28, %s5978_s5  ;;  %1931 = vrot.lane.b32.xlu0 %v3919_v40, %s5976_s3  ;;  %v2342_v28 = vsel %vm2336_vm9, %v2309_v3, %v1811_v27  ;;  %v2146_v44 = vsel %vm2138_vm3, %v2113_v12, %v4511_v55  ;;  %v4760_v27 = vld [vmem:[%s4213_s27 + $0x48] sm:$0xff]   ;;  %v3986_v12 = vld [vmem:[%s4121_s25 + $0x50] sm:$0xff]  }
 0x125   : > { %v2375_v37 = vsel %vm2369_vm10, %v2342_v28, %v1848_v45  ;;  %v2179_v43 = vsel %vm5944_vm4, %v2146_v44, %v4530_v11 }
 0x126   : > { %v1959_v42 = vpop.permute.xlu1 %1958  ;;  %v1924_v36 = vpop.permute.xlu0 %1923  ;;  %v2408_v5 = vsel %vm2402_vm11, %v2375_v37, %v1885_v9  ;;  %v3928_v37 = vld [vmem:[%s4173_s13 + $0x50] sm:$0xff]  }
 0x127   : > { %v2441_v48 = vsel %vm5943_vm12, %v2408_v5, %v1922_v52  ;;  %v4815_v5 = vld [vmem:[%s4163_s29 + $0x58] sm:$0xff]  }
 0x128   : > { %1711 = vrot.lane.b32.xlu1 %v3923_v32, %s5964_s26  ;;  %1601 = vrot.lane.b32.xlu0 %v4723_v16, %s5977_s4  ;;  %v2474_v45 = vsel %vm2468_vm13, %v2441_v48, %v1959_v42  ;;  %v3925_v42 = vld [vmem:[%s4163_s29 + $0x50] sm:$0xff]  }
 0x12a   : > { %v4740_v59 = vpop.permute.xlu1 %1703  ;;  %v4745_v40 = vpop.permute.xlu0 %1593 }
 0x12c   : > { %2003 = vrot.lane.b32.xlu1 %v4580_v26, %s5979_s6  ;;  %1968 = vrot.lane.b32.xlu0 %v3921_v51, %s5978_s5  ;;  %v2212_v26 = vsel %vm2204_vm5, %v2179_v43, %v4562_v19 }
 0x12d   : > { %v2245_v51 = vsel %vm2237_vm6, %v2212_v26, %v4613_v50  ;;  %v4832_v26 = vld [vmem:[%s4173_s13 + $0x58] sm:$0xff]  }
 0x12e   : > { %v1996_v9 = vpop.permute.xlu1 %1995  ;;  %v1961_v61 = vpop.permute.xlu0 %1960  ;;  %v2278_v11 = vsel %vm2270_vm7, %v2245_v51, %v4640_v22 }
 0x12f   : > { %v2507_v55 = vsel %vm5980_vm0, %v2474_v45, %v1996_v9  ;;  %v2311_v19 = vsel %vm2303_vm8, %v2278_v11, %v4650_v18  ;;  %v3931_v9 = vld [vmem:[%s4179_s16 + $0x50] sm:$0xff]  }
 0x130   : > { %v3667_v52 = vcombine.low %v2507_v55, %v2507_v55  ;;  %v3668_v13 = vcombine.high %v2507_v55, %v2507_v55  ;;  %1748 = vrot.lane.b32.xlu1 %v4760_v27, %s5966_s28  ;;  %1713 = vrot.lane.b32.xlu0 %v4757_v15, %s5964_s26  ;;  %v2344_v46 = vsel %vm2336_vm9, %v2311_v19, %v4668_v47 }
 0x131   : > { %v2377_v22 = vsel %vm2369_vm10, %v2344_v46, %v4684_v41 }
 0x132   : > { %2651 = vst.msk [vmem:[#allocation2 + $0x10] sm:$0xf] %vm2646_vm15, %v3667_v52  ;;  %2652 = vst.msk [vmem:[#allocation2 + $0x14] sm:$0xf] %vm2646_vm15, %v3668_v13  ;;  %v4783_v50 = vpop.permute.xlu1 %1740  ;;  %v4787_v23 = vpop.permute.xlu0 %1705  ;;  %v2410_v18 = vsel %vm2402_vm11, %v2377_v22, %v1887_v21  ;;  %v3933_v52 = vld [vmem:[%s4189_s24 + $0x50] sm:$0xff]   ;;  %v4848_v13 = vld [vmem:[%s4179_s16 + $0x58] sm:$0xff]  }
 0x133   : > { %v2443_v33 = vsel %vm5943_vm12, %v2410_v18, %v1924_v36 }
 0x134   : > { %1750 = vrot.lane.b32.xlu1 %v4777_v25, %s5966_s28  ;;  %2005 = vrot.lane.b32.xlu0 %v3923_v32, %s5979_s6  ;;  %v2476_v47 = vsel %vm2468_vm13, %v2443_v33, %v1961_v61 }
 0x136   : > { %v4797_v53 = vpop.permute.xlu1 %1742  ;;  %v1998_v3 = vpop.permute.xlu0 %1997 }
 0x137   : > { %v2509_v10 = vsel %vm5980_vm0, %v2476_v47, %v1998_v3  ;;  %v2082_v47 = vsel %vm2072_vm1, %v4345_v56, %v4420_v20  ;;  %v4887_v56 = vld [vmem:[%s4195_s30 + $0x58] sm:$0xff]  }
 0x138   : > { %1155 = vrot.lane.b32.xlu1 %v3925_v42, %s5970_s21  ;;  %v3669_v41 = vcombine.low %v2509_v10, %v2509_v10  ;;  %v3670_v28 = vcombine.high %v2509_v10, %v2509_v10  ;;  %1785 = vrot.lane.b32.xlu0 %v3985_v62, %s5967_s23 }
 0x139   : > { %v3926_v21 = vld [vmem:[#allocation2 + $0x10] sm:$0xff]  }
 0x13a   : > { %v4804_v32 = vpop.permute.xlu1 %1147  ;;  %2653 = vst.msk [vmem:[#allocation2 + $0x18] sm:$0xf] %vm2646_vm15, %v3669_v41  ;;  %2654 = vst.msk [vmem:[#allocation2 + $0x1c] sm:$0xf] %vm2646_vm15, %v3670_v28  ;;  %v1778_v36 = vpop.permute.xlu0 %1777  ;;  %3758 = vmatprep.mubr.msk.bf16.mxu0 %vm2806_vm14, %v3926_v21  ;;  %v3937_v28 = vld [vmem:[%s4205_s15 + $0x50] sm:$0xff]  }
 0x13c   : > { %1822 = vrot.lane.b32.xlu1 %v4648_v29, %s5968_s12  ;;  %1787 = vrot.lane.b32.xlu0 %v3986_v12, %s5967_s23 }
 0x13e   : > { %v1815_v44 = vpop.permute.xlu1 %1814  ;;  %v4817_v48 = vpop.permute.xlu0 %1779 }
 0x140   : > { %1267 = vrot.lane.b32.xlu1 %v3928_v37, %s5969_s14  ;;  %1157 = vrot.lane.b32.xlu0 %v4815_v5, %s5970_s21 }
 0x141   : > { %v3929_v45 = vld [vmem:[#allocation2 + $0x18] sm:$0xff]  }
 0x142   : > { %v4822_v43 = vpop.permute.xlu1 %1259  ;;  %v4824_v29 = vpop.permute.xlu0 %1149  ;;  %3759 = vmatmul.mubr.msk.bf16.gmra.mxu0 %vm2806_vm14, %v3929_v45 }
 0x144   : > { %1859 = vrot.lane.b32.xlu1 %v4666_v38, %s5971_s0  ;;  %1824 = vrot.lane.b32.xlu0 %v3925_v42, %s5968_s12  ;;  %v4864_v42 = vld [vmem:[%s4189_s24 + $0x58] sm:$0xff]  }
 0x146   : > { %v1852_v61 = vpop.permute.xlu1 %1851  ;;  %v4834_v55 = vpop.permute.xlu0 %1816 }
 0x148   : > { %1379 = vrot.lane.b32.xlu1 %v3931_v9, %s5972_s1  ;;  %1269 = vrot.lane.b32.xlu0 %v4832_v26, %s5969_s14 }
 0x14a   : > { %v4839_v51 = vpop.permute.xlu1 %1371  ;;  %v4841_v38 = vpop.permute.xlu0 %1261 }
 0x14c   : > { %1896 = vrot.lane.b32.xlu1 %v4682_v57, %s5973_s2  ;;  %1861 = vrot.lane.b32.xlu0 %v3928_v37, %s5971_s0  ;;  %v3935_v57 = vld [vmem:[%s4195_s30 + $0x50] sm:$0xff]  }
 0x14e   : > { %v1889_v11 = vpop.permute.xlu1 %1888  ;;  %v4850_v19 = vpop.permute.xlu0 %1853 }
 0x150   : > { %1491 = vrot.lane.b32.xlu1 %v3933_v52, %s5963_s22  ;;  %1381 = vrot.lane.b32.xlu0 %v4848_v13, %s5972_s1 }
 0x152   : > { %v4855_v46 = vpop.permute.xlu1 %1483  ;;  %v4857_v22 = vpop.permute.xlu0 %1373 }
 0x154   : > { %1933 = vrot.lane.b32.xlu1 %v4698_v49, %s5976_s3  ;;  %1898 = vrot.lane.b32.xlu0 %v3931_v9, %s5973_s2  ;;  %v2115_v49 = vsel %vm2105_vm2, %v2082_v47, %v4656_v31 }
 0x155   : > { %v2148_v41 = vsel %vm2138_vm3, %v2115_v49, %v4673_v39  ;;  %v4938_v49 = vld [vmem:[%s4213_s27 + $0x60] sm:$0xff]  }
 0x156   : > { %v1926_v18 = vpop.permute.xlu1 %1925  ;;  %v1891_v33 = vpop.permute.xlu0 %1890  ;;  %v2181_v62 = vsel %vm5944_vm4, %v2148_v41, %v4689_v17 }
 0x157   : > { %v2214_v20 = vsel %vm2204_vm5, %v2181_v62, %v4708_v7 }
 0x158   : > { %1603 = vrot.lane.b32.xlu1 %v3935_v57, %s5977_s4  ;;  %1493 = vrot.lane.b32.xlu0 %v4864_v42, %s5963_s22  ;;  %v2247_v21 = vsel %vm2237_vm6, %v2214_v20, %v4740_v59  ;;  %v2084_v59 = vsel %vm2072_vm1, %v4342_v54, %v4658_v34  ;;  %v4918_v54 = vld [vmem:[%s4205_s15 + $0x58] sm:$0xff]   ;;  %v3939_v20 = vld [vmem:[%s4163_s29 + $0x60] sm:$0xff]  }
 0x159   : > { %v2280_v39 = vsel %vm2270_vm7, %v2247_v21, %v4783_v50  ;;  %v2117_v50 = vsel %vm2105_vm2, %v2084_v59, %v4675_v14  ;;  %v4921_v34 = vld [vmem:[%s4213_s27 + $0x58] sm:$0xff]  }
 0x15a   : > { %v4872_v3 = vpop.permute.xlu1 %1595  ;;  %v4876_v10 = vpop.permute.xlu0 %1485  ;;  %v2313_v17 = vsel %vm2303_vm8, %v2280_v39, %v1778_v36  ;;  %v3987_v59 = vld [vmem:[%s4121_s25 + $0x58] sm:$0xff]  }
 0x15c   : > { %1970 = vrot.lane.b32.xlu1 %v4723_v16, %s5978_s5  ;;  %1935 = vrot.lane.b32.xlu0 %v3933_v52, %s5976_s3  ;;  %v2346_v16 = vsel %vm2336_vm9, %v2313_v17, %v1815_v44  ;;  %v2150_v44 = vsel %vm2138_vm3, %v2117_v50, %v4691_v30  ;;  %v3988_v50 = vld [vmem:[%s4121_s25 + $0x60] sm:$0xff]  }
 0x15d   : > { %v2379_v12 = vsel %vm2369_vm10, %v2346_v16, %v1852_v61  ;;  %v2183_v14 = vsel %vm5944_vm4, %v2150_v44, %v4712_v24 }
 0x15e   : > { %v1963_v31 = vpop.permute.xlu1 %1962  ;;  %v1928_v37 = vpop.permute.xlu0 %1927  ;;  %v2412_v36 = vsel %vm2402_vm11, %v2379_v12, %v1889_v11  ;;  %v3942_v12 = vld [vmem:[%s4173_s13 + $0x60] sm:$0xff]  }
 0x15f   : > { %v2445_v9 = vsel %vm5943_vm12, %v2412_v36, %v1926_v18  ;;  %v4976_v36 = vld [vmem:[%s4163_s29 + $0x68] sm:$0xff]  }
 0x160   : > { %1715 = vrot.lane.b32.xlu1 %v3937_v28, %s5964_s26  ;;  %1605 = vrot.lane.b32.xlu0 %v4887_v56, %s5977_s4  ;;  %v2478_v61 = vsel %vm2468_vm13, %v2445_v9, %v1963_v31 }
 0x162   : > { %v4900_v7 = vpop.permute.xlu1 %1707  ;;  %v4906_v45 = vpop.permute.xlu0 %1597 }
 0x164   : > { %2007 = vrot.lane.b32.xlu1 %v4757_v15, %s5979_s6  ;;  %1972 = vrot.lane.b32.xlu0 %v3935_v57, %s5978_s5  ;;  %v2216_v15 = vsel %vm2204_vm5, %v2183_v14, %v4745_v40 }
 0x165   : > { %v2249_v57 = vsel %vm2237_vm6, %v2216_v15, %v4787_v23  ;;  %v4993_v15 = vld [vmem:[%s4173_s13 + $0x68] sm:$0xff]  }
 0x166   : > { %v2000_v52 = vpop.permute.xlu1 %1999  ;;  %v1965_v11 = vpop.permute.xlu0 %1964  ;;  %v2282_v24 = vsel %vm2270_vm7, %v2249_v57, %v4797_v53 }
 0x167   : > { %v2511_v30 = vsel %vm5980_vm0, %v2478_v61, %v2000_v52  ;;  %v2315_v40 = vsel %vm2303_vm8, %v2282_v24, %v4817_v48  ;;  %v3945_v52 = vld [vmem:[%s4179_s16 + $0x60] sm:$0xff]  }
 0x168   : > { %v3671_v18 = vcombine.low %v2511_v30, %v2511_v30  ;;  %v3672_v47 = vcombine.high %v2511_v30, %v2511_v30  ;;  %1752 = vrot.lane.b32.xlu1 %v4921_v34, %s5966_s28  ;;  %1717 = vrot.lane.b32.xlu0 %v4918_v54, %s5964_s26  ;;  %v2348_v41 = vsel %vm2336_vm9, %v2315_v40, %v4834_v55 }
 0x169   : > { %v2381_v53 = vsel %vm2369_vm10, %v2348_v41, %v4850_v19 }
 0x16a   : > { %2655 = vst.msk [vmem:[#allocation2 + $0x20] sm:$0xf] %vm2646_vm15, %v3671_v18  ;;  %2656 = vst.msk [vmem:[#allocation2 + $0x24] sm:$0xf] %vm2646_vm15, %v3672_v47  ;;  %v4944_v23 = vpop.permute.xlu1 %1744  ;;  %v4948_v62 = vpop.permute.xlu0 %1709  ;;  %v2414_v48 = vsel %vm2402_vm11, %v2381_v53, %v1891_v33  ;;  %v3947_v18 = vld [vmem:[%s4189_s24 + $0x60] sm:$0xff]   ;;  %v5009_v47 = vld [vmem:[%s4179_s16 + $0x68] sm:$0xff]  }
 0x16b   : > { %v2447_v31 = vsel %vm5943_vm12, %v2414_v48, %v1928_v37 }
 0x16c   : > { %1754 = vrot.lane.b32.xlu1 %v4938_v49, %s5966_s28  ;;  %2009 = vrot.lane.b32.xlu0 %v3937_v28, %s5979_s6  ;;  %v2480_v55 = vsel %vm2468_vm13, %v2447_v31, %v1965_v11 }
 0x16e   : > { %v4958_v21 = vpop.permute.xlu1 %1746  ;;  %v2002_v39 = vpop.permute.xlu0 %2001 }
 0x16f   : > { %v2513_v17 = vsel %vm5980_vm0, %v2480_v55, %v2002_v39  ;;  %v2086_v55 = vsel %vm2072_vm1, %v4354_v60, %v4804_v32  ;;  %v5048_v60 = vld [vmem:[%s4195_s30 + $0x68] sm:$0xff]   ;;  %vm5981_vm0 = vcmask 7168  }
 0x170   : > { %1159 = vrot.lane.b32.xlu1 %v3939_v20, %s5970_s21  ;;  %v3673_v19 = vcombine.low %v2513_v17, %v2513_v17  ;;  %v3674_v16 = vcombine.high %v2513_v17, %v2513_v17  ;;  %1789 = vrot.lane.b32.xlu0 %v3987_v59, %s5967_s23 }
 0x171   : > { %v3940_v33 = vld [vmem:[#allocation2 + $0x20] sm:$0xff]  }
 0x172   : > { %v4965_v28 = vpop.permute.xlu1 %1151  ;;  %2657 = vst.msk [vmem:[#allocation2 + $0x28] sm:$0xf] %vm2646_vm15, %v3673_v19  ;;  %2658 = vst.msk [vmem:[#allocation2 + $0x2c] sm:$0xf] %vm2646_vm15, %v3674_v16  ;;  %v1782_v37 = vpop.permute.xlu0 %1781  ;;  %3762 = vmatprep.mubr.msk.bf16.mxu0 %vm2806_vm14, %v3940_v33  ;;  %v3951_v16 = vld [vmem:[%s4205_s15 + $0x60] sm:$0xff]  }
 0x174   : > { %1826 = vrot.lane.b32.xlu1 %v4815_v5, %s5968_s12  ;;  %1791 = vrot.lane.b32.xlu0 %v3988_v50, %s5967_s23 }
 0x176   : > { %v1819_v44 = vpop.permute.xlu1 %1818  ;;  %v4978_v9 = vpop.permute.xlu0 %1783 }
 0x178   : > { %1271 = vrot.lane.b32.xlu1 %v3942_v12, %s5969_s14  ;;  %1161 = vrot.lane.b32.xlu0 %v4976_v36, %s5970_s21 }
 0x179   : > { %v3943_v61 = vld [vmem:[#allocation2 + $0x28] sm:$0xff]  }
 0x17a   : > { %v4983_v14 = vpop.permute.xlu1 %1263  ;;  %v4985_v5 = vpop.permute.xlu0 %1153  ;;  %3763 = vmatmul.mubr.msk.bf16.gmra.mxu0 %vm2806_vm14, %v3943_v61 }
 0x17c   : > { %1863 = vrot.lane.b32.xlu1 %v4832_v26, %s5971_s0  ;;  %1828 = vrot.lane.b32.xlu0 %v3939_v20, %s5968_s12  ;;  %v5025_v20 = vld [vmem:[%s4189_s24 + $0x68] sm:$0xff]  }
 0x17e   : > { %v1856_v11 = vpop.permute.xlu1 %1855  ;;  %v4995_v30 = vpop.permute.xlu0 %1820 }
 0x180   : > { %1383 = vrot.lane.b32.xlu1 %v3945_v52, %s5972_s1  ;;  %1273 = vrot.lane.b32.xlu0 %v4993_v15, %s5969_s14 }
 0x182   : > { %v5000_v57 = vpop.permute.xlu1 %1375  ;;  %v5002_v26 = vpop.permute.xlu0 %1265 }
 0x184   : > { %1900 = vrot.lane.b32.xlu1 %v4848_v13, %s5973_s2  ;;  %1865 = vrot.lane.b32.xlu0 %v3942_v12, %s5971_s0  ;;  %v3949_v13 = vld [vmem:[%s4195_s30 + $0x60] sm:$0xff]  }
 0x186   : > { %v1893_v24 = vpop.permute.xlu1 %1892  ;;  %v5011_v40 = vpop.permute.xlu0 %1857 }
 0x188   : > { %1495 = vrot.lane.b32.xlu1 %v3947_v18, %s5963_s22  ;;  %1385 = vrot.lane.b32.xlu0 %v5009_v47, %s5972_s1 }
 0x18a   : > { %v5016_v41 = vpop.permute.xlu1 %1487  ;;  %v5018_v53 = vpop.permute.xlu0 %1377 }
 0x18c   : > { %1937 = vrot.lane.b32.xlu1 %v4864_v42, %s5976_s3  ;;  %1902 = vrot.lane.b32.xlu0 %v3945_v52, %s5973_s2  ;;  %v2119_v42 = vsel %vm2105_vm2, %v2086_v55, %v4822_v43 }
 0x18d   : > { %v2152_v19 = vsel %vm2138_vm3, %v2119_v42, %v4839_v51  ;;  %v5101_v42 = vld [vmem:[%s4213_s27 + $0x70] sm:$0xff]  }
 0x18e   : > { %v1930_v48 = vpop.permute.xlu1 %1929  ;;  %v1895_v31 = vpop.permute.xlu0 %1894  ;;  %v2185_v59 = vsel %vm5944_vm4, %v2152_v19, %v4855_v46 }
 0x18f   : > { %v2218_v32 = vsel %vm2204_vm5, %v2185_v59, %v4872_v3  ;;  %v2047_v3 = vsel %vm5981_vm0, %v4583_v35, %v4351_v58  ;;  %vm5982_vm0 = vcmask 121856  }
 0x190   : > { %1607 = vrot.lane.b32.xlu1 %v3949_v13, %s5977_s4  ;;  %1497 = vrot.lane.b32.xlu0 %v5025_v20, %s5963_s22  ;;  %v2251_v33 = vsel %vm2237_vm6, %v2218_v32, %v4900_v7  ;;  %v3953_v32 = vld [vmem:[%s4163_s29 + $0x70] sm:$0xff]  }
 0x191   : > { %v2284_v51 = vsel %vm2270_vm7, %v2251_v33, %v4944_v23  ;;  %v2088_v23 = vsel %vm2072_vm1, %v2047_v3, %v4824_v29  ;;  %v5081_v29 = vld [vmem:[%s4205_s15 + $0x68] sm:$0xff]  }
 0x192   : > { %v5033_v39 = vpop.permute.xlu1 %1599  ;;  %v5037_v17 = vpop.permute.xlu0 %1489  ;;  %v2317_v46 = vsel %vm2303_vm8, %v2284_v51, %v1782_v37  ;;  %v2121_v37 = vsel %vm2105_vm2, %v2088_v23, %v4841_v38 }
 0x193   : > { %v2154_v58 = vsel %vm2138_vm3, %v2121_v37, %v4857_v22  ;;  %v3956_v37 = vld [vmem:[%s4173_s13 + $0x70] sm:$0xff]  }
 0x194   : > { %1974 = vrot.lane.b32.xlu1 %v4887_v56, %s5978_s5  ;;  %1939 = vrot.lane.b32.xlu0 %v3947_v18, %s5976_s3  ;;  %v2350_v56 = vsel %vm2336_vm9, %v2317_v46, %v1819_v44  ;;  %v5084_v44 = vld [vmem:[%s4213_s27 + $0x68] sm:$0xff]   ;;  %v2187_v38 = vsel %vm5944_vm4, %v2154_v58, %v4876_v10 }
 0x195   : > { %v2383_v50 = vsel %vm2369_vm10, %v2350_v56, %v1856_v11  ;;  %v3989_v56 = vld [vmem:[%s4121_s25 + $0x68] sm:$0xff]  }
 0x196   : > { %v1967_v43 = vpop.permute.xlu1 %1966  ;;  %v1932_v12 = vpop.permute.xlu0 %1931  ;;  %v2416_v52 = vsel %vm2402_vm11, %v2383_v50, %v1893_v24 }
 0x197   : > { %v2449_v35 = vsel %vm5943_vm12, %v2416_v52, %v1930_v48  ;;  %v3990_v52 = vld [vmem:[%s4121_s25 + $0x70] sm:$0xff]  }
 0x198   : > { %1719 = vrot.lane.b32.xlu1 %v3951_v16, %s5964_s26  ;;  %1609 = vrot.lane.b32.xlu0 %v5048_v60, %s5977_s4  ;;  %v2482_v11 = vsel %vm2468_vm13, %v2449_v35, %v1967_v43 }
 0x19a   : > { %v5064_v7 = vpop.permute.xlu1 %1711  ;;  %v5069_v61 = vpop.permute.xlu0 %1601 }
 0x19c   : > { %2011 = vrot.lane.b32.xlu1 %v4918_v54, %s5979_s6  ;;  %1976 = vrot.lane.b32.xlu0 %v3949_v13, %s5978_s5  ;;  %v2220_v54 = vsel %vm2204_vm5, %v2187_v38, %v4906_v45 }
 0x19d   : > { %v2253_v13 = vsel %vm2237_vm6, %v2220_v54, %v4948_v62 }
 0x19e   : > { %v2004_v18 = vpop.permute.xlu1 %2003  ;;  %v1969_v24 = vpop.permute.xlu0 %1968  ;;  %v2286_v10 = vsel %vm2270_vm7, %v2253_v13, %v4958_v21 }
 0x19f   : > { %v2515_v22 = vsel %vm5982_vm0, %v2482_v11, %v2004_v18  ;;  %v2319_v45 = vsel %vm2303_vm8, %v2286_v10, %v4978_v9  ;;  %v3961_v10 = vld [vmem:[%s4189_s24 + $0x70] sm:$0xff]  }
 0x1a0   : > { %v3675_v48 = vcombine.low %v2515_v22, %v2515_v22  ;;  %v3676_v55 = vcombine.high %v2515_v22, %v2515_v22  ;;  %1756 = vrot.lane.b32.xlu1 %v5084_v44, %s5966_s28  ;;  %1721 = vrot.lane.b32.xlu0 %v5081_v29, %s5964_s26  ;;  %v2352_v19 = vsel %vm2336_vm9, %v2319_v45, %v4995_v30  ;;  %v5163_v22 = vld [vmem:[%s4173_s13 + $0x78] sm:$0xff]  }
 0x1a1   : > { %v2385_v21 = vsel %vm2369_vm10, %v2352_v19, %v5011_v40  ;;  %v5179_v45 = vld [vmem:[%s4179_s16 + $0x78] sm:$0xff]  }
 0x1a2   : > { %2659 = vst.msk [vmem:[#allocation2 + $0x30] sm:$0xf] %vm2646_vm15, %v3675_v48  ;;  %2660 = vst.msk [vmem:[#allocation2 + $0x34] sm:$0xf] %vm2646_vm15, %v3676_v55  ;;  %v5107_v62 = vpop.permute.xlu1 %1748  ;;  %v5111_v59 = vpop.permute.xlu0 %1713  ;;  %v2418_v9 = vsel %vm2402_vm11, %v2385_v21, %v1895_v31 }
 0x1a3   : > { %v2451_v43 = vsel %vm5943_vm12, %v2418_v9, %v1932_v12  ;;  %vm5983_vm12 = vcmask 7168  }
 0x1a4   : > { %1758 = vrot.lane.b32.xlu1 %v5101_v42, %s5966_s28  ;;  %2013 = vrot.lane.b32.xlu0 %v3951_v16, %s5979_s6  ;;  %v2484_v51 = vsel %vm2468_vm13, %v2451_v43, %v1969_v24  ;;  %v2056_v16 = vsel %vm5983_vm12, %v4777_v25, %v4373_v2  ;;  %v5143_v2 = vld [vmem:[%s4163_s29 + $0x78] sm:$0xff]   ;;  %v3959_v24 = vld [vmem:[%s4179_s16 + $0x70] sm:$0xff]  }
 0x1a6   : > { %v5121_v33 = vpop.permute.xlu1 %1750  ;;  %v2006_v30 = vpop.permute.xlu0 %2005 }
 0x1a7   : > { %v2517_v46 = vsel %vm5982_vm0, %v2484_v51, %v2006_v30  ;;  %v3963_v51 = vld [vmem:[%s4195_s30 + $0x70] sm:$0xff]   ;;  %v5196_v30 = vld [vmem:[%s4189_s24 + $0x78] sm:$0xff]   ;;  %vm5984_vm0 = vmmov %vm5983_vm12 }
 0x1a8   : > { %1163 = vrot.lane.b32.xlu1 %v3953_v32, %s5970_s21  ;;  %v3677_v40 = vcombine.low %v2517_v46, %v2517_v46  ;;  %v3678_v3 = vcombine.high %v2517_v46, %v2517_v46  ;;  %1793 = vrot.lane.b32.xlu0 %v3989_v56, %s5967_s23 }
 0x1a9   : > { %v3954_v31 = vld [vmem:[#allocation2 + $0x30] sm:$0xff]  }
 0x1aa   : > { %v1156_v12 = vpop.permute.xlu1 %1155  ;;  %2661 = vst.msk [vmem:[#allocation2 + $0x38] sm:$0xf] %vm2646_vm15, %v3677_v40  ;;  %2662 = vst.msk [vmem:[#allocation2 + $0x3c] sm:$0xf] %vm2646_vm15, %v3678_v3  ;;  %v5133_v23 = vpop.permute.xlu0 %1785  ;;  %3766 = vmatprep.mubr.msk.bf16.mxu0 %vm2806_vm14, %v3954_v31  ;;  %v2050_v3 = vsel %vm5984_vm0, %v4608_v4, %v4366_v0 }
 0x1ab   : > { %v2094_v50 = vsel %vm2072_vm1, %v2056_v16, %v1156_v12  ;;  %v2090_v56 = vsel %vm2072_vm1, %v2050_v3, %v4965_v28  ;;  %v3967_v3 = vld [vmem:[%s4213_s27 + $0x80] sm:$0xff]  }
 0x1ac   : > { %1830 = vrot.lane.b32.xlu1 %v4976_v36, %s5968_s12  ;;  %1795 = vrot.lane.b32.xlu0 %v3990_v52, %s5967_s23  ;;  %v2059_v36 = vsel %vm5983_vm12, %v4921_v34, %v4371_v1  ;;  %v2123_v16 = vsel %vm2105_vm2, %v2090_v56, %v4983_v14  ;;  %v3965_v14 = vld [vmem:[%s4205_s15 + $0x70] sm:$0xff]   ;;  %vm5985_vm12 = vmmov %vm5984_vm0  ;;  %vm5986_vm0 = vcmask 105472  }
 0x1ad   : > { %v2156_v4 = vsel %vm2138_vm3, %v2123_v16, %v5000_v57 }
 0x1ae   : > { %v5145_v25 = vpop.permute.xlu1 %1822  ;;  %v5147_v58 = vpop.permute.xlu0 %1787 }
 0x1b0   : > { %1275 = vrot.lane.b32.xlu1 %v3956_v37, %s5969_s14  ;;  %1165 = vrot.lane.b32.xlu0 %v5143_v2, %s5970_s21  ;;  %s3525_s21 = sshll.u32 %s4008_s17, 5 }
 0x1b1   : > { %v3957_v38 = vld [vmem:[#allocation2 + $0x38] sm:$0xff]   ;;  %p578_p5 = scmp.lt.s32.totalorder %s3525_s21, 63 }
 0x1b2   : > { %v1268_v35 = vpop.permute.xlu1 %1267  ;;  %v1158_v11 = vpop.permute.xlu0 %1157  ;;  %3767 = vmatmul.mubr.msk.bf16.gmra.mxu0 %vm2806_vm14, %v3957_v38 }
 0x1b3   : > { %v2127_v18 = vsel %vm2105_vm2, %v2094_v50, %v1268_v35  ;;  %v2096_v54 = vsel %vm2072_vm1, %v2059_v36, %v1158_v11  ;;  %s6012_s21 = smov (!%p578_p5, %s3525_s21), 63  ;;  %v5237_v35 = vld [vmem:[%s4195_s30 + $0x78] sm:$0xff]  }
 0x1b4   : > { %1867 = vrot.lane.b32.xlu1 %v4993_v15, %s5971_s0  ;;  %1832 = vrot.lane.b32.xlu0 %v3953_v32, %s5968_s12 }
 0x1b6   : > { %v5165_v13 = vpop.permute.xlu1 %1859  ;;  %v5167_v1 = vpop.permute.xlu0 %1824 }
 0x1b8   : > { %1387 = vrot.lane.b32.xlu1 %v3959_v24, %s5972_s1  ;;  %1277 = vrot.lane.b32.xlu0 %v5163_v22, %s5969_s14 }
 0x1ba   : > { %v1380_v34 = vpop.permute.xlu1 %1379  ;;  %v1270_v15 = vpop.permute.xlu0 %1269 }
 0x1bb   : > { %v2160_v48 = vsel %vm2138_vm3, %v2127_v18, %v1380_v34  ;;  %v2129_v55 = vsel %vm2105_vm2, %v2096_v54, %v1270_v15 }
 0x1bc   : > { %1904 = vrot.lane.b32.xlu1 %v5009_v47, %s5973_s2  ;;  %1869 = vrot.lane.b32.xlu0 %v3956_v37, %s5971_s0  ;;  %v2189_v37 = vsel %vm5944_vm4, %v2156_v4, %v5016_v41 }
 0x1bd   : > { %v2222_v57 = vsel %vm2204_vm5, %v2189_v37, %v5033_v39 }
 0x1be   : > { %v1897_v19 = vpop.permute.xlu1 %1896  ;;  %v5182_v21 = vpop.permute.xlu0 %1861  ;;  %v2255_v36 = vsel %vm2237_vm6, %v2222_v57, %v5064_v7 }
 0x1bf   : > { %v2288_v18 = vsel %vm2270_vm7, %v2255_v36, %v5107_v62  ;;  %v2053_v62 = vsel %vm5985_vm12, %v4760_v27, %v4364_v63  ;;  %vm5987_vm12 = vcmask 121856   ;;  %v3991_v36 = vld [vmem:[%s4121_s25 + $0x78] sm:$0xff]  }
 0x1c0   : > { %1499 = vrot.lane.b32.xlu1 %v3961_v10, %s5963_s22  ;;  %1389 = vrot.lane.b32.xlu0 %v5179_v45, %s5972_s1  ;;  %s3526_s1 = sshll.u32 %s6012_s21, 3  ;;  %v2321_v54 = vsel %vm2303_vm8, %v2288_v18, %v5133_v23  ;;  %v2092_v15 = vsel %vm2072_vm1, %v2053_v62, %v4985_v5 }
 0x1c1   : > { %s5220_s20 = scalar_lea.vmem %s5911_s10, %s3526_s1  ;;  %v2125_v63 = vsel %vm2105_vm2, %v2092_v15, %v5002_v26 }
 0x1c2   : > { %v1492_v32 = vpop.permute.xlu1 %1491  ;;  %v1382_v9 = vpop.permute.xlu0 %1381  ;;  %v2158_v5 = vsel %vm2138_vm3, %v2125_v63, %v5018_v53 }
 0x1c3   : > { %v5188_v47 = vsel %vm5944_vm4, %v2160_v48, %v1492_v32  ;;  %v2162_v43 = vsel %vm2138_vm3, %v2129_v55, %v1382_v9  ;;  %v2191_v26 = vsel %vm5944_vm4, %v2158_v5, %v5037_v17 }
 0x1c4   : > { %1941 = vrot.lane.b32.xlu1 %v5025_v20, %s5976_s3  ;;  %1906 = vrot.lane.b32.xlu0 %v3959_v24, %s5973_s2  ;;  %v5209_v20 = vld [vmem:[%s5910_s9] ss:$0 sm:$0xff]  ;;  %v2354_v24 = vsel %vm2336_vm9, %v2321_v54, %v5145_v25 }
 0x1c5   : > { %v2387_v48 = vsel %vm2369_vm10, %v2354_v24, %v5165_v13  ;;  %v5294_v13 = vld [vmem:[%s4205_s15 + $0x78] sm:$0xff]   ;;  %v3971_v54 = vld [vmem:[%s4173_s13 + $0x80] sm:$0xff]  }
 0x1c6   : > { %v1934_v46 = vpop.permute.xlu1 %1933  ;;  %v5198_v40 = vpop.permute.xlu0 %1898  ;;  %v2420_v27 = vsel %vm2402_vm11, %v2387_v48, %v1897_v19 }
 0x1c7   : > { %v2453_v25 = vsel %vm5986_vm0, %v2420_v27, %v1934_v46  ;;  %v3974_v27 = vld [vmem:[%s4189_s24 + $0x80] sm:$0xff]  }
 0x1c8   : > { %1611 = vrot.lane.b32.xlu1 %v3963_v51, %s5977_s4  ;;  %1501 = vrot.lane.b32.xlu0 %v5196_v30, %s5963_s22 }
 0x1ca   : > { %v5213_v31 = vpop.permute.xlu1 %1603  ;;  %v1494_v12 = vpop.permute.xlu0 %1493 }
 0x1cb   : > { %v3756_v0 = vpop.f32.mrf.mxu0  ;;  %v5225_v50 = vsel %vm5944_vm4, %v2162_v43, %v1494_v12  ;;  %v3968_v12 = vld [vmem:[%s4121_s25 + $0x80] sm:$0xff]  }
 0x1cc   : > { %1978 = vrot.lane.b32.xlu1 %v5048_v60, %s5978_s5  ;;  %v5230_v28 = vadd.f32 %v3756_v0, %v5209_v20  ;;  %1943 = vrot.lane.b32.xlu0 %v3961_v10, %s5976_s3  ;;  %v5297_v10 = vld [vmem:[%s4213_s27 + $0x78] sm:$0xff]  }
 0x1cd   : > { %v2889_v52 = vpop.f32.mrf.mxu0 }
 0x1ce   : > { %3018 = vst.msk [vmem:[%s5220_s20 + $0x10] sm:$0xff] %vm2270_vm7, %v5230_v28  ;;  %v1971_v60 = vpop.permute.xlu1 %1970  ;;  %v5245_v38 = vadd.f32 %v5209_v20, %v2889_v52  ;;  %v1936_v41 = vpop.permute.xlu0 %1935 }
 0x1cf   : > { %v3757_v11 = vpop.f32.mrf.mxu0  ;;  %v2486_v19 = vsel %vm2468_vm13, %v2453_v25, %v1971_v60  ;;  %v3975_v25 = vld [vmem:[%s4195_s30 + $0x80] sm:$0xff]  }
 0x1d0   : > { %3016 = vst.msk [vmem:[%s5220_s20] sm:$0xff] %vm2270_vm7, %v5245_v38  ;;  %1723 = vrot.lane.b32.xlu1 %v3965_v14, %s5964_s26  ;;  %v5256_v39 = vadd.f32 %v3757_v11, %v5209_v20  ;;  %1613 = vrot.lane.b32.xlu0 %v5237_v35, %s5977_s4 }
 0x1d1   : > { %v2892_v7 = vpop.f32.mrf.mxu0 }
 0x1d2   : > { %3019 = vst.msk [vmem:[%s5220_s20 + $0x18] sm:$0xff] %vm2270_vm7, %v5256_v39  ;;  %v5270_v34 = vpop.permute.xlu1 %1715  ;;  %v5273_v23 = vadd.f32 %v5209_v20, %v2892_v7  ;;  %v5279_v55 = vpop.permute.xlu0 %1605 }
 0x1d4   : > { %3017 = vst.msk [vmem:[%s5220_s20 + $0x8] sm:$0xff] %vm2270_vm7, %v5273_v23  ;;  %2015 = vrot.lane.b32.xlu1 %v5081_v29, %s5979_s6  ;;  %1980 = vrot.lane.b32.xlu0 %v3963_v51, %s5978_s5  ;;  %v2224_v29 = vsel %vm2204_vm5, %v2191_v26, %v5069_v61 }
 0x1d5   : > { %v2257_v43 = vsel %vm2237_vm6, %v2224_v29, %v5111_v59 }
 0x1d6   : > { %v2008_v32 = vpop.permute.xlu1 %2007  ;;  %v1973_v9 = vpop.permute.xlu0 %1972  ;;  %v2290_v17 = vsel %vm2270_vm7, %v2257_v43, %v5121_v33 }
 0x1d7   : > { %v2519_v53 = vsel %vm5987_vm12, %v2486_v19, %v2008_v32  ;;  %v2323_v61 = vsel %vm2303_vm8, %v2290_v17, %v5147_v58  ;;  %v3976_v32 = vld [vmem:[%s4205_s15 + $0x80] sm:$0xff]  }
 0x1d8   : > { %v3679_v51 = vcombine.low %v2519_v53, %v2519_v53  ;;  %v3680_v46 = vcombine.high %v2519_v53, %v2519_v53  ;;  %1760 = vrot.lane.b32.xlu1 %v5297_v10, %s5966_s28  ;;  %1725 = vrot.lane.b32.xlu0 %v5294_v13, %s5964_s26  ;;  %v2356_v56 = vsel %vm2336_vm9, %v2323_v61, %v5167_v1 }
 0x1d9   : > { %v2389_v33 = vsel %vm2369_vm10, %v2356_v56, %v5182_v21  ;;  %v3969_v21 = vld [vmem:[%s4163_s29 + $0x80] sm:$0xff]   ;;  %v2226_v56 = vsel %vm2204_vm5, %v5188_v47, %v5213_v31 }
 0x1da   : > { %2663 = vst.msk [vmem:[#allocation2 + $0x40] sm:$0xf] %vm2646_vm15, %v3679_v51  ;;  %2664 = vst.msk [vmem:[#allocation2 + $0x44] sm:$0xf] %vm2646_vm15, %v3680_v46  ;;  %v5318_v59 = vpop.permute.xlu1 %1752  ;;  %v5322_v16 = vpop.permute.xlu0 %1717  ;;  %v2422_v58 = vsel %vm2402_vm11, %v2389_v33, %v5198_v40 }
 0x1db   : > { %v2455_v0 = vsel %vm5986_vm0, %v2422_v58, %v1936_v41  ;;  %vm5988_vm0 = vcmask 7168   ;;  %v2259_v58 = vsel %vm2237_vm6, %v2226_v56, %v5270_v34 }
 0x1dc   : > { %1762 = vrot.lane.b32.xlu1 %v3967_v3, %s5966_s28  ;;  %2017 = vrot.lane.b32.xlu0 %v3965_v14, %s5979_s6  ;;  %v2488_v1 = vsel %vm2468_vm13, %v2455_v0, %v1973_v9  ;;  %v2062_v14 = vsel %vm5988_vm0, %v4938_v49, %v4384_v8  ;;  %v3972_v8 = vld [vmem:[%s4179_s16 + $0x80] sm:$0xff]  }
 0x1de   : > { %v5332_v4 = vpop.permute.xlu1 %1754  ;;  %v2010_v37 = vpop.permute.xlu0 %2009 }
 0x1df   : > { %v2521_v52 = vsel %vm5987_vm12, %v2488_v1, %v2010_v37  ;;  %vm5989_vm12 = vmmov %vm5988_vm0  ;;  %v2292_v37 = vsel %vm2270_vm7, %v2259_v58, %v5318_v59  ;;  %vm5990_vm0 = vcmask 105472  }
 0x1e0   : > { %1799 = vrot.lane.b32.xlu1 %v3968_v12, %s5967_s23  ;;  %v3681_v57 = vcombine.low %v2521_v52, %v2521_v52  ;;  %v3682_v60 = vcombine.high %v2521_v52, %v2521_v52  ;;  %1797 = vrot.lane.b32.xlu0 %v3991_v36, %s5967_s23  ;;  %v2065_v15 = vsel %vm5989_vm12, %v5084_v44, %v4382_v6  ;;  %vm5991_vm12 = vcmask 121856  }
 0x1e1   : > { %v3970_v40 = vld [vmem:[#allocation2 + $0x40] sm:$0xff]  }
 0x1e2   : > { %v1160_v41 = vpop.permute.xlu1 %1159  ;;  %2665 = vst.msk [vmem:[#allocation2 + $0x48] sm:$0xf] %vm2646_vm15, %v3681_v57  ;;  %2666 = vst.msk [vmem:[#allocation2 + $0x4c] sm:$0xf] %vm2646_vm15, %v3682_v60  ;;  %v1790_v11 = vpop.permute.xlu0 %1789  ;;  %3770 = vmatprep.mubr.msk.bf16.mxu1 %vm2806_vm14, %v3970_v40 }
 0x1e3   : > { %v2098_v18 = vsel %vm2072_vm1, %v2062_v14, %v1160_v41  ;;  %v2325_v47 = vsel %vm2303_vm8, %v2292_v37, %v1790_v11 }
 0x1e4   : > { %1836 = vrot.lane.b32.xlu1 %v3969_v21, %s5968_s12  ;;  %1834 = vrot.lane.b32.xlu0 %v5143_v2, %s5968_s12 }
 0x1e6   : > { %v1827_v7 = vpop.permute.xlu1 %1826  ;;  %v5351_v62 = vpop.permute.xlu0 %1791 }
 0x1e7   : > { %v2358_v34 = vsel %vm2336_vm9, %v2325_v47, %v1827_v7 }
 0x1e8   : > { %1873 = vrot.lane.b32.xlu1 %v3971_v54, %s5971_s0  ;;  %1871 = vrot.lane.b32.xlu0 %v5163_v22, %s5971_s0 }
 0x1e9   : > { %v3973_v24 = vld [vmem:[#allocation2 + $0x48] sm:$0xff]  }
 0x1ea   : > { %v1272_v49 = vpop.permute.xlu1 %1271  ;;  %v1162_v48 = vpop.permute.xlu0 %1161  ;;  %3771 = vmatmul.mubr.msk.bf16.vlgmr.msra.gmra.mxu1 %vm2806_vm14, %v3973_v24 }
 0x1eb   : > { %v2131_v63 = vsel %vm2105_vm2, %v2098_v18, %v1272_v49  ;;  %v2100_v2 = vsel %vm2072_vm1, %v2065_v15, %v1162_v48  ;;  %v2228_v18 = vsel %vm2204_vm5, %v5225_v50, %v5279_v55 }
 0x1ec   : > { %1910 = vrot.lane.b32.xlu1 %v3972_v8, %s5973_s2  ;;  %1908 = vrot.lane.b32.xlu0 %v5179_v45, %s5973_s2  ;;  %v2261_v8 = vsel %vm2237_vm6, %v2228_v18, %v5322_v16 }
 0x1ed   : > { %v2294_v15 = vsel %vm2270_vm7, %v2261_v8, %v5332_v4 }
 0x1ee   : > { %v1864_v22 = vpop.permute.xlu1 %1863  ;;  %v1829_v5 = vpop.permute.xlu0 %1828  ;;  %v2327_v48 = vsel %vm2303_vm8, %v2294_v15, %v5351_v62 }
 0x1ef   : > { %v2391_v60 = vsel %vm2369_vm10, %v2358_v34, %v1864_v22  ;;  %v2360_v50 = vsel %vm2336_vm9, %v2327_v48, %v1829_v5 }
 0x1f0   : > { %1947 = vrot.lane.b32.xlu1 %v3974_v27, %s5976_s3  ;;  %1945 = vrot.lane.b32.xlu0 %v5196_v30, %s5976_s3 }
 0x1f2   : > { %v1384_v6 = vpop.permute.xlu1 %1383  ;;  %v1274_v44 = vpop.permute.xlu0 %1273 }
 0x1f3   : > { %v2164_v26 = vsel %vm2138_vm3, %v2131_v63, %v1384_v6  ;;  %v2133_v19 = vsel %vm2105_vm2, %v2100_v2, %v1274_v44 }
 0x1f4   : > { %1984 = vrot.lane.b32.xlu1 %v3975_v25, %s5978_s5  ;;  %1982 = vrot.lane.b32.xlu0 %v5237_v35, %s5978_s5 }
 0x1f6   : > { %v1901_v45 = vpop.permute.xlu1 %1900  ;;  %v1866_v29 = vpop.permute.xlu0 %1865 }
 0x1f7   : > { %v2424_v40 = vsel %vm2402_vm11, %v2391_v60, %v1901_v45  ;;  %v2393_v2 = vsel %vm2369_vm10, %v2360_v50, %v1866_v29 }
 0x1f8   : > { %2021 = vrot.lane.b32.xlu1 %v3976_v32, %s5979_s6  ;;  %2019 = vrot.lane.b32.xlu0 %v5294_v13, %s5979_s6 }
 0x1fa   : > { %v1496_v30 = vpop.permute.xlu1 %1495  ;;  %v1386_v9 = vpop.permute.xlu0 %1385 }
 0x1fb   : > { %v5381_v53 = vsel %vm5944_vm4, %v2164_v26, %v1496_v30  ;;  %v2166_v43 = vsel %vm2138_vm3, %v2133_v19, %v1386_v9  ;;  %v5992_v19 = vld [vmem:[#allocation5_spill] sm:$0xff] }
 0x1fe   : > { %v1938_v51 = vpop.permute.xlu1 %1937  ;;  %v1903_v46 = vpop.permute.xlu0 %1902 }
 0x1ff   : > { %v2457_v14 = vsel %vm5990_vm0, %v2424_v40, %v1938_v51  ;;  %v2426_v16 = vsel %vm2402_vm11, %v2393_v2, %v1903_v46 }
 0x202   : > { %v5384_v3 = vpop.permute.xlu1 %1607  ;;  %v1498_v35 = vpop.permute.xlu0 %1497 }
 0x203   : > { %v5387_v17 = vsel %vm5944_vm4, %v2166_v43, %v1498_v35  ;;  %v3760_v61 = vpop.f32.mrf.mxu0  ;;  %vm5993_vm4 = vcmask 7168   ;;  %v2230_v40 = vsel %vm2204_vm5, %v5381_v53, %v5384_v3 }
 0x204   : > { %v5390_v13 = vadd.f32 %v3760_v61, %v5209_v20  ;;  %v2068_v5 = vsel %vm5993_vm4, %v5101_v42, %v5992_v19  ;;  %vm5994_vm4 = vmmov %vm5990_vm0 }
 0x205   : > { %v2905_v12 = vpop.f32.mrf.mxu0 }
 0x206   : > { %v1975_v33 = vpop.permute.xlu1 %1974  ;;  %3022 = vst.msk [vmem:[%s5220_s20 + $0x30] sm:$0xff] %vm2270_vm7, %v5390_v13  ;;  %v1940_v0 = vpop.permute.xlu0 %1939  ;;  %v5401_v1 = vadd.f32 %v5209_v20, %v2905_v12 }
 0x207   : > { %v3761_v52 = vpop.f32.mrf.mxu0  ;;  %v2490_v41 = vsel %vm2468_vm13, %v2457_v14, %v1975_v33  ;;  %v2459_v27 = vsel %vm5990_vm0, %v2426_v16, %v1940_v0  ;;  %vm5995_vm0 = vmmov %vm5991_vm12 }
 0x208   : > { %3020 = vst.msk [vmem:[%s5220_s20 + $0x20] sm:$0xff] %vm2270_vm7, %v5401_v1  ;;  %v5410_v31 = vadd.f32 %v3761_v52, %v5209_v20 }
 0x209   : > { %v2908_v57 = vpop.f32.mrf.mxu0 }
 0x20a   : > { %v5413_v21 = vpop.permute.xlu1 %1719  ;;  %3023 = vst.msk [vmem:[%s5220_s20 + $0x38] sm:$0xff] %vm2270_vm7, %v5410_v31  ;;  %v5419_v59 = vpop.permute.xlu0 %1609  ;;  %v5422_v36 = vadd.f32 %v5209_v20, %v2908_v57 }
 0x20c   : > { %3021 = vst.msk [vmem:[%s5220_s20 + $0x28] sm:$0xff] %vm2270_vm7, %v5422_v36 }
 0x20e   : > { %v2012_v11 = vpop.permute.xlu1 %2011  ;;  %v1977_v54 = vpop.permute.xlu0 %1976 }
 0x20f   : > { %v2523_v7 = vsel %vm5991_vm12, %v2490_v41, %v2012_v11  ;;  %v2492_v4 = vsel %vm2468_vm13, %v2459_v27, %v1977_v54  ;;  %v2263_v11 = vsel %vm2237_vm6, %v2230_v40, %v5413_v21 }
 0x210   : > { %v3683_v49 = vcombine.low %v2523_v7, %v2523_v7  ;;  %v3684_v24 = vcombine.high %v2523_v7, %v2523_v7 }
 0x212   : > { %2667 = vst.msk [vmem:[#allocation2 + $0x50] sm:$0xf] %vm2646_vm15, %v3683_v49  ;;  %2668 = vst.msk [vmem:[#allocation2 + $0x54] sm:$0xf] %vm2646_vm15, %v3684_v24  ;;  %v1757_v63 = vpop.permute.xlu1 %1756  ;;  %v5443_v55 = vpop.permute.xlu0 %1721 }
 0x213   : > { %v2296_v7 = vsel %vm2270_vm7, %v2263_v11, %v1757_v63 }
 0x216   : > { %v5448_v22 = vpop.permute.xlu1 %1758  ;;  %v2014_v62 = vpop.permute.xlu0 %2013 }
 0x217   : > { %v2525_v25 = vsel %vm5991_vm12, %v2492_v4, %v2014_v62  ;;  %v2232_v4 = vsel %vm2204_vm5, %v5387_v17, %v5419_v59  ;;  %vm5996_vm12 = vmmov %vm5994_vm4 }
 0x218   : > { %v3685_v6 = vcombine.low %v2525_v25, %v2525_v25  ;;  %v3686_v44 = vcombine.high %v2525_v25, %v2525_v25 }
 0x219   : > { %v3977_v26 = vld [vmem:[#allocation2 + $0x50] sm:$0xff]  }
 0x21a   : > { %v1164_v32 = vpop.permute.xlu1 %1163  ;;  %2669 = vst.msk [vmem:[#allocation2 + $0x58] sm:$0xf] %vm2646_vm15, %v3685_v6  ;;  %2670 = vst.msk [vmem:[#allocation2 + $0x5c] sm:$0xf] %vm2646_vm15, %v3686_v44  ;;  %v1794_v45 = vpop.permute.xlu0 %1793  ;;  %3774 = vmatprep.mubr.msk.bf16.mxu1 %vm2806_vm14, %v3977_v26  ;;  %v2265_v6 = vsel %vm2237_vm6, %v2232_v4, %v5443_v55 }
 0x21b   : > { %v5458_v29 = vsel %vm2072_vm1, %v2068_v5, %v1164_v32  ;;  %v2329_v49 = vsel %vm2303_vm8, %v2296_v7, %v1794_v45  ;;  %v2298_v19 = vsel %vm2270_vm7, %v2265_v6, %v5448_v22 }
 0x21e   : > { %v1831_v30 = vpop.permute.xlu1 %1830  ;;  %v1796_v9 = vpop.permute.xlu0 %1795 }
 0x21f   : > { %v2362_v3 = vsel %vm2336_vm9, %v2329_v49, %v1831_v30  ;;  %v2331_v5 = vsel %vm2303_vm8, %v2298_v19, %v1796_v9 }
 0x221   : > { %v3978_v51 = vld [vmem:[#allocation2 + $0x58] sm:$0xff]  }
 0x222   : > { %v5461_v43 = vpop.permute.xlu1 %1275  ;;  %v5463_v46 = vpop.permute.xlu0 %1165  ;;  %3775 = vmatmul.mubr.msk.bf16.gmra.mxu1 %vm2806_vm14, %v3978_v51 }
 0x226   : > { %v1868_v42 = vpop.permute.xlu1 %1867  ;;  %v1833_v35 = vpop.permute.xlu0 %1832 }
 0x227   : > { %v2395_v15 = vsel %vm2369_vm10, %v2362_v3, %v1868_v42  ;;  %v2364_v17 = vsel %vm2336_vm9, %v2331_v5, %v1833_v35 }
 0x22a   : > { %v5466_v61 = vpop.permute.xlu1 %1387  ;;  %v5468_v56 = vpop.permute.xlu0 %1277 }
 0x22e   : > { %v1905_v33 = vpop.permute.xlu1 %1904  ;;  %v1870_v12 = vpop.permute.xlu0 %1869 }
 0x22f   : > { %v2428_v50 = vsel %vm2402_vm11, %v2395_v15, %v1905_v33  ;;  %v2397_v45 = vsel %vm2369_vm10, %v2364_v17, %v1870_v12  ;;  %v2135_v15 = vsel %vm2105_vm2, %v5458_v29, %v5461_v43 }
 0x232   : > { %v5470_v58 = vpop.permute.xlu1 %1499  ;;  %v5472_v0 = vpop.permute.xlu0 %1389 }
 0x236   : > { %v1942_v37 = vpop.permute.xlu1 %1941  ;;  %v1907_v52 = vpop.permute.xlu0 %1906 }
 0x237   : > { %v2461_v2 = vsel %vm5994_vm4, %v2428_v50, %v1942_v37  ;;  %v2430_v30 = vsel %vm2402_vm11, %v2397_v45, %v1907_v52  ;;  %vm5997_vm4 = vmmov %vm5995_vm0 }
 0x23a   : > { %v5474_v47 = vpop.permute.xlu1 %1611  ;;  %v5476_v34 = vpop.permute.xlu0 %1501 }
 0x23b   : > { %v3764_v57 = vpop.f32.mrf.mxu0 }
 0x23c   : > { %v5479_v60 = vadd.f32 %v3764_v57, %v5209_v20 }
 0x23d   : > { %v2921_v41 = vpop.f32.mrf.mxu0 }
 0x23e   : > { %v1979_v14 = vpop.permute.xlu1 %1978  ;;  %3026 = vst.msk [vmem:[%s5220_s20 + $0x50] sm:$0xff] %vm2270_vm7, %v5479_v60  ;;  %v1944_v18 = vpop.permute.xlu0 %1943  ;;  %v5490_v54 = vadd.f32 %v5209_v20, %v2921_v41 }
 0x23f   : > { %v3765_v8 = vpop.f32.mrf.mxu0  ;;  %v2494_v16 = vsel %vm2468_vm13, %v2461_v2, %v1979_v14  ;;  %v2463_v55 = vsel %vm5996_vm12, %v2430_v30, %v1944_v18  ;;  %v5998_v18 = vld [vmem:[#allocation4_spill] sm:$0xff]  ;;  %v2168_v2 = vsel %vm2138_vm3, %v2135_v15, %v5466_v61  ;;  %vm6000_vm12 = vcmask 39936  }
 0x240   : > { %3024 = vst.msk [vmem:[%s5220_s20 + $0x40] sm:$0xff] %vm2270_vm7, %v5490_v54  ;;  %v5498_v53 = vadd.f32 %v3765_v8, %v5209_v20 }
 0x241   : > { %v2924_v24 = vpop.f32.mrf.mxu0 }
 0x242   : > { %v1724_v21 = vpop.permute.xlu1 %1723  ;;  %3027 = vst.msk [vmem:[%s5220_s20 + $0x58] sm:$0xff] %vm2270_vm7, %v5498_v53  ;;  %v1614_v48 = vpop.permute.xlu0 %1613  ;;  %v5506_v63 = vadd.f32 %v5209_v20, %v2924_v24 }
 0x244   : > { %3025 = vst.msk [vmem:[%s5220_s20 + $0x48] sm:$0xff] %vm2270_vm7, %v5506_v63 }
 0x246   : > { %v2016_v27 = vpop.permute.xlu1 %2015  ;;  %v1981_v62 = vpop.permute.xlu0 %1980 }
 0x247   : > { %v2527_v25 = vsel %vm5995_vm0, %v2494_v16, %v2016_v27  ;;  %v2496_v42 = vsel %vm2468_vm13, %v2463_v55, %v1981_v62  ;;  %vm5999_vm0 = vcmask 7168  }
 0x248   : > { %v3687_v44 = vcombine.low %v2527_v25, %v2527_v25  ;;  %v3688_v26 = vcombine.high %v2527_v25, %v2527_v25  ;;  %v2071_v7 = vsel %vm5999_vm0, %v5297_v10, %v5998_v18 }
 0x249   : > { %v2104_v8 = vsel %vm2072_vm1, %v2071_v7, %v5463_v46  ;;  %vm6001_vm1 = vmmov %vm6000_vm12 }
 0x24a   : > { %2671 = vst.msk [vmem:[#allocation2 + $0x60] sm:$0xf] %vm2646_vm15, %v3687_v44  ;;  %2672 = vst.msk [vmem:[#allocation2 + $0x64] sm:$0xf] %vm2646_vm15, %v3688_v26  ;;  %v1761_v32 = vpop.permute.xlu1 %1760  ;;  %v1726_v59 = vpop.permute.xlu0 %1725  ;;  %v2137_v3 = vsel %vm2105_vm2, %v2104_v8, %v5468_v56  ;;  %v2201_v46 = vsel %vm6001_vm1, %v2168_v2, %v5470_v58  ;;  %vm6002_vm2 = vcmask 105472  }
 0x24b   : > { %v2170_v50 = vsel %vm2138_vm3, %v2137_v3, %v5472_v0  ;;  %v2234_v27 = vsel %vm2204_vm5, %v2201_v46, %v5474_v47  ;;  %vm6003_vm3 = vmmov %vm6002_vm2 }
 0x24c   : > { %v2203_v10 = vsel %vm6000_vm12, %v2170_v50, %v5476_v34  ;;  %v2267_v0 = vsel %vm2237_vm6, %v2234_v27, %v1724_v21 }
 0x24d   : > { %v2236_v16 = vsel %vm2204_vm5, %v2203_v10, %v1614_v48  ;;  %v2300_v61 = vsel %vm2270_vm7, %v2267_v0, %v1761_v32  ;;  %vm6004_vm5 = vmmov %vm5997_vm4  ;;  %v3049_v0 = vsel %vm2270_vm7, %v5273_v23, 0.0 }
 0x24e   : > { %v1763_v51 = vpop.permute.xlu1 %1762  ;;  %v2018_v22 = vpop.permute.xlu0 %2017  ;;  %v2269_v29 = vsel %vm2237_vm6, %v2236_v16, %v1726_v59  ;;  %vm6005_vm6 = vmmov %vm5997_vm4 }
 0x24f   : > { %v2529_v9 = vsel %vm5997_vm4, %v2496_v42, %v2018_v22  ;;  %v2302_v4 = vsel %vm2270_vm7, %v2269_v29, %v1763_v51 }
 0x250   : > { %v3689_v33 = vcombine.low %v2529_v9, %v2529_v9  ;;  %v3690_v37 = vcombine.high %v2529_v9, %v2529_v9 }
 0x251   : > { %v3979_v57 = vld [vmem:[#allocation2 + $0x60] sm:$0xff]  }
 0x252   : > { %v1800_v40 = vpop.permute.xlu1 %1799  ;;  %2673 = vst.msk [vmem:[#allocation2 + $0x68] sm:$0xf] %vm2646_vm15, %v3689_v33  ;;  %2674 = vst.msk [vmem:[#allocation2 + $0x6c] sm:$0xf] %vm2646_vm15, %v3690_v37  ;;  %v1798_v35 = vpop.permute.xlu0 %1797  ;;  %3778 = vmatprep.mubr.msk.bf16.mxu1 %vm2806_vm14, %v3979_v57 }
 0x253   : > { %v2335_v34 = vsel %vm2303_vm8, %v2302_v4, %v1800_v40  ;;  %v2333_v62 = vsel %vm2303_vm8, %v2300_v61, %v1798_v35  ;;  %v3048_v4 = vsel %vm2270_vm7, %v5245_v38, 0.0 }
 0x254   : > { %v3050_v61 = vadd.f32 %v3049_v0, %v3048_v4 }
 0x256   : > { %v1837_v12 = vpop.permute.xlu1 %1836  ;;  %v1835_v52 = vpop.permute.xlu0 %1834 }
 0x257   : > { %v2368_v58 = vsel %vm2336_vm9, %v2335_v34, %v1837_v12  ;;  %v2366_v25 = vsel %vm2336_vm9, %v2333_v62, %v1835_v52  ;;  %v3051_v34 = vsel %vm2270_vm7, %v5230_v28, 0.0 }
 0x258   : > { %v3052_v62 = vadd.f32 %v3051_v34, %v3050_v61 }
 0x259   : > { %v3980_v41 = vld [vmem:[#allocation2 + $0x68] sm:$0xff]  }
 0x25a   : > { %v1874_v14 = vpop.permute.xlu1 %1873  ;;  %v1872_v11 = vpop.permute.xlu0 %1871  ;;  %3779 = vmatmul.mubr.msk.bf16.gmra.mxu1 %vm2806_vm14, %v3980_v41 }
 0x25b   : > { %v2401_v47 = vsel %vm2369_vm10, %v2368_v58, %v1874_v14  ;;  %v2399_v44 = vsel %vm2369_vm10, %v2366_v25, %v1872_v11  ;;  %v3053_v58 = vsel %vm2270_vm7, %v5256_v39, 0.0 }
 0x25c   : > { %v3054_v25 = vadd.f32 %v3053_v58, %v3052_v62 }
 0x25e   : > { %v1911_v49 = vpop.permute.xlu1 %1910  ;;  %v1909_v24 = vpop.permute.xlu0 %1908 }
 0x25f   : > { %v2434_v21 = vsel %vm2402_vm11, %v2401_v47, %v1911_v49  ;;  %v2432_v26 = vsel %vm2402_vm11, %v2399_v44, %v1909_v24  ;;  %v3057_v47 = vsel %vm2270_vm7, %v5422_v36, 0.0 }
 0x262   : > { %v1948_v56 = vpop.permute.xlu1 %1947  ;;  %v1946_v43 = vpop.permute.xlu0 %1945 }
 0x263   : > { %v2467_v19 = vsel %vm6002_vm2, %v2434_v21, %v1948_v56  ;;  %v2465_v5 = vsel %vm6003_vm3, %v2432_v26, %v1946_v43  ;;  %v3059_v21 = vsel %vm2270_vm7, %v5390_v13, 0.0 }
 0x266   : > { %v1985_v48 = vpop.permute.xlu1 %1984  ;;  %v1983_v6 = vpop.permute.xlu0 %1982 }
 0x267   : > { %v2500_v32 = vsel %vm2468_vm13, %v2467_v19, %v1985_v48  ;;  %v2498_v59 = vsel %vm2468_vm13, %v2465_v5, %v1983_v6  ;;  %v3055_v48 = vsel %vm2270_vm7, %v5401_v1, 0.0  ;;  %v3061_v19 = vsel %vm2270_vm7, %v5410_v31, 0.0 }
 0x268   : > { %v3056_v6 = vadd.f32 %v3055_v48, %v3054_v25  ;;  %v3063_v5 = vsel %vm2270_vm7, %v5490_v54, 0.0 }
 0x26a   : > { %v2022_v17 = vpop.permute.xlu1 %2021  ;;  %v2020_v45 = vpop.permute.xlu0 %2019  ;;  %v3058_v44 = vadd.f32 %v3057_v47, %v3056_v6 }
 0x26b   : > { %v2533_v30 = vsel %vm6004_vm5, %v2500_v32, %v2022_v17  ;;  %v2531_v55 = vsel %vm6005_vm6, %v2498_v59, %v2020_v45  ;;  %v3065_v17 = vsel %vm2270_vm7, %v5506_v63, 0.0 }
 0x26c   : > { %v3693_v51 = vcombine.low %v2533_v30, %v2533_v30  ;;  %v3694_v42 = vcombine.high %v2533_v30, %v2533_v30  ;;  %v3691_v22 = vcombine.low %v2531_v55, %v2531_v55  ;;  %v3692_v9 = vcombine.high %v2531_v55, %v2531_v55 }
 0x26d   : > { %v3060_v26 = vadd.f32 %v3059_v21, %v3058_v44  ;;  %v3067_v30 = vsel %vm2270_vm7, %v5479_v60, 0.0 }
 0x26e   : > { %2677 = vst.msk [vmem:[#allocation2 + $0x78] sm:$0xf] %vm2646_vm15, %v3693_v51  ;;  %2678 = vst.msk [vmem:[#allocation2 + $0x7c] sm:$0xf] %vm2646_vm15, %v3694_v42  ;;  %v3069_v51 = vsel %vm2270_vm7, %v5498_v53, 0.0 }
 0x26f   : > { %2675 = vst.msk [vmem:[#allocation2 + $0x70] sm:$0xf] %vm2646_vm15, %v3691_v22  ;;  %2676 = vst.msk [vmem:[#allocation2 + $0x74] sm:$0xf] %vm2646_vm15, %v3692_v9  ;;  %v3062_v32 = vadd.f32 %v3061_v19, %v3060_v26 }
 0x271   : > { %v3064_v59 = vadd.f32 %v3063_v5, %v3062_v32 }
 0x272   : > { %v3768_v33 = vpop.f32.mrf.mxu0 }
 0x273   : > { %v5579_v37 = vadd.f32 %v3768_v33, %v5209_v20  ;;  %v3066_v45 = vadd.f32 %v3065_v17, %v3064_v59 }
 0x274   : > { %v2937_v40 = vpop.f32.mrf.mxu0 }
 0x275   : > { %v3982_v57 = vld [vmem:[#allocation2 + $0x78] sm:$0xff]   ;;  %3030 = vst.msk [vmem:[%s5220_s20 + $0x70] sm:$0xff] %vm2270_vm7, %v5579_v37  ;;  %v5585_v12 = vadd.f32 %v5209_v20, %v2937_v40  ;;  %v3068_v55 = vadd.f32 %v3067_v30, %v3066_v45  ;;  %v3075_v40 = vsel %vm2270_vm7, %v5579_v37, 0.0 }
 0x276   : > { %v3981_v35 = vld [vmem:[#allocation2 + $0x70] sm:$0xff]   ;;  %v3769_v52 = vpop.f32.mrf.mxu0 }
 0x277   : > { %3782 = vmatprep.mubr.msk.bf16.mxu1 %vm2806_vm14, %v3981_v35  ;;  %3028 = vst.msk [vmem:[%s5220_s20 + $0x60] sm:$0xff] %vm2270_vm7, %v5585_v12  ;;  %v5592_v14 = vadd.f32 %v3769_v52, %v5209_v20  ;;  %v3071_v42 = vsel %vm2270_vm7, %v5585_v12, 0.0  ;;  %v3070_v22 = vadd.f32 %v3069_v51, %v3068_v55 }
 0x278   : > { %3783 = vmatmul.mubr.msk.bf16.gmra.mxu1 %vm2806_vm14, %v3982_v57  ;;  %v2940_v41 = vpop.f32.mrf.mxu0 }
 0x279   : > { %3031 = vst.msk [vmem:[%s5220_s20 + $0x78] sm:$0xff] %vm2270_vm7, %v5592_v14  ;;  %v5599_v11 = vadd.f32 %v5209_v20, %v2940_v41  ;;  %v3072_v33 = vadd.f32 %v3071_v42, %v3070_v22  ;;  %v3077_v52 = vsel %vm2270_vm7, %v5592_v14, 0.0 }
 0x27b   : > { %3029 = vst.msk [vmem:[%s5220_s20 + $0x68] sm:$0xff] %vm2270_vm7, %v5599_v11  ;;  %v3073_v9 = vsel %vm2270_vm7, %v5599_v11, 0.0 }
 0x27c   : > { %v3074_v57 = vadd.f32 %v3073_v9, %v3072_v33 }
 0x27e   : > { %v3076_v35 = vadd.f32 %v3075_v40, %v3074_v57 }
 0x2aa   : > { %v3772_v18 = vpop.f32.mrf.mxu1 }
 0x2ab   : > { %v5605_v7 = vadd.f32 %v3772_v18, %v5209_v20  ;;  %v3078_v18 = vadd.f32 %v3077_v52, %v3076_v35 }
 0x2ac   : > { %v2953_v8 = vpop.f32.mrf.mxu1 }
 0x2ad   : > { %3034 = vst.msk [vmem:[%s5220_s20 + $0x90] sm:$0xff] %vm2270_vm7, %v5605_v7  ;;  %v5611_v49 = vadd.f32 %v5209_v20, %v2953_v8  ;;  %v3083_v61 = vsel %vm2270_vm7, %v5605_v7, 0.0 }
 0x2ae   : > { %v3773_v3 = vpop.f32.mrf.mxu1 }
 0x2af   : > { %3032 = vst.msk [vmem:[%s5220_s20 + $0x80] sm:$0xff] %vm2270_vm7, %v5611_v49  ;;  %v5617_v24 = vadd.f32 %v3773_v3, %v5209_v20  ;;  %v3079_v41 = vsel %vm2270_vm7, %v5611_v49, 0.0 }
 0x2b0   : > { %v2956_v15 = vpop.f32.mrf.mxu1 }
 0x2b1   : > { %3035 = vst.msk [vmem:[%s5220_s20 + $0x98] sm:$0xff] %vm2270_vm7, %v5617_v24  ;;  %v5623_v50 = vadd.f32 %v5209_v20, %v2956_v15  ;;  %v3080_v15 = vadd.f32 %v3079_v41, %v3078_v18  ;;  %v3085_v48 = vsel %vm2270_vm7, %v5617_v24, 0.0 }
 0x2b3   : > { %3033 = vst.msk [vmem:[%s5220_s20 + $0x88] sm:$0xff] %vm2270_vm7, %v5623_v50  ;;  %v3081_v8 = vsel %vm2270_vm7, %v5623_v50, 0.0 }
 0x2e2   : > { %v3776_v2 = vpop.f32.mrf.mxu1 }
 0x2e3   : > { %v5629_v10 = vadd.f32 %v3776_v2, %v5209_v20 }
 0x2e4   : > { %v2969_v46 = vpop.f32.mrf.mxu1 }
 0x2e5   : > { %3038 = vst.msk [vmem:[%s5220_s20 + $0xb0] sm:$0xff] %vm2270_vm7, %v5629_v10  ;;  %v5635_v16 = vadd.f32 %v5209_v20, %v2969_v46  ;;  %v3091_v26 = vsel %vm2270_vm7, %v5629_v10, 0.0 }
 0x2e6   : > { %v3777_v56 = vpop.f32.mrf.mxu1 }
 0x2e7   : > { %3036 = vst.msk [vmem:[%s5220_s20 + $0xa0] sm:$0xff] %vm2270_vm7, %v5635_v16  ;;  %v5641_v27 = vadd.f32 %v3777_v56, %v5209_v20  ;;  %v3082_v56 = vadd.f32 %v3081_v8, %v3080_v15  ;;  %v3087_v25 = vsel %vm2270_vm7, %v5635_v16, 0.0 }
 0x2e8   : > { %v2972_v29 = vpop.f32.mrf.mxu1 }
 0x2e9   : > { %3039 = vst.msk [vmem:[%s5220_s20 + $0xb8] sm:$0xff] %vm2270_vm7, %v5641_v27  ;;  %v5647_v43 = vadd.f32 %v5209_v20, %v2972_v29  ;;  %v3084_v62 = vadd.f32 %v3083_v61, %v3082_v56  ;;  %v3093_v5 = vsel %vm2270_vm7, %v5641_v27, 0.0 }
 0x2eb   : > { %3037 = vst.msk [vmem:[%s5220_s20 + $0xa8] sm:$0xff] %vm2270_vm7, %v5647_v43  ;;  %v3086_v47 = vadd.f32 %v3085_v48, %v3084_v62  ;;  %v3089_v6 = vsel %vm2270_vm7, %v5647_v43, 0.0 }
 0x2ed   : > { %v3088_v44 = vadd.f32 %v3087_v25, %v3086_v47 }
 0x2ef   : > { %v3090_v21 = vadd.f32 %v3089_v6, %v3088_v44 }
 0x2f1   : > { %v3092_v19 = vadd.f32 %v3091_v26, %v3090_v21 }
 0x2f3   : > { %v3094_v17 = vadd.f32 %v3093_v5, %v3092_v19 }
 0x31a   : > { %v3780_v3 = vpop.f32.mrf.mxu1 }
 0x31b   : > { %v5689_v2 = vadd.f32 %v3780_v3, %v5209_v20 }
 0x31c   : > { %v2985_v46 = vpop.f32.mrf.mxu1 }
 0x31d   : > { %3042 = vst.msk [vmem:[%s5220_s20 + $0xd0] sm:$0xff] %vm2270_vm7, %v5689_v2  ;;  %v5695_v29 = vadd.f32 %v5209_v20, %v2985_v46  ;;  %v3099_v51 = vsel %vm2270_vm7, %v5689_v2, 0.0 }
 0x31e   : > { %v3781_v0 = vpop.f32.mrf.mxu1 }
 0x31f   : > { %3040 = vst.msk [vmem:[%s5220_s20 + $0xc0] sm:$0xff] %vm2270_vm7, %v5695_v29  ;;  %v5701_v4 = vadd.f32 %v3781_v0, %v5209_v20  ;;  %v3095_v32 = vsel %vm2270_vm7, %v5695_v29, 0.0 }
 0x320   : > { %v2988_v34 = vpop.f32.mrf.mxu1  ;;  %v3096_v45 = vadd.f32 %v3095_v32, %v3094_v17 }
 0x321   : > { %3043 = vst.msk [vmem:[%s5220_s20 + $0xd8] sm:$0xff] %vm2270_vm7, %v5701_v4  ;;  %v5709_v58 = vadd.f32 %v5209_v20, %v2988_v34  ;;  %v3101_v40 = vsel %vm2270_vm7, %v5701_v4, 0.0 }
 0x323   : > { %3041 = vst.msk [vmem:[%s5220_s20 + $0xc8] sm:$0xff] %vm2270_vm7, %v5709_v58  ;;  %v3097_v59 = vsel %vm2270_vm7, %v5709_v58, 0.0 }
 0x324   : > { %v3098_v30 = vadd.f32 %v3097_v59, %v3096_v45 }
 0x326   : > { %v3100_v22 = vadd.f32 %v3099_v51, %v3098_v30 }
 0x328   : > { %v3102_v41 = vadd.f32 %v3101_v40, %v3100_v22 }
 0x338   : > { %v3784_v55 = vpop.f32.mrf.mxu1 }
 0x339   : > { %v5731_v42 = vadd.f32 %v3784_v55, %v5209_v20 }
 0x33a   : > { %v3001_v9 = vpop.f32.mrf.mxu1 }
 0x33b   : > { %3046 = vst.msk [vmem:[%s5220_s20 + $0xf0] sm:$0xff] %vm2270_vm7, %v5731_v42  ;;  %v5737_v33 = vadd.f32 %v5209_v20, %v3001_v9  ;;  %v3107_v56 = vsel %vm2270_vm7, %v5731_v42, 0.0 }
 0x33c   : > { %v3785_v57 = vpop.f32.mrf.mxu1 }
 0x33d   : > { %3044 = vst.msk [vmem:[%s5220_s20 + $0xe0] sm:$0xff] %vm2270_vm7, %v5737_v33  ;;  %v3103_v35 = vsel %vm2270_vm7, %v5737_v33, 0.0  ;;  %v5747_v52 = vadd.f32 %v3785_v57, %v5209_v20 }
 0x33e   : > { %v3004_v18 = vpop.f32.mrf.mxu1  ;;  %v3104_v3 = vadd.f32 %v3103_v35, %v3102_v41 }
 0x33f   : > { %3047 = vst.msk [vmem:[%s5220_s20 + $0xf8] sm:$0xff] %vm2270_vm7, %v5747_v52  ;;  %v5753_v8 = vadd.f32 %v5209_v20, %v3004_v18  ;;  %v3109_v61 = vsel %vm2270_vm7, %v5747_v52, 0.0 }
 0x341   : > { %3045 = vst.msk [vmem:[%s5220_s20 + $0xe8] sm:$0xff] %vm2270_vm7, %v5753_v8  ;;  %v3105_v15 = vsel %vm2270_vm7, %v5753_v8, 0.0 }
 0x342   : > { %v3106_v46 = vadd.f32 %v3105_v15, %v3104_v3 }
 0x344   : > { %v3108_v0 = vadd.f32 %v3107_v56, %v3106_v46 }
 0x346   : > { %v3110_v34 = vadd.f32 %v3109_v61, %v3108_v0 }
 0x348   : > { %v3111_v62 = vrot.slane %v3110_v34, 4 }
 0x34a   : > { %v3112_v48 = vadd.f32 %v3111_v62, %v3110_v34 }
 0x34c   : > { %v3113_v20 = vrot.slane %v3112_v48, 2 }
 0x34e   : > { %v3114_v25 = vadd.f32 %v3113_v20, %v3112_v48 }
 0x350   : > { %v3115_v47 = vrot.slane %v3114_v25, 1 }
 0x352   : > { %v3116_v6 = vadd.f32 %v3115_v47, %v3114_v25 }
 0x354   : > { %v5764_v44 = vmul.f32 0.00390625, %v3116_v6 }
 0x356   : > { %v3118_v21 = vsub.f32 %v5245_v38, %v5764_v44  ;;  %v3119_v26 = vsub.f32 %v5273_v23, %v5764_v44  ;;  %v3120_v19 = vsub.f32 %v5230_v28, %v5764_v44  ;;  %v3121_v5 = vsub.f32 %v5256_v39, %v5764_v44 }
 0x357   : > { %v3122_v59 = vsub.f32 %v5401_v1, %v5764_v44  ;;  %v3123_v30 = vsub.f32 %v5422_v36, %v5764_v44  ;;  %v3124_v28 = vsub.f32 %v5390_v13, %v5764_v44  ;;  %v3125_v1 = vsub.f32 %v5410_v31, %v5764_v44 }
 0x358   : > { %v3150_v32 = vmul.f32 %v3118_v21, %v3118_v21  ;;  %v3151_v17 = vmul.f32 %v3119_v26, %v3119_v26  ;;  %v3152_v45 = vmul.f32 %v3120_v19, %v3120_v19  ;;  %v3153_v55 = vmul.f32 %v3121_v5, %v3121_v5 }
 0x359   : > { %v3154_v22 = vmul.f32 %v3122_v59, %v3122_v59  ;;  %v3155_v57 = vmul.f32 %v3123_v30, %v3123_v30  ;;  %v3126_v35 = vsub.f32 %v5490_v54, %v5764_v44  ;;  %v3156_v41 = vmul.f32 %v3124_v28, %v3124_v28 }
 0x35a   : > { %v3182_v38 = vsel %vm2270_vm7, %v3150_v32, 0.0  ;;  %v3183_v23 = vsel %vm2270_vm7, %v3151_v17, 0.0  ;;  %v3185_v39 = vsel %vm2270_vm7, %v3152_v45, 0.0  ;;  %v3187_v40 = vsel %vm2270_vm7, %v3153_v55, 0.0 }
 0x35b   : > { %v3184_v51 = vadd.f32 %v3183_v23, %v3182_v38  ;;  %v3189_v18 = vsel %vm2270_vm7, %v3154_v22, 0.0  ;;  %v3127_v13 = vsub.f32 %v5506_v63, %v5764_v44  ;;  %v3157_v15 = vmul.f32 %v3125_v1, %v3125_v1 }
 0x35c   : > { %v3191_v46 = vsel %vm2270_vm7, %v3155_v57, 0.0  ;;  %v3128_v31 = vsub.f32 %v5479_v60, %v5764_v44  ;;  %v3158_v0 = vmul.f32 %v3126_v35, %v3126_v35  ;;  %v3193_v61 = vsel %vm2270_vm7, %v3156_v41, 0.0 }
 0x35d   : > { %v3186_v9 = vadd.f32 %v3185_v39, %v3184_v51  ;;  %v3129_v54 = vsub.f32 %v5498_v53, %v5764_v44  ;;  %v3159_v62 = vmul.f32 %v3127_v13, %v3127_v13  ;;  %v3195_v48 = vsel %vm2270_vm7, %v3157_v15, 0.0 }
 0x35e   : > { %v3130_v63 = vsub.f32 %v5585_v12, %v5764_v44  ;;  %v3160_v25 = vmul.f32 %v3128_v31, %v3128_v31  ;;  %v3197_v47 = vsel %vm2270_vm7, %v3158_v0, 0.0  ;;  %v3131_v60 = vsub.f32 %v5599_v11, %v5764_v44 }
 0x35f   : > { %v3188_v36 = vadd.f32 %v3187_v40, %v3186_v9  ;;  %v3161_v21 = vmul.f32 %v3129_v54, %v3129_v54  ;;  %v3199_v26 = vsel %vm2270_vm7, %v3159_v62, 0.0  ;;  %v3132_v53 = vsub.f32 %v5579_v37, %v5764_v44 }
 0x360   : > { %v3162_v5 = vmul.f32 %v3130_v63, %v3130_v63  ;;  %v3201_v32 = vsel %vm2270_vm7, %v3160_v25, 0.0  ;;  %v3133_v12 = vsub.f32 %v5592_v14, %v5764_v44  ;;  %v3163_v59 = vmul.f32 %v3131_v60, %v3131_v60 }
 0x361   : > { %v3190_v3 = vadd.f32 %v3189_v18, %v3188_v36  ;;  %v3203_v45 = vsel %vm2270_vm7, %v3161_v21, 0.0  ;;  %v3134_v11 = vsub.f32 %v5611_v49, %v5764_v44  ;;  %v3164_v55 = vmul.f32 %v3132_v53, %v3132_v53 }
 0x362   : > { %v3205_v38 = vsel %vm2270_vm7, %v3162_v5, 0.0  ;;  %v3135_v37 = vsub.f32 %v5623_v50, %v5764_v44  ;;  %v3165_v51 = vmul.f32 %v3133_v12, %v3133_v12  ;;  %v3207_v28 = vsel %vm2270_vm7, %v3163_v59, 0.0 }
 0x363   : > { %v3192_v56 = vadd.f32 %v3191_v46, %v3190_v3  ;;  %v3136_v14 = vsub.f32 %v5605_v7, %v5764_v44  ;;  %v3166_v39 = vmul.f32 %v3134_v11, %v3134_v11  ;;  %v3209_v9 = vsel %vm2270_vm7, %v3164_v55, 0.0 }
 0x364   : > { %v3137_v49 = vsub.f32 %v5617_v24, %v5764_v44  ;;  %v3167_v57 = vmul.f32 %v3135_v37, %v3135_v37  ;;  %v3211_v40 = vsel %vm2270_vm7, %v3165_v51, 0.0  ;;  %v3138_v50 = vsub.f32 %v5635_v16, %v5764_v44 }
 0x365   : > { %v3194_v34 = vadd.f32 %v3193_v61, %v3192_v56  ;;  %v3168_v35 = vmul.f32 %v3136_v14, %v3136_v14  ;;  %v3213_v41 = vsel %vm2270_vm7, %v3166_v39, 0.0  ;;  %v3139_v7 = vsub.f32 %v5647_v43, %v5764_v44 }
 0x366   : > { %v3169_v3 = vmul.f32 %v3137_v49, %v3137_v49  ;;  %v3215_v13 = vsel %vm2270_vm7, %v3167_v57, 0.0  ;;  %v3140_v24 = vsub.f32 %v5629_v10, %v5764_v44  ;;  %v3170_v46 = vmul.f32 %v3138_v50, %v3138_v50 }
 0x367   : > { %v3196_v20 = vadd.f32 %v3195_v48, %v3194_v34  ;;  %v3217_v56 = vsel %vm2270_vm7, %v3168_v35, 0.0  ;;  %v3141_v16 = vsub.f32 %v5641_v27, %v5764_v44  ;;  %v3171_v0 = vmul.f32 %v3139_v7, %v3139_v7 }
 0x368   : > { %v3219_v61 = vsel %vm2270_vm7, %v3169_v3, 0.0  ;;  %v3142_v43 = vsub.f32 %v5695_v29, %v5764_v44  ;;  %v3172_v54 = vmul.f32 %v3140_v24, %v3140_v24  ;;  %v3221_v62 = vsel %vm2270_vm7, %v3170_v46, 0.0 }
 0x369   : > { %v3198_v6 = vadd.f32 %v3197_v47, %v3196_v20  ;;  %v3143_v10 = vsub.f32 %v5709_v58, %v5764_v44  ;;  %v3173_v20 = vmul.f32 %v3141_v16, %v3141_v16  ;;  %v3223_v63 = vsel %vm2270_vm7, %v3171_v0, 0.0 }
 0x36a   : > { %v3144_v27 = vsub.f32 %v5689_v2, %v5764_v44  ;;  %v3174_v47 = vmul.f32 %v3142_v43, %v3142_v43  ;;  %v3145_v29 = vsub.f32 %v5701_v4, %v5764_v44  ;;  %v3146_v58 = vsub.f32 %v5737_v33, %v5764_v44 }
 0x36b   : > { %v3200_v19 = vadd.f32 %v3199_v26, %v3198_v6  ;;  %v3225_v6 = vsel %vm2270_vm7, %v3172_v54, 0.0  ;;  %v3175_v21 = vmul.f32 %v3143_v10, %v3143_v10  ;;  %v3227_v26 = vsel %vm2270_vm7, %v3173_v20, 0.0 }
 0x36c   : > { %v3176_v53 = vmul.f32 %v3144_v27, %v3144_v27  ;;  %v3229_v5 = vsel %vm2270_vm7, %v3174_v47, 0.0  ;;  %v3147_v2 = vsub.f32 %v5753_v8, %v5764_v44  ;;  %v3148_v4 = vsub.f32 %v5731_v42, %v5764_v44 }
 0x36d   : > { %v3202_v17 = vadd.f32 %v3201_v32, %v3200_v19  ;;  %v3231_v12 = vsel %vm2270_vm7, %v3175_v21, 0.0  ;;  %v3149_v33 = vsub.f32 %v5747_v52, %v5764_v44 }
 0x36e   : > { %v3179_v55 = vmul.f32 %v3147_v2, %v3147_v2  ;;  %v3180_v37 = vmul.f32 %v3148_v4, %v3148_v4 }
 0x36f   : > { %v3204_v30 = vadd.f32 %v3203_v45, %v3202_v17  ;;  %v3177_v17 = vmul.f32 %v3145_v29, %v3145_v29  ;;  %v3178_v45 = vmul.f32 %v3146_v58, %v3146_v58 }
 0x370   : > { %v3241_v42 = vsel %vm2270_vm7, %v3180_v37, 0.0 }
 0x371   : > { %v3206_v23 = vadd.f32 %v3205_v38, %v3204_v30  ;;  %v3233_v30 = vsel %vm2270_vm7, %v3176_v53, 0.0  ;;  %v3235_v38 = vsel %vm2270_vm7, %v3177_v17, 0.0  ;;  %v3237_v8 = vsel %vm2270_vm7, %v3178_v45, 0.0 }
 0x373   : > { %v3208_v22 = vadd.f32 %v3207_v28, %v3206_v23  ;;  %v3181_v28 = vmul.f32 %v3149_v33, %v3149_v33 }
 0x375   : > { %v3210_v1 = vadd.f32 %v3209_v9, %v3208_v22  ;;  %v3239_v22 = vsel %vm2270_vm7, %v3179_v55, 0.0  ;;  %v3243_v9 = vsel %vm2270_vm7, %v3181_v28, 0.0 }
 0x377   : > { %v3212_v36 = vadd.f32 %v3211_v40, %v3210_v1 }
 0x379   : > { %v3214_v18 = vadd.f32 %v3213_v41, %v3212_v36 }
 0x37b   : > { %v3216_v15 = vadd.f32 %v3215_v13, %v3214_v18 }
 0x37d   : > { %v3218_v31 = vadd.f32 %v3217_v56, %v3216_v15 }
 0x37f   : > { %v3220_v34 = vadd.f32 %v3219_v61, %v3218_v31 }
 0x381   : > { %v3222_v48 = vadd.f32 %v3221_v62, %v3220_v34 }
 0x383   : > { %v3224_v25 = vadd.f32 %v3223_v63, %v3222_v48 }
 0x385   : > { %v3226_v60 = vadd.f32 %v3225_v6, %v3224_v25 }
 0x387   : > { %v3228_v19 = vadd.f32 %v3227_v26, %v3226_v60 }
 0x389   : > { %v3230_v32 = vadd.f32 %v3229_v5, %v3228_v19 }
 0x38b   : > { %v3232_v59 = vadd.f32 %v3231_v12, %v3230_v32 }
 0x38d   : > { %v3234_v11 = vadd.f32 %v3233_v30, %v3232_v59 }
 0x38f   : > { %v3236_v23 = vadd.f32 %v3235_v38, %v3234_v11 }
 0x391   : > { %v3238_v51 = vadd.f32 %v3237_v8, %v3236_v23 }
 0x393   : > { %v3240_v14 = vadd.f32 %v3239_v22, %v3238_v51 }
 0x395   : > { %v3242_v39 = vadd.f32 %v3241_v42, %v3240_v14 }
 0x397   : > { %v3244_v1 = vadd.f32 %v3243_v9, %v3242_v39 }
 0x399   : > { %v3245_v49 = vrot.slane %v3244_v1, 4 }
 0x39b   : > { %v3246_v52 = vadd.f32 %v3245_v49, %v3244_v1 }
 0x39d   : > { %v3247_v57 = vrot.slane %v3246_v52, 2 }
 0x39f   : > { %v3248_v40 = vadd.f32 %v3247_v57, %v3246_v52  ;;  %3254 = sbr.rel (%p3729_p6) target bundleno = 934 (0x3a6), region = 64 }
 0x3a1   : > { %v3249_v36 = vrot.slane %v3248_v40, 1 }
 0x3a3   : > { %v3250_v50 = vadd.f32 %v3249_v36, %v3248_v40 }
 0x3a4   : > { %vm3255_vm8 = vcmask 57344  }
 0x3a5   : > { %3256 = vst.msk [vmem:[%s5912_s11] sm:$0x1] %vm3255_vm8, %v5764_v44  ;;  %3257 = vst.msk [vmem:[%s5912_s11 + $0x1] sm:$0x1] %vm3255_vm8, %v3250_v50 }
 0x3a6 PF: > { %p3730_p7 = scmp.le.s32.totalorder %s4008_s17, 0 }
 0x3a7   : > { %s3264_s5 = scvt.s32.f32 (!%p3730_p7), %s4008_s17 }
 0x3a8   : > { %3261 = sbr.rel (%p3730_p7) target bundleno = 1015 (0x3f7), region = 68 }
 0x3a9   : > { %s3265_s6 = smul.f32 (!%p3730_p7), 256.0, %s3264_s5 }
 0x3ab   : > { %s3266_s7 = sadd.f32 (!%p3730_p7), 256.0, %s3265_s6  ;;  %s3279_s25 = smul.f32 (!%p3730_p7), 256.0, %s3265_s6 }
 0x3ad   : > { %v3268_v35 = vstv %s3266_s7  ;;  %v3262_v18 = vld [vmem:[%s5912_s11] sm:$0x1]  ;;  %v3263_v3 = vld [vmem:[%s5912_s11 + $0x1] sm:$0x1]  ;;  %vm3275_vm7 = vcmask 57344  }
 0x3ae   : > { %3992 = vrcp.f32 %v3268_v35  ;;  %v3267_v7 = vsub.f32 %v5764_v44, %v3262_v18  ;;  %v3277_v24 = vadd.f32 %v3263_v3, %v3250_v50 }
 0x3b0   : > { %v3278_v13 = vmul.f32 %v3267_v7, %v3267_v7 }
 0x3bb   : > { %v3993_v41 = vpop.eup %3992 }
 0x3bc   : > { %3789 = vpush %v3993_v41 }
 0x3ed   : > { %s3790_s16 = spop %3789 }
 0x3ee   : > { %s3271_s24 = smul.f32 256.0, %s3790_s16 }
 0x3ef   : > { %s3283_s30 = smul.f32 %s3790_s16, %s3279_s25 }
 0x3f0   : > { %v3272_v15 = vstv %s3271_s24 }
 0x3f1   : > { %v3273_v46 = vmul.f32 %v3272_v15, %v3267_v7  ;;  %v3284_v56 = vstv %s3283_s30 }
 0x3f2   : > { %v3285_v31 = vmul.f32 %v3284_v56, %v3278_v13 }
 0x3f3   : > { %v3274_v16 = vadd.f32 %v3273_v46, %v3262_v18 }
 0x3f4   : > { %v3286_v0 = vadd.f32 %v3285_v31, %v3277_v24 }
 0x3f5   : > { %3276 = vst.msk [vmem:[%s5912_s11] sm:$0x1] %vm3275_vm7, %v3274_v16 }
 0x3f6   : > { %3287 = vst.msk [vmem:[%s5912_s11 + $0x1] sm:$0x1] %vm3275_vm7, %v3286_v0 }
 0x3f7 PF: > { %p3731_p8 = scmp.ne.s32.totalorder %s4008_s17, 1 }
 0x3f9   : > { %3291 = sbr.rel (%p3731_p8) target bundleno = 1026 (0x402), region = 72 }
 0x3fe   : > { %v3292_v44 = vld [vmem:[%s5912_s11 + $0x1] sm:$0x1]  ;;  %vm3294_vm9 = vcmask 57344  }
 0x3ff   : > { %v3293_v61 = vmul.f32 0.001953125, %v3292_v44 }
 0x401   : > { %3295 = vst.msk [vmem:[%s5912_s11 + $0x1] sm:$0x1] %vm3294_vm9, %v3293_v61 }
 0x402 PF: > { %s22_s19 = sadd.s32 1, %s4016_s19   ;;  %s6006_s14 = sld [smem:[#allocation3_spill]] }
 0x403   : > { %p19_p9 = scmp.ge.s32.totalorder %s22_s19, 4   ;;  %s6007_s17 = smov %s4012_s18 }
 0x405   :  { %21 = sbr.rel (!%p19_p9) target bundleno = 10 (0xa), region = 141 }
 0x408   : > { %s6008_s18 = smov %s6006_s14 }

// kernel: mnist_encoder_forward.15
= control target key start
LH: loop header
LB: loop body
LE: loop exit
PB: predicated region body
PF: predicated region fallthrough
CT: control target
= control target key end

     0   :  { %vm60_vm0 = vcmask 257024   ;;  %s129_s0 = inlined_call_operand.vmem [shape: f32[32,32], index: 0, kind: input, shape index: {}]   ;;  %s130_s1 = inlined_call_operand.vmem [shape: f32[1,32], index: 1, kind: input, shape index: {}]   ;;  %s131_s2 = inlined_call_operand.vmem [shape: f32[1,32], index: 2, kind: input, shape index: {}]   ;;  %s132_s3 = inlined_call_operand.vmem [shape: bf16[32,32], index: 3, kind: output, shape index: {}]  }
   0x1   :  { %v14_v0 = vld [vmem:[%s129_s0] sm:$0xff]  ;;  %v15_v4 = vld [vmem:[%s129_s0 + $0x8] sm:$0xff]  ;;  %v16_v5 = vld [vmem:[%s129_s0 + $0x10] sm:$0xff] }
   0x2   :  { %v69_v1 = vld [vmem:[%s130_s1] ss:$0 sm:$0xff]  ;;  %v17_v6 = vld [vmem:[%s129_s0 + $0x18] sm:$0xff] }
   0x3   :  { %v70_v2 = vld [vmem:[%s131_s2] ss:$0 sm:$0xff]  ;;  %v25_v3 = vmul.f32 %v69_v1, %v14_v0  ;;  %v26_v7 = vmul.f32 %v69_v1, %v15_v4  ;;  %v27_v8 = vmul.f32 %v69_v1, %v16_v5  ;;  %v28_v9 = vmul.f32 %v69_v1, %v17_v6 }
   0x5   :  { %v36_v10 = vadd.f32 %v70_v2, %v25_v3  ;;  %v37_v11 = vadd.f32 %v70_v2, %v26_v7  ;;  %v38_v12 = vadd.f32 %v70_v2, %v27_v8  ;;  %v39_v13 = vadd.f32 %v70_v2, %v28_v9 }
   0x7   :  { %v40_v14 = vmax.f32 %v36_v10, 0.0  ;;  %v41_v15 = vmax.f32 %v37_v11, 0.0  ;;  %v42_v16 = vmax.f32 %v38_v12, 0.0  ;;  %v43_v17 = vmax.f32 %v39_v13, 0.0 }
   0x9   :  { %v75_v18 = vpack.c.bf16 %v40_v14, %v40_v14  ;;  %v76_v19 = vpack.c.bf16 %v41_v15, %v41_v15  ;;  %v77_v20 = vpack.c.bf16 %v42_v16, %v42_v16  ;;  %v78_v21 = vpack.c.bf16 %v43_v17, %v43_v17 }
   0xb   :  { %61 = vst.msk [vmem:[%s132_s3] sm:$0xf] %vm60_vm0, %v75_v18  ;;  %62 = vst.msk [vmem:[%s132_s3 + $0x4] sm:$0xf] %vm60_vm0, %v76_v19 }
   0xc   :  { %63 = vst.msk [vmem:[%s132_s3 + $0x8] sm:$0xf] %vm60_vm0, %v77_v20  ;;  %64 = vst.msk [vmem:[%s132_s3 + $0xc] sm:$0xf] %vm60_vm0, %v78_v21 }

// kernel: mnist_encoder_forward.14
= control target key start
LH: loop header
LB: loop body
LE: loop exit
PB: predicated region body
PF: predicated region fallthrough
CT: control target
= control target key end

     0   :  { %vm130_vm0 = vcmask 1045504   ;;  %s1001_s12 = smov 16   ;;  %s1002_s15 = smov 32   ;;  %vm211_vm1 = vcmask 130048   ;;  %vm218_vm2 = vcmask 392192   ;;  %vm215_vm3 = vcmask 261120   ;;  %s1472_s2 = inlined_call_operand.vmem [shape: bf16[2,20,16], index: 2, kind: input, shape index: {}]   ;;  %s1473_s1 = inlined_call_operand.vmem [shape: bf16[2,20,16], index: 1, kind: input, shape index: {}]   ;;  %s1474_s3 = inlined_call_operand.vmem [shape: bf16[2,20,16], index: 3, kind: input, shape index: {}]   ;;  %s1475_s4 = inlined_call_operand.vmem [shape: bf16[2,20,16], index: 4, kind: input, shape index: {}]   ;;  %s1476_s6 = inlined_call_operand.vmem [shape: bf16[2,20,16], index: 6, kind: input, shape index: {}]   ;;  %s1477_s8 = inlined_call_operand.vmem [shape: bf16[256,32], index: 8, kind: input, shape index: {}]   ;;  %s1478_s5 = inlined_call_operand.vmem [shape: bf16[2,20,16], index: 5, kind: input, shape index: {}]   ;;  %s1479_s7 = inlined_call_operand.vmem [shape: bf16[2,20,16], index: 7, kind: input, shape index: {}]   ;;  %s1480_s0 = inlined_call_operand.vmem [shape: bf16[2,20,16], index: 0, kind: input, shape index: {}]   ;;  %s1481_s9 = inlined_call_operand.vmem [shape: f32[1,32], index: 9, kind: input, shape index: {}]   ;;  %s1482_s10 = inlined_call_operand.vmem [shape: f32[32,32], index: 10, kind: output, shape index: {0}]   ;;  %s1483_s11 = inlined_call_operand.vmem [shape: f32[2,32], index: 11, kind: output, shape index: {1}]  }
   0x1   :  { %v40_v0 = vld [vmem:[%s1472_s2] sm:$0xf]  ;;  %v41_v1 = vld [vmem:[%s1472_s2 + $0x4] sm:$0xf]  ;;  %s1003_s21 = smov 48   ;;  %v982_v46 = vld [vmem:[%s1477_s8 + $0x78] sm:$0xff]  }
   0x2   :  { %v56_v2 = vld [vmem:[%s1472_s2] sm:$0xc]  ;;  %v782_v3 = vcombine.low %v40_v0, %v41_v1  ;;  %v43_v6 = vld [vmem:[%s1473_s1 + $0x4] sm:$0xf]  ;;  %v1139_v39 = vld [vmem:[%s1472_s2 + $0x10] sm:$0xf]  ;;  %886 = vmatprep.subr.bf16.mxu0 %v982_v46  ;;  %914 = vmatprep.subr.bf16.mxu1 %v982_v46 }
   0x3   :  { %v791_v4 = vcombine.low %v56_v2, %v41_v1  ;;  %v42_v5 = vld [vmem:[%s1473_s1] sm:$0xf]  ;;  %v941_v10 = vld [vmem:[%s1472_s2 + $0x8] ss:$0 sps:$4 sm:$0x33]   ;;  %s1004_s17 = smov 64  }
   0x4   :  { %v58_v7 = vld [vmem:[%s1473_s1] sm:$0xc]  ;;  %v783_v8 = vcombine.low %v42_v5, %v43_v6  ;;  %80 = vrot.lane.b32.xlu0 %v782_v3, %s1001_s12  ;;  %v942_v12 = vld [vmem:[%s1473_s1 + $0x8] ss:$0 sps:$4 sm:$0x33]   ;;  %v141_v14 = vrot.slane %v941_v10, 2 }
   0x5   :  { %v793_v9 = vcombine.low %v58_v7, %v43_v6  ;;  %v140_v11 = vrot.slane %v791_v4, 2  ;;  %v45_v15 = vld [vmem:[%s1474_s3 + $0x4] sm:$0xf]  ;;  %v60_v16 = vld [vmem:[%s1474_s3] sm:$0xc]  ;;  %v152_v17 = vrot.slane %v942_v12, 2 }
   0x6   :  { %87 = vrot.lane.b32.xlu1 %v783_v8, %s1002_s15  ;;  %v795_v18 = vcombine.low %v60_v16, %v45_v15  ;;  %v944_v19 = vld [vmem:[%s1474_s3 + $0x8] ss:$0 sps:$4 sm:$0x33]   ;;  %v44_v21 = vld [vmem:[%s1474_s3] sm:$0xf]  ;;  %v983_v54 = vld [vmem:[%s1477_s8 + $0x38] sm:$0xff]  }
   0x7   :  { %v151_v13 = vrot.slane %v793_v9, 2  ;;  %v142_v20 = vsel %vm130_vm0, %v140_v11, %v141_v14  ;;  %v47_v22 = vld [vmem:[%s1475_s4 + $0x4] sm:$0xf]  ;;  %v62_v23 = vld [vmem:[%s1475_s4] sm:$0xc]  ;;  %v163_v26 = vrot.slane %v944_v19, 2  ;;  %v784_v27 = vcombine.low %v44_v21, %v45_v15  ;;  %887 = vmatpush3.bf16.msra.mxu0 %v983_v54  ;;  %922 = vmatpush3.bf16.msra.mxu1 %v983_v54 }
   0x8   :  { %143 = vrot.lane.b32.xlu0 %v142_v20, %s1001_s12  ;;  %v162_v25 = vrot.slane %v795_v18, 2  ;;  %v797_v28 = vcombine.low %v62_v23, %v47_v22  ;;  %v947_v29 = vld [vmem:[%s1475_s4 + $0x8] ss:$0 sps:$4 sm:$0x33]   ;;  %v46_v30 = vld [vmem:[%s1475_s4] sm:$0xf] }
   0x9   :  { %v153_v24 = vsel %vm130_vm0, %v151_v13, %v152_v17  ;;  %v1126_v32 = vld [vmem:[%s1476_s6 + $0x4] sm:$0xf]  ;;  %v64_v33 = vld [vmem:[%s1476_s6] sm:$0xc]  ;;  %v174_v35 = vrot.slane %v947_v29, 2  ;;  %v785_v38 = vcombine.low %v46_v30, %v47_v22  ;;  %v984_v63 = vld [vmem:[%s1477_s8 + $0x70] sm:$0xff]  }
   0xa   :  { %154 = vrot.lane.b32.xlu1 %v153_v24, %s1002_s15  ;;  %v164_v31 = vsel %vm130_vm0, %v162_v25, %v163_v26  ;;  %v173_v34 = vrot.slane %v797_v28, 2  ;;  %v799_v36 = vcombine.low %v64_v33, %v1126_v32  ;;  %v950_v37 = vld [vmem:[%s1476_s6 + $0x8] ss:$0 sps:$4 sm:$0x33]   ;;  %v825_v40 = vld [vmem:[%s1472_s2 + $0xc] sm:$0xc]  ;;  %888 = vmatprep.subr.bf16.mxu0 %v984_v63 }
   0xb   :  { %v185_v43 = vrot.slane %v950_v37, 2  ;;  %v849_v44 = vcombine.low %v825_v40, %v1139_v39  ;;  %v952_v45 = vld [vmem:[%s1472_s2 + $0x14] ss:$0 sps:$4 sm:$0x33]   ;;  %v1156_v47 = vld [vmem:[%s1478_s5 + $0x4] sm:$0xf]  ;;  %915 = vmatprep.subr.bf16.mxu1 %v984_v63 }
   0xc   :  { %165 = vrot.lane.b32.xlu0 %v164_v31, %s1003_s21  ;;  %v175_v41 = vsel %vm130_vm0, %v173_v34, %v174_v35  ;;  %v184_v42 = vrot.slane %v799_v36, 2  ;;  %v66_v48 = vld [vmem:[%s1478_s5] sm:$0xc]  ;;  %v370_v50 = vrot.slane %v952_v45, 2  ;;  %v1169_v53 = vld [vmem:[%s1473_s1 + $0x10] sm:$0xf] }
   0xd   :  { %v369_v49 = vrot.slane %v849_v44, 2  ;;  %v801_v51 = vcombine.low %v66_v48, %v1156_v47  ;;  %v955_v52 = vld [vmem:[%s1478_s5 + $0x8] ss:$0 sps:$4 sm:$0x33]   ;;  %v48_v56 = vld [vmem:[%s1476_s6] sm:$0xf] }
   0xe   :  { %94 = vrot.lane.b32.xlu1 %v784_v27, %s1003_s21  ;;  %v186_v55 = vsel %vm130_vm0, %v184_v42, %v185_v43  ;;  %v827_v57 = vld [vmem:[%s1473_s1 + $0xc] sm:$0xc]  ;;  %v196_v60 = vrot.slane %v955_v52, 2  ;;  %v958_v62 = vld [vmem:[%s1473_s1 + $0x14] ss:$0 sps:$4 sm:$0x33]   ;;  %v786_v2 = vcombine.low %v48_v56, %v1126_v32 }
   0xf   :  { %v371_v58 = vsel %vm130_vm0, %v369_v49, %v370_v50  ;;  %v195_v59 = vrot.slane %v801_v51, 2  ;;  %v851_v61 = vcombine.low %v827_v57, %v1169_v53  ;;  %v1193_v0 = vld [vmem:[%s1479_s7 + $0x4] sm:$0xf]  ;;  %v68_v1 = vld [vmem:[%s1479_s7] sm:$0xc]  ;;  %s1005_s22 = smov 80  }
  0x10   :  { %176 = vrot.lane.b32.xlu0 %v175_v41, %s1004_s17  ;;  %v985_v3 = vld [vmem:[%s1477_s8 + $0x30] sm:$0xff]   ;;  %v809_v4 = vld [vmem:[%s1472_s2 + $0xc] sm:$0xf]  ;;  %v381_v7 = vrot.slane %v958_v62, 2  ;;  %v803_v8 = vcombine.low %v68_v1, %v1193_v0  ;;  %v50_v13 = vld [vmem:[%s1478_s5] sm:$0xf] }
  0x11   :  { %v380_v5 = vrot.slane %v851_v61, 2  ;;  %v197_v6 = vsel %vm130_vm0, %v195_v59, %v196_v60  ;;  %v961_v9 = vld [vmem:[%s1479_s7 + $0x8] ss:$0 sps:$4 sm:$0x33]   ;;  %889 = vmatpush3.bf16.msra.mxu0 %v985_v3  ;;  %923 = vmatpush3.bf16.msra.mxu1 %v985_v3  ;;  %v1215_v10 = vld [vmem:[%s1474_s3 + $0x10] sm:$0xf]  ;;  %v840_v12 = vcombine.low %v809_v4, %v1139_v39  ;;  %v787_v24 = vcombine.low %v50_v13, %v1156_v47 }
  0x12   :  { %101 = vrot.lane.b32.xlu1 %v785_v38, %s1004_s17  ;;  %v829_v11 = vld [vmem:[%s1474_s3 + $0xc] sm:$0xc]  ;;  %s1006_s18 = smov 96   ;;  %v1229_v14 = vld [vmem:[%s1475_s4 + $0x10] sm:$0xf]  ;;  %v206_v18 = vrot.slane %v803_v8, 2 }
  0x13   :  { %v831_v15 = vld [vmem:[%s1475_s4 + $0xc] sm:$0xc]  ;;  %v382_v17 = vsel %vm130_vm0, %v380_v5, %v381_v7  ;;  %v207_v19 = vrot.slane %v961_v9, 2  ;;  %v853_v20 = vcombine.low %v829_v11, %v1215_v10  ;;  %v964_v21 = vld [vmem:[%s1474_s3 + $0x14] ss:$0 sps:$4 sm:$0x33]  }
  0x14   :  { %187 = vrot.lane.b32.xlu0 %v186_v55, %s1005_s22  ;;  %v986_v16 = vld [vmem:[%s1477_s8 + $0x68] sm:$0xff]   ;;  %v1245_v22 = vld [vmem:[%s1476_s6 + $0x10] sm:$0xf]  ;;  %v855_v25 = vcombine.low %v831_v15, %v1229_v14  ;;  %v392_v30 = vrot.slane %v964_v21, 2  ;;  %v990_v33 = vld [vmem:[%s1477_s8 + $0x60] sm:$0xff]   ;;  %s1007_s14 = smov 112  }
  0x15   :  { %v833_v23 = vld [vmem:[%s1476_s6 + $0xc] sm:$0xc]  ;;  %890 = vmatprep.subr.bf16.mxu0 %v986_v16  ;;  %916 = vmatprep.subr.bf16.mxu1 %v986_v16  ;;  %v208_v28 = vsel %vm130_vm0, %v206_v18, %v207_v19  ;;  %v391_v29 = vrot.slane %v853_v20, 2  ;;  %v968_v31 = vld [vmem:[%s1475_s4 + $0x14] ss:$0 sps:$4 sm:$0x33]  }
  0x16   :  { %372 = vrot.lane.b32.xlu1 %v371_v58, %s1001_s12  ;;  %v987_v26 = vld [vmem:[%s1477_s8 + $0x28] sm:$0xff]   ;;  %v857_v32 = vcombine.low %v833_v23, %v1245_v22  ;;  %v971_v34 = vld [vmem:[%s1476_s6 + $0x14] ss:$0 sps:$4 sm:$0x33]   ;;  %v52_v36 = vld [vmem:[%s1479_s7] sm:$0xf] }
  0x17   :  { %v811_v27 = vld [vmem:[%s1473_s1 + $0xc] sm:$0xf]  ;;  %891 = vmatpush3.bf16.msra.mxu0 %v987_v26  ;;  %924 = vmatpush3.bf16.msra.mxu1 %v987_v26  ;;  %v402_v38 = vrot.slane %v855_v25, 2  ;;  %v991_v39 = vld [vmem:[%s1477_s8 + $0x20] sm:$0xff]   ;;  %v1286_v40 = vld [vmem:[%s1478_s5 + $0x10] sm:$0xf]  ;;  %v393_v43 = vsel %vm130_vm0, %v391_v29, %v392_v30  ;;  %v788_v50 = vcombine.low %v52_v36, %v1193_v0 }
  0x18   :  { %108 = vrot.lane.b32.xlu0 %v786_v2, %s1005_s22  ;;  %v841_v35 = vcombine.low %v811_v27, %v1169_v53  ;;  %v813_v37 = vld [vmem:[%s1474_s3 + $0xc] sm:$0xf]  ;;  %892 = vmatprep.subr.bf16.mxu0 %v990_v33  ;;  %v1294_v42 = vld [vmem:[%s1480_s0 + $0x4] sm:$0xf]  ;;  %v403_v44 = vrot.slane %v968_v31, 2  ;;  %v413_v45 = vrot.slane %v857_v32, 2 }
  0x19   :  { %v835_v41 = vld [vmem:[%s1478_s5 + $0xc] sm:$0xc]  ;;  %917 = vmatprep.subr.bf16.mxu1 %v990_v33  ;;  %v54_v46 = vld [vmem:[%s1480_s0] sm:$0xc]  ;;  %v414_v47 = vrot.slane %v971_v34, 2  ;;  %v842_v52 = vcombine.low %v813_v37, %v1215_v10  ;;  %v992_v8 = vld [vmem:[%s1477_s8 + $0x58] sm:$0xff]  }
  0x1a   :  { %198 = vrot.lane.b32.xlu1 %v197_v6, %s1006_s18  ;;  %v789_v48 = vcombine.low %v54_v46, %v1294_v42  ;;  %v981_v49 = vld [vmem:[%s1480_s0 + $0x8] ss:$0 sps:$4 sm:$0x33]   ;;  %v815_v51 = vld [vmem:[%s1475_s4 + $0xc] sm:$0xf]  ;;  %v859_v53 = vcombine.low %v835_v41, %v1286_v40  ;;  %v404_v63 = vsel %vm130_vm0, %v402_v38, %v403_v44  ;;  %v995_v15 = vld [vmem:[%s1477_s8 + $0x50] sm:$0xff]  }
  0x1b   :  { %893 = vmatpush3.bf16.msra.mxu0 %v991_v39  ;;  %925 = vmatpush3.bf16.msra.mxu1 %v991_v39  ;;  %v132_v55 = vrot.slane %v981_v49, 2  ;;  %v974_v56 = vld [vmem:[%s1478_s5 + $0x14] ss:$0 sps:$4 sm:$0x33]   ;;  %v817_v58 = vld [vmem:[%s1476_s6 + $0xc] sm:$0xf]  ;;  %v843_v0 = vcombine.low %v815_v51, %v1229_v14  ;;  %v415_v9 = vsel %vm130_vm0, %v413_v45, %v414_v47 }
  0x1c   :  { %310 = vrot.lane.b32.xlu0 %v840_v12, %s1001_s12  ;;  %v131_v54 = vrot.slane %v789_v48, 2  ;;  %v822_v59 = vld [vmem:[%s1479_s7 + $0x10] sm:$0xf]  ;;  %v837_v60 = vld [vmem:[%s1479_s7 + $0xc] sm:$0xc]  ;;  %v424_v1 = vrot.slane %v859_v53, 2  ;;  %v844_v10 = vcombine.low %v817_v58, %v1245_v22  ;;  %894 = vmatprep.subr.bf16.mxu0 %v992_v8 }
  0x1d   :  { %v1331_v61 = vld [vmem:[%s1480_s0 + $0x10] sm:$0xf]  ;;  %v823_v62 = vld [vmem:[%s1480_s0 + $0xc] sm:$0xc]  ;;  %v425_v6 = vrot.slane %v974_v56, 2  ;;  %v861_v11 = vcombine.low %v837_v60, %v822_v59  ;;  %v993_v14 = vld [vmem:[%s1477_s8 + $0x18] sm:$0xff]   ;;  %918 = vmatprep.subr.bf16.mxu1 %v992_v8 }
  0x1e   :  { %383 = vrot.lane.b32.xlu1 %v382_v17, %s1002_s15  ;;  %v1316_v57 = vsel %vm130_vm0, %v131_v54, %v132_v55  ;;  %v847_v2 = vcombine.low %v823_v62, %v1331_v61  ;;  %v989_v3 = vld [vmem:[%s1480_s0 + $0x14] ss:$0 sps:$4 sm:$0x33]   ;;  %v819_v7 = vld [vmem:[%s1478_s5 + $0xc] sm:$0xf]  ;;  %v1000_v27 = vld [vmem:[%s1477_s8] sm:$0xff]  }
  0x1f   :  { %v361_v5 = vrot.slane %v989_v3, 2  ;;  %v977_v12 = vld [vmem:[%s1479_s7 + $0x14] ss:$0 sps:$4 sm:$0x33]   ;;  %895 = vmatpush3.bf16.msra.mxu0 %v993_v14  ;;  %926 = vmatpush3.bf16.msra.mxu1 %v993_v14  ;;  %v997_v17 = vld [vmem:[%s1477_s8 + $0x48] sm:$0xff]   ;;  %v426_v18 = vsel %vm130_vm0, %v424_v1, %v425_v6  ;;  %v845_v19 = vcombine.low %v819_v7, %v1286_v40  ;;  %v435_v20 = vrot.slane %v861_v11, 2 }
  0x20   :  { %115 = vrot.lane.b32.xlu0 %v787_v24, %s1006_s18  ;;  %v360_v4 = vrot.slane %v847_v2, 2  ;;  %v996_v16 = vld [vmem:[%s1477_s8 + $0x10] sm:$0xff]   ;;  %896 = vmatprep.subr.bf16.mxu0 %v995_v15  ;;  %v436_v21 = vrot.slane %v977_v12, 2  ;;  %v821_v22 = vld [vmem:[%s1479_s7 + $0xc] sm:$0xf]  ;;  %v999_v24 = vld [vmem:[%s1477_s8 + $0x40] sm:$0xff]  }
  0x21   :  { %919 = vmatprep.subr.bf16.mxu1 %v995_v15  ;;  %v998_v23 = vld [vmem:[%s1477_s8 + $0x8] sm:$0xff]   ;;  %v846_v26 = vcombine.low %v821_v22, %v822_v59  ;;  %v38_v40 = vld [vmem:[%s1480_s0] sm:$0xf]  ;;  %vm221_vm4 = vcmask 523264   ;;  %vm224_vm5 = vcmask 654336   ;;  %vm227_vm6 = vcmask 785408  }
  0x22   :  { %209 = vrot.lane.b32.xlu1 %v208_v28, %s1007_s14  ;;  %v1357_v13 = vsel %vm130_vm0, %v360_v4, %v361_v5  ;;  %v437_v25 = vsel %vm130_vm0, %v435_v20, %v436_v21  ;;  %v781_v44 = vcombine.low %v38_v40, %v1294_v42  ;;  %vm230_vm7 = vcmask 916480   ;;  %v807_v2 = vld [vmem:[%s1480_s0 + $0xc] sm:$0xf] }
  0x23   :  { %897 = vmatpush3.bf16.msra.mxu0 %v996_v16  ;;  %927 = vmatpush3.bf16.msra.mxu1 %v996_v16  ;;  %v839_v4 = vcombine.low %v807_v2, %v1331_v61  ;;  %vm733_vm8 = vcmask 253952  }
  0x24   :  { %317 = vrot.lane.b32.xlu0 %v841_v35, %s1002_s15  ;;  %898 = vmatprep.subr.bf16.mxu0 %v997_v17 }
  0x25   :  { %920 = vmatprep.subr.bf16.mxu1 %v997_v17 }
  0x26   :  { %394 = vrot.lane.b32.xlu1 %v393_v43, %s1003_s21 }
  0x27   :  { %899 = vmatpush3.bf16.msra.mxu0 %v998_v23  ;;  %928 = vmatpush3.bf16.msra.mxu1 %v998_v23 }
  0x28   :  { %122 = vrot.lane.b32.xlu0 %v788_v50, %s1007_s14  ;;  %900 = vmatprep.subr.bf16.mxu0 %v999_v24 }
  0x29   :  { %921 = vmatprep.subr.bf16.mxu1 %v999_v24 }
  0x2a   :  { %324 = vrot.lane.b32.xlu1 %v842_v52, %s1003_s21 }
  0x2b   :  { %901 = vmatpush3.bf16.msra.mxu0 %v1000_v27  ;;  %929 = vmatpush3.bf16.msra.mxu1 %v1000_v27 }
  0x2c   :  { %405 = vrot.lane.b32.xlu0 %v404_v63, %s1004_s17 }
  0x2e   :  { %331 = vrot.lane.b32.xlu1 %v843_v0, %s1004_s17 }
  0x30   :  { %416 = vrot.lane.b32.xlu0 %v415_v9, %s1005_s22 }
  0x32   :  { %338 = vrot.lane.b32.xlu1 %v844_v10, %s1005_s22 }
  0x34   :  { %427 = vrot.lane.b32.xlu0 %v426_v18, %s1006_s18 }
  0x36   :  { %345 = vrot.lane.b32.xlu1 %v845_v19, %s1006_s18 }
  0x38   :  { %438 = vrot.lane.b32.xlu0 %v437_v25, %s1007_s14  ;;  %v865_v25 = vld [vmem:[%s1481_s9] ss:$0 sm:$0xff] }
  0x3a   :  { %352 = vrot.lane.b32.xlu1 %v846_v26, %s1007_s14 }
  0x76   :  { %v81_v28 = vpop.permute.xlu0 %80 }
  0x77   :  { %v214_v51 = vsel %vm211_vm1, %v781_v44, %v81_v28 }
  0x78   :  { %v88_v29 = vpop.permute.xlu1 %87 }
  0x79   :  { %v217_v54 = vsel %vm215_vm3, %v214_v51, %v88_v29 }
  0x7a   :  { %v144_v30 = vpop.permute.xlu0 %143 }
  0x7b   :  { %v235_v41 = vsel %vm211_vm1, %v1316_v57, %v144_v30 }
  0x7c   :  { %v155_v31 = vpop.permute.xlu1 %154 }
  0x7d   :  { %v237_v45 = vsel %vm215_vm3, %v235_v41, %v155_v31 }
  0x7e   :  { %v166_v32 = vpop.permute.xlu0 %165 }
  0x7f   :  { %v239_v47 = vsel %vm218_vm2, %v237_v45, %v166_v32 }
  0x80   :  { %v95_v33 = vpop.permute.xlu1 %94 }
  0x81   :  { %v220_v56 = vsel %vm218_vm2, %v217_v54, %v95_v33 }
  0x82   :  { %v177_v34 = vpop.permute.xlu0 %176 }
  0x83   :  { %v241_v48 = vsel %vm221_vm4, %v239_v47, %v177_v34 }
  0x84   :  { %v102_v35 = vpop.permute.xlu1 %101 }
  0x85   :  { %v223_v58 = vsel %vm221_vm4, %v220_v56, %v102_v35 }
  0x86   :  { %v188_v36 = vpop.permute.xlu0 %187 }
  0x87   :  { %v243_v49 = vsel %vm224_vm5, %v241_v48, %v188_v36 }
  0x88   :  { %v373_v37 = vpop.permute.xlu1 %372 }
  0x89   :  { %v457_v7 = vsel %vm211_vm1, %v1357_v13, %v373_v37 }
  0x8a   :  { %v109_v38 = vpop.permute.xlu0 %108 }
  0x8b   :  { %v226_v59 = vsel %vm224_vm5, %v223_v58, %v109_v38 }
  0x8c   :  { %v199_v39 = vpop.permute.xlu1 %198 }
  0x8d   :  { %v245_v52 = vsel %vm227_vm6, %v243_v49, %v199_v39 }
  0x8e   :  { %v311_v43 = vpop.permute.xlu0 %310 }
  0x8f   :  { %v442_v8 = vsel %vm211_vm1, %v839_v4, %v311_v43 }
  0x90   :  { %v384_v46 = vpop.permute.xlu1 %383 }
  0x91   :  { %v459_v9 = vsel %vm215_vm3, %v457_v7, %v384_v46 }
  0x92   :  { %v116_v50 = vpop.permute.xlu0 %115 }
  0x93   :  { %v229_v60 = vsel %vm227_vm6, %v226_v59, %v116_v50 }
  0x94   :  { %v210_v53 = vpop.permute.xlu1 %209 }
  0x95   :  { %v247_v42 = vsel %vm230_vm7, %v245_v52, %v210_v53 }
  0x96   :  { %673 = vmatprep.mubr.bf16.mxu0 %v247_v42  ;;  %v318_v55 = vpop.permute.xlu0 %317 }
  0x97   :  { %v444_v11 = vsel %vm215_vm3, %v442_v8, %v318_v55 }
  0x98   :  { %v395_v57 = vpop.permute.xlu1 %394 }
  0x99   :  { %v461_v12 = vsel %vm218_vm2, %v459_v9, %v395_v57 }
  0x9a   :  { %v123_v62 = vpop.permute.xlu0 %122 }
  0x9b   :  { %v232_v0 = vsel %vm230_vm7, %v229_v60, %v123_v62 }
  0x9c   :  { %v325_v63 = vpop.permute.xlu1 %324  ;;  %674 = vmatmul.mubr.bf16.vlgmr.msra.gmra.mxu0 %v232_v0 }
  0x9d   :  { %v446_v15 = vsel %vm218_vm2, %v444_v11, %v325_v63 }
  0x9e   :  { %v406_v1 = vpop.permute.xlu0 %405 }
  0x9f   :  { %v463_v16 = vsel %vm221_vm4, %v461_v12, %v406_v1 }
  0xa0   :  { %v332_v3 = vpop.permute.xlu1 %331 }
  0xa1   :  { %v448_v61 = vsel %vm221_vm4, %v446_v15, %v332_v3 }
  0xa2   :  { %v417_v5 = vpop.permute.xlu0 %416 }
  0xa3   :  { %v465_v17 = vsel %vm224_vm5, %v463_v16, %v417_v5 }
  0xa4   :  { %v339_v6 = vpop.permute.xlu1 %338 }
  0xa5   :  { %v450_v13 = vsel %vm224_vm5, %v448_v61, %v339_v6 }
  0xa6   :  { %v428_v10 = vpop.permute.xlu0 %427 }
  0xa7   :  { %v467_v18 = vsel %vm227_vm6, %v465_v17, %v428_v10 }
  0xa8   :  { %v346_v14 = vpop.permute.xlu1 %345 }
  0xa9   :  { %v452_v20 = vsel %vm227_vm6, %v450_v13, %v346_v14 }
  0xaa   :  { %v439_v19 = vpop.permute.xlu0 %438 }
  0xab   :  { %v469_v22 = vsel %vm230_vm7, %v467_v18, %v439_v19 }
  0xac   :  { %v353_v21 = vpop.permute.xlu1 %352  ;;  %681 = vmatprep.mubr.bf16.mxu1 %v469_v22 }
  0xad   :  { %v454_v23 = vsel %vm230_vm7, %v452_v20, %v353_v21 }
  0xae   :  { %682 = vmatmul.mubr.bf16.vlgmr.msra.gmra.mxu1 %v454_v23 }
 0x15c   :  { %v902_v24 = vpop.f32.mrf.mxu0 }
 0x15e   :  { %v903_v26 = vpop.f32.mrf.mxu0 }
 0x15f   :  { %v904_v27 = vadd.f32 %v903_v26, %v902_v24 }
 0x160   :  { %v905_v28 = vpop.f32.mrf.mxu0 }
 0x161   :  { %v676_v29 = vadd.f32 %v904_v27, %v865_v25 }
 0x162   :  { %v906_v30 = vpop.f32.mrf.mxu0 }
 0x163   :  { %690 = vst.msk [vmem:[%s1482_s10] sm:$0xff] %vm215_vm3, %v676_v29  ;;  %v907_v31 = vadd.f32 %v906_v30, %v905_v28  ;;  %v694_v40 = vsel %vm215_vm3, %v676_v29, 0.0 }
 0x165   :  { %v679_v32 = vadd.f32 %v907_v31, %v865_v25 }
 0x167   :  { %691 = vst.msk [vmem:[%s1482_s10 + $0x8] sm:$0xff] %vm215_vm3, %v679_v32  ;;  %v695_v37 = vsel %vm215_vm3, %v679_v32, 0.0 }
 0x168   :  { %v696_v44 = vadd.f32 %v695_v37, %v694_v40 }
 0x16e   :  { %v908_v33 = vpop.f32.mrf.mxu1 }
 0x170   :  { %v909_v34 = vpop.f32.mrf.mxu1 }
 0x171   :  { %v910_v35 = vadd.f32 %v909_v34, %v908_v33 }
 0x172   :  { %v911_v36 = vpop.f32.mrf.mxu1 }
 0x173   :  { %v684_v38 = vadd.f32 %v910_v35, %v865_v25 }
 0x174   :  { %v912_v39 = vpop.f32.mrf.mxu1 }
 0x175   :  { %692 = vst.msk [vmem:[%s1482_s10 + $0x10] sm:$0xff] %vm215_vm3, %v684_v38  ;;  %v697_v41 = vsel %vm215_vm3, %v684_v38, 0.0  ;;  %v913_v43 = vadd.f32 %v912_v39, %v911_v36 }
 0x176   :  { %v698_v46 = vadd.f32 %v697_v41, %v696_v44 }
 0x177   :  { %v687_v45 = vadd.f32 %v913_v43, %v865_v25 }
 0x179   :  { %693 = vst.msk [vmem:[%s1482_s10 + $0x18] sm:$0xff] %vm215_vm3, %v687_v45  ;;  %v699_v47 = vsel %vm215_vm3, %v687_v45, 0.0 }
 0x17a   :  { %v700_v48 = vadd.f32 %v699_v47, %v698_v46 }
 0x17c   :  { %v701_v49 = vrot.slane %v700_v48, 4 }
 0x17e   :  { %v702_v50 = vadd.f32 %v701_v49, %v700_v48 }
 0x180   :  { %v703_v51 = vrot.slane %v702_v50, 2 }
 0x182   :  { %v704_v52 = vadd.f32 %v703_v51, %v702_v50 }
 0x184   :  { %v705_v53 = vrot.slane %v704_v52, 1 }
 0x186   :  { %v706_v42 = vadd.f32 %v705_v53, %v704_v52 }
 0x188   :  { %v707_v54 = vmul.f32 0.03125, %v706_v42 }
 0x18a   :  { %v708_v55 = vsub.f32 %v676_v29, %v707_v54  ;;  %v709_v56 = vsub.f32 %v679_v32, %v707_v54  ;;  %v710_v57 = vsub.f32 %v684_v38, %v707_v54  ;;  %v711_v58 = vsub.f32 %v687_v45, %v707_v54  ;;  %734 = vst.msk [vmem:[%s1483_s11] sm:$0x1] %vm733_vm8, %v707_v54 }
 0x18c   :  { %v712_v59 = vmul.f32 %v708_v55, %v708_v55  ;;  %v713_v60 = vmul.f32 %v709_v56, %v709_v56  ;;  %v714_v62 = vmul.f32 %v710_v57, %v710_v57  ;;  %v715_v63 = vmul.f32 %v711_v58, %v711_v58 }
 0x18e   :  { %v716_v0 = vsel %vm215_vm3, %v712_v59, 0.0  ;;  %v717_v1 = vsel %vm215_vm3, %v713_v60, 0.0  ;;  %v719_v3 = vsel %vm215_vm3, %v714_v62, 0.0  ;;  %v721_v5 = vsel %vm215_vm3, %v715_v63, 0.0 }
 0x18f   :  { %v718_v2 = vadd.f32 %v717_v1, %v716_v0 }
 0x191   :  { %v720_v4 = vadd.f32 %v719_v3, %v718_v2 }
 0x193   :  { %v722_v6 = vadd.f32 %v721_v5, %v720_v4 }
 0x195   :  { %v723_v7 = vrot.slane %v722_v6, 4 }
 0x197   :  { %v724_v8 = vadd.f32 %v723_v7, %v722_v6 }
 0x199   :  { %v725_v9 = vrot.slane %v724_v8, 2 }
 0x19b   :  { %v726_v10 = vadd.f32 %v725_v9, %v724_v8 }
 0x19d   :  { %v727_v11 = vrot.slane %v726_v10, 1 }
 0x19f   :  { %v728_v12 = vadd.f32 %v727_v11, %v726_v10 }
 0x1a1   :  { %735 = vst.msk [vmem:[%s1483_s11 + $0x1] sm:$0x1] %vm733_vm8, %v728_v12 }
 0x1a8   :  { %v769_v14 = vld [vmem:[%s1483_s11 + $0x1] sm:$0x1] }
 0x1a9   :  { %v770_v15 = vmul.f32 0.03125, %v769_v14 }
 0x1ab   :  { %772 = vst.msk [vmem:[%s1483_s11 + $0x1] sm:$0x1] %vm733_vm8, %v770_v15 }

// kernel: mnist_encoder_forward.17
= control target key start
LH: loop header
LB: loop body
LE: loop exit
PB: predicated region body
PF: predicated region fallthrough
CT: control target
= control target key end

     0   :  { %vm33_vm0 = vcmask 519168   ;;  %s73_s0 = inlined_call_operand.vmem [shape: f32[8,64], index: 0, kind: input, shape index: {}]   ;;  %s74_s1 = inlined_call_operand.vmem [shape: f32[1,64], index: 1, kind: input, shape index: {}]   ;;  %s75_s2 = inlined_call_operand.vmem [shape: f32[1,64], index: 2, kind: input, shape index: {}]   ;;  %s76_s3 = inlined_call_operand.vmem [shape: bf16[8,64], index: 3, kind: output, shape index: {}]  }
   0x1   :  { %v14_v0 = vld [vmem:[%s73_s0] sm:$0xff] }
   0x2   :  { %v39_v1 = vld [vmem:[%s74_s1] ss:$0 sm:$0xff] }
   0x3   :  { %v40_v2 = vld [vmem:[%s75_s2] ss:$0 sm:$0xff]  ;;  %v22_v3 = vmul.f32 %v39_v1, %v14_v0 }
   0x5   :  { %v30_v4 = vadd.f32 %v40_v2, %v22_v3 }
   0x7   :  { %v31_v5 = vmax.f32 %v30_v4, 0.0 }
   0x9   :  { %v32_v6 = vpack.c.bf16 %v31_v5, %v31_v5 }
   0xb   :  { %34 = vst.msk [vmem:[%s76_s3] sm:$0xf] %vm33_vm0, %v32_v6 }

// kernel: mnist_encoder_forward.16
= control target key start
LH: loop header
LB: loop body
LE: loop exit
PB: predicated region body
PF: predicated region fallthrough
CT: control target
= control target key end

     0   :  { %s940_s23 = smov 32   ;;  %s941_s28 = smov 64   ;;  %vm128_vm0 = vcmask 261120   ;;  %vm132_vm1 = vcmask 523264   ;;  %vm135_vm2 = vcmask 785408   ;;  %vm696_vm3 = vcmask 516096   ;;  %s1264_s2 = inlined_call_operand.vmem [shape: bf16[2,6,32], index: 2, kind: input, shape index: {}]   ;;  %s1265_s1 = inlined_call_operand.vmem [shape: bf16[2,6,32], index: 1, kind: input, shape index: {}]   ;;  %s1266_s6 = inlined_call_operand.vmem [shape: bf16[2,6,32], index: 6, kind: input, shape index: {}]   ;;  %s1267_s8 = inlined_call_operand.vmem [shape: bf16[512,64], index: 8, kind: input, shape index: {}]   ;;  %s1268_s5 = inlined_call_operand.vmem [shape: bf16[2,6,32], index: 5, kind: input, shape index: {}]   ;;  %s1269_s3 = inlined_call_operand.vmem [shape: bf16[2,6,32], index: 3, kind: input, shape index: {}]   ;;  %s1270_s7 = inlined_call_operand.vmem [shape: bf16[2,6,32], index: 7, kind: input, shape index: {}]   ;;  %s1271_s0 = inlined_call_operand.vmem [shape: bf16[2,6,32], index: 0, kind: input, shape index: {}]   ;;  %s1272_s4 = inlined_call_operand.vmem [shape: bf16[2,6,32], index: 4, kind: input, shape index: {}]   ;;  %s1273_s9 = inlined_call_operand.vmem [shape: f32[1,64], index: 9, kind: input, shape index: {}]   ;;  %s1274_s10 = inlined_call_operand.vmem [shape: f32[8,64], index: 10, kind: output, shape index: {0}]   ;;  %s1275_s11 = inlined_call_operand.vmem [shape: f32[2,64], index: 11, kind: output, shape index: {1}]  }
   0x1   :  { %v876_v0 = vld [vmem:[%s1264_s2 + $0x4] ss:$0 sps:$4 sm:$0x33]   ;;  %v900_v2 = vld [vmem:[%s1267_s8 + $0x78] sm:$0xff]   ;;  %v902_v6 = vld [vmem:[%s1267_s8 + $0x70] sm:$0xff]   ;;  %s942_s19 = smov 96  }
   0x2   :  { %v877_v1 = vld [vmem:[%s1265_s1 + $0x4] ss:$0 sps:$4 sm:$0x33]   ;;  %200 = vrot.lane.b32.xlu0 %v876_v0, %s940_s23  ;;  %v901_v4 = vld [vmem:[%s1267_s8 + $0x38] sm:$0xff]   ;;  %829 = vmatprep.subr.bf16.mxu0 %v900_v2  ;;  %v903_v7 = vld [vmem:[%s1267_s8 + $0x30] sm:$0xff]  }
   0x3   :  { %v878_v3 = vld [vmem:[%s1266_s6 + $0x4] ss:$0 sps:$4 sm:$0x33]   ;;  %205 = vrot.lane.b32.xlu1 %v877_v1, %s941_s28  ;;  %830 = vmatpush3.bf16.msra.mxu0 %v901_v4  ;;  %v880_v8 = vld [vmem:[%s1264_s2] ss:$0 sps:$4 sm:$0x33]  }
   0x4   :  { %v879_v5 = vld [vmem:[%s1268_s5 + $0x4] ss:$0 sps:$4 sm:$0x33]   ;;  %831 = vmatprep.subr.bf16.mxu0 %v902_v6  ;;  %v906_v9 = vld [vmem:[%s1267_s8 + $0x68] sm:$0xff]   ;;  %v910_v20 = vld [vmem:[%s1267_s8 + $0x58] sm:$0xff]  }
   0x5   :  { %v881_v10 = vld [vmem:[%s1266_s6] ss:$0 sps:$4 sm:$0x33]   ;;  %v882_v11 = vld [vmem:[%s1269_s3 + $0x4] ss:$0 sps:$4 sm:$0x33]  }
   0x6   :  { %215 = vrot.lane.b32.xlu0 %v878_v3, %s940_s23  ;;  %v907_v12 = vld [vmem:[%s1267_s8 + $0x28] sm:$0xff]   ;;  %v883_v13 = vld [vmem:[%s1270_s7 + $0x4] ss:$0 sps:$4 sm:$0x33]   ;;  %v911_v23 = vld [vmem:[%s1267_s8 + $0xf8] sm:$0xff]  }
   0x7   :  { %220 = vrot.lane.b32.xlu1 %v879_v5, %s941_s28  ;;  %832 = vmatpush3.bf16.msra.mxu0 %v903_v7  ;;  %v884_v14 = vld [vmem:[%s1264_s2 + $0x4] ss:$0 sps:$4 sm:$0x66]   ;;  %v886_v21 = vld [vmem:[%s1268_s5] ss:$0 sps:$4 sm:$0x33]  }
   0x8   :  { %833 = vmatprep.subr.bf16.mxu0 %v906_v9  ;;  %v885_v15 = vld [vmem:[%s1266_s6 + $0x4] ss:$0 sps:$4 sm:$0x66]   ;;  %v234_v18 = vrot.slane %v884_v14, 1  ;;  %851 = vmatprep.subr.bf16.mxu1 %v911_v23  ;;  %v912_v33 = vld [vmem:[%s1267_s8 + $0x18] sm:$0xff]   ;;  %v914_v39 = vld [vmem:[%s1267_s8 + $0x50] sm:$0xff]  }
   0x9   :  { %v908_v16 = vld [vmem:[%s1267_s8 + $0x60] sm:$0xff]   ;;  %v256_v19 = vrot.slane %v885_v15, 1  ;;  %v913_v36 = vld [vmem:[%s1267_s8 + $0xb8] sm:$0xff]   ;;  %v915_v43 = vld [vmem:[%s1267_s8 + $0xf0] sm:$0xff]  }
   0xa   :  { %57 = vrot.lane.b32.xlu0 %v880_v8, %s940_s23  ;;  %v909_v17 = vld [vmem:[%s1267_s8 + $0x20] sm:$0xff]   ;;  %852 = vmatpush3.bf16.msra.mxu1 %v913_v36  ;;  %v916_v45 = vld [vmem:[%s1267_s8 + $0x10] sm:$0xff]   ;;  %v920_v50 = vld [vmem:[%s1267_s8 + $0x48] sm:$0xff]  }
   0xb   :  { %72 = vrot.lane.b32.xlu1 %v881_v10, %s940_s23  ;;  %834 = vmatpush3.bf16.msra.mxu0 %v907_v12  ;;  %v887_v22 = vld [vmem:[%s1265_s1] ss:$0 sps:$4 sm:$0x33]   ;;  %v889_v24 = vld [vmem:[%s1265_s1 + $0x4] ss:$0 sps:$4 sm:$0x66]  }
   0xc   :  { %835 = vmatprep.subr.bf16.mxu0 %v908_v16  ;;  %v888_v25 = vld [vmem:[%s1268_s5 + $0x4] ss:$0 sps:$4 sm:$0x66]   ;;  %v240_v26 = vrot.slane %v889_v24, 1  ;;  %853 = vmatprep.subr.bf16.mxu1 %v915_v43  ;;  %v917_v47 = vld [vmem:[%s1267_s8 + $0xb0] sm:$0xff]   ;;  %v921_v53 = vld [vmem:[%s1267_s8 + $0xe8] sm:$0xff]  }
   0xd   :  { %v262_v27 = vrot.slane %v888_v25, 1  ;;  %v892_v28 = vld [vmem:[%s1266_s6] ss:$0 sps:$4 sm:$0x66]   ;;  %v922_v54 = vld [vmem:[%s1267_s8 + $0x8] sm:$0xff]   ;;  %v930_v60 = vld [vmem:[%s1267_s8 + $0xd8] sm:$0xff]  }
   0xe   :  { %210 = vrot.lane.b32.xlu0 %v882_v11, %s942_s19  ;;  %v891_v29 = vld [vmem:[%s1269_s3] ss:$0 sps:$4 sm:$0x33]   ;;  %v894_v31 = vld [vmem:[%s1270_s7 + $0x4] ss:$0 sps:$4 sm:$0x66]   ;;  %854 = vmatpush3.bf16.msra.mxu1 %v917_v47 }
   0xf   :  { %225 = vrot.lane.b32.xlu1 %v883_v13, %s942_s19  ;;  %836 = vmatpush3.bf16.msra.mxu0 %v909_v17  ;;  %v893_v30 = vld [vmem:[%s1264_s2] ss:$0 sps:$4 sm:$0x66]   ;;  %v895_v32 = vld [vmem:[%s1269_s3 + $0x4] ss:$0 sps:$4 sm:$0x66]  }
  0x10   :  { %837 = vmatprep.subr.bf16.mxu0 %v910_v20  ;;  %v890_v34 = vld [vmem:[%s1270_s7] ss:$0 sps:$4 sm:$0x33]   ;;  %v113_v38 = vrot.slane %v892_v28, 1  ;;  %v91_v40 = vrot.slane %v893_v30, 1  ;;  %v268_v41 = vrot.slane %v894_v31, 1  ;;  %855 = vmatprep.subr.bf16.mxu1 %v921_v53 }
  0x11   :  { %v896_v35 = vld [vmem:[%s1268_s5] ss:$0 sps:$4 sm:$0x66]   ;;  %v246_v42 = vrot.slane %v895_v32, 1  ;;  %v923_v55 = vld [vmem:[%s1267_s8 + $0xa8] sm:$0xff]   ;;  %v931_v61 = vld [vmem:[%s1267_s8 + $0x98] sm:$0xff]  }
  0x12   :  { %235 = vrot.lane.b32.xlu0 %v234_v18, %s940_s23  ;;  %v897_v37 = vld [vmem:[%s1265_s1] ss:$0 sps:$4 sm:$0x66]   ;;  %v119_v44 = vrot.slane %v896_v35, 1  ;;  %856 = vmatpush3.bf16.msra.mxu1 %v923_v55  ;;  %v932_v62 = vld [vmem:[%s1267_s8 + $0xd0] sm:$0xff]   ;;  %v934_v0 = vld [vmem:[%s1267_s8 + $0xc8] sm:$0xff]  }
  0x13   :  { %257 = vrot.lane.b32.xlu1 %v256_v19, %s940_s23  ;;  %838 = vmatpush3.bf16.msra.mxu0 %v912_v33  ;;  %v97_v46 = vrot.slane %v897_v37, 1  ;;  %v899_v48 = vld [vmem:[%s1269_s3] ss:$0 sps:$4 sm:$0x66]   ;;  %v933_v63 = vld [vmem:[%s1267_s8 + $0x90] sm:$0xff]   ;;  %v935_v1 = vld [vmem:[%s1267_s8 + $0x88] sm:$0xff]  }
  0x14   :  { %839 = vmatprep.subr.bf16.mxu0 %v914_v39  ;;  %v898_v49 = vld [vmem:[%s1270_s7] ss:$0 sps:$4 sm:$0x66]   ;;  %v103_v51 = vrot.slane %v899_v48, 1  ;;  %v760_v8 = vld [vmem:[%s1271_s0 + $0x4] sm:$0x3] }
  0x15   :  { %v125_v52 = vrot.slane %v898_v49, 1  ;;  %v924_v56 = vld [vmem:[%s1267_s8 + $0x40] sm:$0xff]  }
  0x16   :  { %62 = vrot.lane.b32.xlu0 %v887_v22, %s941_s28  ;;  %v925_v57 = vld [vmem:[%s1267_s8 + $0xe0] sm:$0xff]  }
  0x17   :  { %77 = vrot.lane.b32.xlu1 %v886_v21, %s941_s28  ;;  %840 = vmatpush3.bf16.msra.mxu0 %v916_v45  ;;  %v926_v58 = vld [vmem:[%s1267_s8] sm:$0xff]  }
  0x18   :  { %841 = vmatprep.subr.bf16.mxu0 %v920_v50  ;;  %857 = vmatprep.subr.bf16.mxu1 %v925_v57  ;;  %v927_v59 = vld [vmem:[%s1267_s8 + $0xa0] sm:$0xff]  }
  0x19   :  { %858 = vmatpush3.bf16.msra.mxu1 %v927_v59  ;;  %v936_v2 = vld [vmem:[%s1267_s8 + $0xc0] sm:$0xff]  }
  0x1a   :  { %241 = vrot.lane.b32.xlu0 %v240_v26, %s941_s28  ;;  %859 = vmatprep.subr.bf16.mxu1 %v930_v60  ;;  %v937_v3 = vld [vmem:[%s1267_s8 + $0x80] sm:$0xff]  }
  0x1b   :  { %263 = vrot.lane.b32.xlu1 %v262_v27, %s941_s28  ;;  %842 = vmatpush3.bf16.msra.mxu0 %v922_v54  ;;  %v764_v9 = vld [vmem:[%s1272_s4 + $0x4] sm:$0x3]  ;;  %v38_v26 = vld [vmem:[%s1271_s0] sm:$0x3] }
  0x1c   :  { %843 = vmatprep.subr.bf16.mxu0 %v924_v56  ;;  %v42_v28 = vld [vmem:[%s1272_s4] sm:$0x3]  ;;  %v904_v31 = vld [vmem:[%s1271_s0 + $0x4] ss:$0 sps:$4 sm:$0x66]  }
  0x1d   :  { %860 = vmatpush3.bf16.msra.mxu1 %v931_v61  ;;  %v905_v33 = vld [vmem:[%s1272_s4 + $0x4] ss:$0 sps:$4 sm:$0x66]   ;;  %v918_v49 = vld [vmem:[%s1272_s4] ss:$0 sps:$4 sm:$0x66]  }
  0x1e   :  { %67 = vrot.lane.b32.xlu0 %v891_v29, %s942_s19  ;;  %861 = vmatprep.subr.bf16.mxu1 %v932_v62  ;;  %v109_v57 = vrot.slane %v918_v49, 1 }
  0x1f   :  { %82 = vrot.lane.b32.xlu1 %v890_v34, %s942_s19  ;;  %844 = vmatpush3.bf16.msra.mxu0 %v926_v58 }
  0x21   :  { %862 = vmatpush3.bf16.msra.mxu1 %v933_v63 }
  0x22   :  { %92 = vrot.lane.b32.xlu0 %v91_v40, %s940_s23  ;;  %863 = vmatprep.subr.bf16.mxu1 %v934_v0  ;;  %v230_v40 = vrot.slane %v904_v31, 1 }
  0x23   :  { %114 = vrot.lane.b32.xlu1 %v113_v38, %s940_s23 }
  0x25   :  { %864 = vmatpush3.bf16.msra.mxu1 %v935_v1 }
  0x26   :  { %247 = vrot.lane.b32.xlu0 %v246_v42, %s942_s19  ;;  %865 = vmatprep.subr.bf16.mxu1 %v936_v2  ;;  %v252_v42 = vrot.slane %v905_v33, 1 }
  0x27   :  { %269 = vrot.lane.b32.xlu1 %v268_v41, %s942_s19 }
  0x29   :  { %866 = vmatpush3.bf16.msra.mxu1 %v937_v3 }
  0x2a   :  { %98 = vrot.lane.b32.xlu0 %v97_v46, %s941_s28  ;;  %v919_v46 = vld [vmem:[%s1271_s0] ss:$0 sps:$4 sm:$0x66]  }
  0x2b   :  { %120 = vrot.lane.b32.xlu1 %v119_v44, %s941_s28  ;;  %v87_v55 = vrot.slane %v919_v46, 1 }
  0x2e   :  { %104 = vrot.lane.b32.xlu0 %v103_v51, %s942_s19 }
  0x2f   :  { %126 = vrot.lane.b32.xlu1 %v125_v52, %s942_s19 }
  0x74   :  { %v201_v4 = vpop.permute.xlu0 %200 }
  0x75   :  { %v206_v5 = vpop.permute.xlu1 %205  ;;  %v273_v11 = vsel %vm128_vm0, %v760_v8, %v201_v4 }
  0x76   :  { %v275_v14 = vsel %vm132_vm1, %v273_v11, %v206_v5 }
  0x78   :  { %v216_v6 = vpop.permute.xlu0 %215 }
  0x79   :  { %v221_v7 = vpop.permute.xlu1 %220  ;;  %v280_v13 = vsel %vm128_vm0, %v764_v9, %v216_v6 }
  0x7a   :  { %v282_v16 = vsel %vm132_vm1, %v280_v13, %v221_v7 }
  0x7c   :  { %v58_v10 = vpop.permute.xlu0 %57 }
  0x7d   :  { %v73_v12 = vpop.permute.xlu1 %72  ;;  %v131_v30 = vsel %vm128_vm0, %v38_v26, %v58_v10 }
  0x7e   :  { %v140_v32 = vsel %vm128_vm0, %v42_v28, %v73_v12 }
  0x80   :  { %v211_v15 = vpop.permute.xlu0 %210 }
  0x81   :  { %v277_v17 = vsel %vm135_vm2, %v275_v14, %v211_v15  ;;  %v226_v18 = vpop.permute.xlu1 %225 }
  0x82   :  { %v284_v19 = vsel %vm135_vm2, %v282_v16, %v226_v18 }
  0x83   :  { %v790_v20 = vcombine.low %v277_v17, %v284_v19  ;;  %v792_v17 = vld [vmem:[%s1273_s9] ss:$0 sm:$0xff] }
  0x84   :  { %v236_v21 = vpop.permute.xlu0 %235 }
  0x85   :  { %v309_v22 = vrot.slane %v790_v20, 6  ;;  %v258_v23 = vpop.permute.xlu1 %257  ;;  %v287_v45 = vsel %vm128_vm0, %v230_v40, %v236_v21 }
  0x86   :  { %v294_v47 = vsel %vm128_vm0, %v252_v42, %v258_v23 }
  0x87   :  { %313 = vst [vmem:[#allocation2] sm:$0xcc] %v309_v22 }
  0x88   :  { %v63_v24 = vpop.permute.xlu0 %62 }
  0x89   :  { %v78_v25 = vpop.permute.xlu1 %77  ;;  %v134_v34 = vsel %vm132_vm1, %v131_v30, %v63_v24 }
  0x8a   :  { %v142_v36 = vsel %vm132_vm1, %v140_v32, %v78_v25 }
  0x8c   :  { %v242_v27 = vpop.permute.xlu0 %241 }
  0x8d   :  { %v264_v29 = vpop.permute.xlu1 %263  ;;  %v289_v48 = vsel %vm132_vm1, %v287_v45, %v242_v27 }
  0x8e   :  { %v296_v51 = vsel %vm132_vm1, %v294_v47, %v264_v29 }
  0x90   :  { %v68_v35 = vpop.permute.xlu0 %67 }
  0x91   :  { %v83_v37 = vpop.permute.xlu1 %82  ;;  %v137_v38 = vsel %vm135_vm2, %v134_v34, %v68_v35 }
  0x92   :  { %v144_v39 = vsel %vm135_vm2, %v142_v36, %v83_v37 }
  0x93   :  { %v758_v41 = vcombine.low %v137_v38, %v144_v39 }
  0x94   :  { %v93_v43 = vpop.permute.xlu0 %92 }
  0x95   :  { %171 = vst [vmem:[#allocation2] sm:$0x33] %v758_v41  ;;  %v115_v44 = vpop.permute.xlu1 %114  ;;  %v147_v0 = vsel %vm128_vm0, %v87_v55, %v93_v43 }
  0x96   :  { %v154_v1 = vsel %vm128_vm0, %v109_v57, %v115_v44 }
  0x98   :  { %v248_v50 = vpop.permute.xlu0 %247 }
  0x99   :  { %v270_v52 = vpop.permute.xlu1 %269  ;;  %v291_v53 = vsel %vm135_vm2, %v289_v48, %v248_v50 }
  0x9a   :  { %v298_v54 = vsel %vm135_vm2, %v296_v51, %v270_v52 }
  0x9b   :  { %v791_v56 = vcombine.low %v291_v53, %v298_v54 }
  0x9c   :  { %v99_v58 = vpop.permute.xlu0 %98  ;;  %v315_v59 = vld [vmem:[#allocation2] sm:$0xff] }
  0x9d   :  { %v310_v60 = vrot.slane %v791_v56, 6  ;;  %v121_v61 = vpop.permute.xlu1 %120  ;;  %v793_v62 = vcombine.low %v315_v59, %v315_v59  ;;  %v794_v63 = vcombine.high %v315_v59, %v315_v59  ;;  %v149_v2 = vsel %vm132_vm1, %v147_v0, %v99_v58 }
  0x9e   :  { %v156_v4 = vsel %vm132_vm1, %v154_v1, %v121_v61 }
  0x9f   :  { %314 = vst [vmem:[#allocation2 + $0x8] sm:$0xcc] %v310_v60  ;;  %626 = vmatprep.mubr.bf16.mxu0 %v794_v63 }
  0xa0   :  { %627 = vmatmul.mubr.bf16.vlgmr.msra.gmra.mxu0 %v793_v62  ;;  %v105_v3 = vpop.permute.xlu0 %104 }
  0xa1   :  { %v127_v5 = vpop.permute.xlu1 %126  ;;  %v151_v6 = vsel %vm135_vm2, %v149_v2, %v105_v3 }
  0xa2   :  { %v158_v7 = vsel %vm135_vm2, %v156_v4, %v127_v5 }
  0xa3   :  { %v759_v8 = vcombine.low %v151_v6, %v158_v7 }
  0xa5   :  { %172 = vst [vmem:[#allocation2 + $0x8] sm:$0x33] %v759_v8 }
  0xac   :  { %v316_v9 = vld [vmem:[#allocation2 + $0x8] sm:$0xff] }
  0xad   :  { %v795_v10 = vcombine.low %v316_v9, %v316_v9  ;;  %v796_v11 = vcombine.high %v316_v9, %v316_v9 }
  0xaf   :  { %666 = vmatprep.mubr.bf16.mxu1 %v796_v11 }
  0xb0   :  { %667 = vmatmul.mubr.bf16.vlgmr.msra.gmra.mxu1 %v795_v10 }
 0x160   :  { %v845_v12 = vpop.f32.mrf.mxu0 }
 0x162   :  { %v846_v13 = vpop.f32.mrf.mxu0 }
 0x163   :  { %v847_v16 = vadd.f32 %v846_v13, %v845_v12 }
 0x164   :  { %v848_v14 = vpop.f32.mrf.mxu0 }
 0x165   :  { %v629_v20 = vadd.f32 %v847_v16, %v792_v17 }
 0x166   :  { %v849_v15 = vpop.f32.mrf.mxu0 }
 0x170   :  { %v867_v18 = vpop.f32.mrf.mxu1 }
 0x172   :  { %v868_v19 = vpop.f32.mrf.mxu1 }
 0x173   :  { %v869_v21 = vadd.f32 %v868_v19, %v867_v18 }
 0x174   :  { %v870_v22 = vpop.f32.mrf.mxu1 }
 0x175   :  { %v669_v23 = vadd.f32 %v869_v21, %v629_v20 }
 0x176   :  { %v871_v24 = vpop.f32.mrf.mxu1 }
 0x177   :  { %674 = vst.msk [vmem:[%s1274_s10] sm:$0xff] %vm132_vm1, %v669_v23  ;;  %v675_v25 = vsel %vm132_vm1, %v669_v23, 0.0 }
 0x178   :  { %v676_v26 = vrot.slane %v675_v25, 4 }
 0x17a   :  { %v677_v27 = vadd.f32 %v676_v26, %v675_v25 }
 0x17c   :  { %v678_v28 = vrot.slane %v677_v27, 2 }
 0x17e   :  { %v679_v29 = vadd.f32 %v678_v28, %v677_v27 }
 0x180   :  { %v680_v30 = vrot.slane %v679_v29, 1 }
 0x182   :  { %v681_v31 = vadd.f32 %v680_v30, %v679_v29 }
 0x184   :  { %v682_v32 = vmul.f32 0.125, %v681_v31 }
 0x186   :  { %v683_v33 = vsub.f32 %v669_v23, %v682_v32  ;;  %697 = vst.msk [vmem:[%s1275_s11] sm:$0x1] %vm696_vm3, %v682_v32 }
 0x188   :  { %v684_v34 = vmul.f32 %v683_v33, %v683_v33 }
 0x18a   :  { %v685_v35 = vsel %vm132_vm1, %v684_v34, 0.0 }
 0x18b   :  { %v686_v36 = vrot.slane %v685_v35, 4 }
 0x18d   :  { %v687_v37 = vadd.f32 %v686_v36, %v685_v35 }
 0x18f   :  { %v688_v38 = vrot.slane %v687_v37, 2 }
 0x191   :  { %v689_v39 = vadd.f32 %v688_v38, %v687_v37 }
 0x193   :  { %v690_v40 = vrot.slane %v689_v39, 1 }
 0x195   :  { %v691_v41 = vadd.f32 %v690_v40, %v689_v39 }
 0x197   :  { %698 = vst.msk [vmem:[%s1275_s11 + $0x1] sm:$0x1] %vm696_vm3, %v691_v41 }
 0x19e   :  { %v732_v42 = vld [vmem:[%s1275_s11 + $0x1] sm:$0x1] }
 0x19f   :  { %v733_v43 = vmul.f32 0.125, %v732_v42 }
 0x1a1   :  { %735 = vst.msk [vmem:[%s1275_s11 + $0x1] sm:$0x1] %vm696_vm3, %v733_v43 }

// kernel: mnist_encoder_forward.19
= control target key start
LH: loop header
LB: loop body
LE: loop exit
PB: predicated region body
PF: predicated region fallthrough
CT: control target
= control target key end

     0   :  { %v206_v0 = vmov 0.0   ;;  %vm207_vm0 = vmmov 0   ;;  %s277_s3 = inlined_call_operand.vmem [shape: bf16[128,128], index: 3, kind: input, shape index: {}]   ;;  %s278_s0 = inlined_call_operand.vmem [shape: f32[2,128], index: 0, kind: input, shape index: {}]   ;;  %s279_s1 = inlined_call_operand.vmem [shape: f32[1,128], index: 1, kind: input, shape index: {}]   ;;  %s280_s2 = inlined_call_operand.vmem [shape: f32[1,128], index: 2, kind: input, shape index: {}]   ;;  %s281_s4 = inlined_call_operand.vmem [shape: f32[1,128], index: 4, kind: input, shape index: {}]   ;;  %s282_s5 = inlined_call_operand.vmem [shape: f32[2,128], index: 5, kind: output, shape index: {}]  }
   0x1   :  { %176 = vmatprep.subr.bf16.mxu0 %v206_v0  ;;  %v198_v1 = vld [vmem:[%s277_s3 + $0x38] sm:$0xff]   ;;  %192 = vmatprep.mubr.msk.bf16.mxu0 %vm207_vm0, %v206_v0  ;;  %v199_v2 = vld [vmem:[%s277_s3 + $0x30] sm:$0xff]   ;;  %v200_v3 = vld [vmem:[%s277_s3 + $0x28] sm:$0xff]  }
   0x2   :  { %177 = vmatpush3.bf16.msra.mxu0 %v198_v1  ;;  %v201_v4 = vld [vmem:[%s277_s3 + $0x20] sm:$0xff]   ;;  %v202_v5 = vld [vmem:[%s277_s3 + $0x18] sm:$0xff]   ;;  %v203_v9 = vld [vmem:[%s277_s3 + $0x10] sm:$0xff]  }
   0x3   :  { %178 = vmatprep.subr.bf16.mxu0 %v206_v0  ;;  %v21_v6 = vld [vmem:[%s278_s0] sm:$0x3]  ;;  %v204_v12 = vld [vmem:[%s277_s3 + $0x8] sm:$0xff]  }
   0x4   :  { %v156_v7 = vld [vmem:[%s279_s1] ss:$0 sm:$0xff] }
   0x5   :  { %v29_v8 = vmul.f32 %v156_v7, %v21_v6  ;;  %v157_v10 = vld [vmem:[%s280_s2] ss:$0 sm:$0xff] }
   0x6   :  { %179 = vmatpush3.bf16.msra.mxu0 %v199_v2  ;;  %v205_v14 = vld [vmem:[%s277_s3] sm:$0xff]  }
   0x7   :  { %180 = vmatprep.subr.bf16.mxu0 %v206_v0  ;;  %v37_v11 = vadd.f32 %v157_v10, %v29_v8  ;;  %v158_v16 = vld [vmem:[%s281_s4] ss:$0 sm:$0xff] }
   0x9   :  { %v38_v13 = vmax.f32 %v37_v11, 0.0 }
   0xa   :  { %181 = vmatpush3.bf16.msra.mxu0 %v200_v3 }
   0xb   :  { %182 = vmatprep.subr.bf16.mxu0 %v206_v0  ;;  %v39_v15 = vpack.c.bf16 %v38_v13, %v38_v13 }
   0xe   :  { %183 = vmatpush3.bf16.msra.mxu0 %v201_v4 }
   0xf   :  { %184 = vmatprep.subr.bf16.mxu0 %v206_v0 }
  0x12   :  { %185 = vmatpush3.bf16.msra.mxu0 %v202_v5 }
  0x13   :  { %186 = vmatprep.subr.bf16.mxu0 %v206_v0 }
  0x16   :  { %187 = vmatpush3.bf16.msra.mxu0 %v203_v9 }
  0x17   :  { %188 = vmatprep.subr.bf16.mxu0 %v206_v0 }
  0x1a   :  { %189 = vmatpush3.bf16.msra.mxu0 %v204_v12 }
  0x1b   :  { %190 = vmatprep.subr.bf16.mxu0 %v206_v0 }
  0x1e   :  { %191 = vmatpush3.bf16.msra.mxu0 %v205_v14 }
  0x21   :  { %193 = vmatmul.mubr.bf16.vlgmr.msra.gmra.mxu0 %v39_v15 }
  0xe1   :  { %v145_v17 = vpop.f32.mrf.mxu0 }
  0xe2   :  { %v146_v18 = vadd.f32 %v158_v16, %v145_v17 }
  0xe3   :  { %v194_v19 = vpop.f32.mrf.mxu0 }
  0xe4   :  { %151 = vst [vmem:[%s282_s5] sm:$0x3] %v146_v18 }
  0xe5   :  { %v148_v20 = vpop.f32.mrf.mxu0 }
  0xe7   :  { %v195_v21 = vpop.f32.mrf.mxu0 }

// kernel: mnist_encoder_forward.18
= control target key start
LH: loop header
LB: loop body
LE: loop exit
PB: predicated region body
PF: predicated region fallthrough
CT: control target
= control target key end

     0   :  { %v57_v0 = vlaneseq  ;;  %v1651_v1 = vmov 1966171168   ;;  %s1652_s25 = smov 64   ;;  %vm289_vm0 = vcmask 1040384   ;;  %vm290_vm1 = vsmask.f32 256  ;;  %s2218_s6 = inlined_call_operand.vmem [shape: bf16[2,2,64], index: 6, kind: input, shape index: {}]   ;;  %s2219_s2 = inlined_call_operand.vmem [shape: bf16[2,2,64], index: 2, kind: input, shape index: {}]   ;;  %s2220_s7 = inlined_call_operand.vmem [shape: bf16[2,2,64], index: 7, kind: input, shape index: {}]   ;;  %s2221_s3 = inlined_call_operand.vmem [shape: bf16[2,2,64], index: 3, kind: input, shape index: {}]   ;;  %s2222_s8 = inlined_call_operand.vmem [shape: bf16[1024,128], index: 8, kind: input, shape index: {}]   ;;  %s2223_s4 = inlined_call_operand.vmem [shape: bf16[2,2,64], index: 4, kind: input, shape index: {}]   ;;  %s2224_s5 = inlined_call_operand.vmem [shape: bf16[2,2,64], index: 5, kind: input, shape index: {}]   ;;  %s2225_s1 = inlined_call_operand.vmem [shape: bf16[2,2,64], index: 1, kind: input, shape index: {}]   ;;  %s2226_s0 = inlined_call_operand.vmem [shape: bf16[2,2,64], index: 0, kind: input, shape index: {}]   ;;  %s2227_s9 = inlined_call_operand.vmem [shape: f32[1,128], index: 9, kind: input, shape index: {}]   ;;  %s2228_s10 = inlined_call_operand.vmem [shape: f32[2,128], index: 10, kind: output, shape index: {0}]   ;;  %s2229_s11 = inlined_call_operand.vmem [shape: f32[2,128], index: 11, kind: output, shape index: {1}]  }
   0x1   :  { %v55_v2 = vunpack.c.l.s4 %v1651_v1  ;;  %v1418_v4 = vld.sshfl [vmem:[%s2218_s6] sm:$0x1 pattern:$0x75316420]  ;;  %v1587_v14 = vld [vmem:[%s2222_s8 + $0x78] sm:$0xff]   ;;  %v1591_v28 = vld [vmem:[%s2222_s8 + $0x70] sm:$0xff]  }
   0x2   :  { %v58_v3 = vshrl.u32 %v57_v0, 7  ;;  %v1416_v6 = vld.sshfl [vmem:[%s2219_s2] sm:$0x1 pattern:$0x75316420]  ;;  %1497 = vmatprep.subr.bf16.mxu0 %v1587_v14  ;;  %v1588_v15 = vld [vmem:[%s2222_s8 + $0x38] sm:$0xff]   ;;  %vm1899_vm5 = vmand %vm289_vm0, %vm290_vm1 }
   0x3   :  { %v56_v5 = vunpack.c.0.s8 %v55_v2  ;;  %v1419_v8 = vld.sshfl [vmem:[%s2220_s7] sm:$0x1 pattern:$0x75316420]  ;;  %1498 = vmatpush3.bf16.msra.mxu0 %v1588_v15  ;;  %v1589_v18 = vld [vmem:[%s2222_s8 + $0xf8] sm:$0xff]   ;;  %v1592_v31 = vld [vmem:[%s2222_s8 + $0x30] sm:$0xff]  }
   0x4   :  { %v1417_v9 = vld.sshfl [vmem:[%s2221_s3] sm:$0x1 pattern:$0x75316420]  ;;  %1519 = vmatprep.subr.bf16.mxu1 %v1589_v18  ;;  %v1590_v27 = vld [vmem:[%s2222_s8 + $0xb8] sm:$0xff]   ;;  %1499 = vmatprep.subr.bf16.mxu0 %v1591_v28  ;;  %v1593_v32 = vld [vmem:[%s2222_s8 + $0xf0] sm:$0xff]  }
   0x5   :  { %v1719_v7 = vsub.s32 %v56_v5, %v58_v3  ;;  %v1428_v20 = vld.sshfl [vmem:[%s2219_s2 + $0x1] sm:$0x1 pattern:$0x75316420]  ;;  %1520 = vmatpush3.bf16.msra.mxu1 %v1590_v27  ;;  %v1594_v35 = vld [vmem:[%s2222_s8 + $0xb0] sm:$0xff]   ;;  %v1595_v36 = vld [vmem:[%s2222_s8 + $0x68] sm:$0xff]  }
   0x6   :  { %v1429_v22 = vld.sshfl [vmem:[%s2221_s3 + $0x1] sm:$0x1 pattern:$0x75316420]  ;;  %1521 = vmatprep.subr.bf16.mxu1 %v1593_v32  ;;  %v1596_v37 = vld [vmem:[%s2222_s8 + $0x28] sm:$0xff]   ;;  %v1603_v46 = vld [vmem:[%s2222_s8 + $0x58] sm:$0xff]  }
   0x7   :  { %v94_v10 = vrot.slane %v1418_v4, %v1719_v7  ;;  %v60_v11 = vrot.slane %v1416_v6, %v1719_v7  ;;  %v111_v12 = vrot.slane %v1419_v8, %v1719_v7  ;;  %v77_v13 = vrot.slane %v1417_v9, %v1719_v7  ;;  %v1430_v23 = vld.sshfl [vmem:[%s2218_s6 + $0x1] sm:$0x1 pattern:$0x75316420]  ;;  %1500 = vmatpush3.bf16.msra.mxu0 %v1592_v31  ;;  %v1597_v40 = vld [vmem:[%s2222_s8 + $0xe8] sm:$0xff]   ;;  %v1604_v47 = vld [vmem:[%s2222_s8 + $0x18] sm:$0xff]  }
   0x8   :  { %v1431_v24 = vld.sshfl [vmem:[%s2220_s7 + $0x1] sm:$0x1 pattern:$0x75316420]  ;;  %v370_v25 = vrot.slane %v1429_v22, %v1719_v7  ;;  %v353_v26 = vrot.slane %v1428_v20, %v1719_v7  ;;  %v387_v30 = vrot.slane %v1430_v23, %v1719_v7  ;;  %1501 = vmatprep.subr.bf16.mxu0 %v1595_v36  ;;  %v1598_v41 = vld [vmem:[%s2222_s8 + $0xa8] sm:$0xff]   ;;  %v1605_v48 = vld [vmem:[%s2222_s8 + $0xd8] sm:$0xff]  }
   0x9   :  { %95 = vrot.lane.b32.xlu1 %v94_v10, %s1652_s25  ;;  %61 = vrot.lane.b32.xlu0 %v60_v11, %s1652_s25  ;;  %v133_v16 = vshrl.u32 %v60_v11, 16  ;;  %v156_v17 = vshrl.u32 %v77_v13, 16  ;;  %v179_v19 = vshrl.u32 %v94_v10, 16  ;;  %v202_v21 = vshrl.u32 %v111_v12, 16  ;;  %v1599_v42 = vld [vmem:[%s2222_s8 + $0x60] sm:$0xff]   ;;  %v1606_v49 = vld [vmem:[%s2222_s8 + $0x98] sm:$0xff]  }
   0xa   :  { %v404_v29 = vrot.slane %v1431_v24, %v1719_v7  ;;  %v449_v33 = vshrl.u32 %v370_v25, 16  ;;  %v426_v34 = vshrl.u32 %v353_v26, 16  ;;  %1522 = vmatpush3.bf16.msra.mxu1 %v1594_v35  ;;  %v472_v39 = vshrl.u32 %v387_v30, 16  ;;  %v1600_v43 = vld [vmem:[%s2222_s8 + $0x20] sm:$0xff]   ;;  %v1607_v50 = vld [vmem:[%s2222_s8 + $0x50] sm:$0xff]   ;;  %v1611_v54 = vld [vmem:[%s2222_s8 + $0x48] sm:$0xff]  }
   0xb   :  { %1502 = vmatpush3.bf16.msra.mxu0 %v1596_v37  ;;  %1523 = vmatprep.subr.bf16.mxu1 %v1597_v40  ;;  %v1601_v44 = vld [vmem:[%s2222_s8 + $0xe0] sm:$0xff]   ;;  %v1608_v51 = vld [vmem:[%s2222_s8 + $0x10] sm:$0xff]   ;;  %v1612_v55 = vld [vmem:[%s2222_s8 + $0x8] sm:$0xff]   ;;  %vm292_vm2 = vcmask 1041409   ;;  %vm293_vm3 = vsmask.f32 1280 }
   0xc   :  { %v495_v38 = vshrl.u32 %v404_v29, 16  ;;  %1503 = vmatprep.subr.bf16.mxu0 %v1599_v42  ;;  %v1602_v45 = vld [vmem:[%s2222_s8 + $0xa0] sm:$0xff]   ;;  %v1609_v52 = vld [vmem:[%s2222_s8 + $0xd0] sm:$0xff]   ;;  %v1613_v56 = vld [vmem:[%s2222_s8 + $0xc8] sm:$0xff]   ;;  %vm584_vm4 = vsmask.f32 7938 }
   0xd   :  { %112 = vrot.lane.b32.xlu1 %v111_v12, %s1652_s25  ;;  %78 = vrot.lane.b32.xlu0 %v77_v13, %s1652_s25  ;;  %v1610_v53 = vld [vmem:[%s2222_s8 + $0x90] sm:$0xff]   ;;  %v1614_v57 = vld [vmem:[%s2222_s8 + $0x88] sm:$0xff]   ;;  %vm586_vm6 = vsmask.f32 7942  ;;  %vm1906_vm7 = vmand %vm292_vm2, %vm293_vm3  ;;  %vm296_vm8 = vcmask 1042434   ;;  %vm300_vm15 = vcmask 1043459  }
   0xe   :  { %1524 = vmatpush3.bf16.msra.mxu1 %v1598_v41  ;;  %v1615_v58 = vld [vmem:[%s2222_s8 + $0x40] sm:$0xff]   ;;  %v1619_v62 = vld [vmem:[%s2222_s8 + $0x178] sm:$0xff]   ;;  %vm297_vm9 = vsmask.f32 2304  ;;  %vm1925_vm10 = vmand %vm289_vm0, %vm584_vm4  ;;  %vm589_vm13 = vsmask.f32 7946 }
   0xf   :  { %1504 = vmatpush3.bf16.msra.mxu0 %v1600_v43  ;;  %1525 = vmatprep.subr.bf16.mxu1 %v1601_v44  ;;  %v1616_v59 = vld [vmem:[%s2222_s8] sm:$0xff]   ;;  %v1621_v63 = vld [vmem:[%s2222_s8 + $0x1f8] sm:$0xff]   ;;  %vm1933_vm11 = vmand %vm292_vm2, %vm586_vm6  ;;  %vm301_vm0 = vsmask.f32 3328  ;;  %vm206_vm3 = vcmask 523264   ;;  %vm304_vm6 = vcmask 1044484  }
  0x10   :  { %1505 = vmatprep.subr.bf16.mxu0 %v1603_v46  ;;  %v1617_v60 = vld [vmem:[%s2222_s8 + $0xc0] sm:$0xff]   ;;  %vm295_vm12 = vmor %vm1906_vm7, %vm1899_vm5 }
  0x11   :  { %158 = vrot.lane.b32.xlu1 %v156_v17, %s1652_s25  ;;  %135 = vrot.lane.b32.xlu0 %v133_v16, %s1652_s25  ;;  %v1618_v61 = vld [vmem:[%s2222_s8 + $0x80] sm:$0xff]   ;;  %vm1945_vm14 = vmand %vm296_vm8, %vm297_vm9  ;;  %vm592_vm9 = vsmask.f32 7950 }
  0x12   :  { %1526 = vmatpush3.bf16.msra.mxu1 %v1602_v45  ;;  %v1876_v4 = vld [vmem:[%s2223_s4] sm:$0x1]  ;;  %v1918_v20 = vld [vmem:[%s2226_s0 + $0x1] sm:$0x1]  ;;  %vm590_vm2 = vmand %vm296_vm8, %vm589_vm13  ;;  %vm305_vm8 = vsmask.f32 4352 }
  0x13   :  { %1506 = vmatpush3.bf16.msra.mxu0 %v1604_v47  ;;  %1527 = vmatprep.subr.bf16.mxu1 %v1605_v48  ;;  %v44_v5 = vld [vmem:[%s2224_s5] sm:$0x1]  ;;  %v167_v8 = vrot.slane %v1876_v4, %v1719_v7  ;;  %v414_v22 = vrot.slane %v1918_v20, %v1719_v7  ;;  %vm1969_vm4 = vmor %vm1945_vm14, %vm295_vm12  ;;  %vm308_vm14 = vcmask 1045509  }
  0x14   :  { %1507 = vmatprep.subr.bf16.mxu0 %v1607_v50  ;;  %v1884_v6 = vld [vmem:[%s2225_s1] sm:$0x1]  ;;  %v190_v9 = vrot.slane %v44_v5, %v1719_v7  ;;  %vm1976_vm1 = vmand %vm300_vm15, %vm301_vm0 }
  0x15   :  { %204 = vrot.lane.b32.xlu1 %v202_v21, %s1652_s25  ;;  %181 = vrot.lane.b32.xlu0 %v179_v19, %s1652_s25  ;;  %v1892_v10 = vld [vmem:[%s2226_s0] sm:$0x1]  ;;  %v144_v12 = vrot.slane %v1884_v6, %v1719_v7  ;;  %v174_v17 = vrot.slane %v167_v8, %v1719_v7  ;;  %v1913_v19 = vld [vmem:[%s2225_s1 + $0x1] sm:$0x1]  ;;  %v421_v37 = vrot.slane %v414_v22, %v1719_v7  ;;  %vm2244_vm5 = vmor %vm1933_vm11, %vm1925_vm10  ;;  %vm595_vm10 = vsmask.f32 7954 }
  0x16   :  { %1528 = vmatpush3.bf16.msra.mxu1 %v1606_v49  ;;  %v121_v11 = vrot.slane %v1892_v10, %v1719_v7  ;;  %v197_v16 = vrot.slane %v190_v9, %v1719_v7  ;;  %v437_v21 = vrot.slane %v1913_v19, %v1719_v7  ;;  %vm1990_vm7 = vmor %vm590_vm2, %vm2244_vm5  ;;  %v1650_v23 = vld [vmem:[%s2222_s8 + $0x180] sm:$0xff]  }
  0x17   :  { %1508 = vmatpush3.bf16.msra.mxu0 %v1608_v51  ;;  %1529 = vmatprep.subr.bf16.mxu1 %v1609_v52  ;;  %v151_v24 = vrot.slane %v144_v12, %v1719_v7  ;;  %v176_v31 = vshrl.u32 %v174_v17, 16  ;;  %v423_v49 = vshrl.u32 %v421_v37, 16  ;;  %vm2001_vm12 = vmand %vm300_vm15, %vm592_vm9  ;;  %vm309_vm15 = vsmask.f32 5376 }
  0x18   :  { %1509 = vmatprep.subr.bf16.mxu0 %v1611_v54  ;;  %v444_v36 = vrot.slane %v437_v21, %v1719_v7  ;;  %vm303_vm11 = vmor %vm1976_vm1, %vm1969_vm4  ;;  %vm313_vm1 = vsmask.f32 6400 }
  0x19   :  { %371 = vrot.lane.b32.xlu1 %v370_v25, %s1652_s25  ;;  %354 = vrot.lane.b32.xlu0 %v353_v26, %s1652_s25  ;;  %v128_v25 = vrot.slane %v121_v11, %v1719_v7  ;;  %vm306_vm13 = vmand %vm304_vm6, %vm305_vm8  ;;  %vm598_vm8 = vsmask.f32 7958 }
  0x1a   :  { %1530 = vmatpush3.bf16.msra.mxu1 %v1610_v53  ;;  %v446_v48 = vshrl.u32 %v444_v36, 16  ;;  %vm594_vm0 = vmor %vm2001_vm12, %vm1990_vm7  ;;  %vm601_vm7 = vsmask.f32 7962 }
  0x1b   :  { %1510 = vmatpush3.bf16.msra.mxu0 %v1612_v55  ;;  %1531 = vmatprep.subr.bf16.mxu1 %v1613_v56  ;;  %vm596_vm2 = vmand %vm304_vm6, %vm595_vm10  ;;  %vm312_vm6 = vcmask 1046534  }
  0x1c   :  { %1511 = vmatprep.subr.bf16.mxu0 %v1615_v58  ;;  %vm2034_vm9 = vmor %vm306_vm13, %vm303_vm11  ;;  %vm316_vm13 = vcmask 1047559  }
  0x1d   :  { %405 = vrot.lane.b32.xlu1 %v404_v29, %s1652_s25  ;;  %388 = vrot.lane.b32.xlu0 %v387_v30, %s1652_s25  ;;  %v1426_v29 = vld [vmem:[%s2224_s5 + $0x1] sm:$0x1]  ;;  %v199_v30 = vshrl.u32 %v197_v16, 16  ;;  %vm2043_vm5 = vmand %vm308_vm14, %vm309_vm15 }
  0x1e   :  { %1532 = vmatpush3.bf16.msra.mxu1 %v1614_v57  ;;  %vm2055_vm4 = vmor %vm596_vm2, %vm594_vm0  ;;  %vm604_vm2 = vsmask.f32 7966  ;;  %v1623_v57 = vld [vmem:[%s2222_s8 + $0x170] sm:$0xff]  }
  0x1f   :  { %1512 = vmatpush3.bf16.msra.mxu0 %v1616_v59  ;;  %1533 = vmatprep.subr.bf16.mxu1 %v1617_v60  ;;  %vm2061_vm10 = vmand %vm308_vm14, %vm598_vm8  ;;  %vm317_vm14 = vsmask.f32 7424 }
  0x20   :  { %1541 = vmatprep.subr.bf16.mxu0 %v1619_v62  ;;  %vm311_vm11 = vmor %vm2043_vm5, %vm2034_vm9 }
  0x21   :  { %451 = vrot.lane.b32.xlu1 %v449_v33, %s1652_s25  ;;  %428 = vrot.lane.b32.xlu0 %v426_v34, %s1652_s25  ;;  %v483_v33 = vrot.slane %v1426_v29, %v1719_v7  ;;  %v1424_v34 = vld [vmem:[%s2223_s4 + $0x1] sm:$0x1]  ;;  %vm314_vm12 = vmand %vm312_vm6, %vm313_vm1 }
  0x22   :  { %1534 = vmatpush3.bf16.msra.mxu1 %v1618_v61  ;;  %v460_v35 = vrot.slane %v1424_v34, %v1719_v7  ;;  %vm600_vm15 = vmor %vm2061_vm10, %vm2055_vm4  ;;  %vm1349_vm4 = vcmask 1041408  }
  0x23   :  { %1563 = vmatprep.subr.bf16.mxu1 %v1621_v63  ;;  %v490_v46 = vrot.slane %v483_v33, %v1719_v7  ;;  %vm602_vm0 = vmand %vm312_vm6, %vm601_vm7 }
  0x24   :  { %v467_v50 = vrot.slane %v460_v35, %v1719_v7  ;;  %vm318_vm8 = vmand %vm316_vm13, %vm317_vm14 }
  0x25   :  { %497 = vrot.lane.b32.xlu1 %v495_v38, %s1652_s25  ;;  %474 = vrot.lane.b32.xlu0 %v472_v39, %s1652_s25  ;;  %v153_v38 = vshrl.u32 %v151_v24, 16  ;;  %v130_v39 = vshrl.u32 %v128_v25, 16  ;;  %v492_v8 = vshrl.u32 %v490_v46, 16  ;;  %vm603_vm6 = vmor %vm602_vm0, %vm600_vm15 }
  0x26   :  { %v469_v9 = vshrl.u32 %v467_v50, 16  ;;  %vm605_vm1 = vmand %vm316_vm13, %vm604_vm2 }
  0x27   :  { %vm606_vm5 = vmor %vm605_vm1, %vm603_vm6 }
  0x7b   :  { %v1865_v0 = vpop.permute.xlu1 %95  ;;  %v1867_v1 = vpop.permute.xlu0 %61 }
  0x7c   :  { %v215_v58 = vsel %vm206_vm3, %v1876_v4, %v1865_v0  ;;  %v209_v62 = vsel %vm206_vm3, %v1892_v10, %v1867_v1  ;;  %v1636_v10 = vld [vmem:[%s2222_s8 + $0x118] sm:$0xff]  }
  0x7f   :  { %v1869_v2 = vpop.permute.xlu1 %112  ;;  %v1871_v3 = vpop.permute.xlu0 %78 }
  0x80   :  { %v218_v47 = vsel %vm206_vm3, %v44_v5, %v1869_v2  ;;  %v212_v52 = vsel %vm206_vm3, %v1884_v6, %v1871_v3 }
  0x81   :  { %v240_v63 = vcombine.low %v215_v58, %v218_v47  ;;  %v239_v0 = vcombine.low %v209_v62, %v212_v52  ;;  %v1620_v52 = vld [vmem:[%s2222_s8 + $0x138] sm:$0xff]   ;;  %v1627_v62 = vld [vmem:[%s2222_s8 + $0x168] sm:$0xff]  }
  0x83   :  { %v159_v13 = vpop.permute.xlu1 %158  ;;  %v136_v14 = vpop.permute.xlu0 %135  ;;  %v256_v16 = vrot.slane %v240_v63, %v1719_v7  ;;  %v249_v17 = vrot.slane %v239_v0, %v1719_v7  ;;  %v1626_v63 = vld [vmem:[%s2222_s8 + $0x1b0] sm:$0xff]   ;;  %v1629_v0 = vld [vmem:[%s2222_s8 + $0x1e8] sm:$0xff]  }
  0x84   :  { %v224_v53 = vsel %vm206_vm3, %v153_v38, %v159_v13  ;;  %v221_v54 = vsel %vm206_vm3, %v130_v39, %v136_v14  ;;  %v1640_v14 = vld [vmem:[%s2222_s8 + $0x110] sm:$0xff]  }
  0x85   :  { %v241_v2 = vcombine.low %v221_v54, %v224_v53 }
  0x87   :  { %v205_v26 = vpop.permute.xlu1 %204  ;;  %v182_v27 = vpop.permute.xlu0 %181  ;;  %v263_v18 = vrot.slane %v241_v2, %v1719_v7  ;;  %v1628_v2 = vld [vmem:[%s2222_s8 + $0x128] sm:$0xff]  }
  0x88   :  { %v230_v43 = vsel %vm206_vm3, %v199_v30, %v205_v26  ;;  %v227_v45 = vsel %vm206_vm3, %v176_v31, %v182_v27  ;;  %v271_v30 = vcombine.low %v249_v17, %v256_v16  ;;  %v1642_v16 = vld [vmem:[%s2222_s8 + $0x190] sm:$0xff]   ;;  %v1645_v17 = vld [vmem:[%s2222_s8 + $0x1c8] sm:$0xff]  }
  0x89   :  { %v242_v59 = vcombine.low %v227_v45, %v230_v43 }
  0x8a   :  { %v279_v37 = vrot.slane %v271_v30, %v1719_v7 }
  0x8b   :  { %v372_v40 = vpop.permute.xlu1 %371  ;;  %v355_v41 = vpop.permute.xlu0 %354  ;;  %v270_v11 = vrot.slane %v242_v59, %v1719_v7  ;;  %v1625_v59 = vld [vmem:[%s2222_s8 + $0x1f0] sm:$0xff]  }
  0x8c   :  { %v504_v3 = vsel %vm206_vm3, %v1913_v19, %v372_v40  ;;  %v501_v4 = vsel %vm206_vm3, %v1918_v20, %v355_v41  ;;  %v320_v41 = vld [vmem:[#allocation2] sm:$0xff] }
  0x8d   :  { %v531_v15 = vcombine.low %v501_v4, %v504_v3  ;;  %v272_v25 = vcombine.low %v263_v18, %v270_v11  ;;  %v1631_v3 = vld [vmem:[%s2222_s8 + $0x160] sm:$0xff]   ;;  %v1630_v4 = vld [vmem:[%s2222_s8 + $0x1a8] sm:$0xff]   ;;  %v1639_v11 = vld [vmem:[%s2222_s8 + $0x150] sm:$0xff]  }
  0x8e   :  { %v1644_v18 = vld [vmem:[%s2222_s8 + $0x108] sm:$0xff]   ;;  %v1647_v19 = vld [vmem:[%s2222_s8 + $0x140] sm:$0xff]  }
  0x8f   :  { %v406_v55 = vpop.permute.xlu1 %405  ;;  %v389_v56 = vpop.permute.xlu0 %388  ;;  %v541_v28 = vrot.slane %v531_v15, %v1719_v7  ;;  %v286_v35 = vrot.slane %v272_v25, %v1719_v7  ;;  %v1643_v15 = vld [vmem:[%s2222_s8 + $0x148] sm:$0xff]  }
  0x90   :  { %v510_v60 = vsel %vm206_vm3, %v1426_v29, %v406_v55  ;;  %v507_v61 = vsel %vm206_vm3, %v1424_v34, %v389_v56  ;;  %v1622_v56 = vld [vmem:[%s2222_s8 + $0x1b8] sm:$0xff]  }
  0x91   :  { %v532_v1 = vcombine.low %v507_v61, %v510_v60  ;;  %v287_v40 = vcombine.low %v279_v37, %v286_v35  ;;  %v1624_v61 = vld [vmem:[%s2222_s8 + $0x130] sm:$0xff]   ;;  %v1432_v35 = vld [vmem:[%s2227_s9] ss:$0 sm:$0xff] }
  0x93   :  { %v452_v5 = vpop.permute.xlu1 %451  ;;  %v429_v6 = vpop.permute.xlu0 %428  ;;  %v548_v20 = vrot.slane %v532_v1, %v1719_v7  ;;  %v1633_v1 = vld [vmem:[%s2222_s8 + $0x1e0] sm:$0xff]  }
  0x94   :  { %v516_v12 = vsel %vm206_vm3, %v446_v48, %v452_v5  ;;  %v513_v13 = vsel %vm206_vm3, %v423_v49, %v429_v6  ;;  %v1632_v5 = vld [vmem:[%s2222_s8 + $0x120] sm:$0xff]   ;;  %v1635_v6 = vld [vmem:[%s2222_s8 + $0x158] sm:$0xff]  }
  0x95   :  { %v533_v21 = vcombine.low %v513_v13, %v516_v12  ;;  %v563_v31 = vcombine.low %v541_v28, %v548_v20  ;;  %v1638_v12 = vld [vmem:[%s2222_s8 + $0x198] sm:$0xff]   ;;  %v1641_v13 = vld [vmem:[%s2222_s8 + $0x1d0] sm:$0xff]   ;;  %v1646_v20 = vld [vmem:[%s2222_s8 + $0x188] sm:$0xff]  }
  0x97   :  { %v498_v22 = vpop.permute.xlu1 %497  ;;  %v475_v24 = vpop.permute.xlu0 %474  ;;  %v555_v32 = vrot.slane %v533_v21, %v1719_v7  ;;  %v571_v38 = vrot.slane %v563_v31, %v1719_v7  ;;  %v1649_v21 = vld [vmem:[%s2222_s8 + $0x1c0] sm:$0xff]  }
  0x98   :  { %v522_v26 = vsel %vm206_vm3, %v492_v8, %v498_v22  ;;  %v519_v27 = vsel %vm206_vm3, %v469_v9, %v475_v24  ;;  %vm2085_vm3 = vmor %vm314_vm12, %vm311_vm11  ;;  %v1634_v8 = vld [vmem:[%s2222_s8 + $0x1a0] sm:$0xff]   ;;  %v1637_v9 = vld [vmem:[%s2222_s8 + $0x1d8] sm:$0xff]  }
  0x99   :  { %v534_v29 = vcombine.low %v519_v27, %v522_v26  ;;  %vm319_vm9 = vmor %vm318_vm8, %vm2085_vm3  ;;  %v1648_v22 = vld [vmem:[%s2222_s8 + $0x100] sm:$0xff]  }
  0x9a   :  { %v321_v44 = vsel %vm319_vm9, %v287_v40, %v320_v41 }
  0x9b   :  { %v562_v33 = vrot.slane %v534_v29, %v1719_v7 }
  0x9d   :  { %v564_v36 = vcombine.low %v555_v32, %v562_v33 }
  0x9f   :  { %v578_v39 = vrot.slane %v564_v36, %v1719_v7 }
  0xa1   :  { %v579_v42 = vcombine.low %v571_v38, %v578_v39 }
  0xa3   :  { %v581_v43 = vshll.u32 %v579_v42, 16 }
  0xa5   :  { %v608_v45 = vsel %vm606_vm5, %v581_v43, %v321_v44 }
  0xa6   :  { %609 = vst [vmem:[#allocation2] sm:$0xff] %v608_v45  ;;  %v747_v46 = vcombine.high %v608_v45, %v608_v45  ;;  %v754_v47 = vrot.slane %v608_v45, %v1719_v7 }
  0xa8   :  { %v762_v48 = vcombine.high %v754_v47, %v754_v47  ;;  %v2099_v49 = vrot.slane %v747_v46, %v1719_v7  ;;  %v770_v50 = vrot.slane %v754_v47, %v1719_v7 }
  0xaa   :  { %v784_v51 = vrot.slane %v762_v48, %v1719_v7  ;;  %v763_v53 = vcombine.high %v2099_v49, %v2099_v49  ;;  %v792_v58 = vcombine.high %v770_v50, %v770_v50  ;;  %v777_v24 = vrot.slane %v2099_v49, %v1719_v7 }
  0xac   :  { %1220 = vmatprep.mubr.bf16.mxu0 %v784_v51  ;;  %v794_v54 = vcombine.high %v784_v51, %v784_v51  ;;  %v791_v55 = vrot.slane %v763_v53, %v1719_v7  ;;  %v793_v25 = vcombine.high %v777_v24, %v777_v24 }
  0xad   :  { %1221 = vmatmul.mubr.bf16.vlgmr.msra.gmra.mxu0 %v770_v50 }
  0xae   :  { %1542 = vmatpush3.bf16.msra.mxu0 %v1620_v52  ;;  %1260 = vmatprep.mubr.bf16.mxu1 %v794_v54  ;;  %v795_v60 = vcombine.high %v791_v55, %v791_v55 }
  0xaf   :  { %1300 = vmatprep.mubr.bf16.mxu0 %v791_v55  ;;  %1261 = vmatmul.mubr.bf16.vlgmr.msra.gmra.mxu1 %v792_v58 }
  0xb0   :  { %1564 = vmatpush3.bf16.msra.mxu1 %v1622_v56  ;;  %1543 = vmatprep.subr.bf16.mxu0 %v1623_v57 }
  0xb1   :  { %1340 = vmatprep.mubr.bf16.mxu1 %v795_v60  ;;  %1565 = vmatprep.subr.bf16.mxu1 %v1625_v59 }
  0xb2   :  { %1544 = vmatpush3.bf16.msra.mxu0 %v1624_v61 }
  0xb3   :  { %1545 = vmatprep.subr.bf16.mxu0 %v1627_v62 }
  0xb4   :  { %1566 = vmatpush3.bf16.msra.mxu1 %v1626_v63 }
  0xb5   :  { %1567 = vmatprep.subr.bf16.mxu1 %v1629_v0 }
  0xb6   :  { %1546 = vmatpush3.bf16.msra.mxu0 %v1628_v2 }
  0xb7   :  { %1547 = vmatprep.subr.bf16.mxu0 %v1631_v3 }
  0xb8   :  { %1568 = vmatpush3.bf16.msra.mxu1 %v1630_v4 }
  0xb9   :  { %1569 = vmatprep.subr.bf16.mxu1 %v1633_v1 }
  0xba   :  { %1548 = vmatpush3.bf16.msra.mxu0 %v1632_v5 }
  0xbb   :  { %1549 = vmatprep.subr.bf16.mxu0 %v1635_v6 }
  0xbc   :  { %1570 = vmatpush3.bf16.msra.mxu1 %v1634_v8 }
  0xbd   :  { %1571 = vmatprep.subr.bf16.mxu1 %v1637_v9 }
  0xbe   :  { %1550 = vmatpush3.bf16.msra.mxu0 %v1636_v10 }
  0xbf   :  { %1551 = vmatprep.subr.bf16.mxu0 %v1639_v11 }
  0xc0   :  { %1572 = vmatpush3.bf16.msra.mxu1 %v1638_v12 }
  0xc1   :  { %1573 = vmatprep.subr.bf16.mxu1 %v1641_v13 }
  0xc2   :  { %1552 = vmatpush3.bf16.msra.mxu0 %v1640_v14 }
  0xc3   :  { %1553 = vmatprep.subr.bf16.mxu0 %v1643_v15 }
  0xc4   :  { %1574 = vmatpush3.bf16.msra.mxu1 %v1642_v16 }
  0xc5   :  { %1575 = vmatprep.subr.bf16.mxu1 %v1645_v17 }
  0xc6   :  { %1554 = vmatpush3.bf16.msra.mxu0 %v1644_v18 }
  0xc7   :  { %1555 = vmatprep.subr.bf16.mxu0 %v1647_v19 }
  0xc8   :  { %1576 = vmatpush3.bf16.msra.mxu1 %v1646_v20 }
  0xc9   :  { %1577 = vmatprep.subr.bf16.mxu1 %v1649_v21 }
  0xca   :  { %1556 = vmatpush3.bf16.msra.mxu0 %v1648_v22 }
  0xcc   :  { %1578 = vmatpush3.bf16.msra.mxu1 %v1650_v23 }
  0xcd   :  { %1301 = vmatmul.mubr.bf16.vlgmr.msra.gmra.mxu0 %v777_v24 }
  0xcf   :  { %1341 = vmatmul.mubr.bf16.vlgmr.msra.gmra.mxu1 %v793_v25 }
 0x16d   :  { %v1513_v26 = vpop.f32.mrf.mxu0 }
 0x16f   :  { %v1514_v27 = vpop.f32.mrf.mxu0  ;;  %v1535_v28 = vpop.f32.mrf.mxu1 }
 0x170   :  { %v1515_v34 = vadd.f32 %v1514_v27, %v1513_v26 }
 0x171   :  { %v1516_v29 = vpop.f32.mrf.mxu0  ;;  %v1536_v30 = vpop.f32.mrf.mxu1 }
 0x172   :  { %v1223_v36 = vadd.f32 %v1515_v34, %v1432_v35  ;;  %v1537_v7 = vadd.f32 %v1536_v30, %v1535_v28 }
 0x173   :  { %v1517_v31 = vpop.f32.mrf.mxu0  ;;  %v1538_v32 = vpop.f32.mrf.mxu1 }
 0x174   :  { %v1263_v40 = vadd.f32 %v1537_v7, %v1223_v36 }
 0x175   :  { %v1539_v33 = vpop.f32.mrf.mxu1 }
 0x18d   :  { %v1557_v37 = vpop.f32.mrf.mxu0 }
 0x18f   :  { %v1558_v38 = vpop.f32.mrf.mxu0  ;;  %v1579_v39 = vpop.f32.mrf.mxu1 }
 0x190   :  { %v1559_v41 = vadd.f32 %v1558_v38, %v1557_v37 }
 0x191   :  { %v1560_v42 = vpop.f32.mrf.mxu0  ;;  %v1580_v43 = vpop.f32.mrf.mxu1 }
 0x192   :  { %v1303_v44 = vadd.f32 %v1559_v41, %v1263_v40  ;;  %v1581_v45 = vadd.f32 %v1580_v43, %v1579_v39 }
 0x193   :  { %v1561_v46 = vpop.f32.mrf.mxu0  ;;  %v1582_v47 = vpop.f32.mrf.mxu1 }
 0x194   :  { %v1343_v48 = vadd.f32 %v1581_v45, %v1303_v44 }
 0x195   :  { %v1583_v49 = vpop.f32.mrf.mxu1 }
 0x196   :  { %1348 = vst [vmem:[%s2228_s10] sm:$0x3] %v1343_v48  ;;  %v1350_v50 = vsel %vm1349_vm4, %v1343_v48, 0.0 }
 0x197   :  { %v1351_v51 = vrot.slane %v1350_v50, 4 }
 0x199   :  { %v1352_v52 = vadd.f32 %v1351_v51, %v1350_v50 }
 0x19b   :  { %v1353_v53 = vrot.slane %v1352_v52, 2 }
 0x19d   :  { %v1354_v54 = vadd.f32 %v1353_v53, %v1352_v52 }
 0x19f   :  { %v1355_v55 = vrot.slane %v1354_v54, 1 }
 0x1a1   :  { %v1356_v56 = vadd.f32 %v1355_v55, %v1354_v54 }
 0x1a3   :  { %v1357_v57 = vmul.f32 0.5, %v1356_v56 }
 0x1a5   :  { %v1358_v58 = vsub.f32 %v1343_v48, %v1357_v57  ;;  %1371 = vst [vmem:[%s2229_s11] sm:$0x1] %v1357_v57 }
 0x1a7   :  { %v1359_v59 = vmul.f32 %v1358_v58, %v1358_v58 }
 0x1a9   :  { %v1360_v60 = vsel %vm1349_vm4, %v1359_v59, 0.0 }
 0x1aa   :  { %v1361_v61 = vrot.slane %v1360_v60, 4 }
 0x1ac   :  { %v1362_v62 = vadd.f32 %v1361_v61, %v1360_v60 }
 0x1ae   :  { %v1363_v63 = vrot.slane %v1362_v62, 2 }
 0x1b0   :  { %v1364_v0 = vadd.f32 %v1363_v63, %v1362_v62 }
 0x1b2   :  { %v1365_v2 = vrot.slane %v1364_v0, 1 }
 0x1b4   :  { %v1366_v3 = vadd.f32 %v1365_v2, %v1364_v0 }
 0x1b6   :  { %1372 = vst [vmem:[%s2229_s11 + $0x1] sm:$0x1] %v1366_v3 }
 0x1bd   :  { %v1405_v4 = vld [vmem:[%s2229_s11 + $0x1] sm:$0x1] }
 0x1be   :  { %v1406_v1 = vmul.f32 0.5, %v1405_v4 }
 0x1c0   :  { %1407 = vst [vmem:[%s2229_s11 + $0x1] sm:$0x1] %v1406_v1 }

</bundles_post_ra>
